<compile_context>
chip_gen: v7x
topology: tpu7x:2x2x1
jax: 0.10.0
libtpu: 0.0.40
codegen_flags: <defaults>
</compile_context>

<pallas_src>
import jax
import jax.numpy as jnp
from jax.experimental import pallas as pl
from jax.experimental.pallas import tpu as pltpu

BN_EPS = 1e-5
N_ACTIONS = 14          # ALE/Asteroids-v5 full action space (env not constructed here)
FRAME_STACK = 4
SCREEN = 84
CNN_CHANNELS = [32, 64, 64]
FC_LAYERS = [512, 256]
LANE = 128              # pad channel dims to the 128-lane vreg width

CONV_CFG = [            # (out_channels, kernel, stride, pad) as in _build_network
    (CNN_CHANNELS[0], 8, 4, 2),
    (CNN_CHANNELS[1], 4, 2, 1),
    (CNN_CHANNELS[2], 4, 2, 1),
]


def _round_up(x, m):
    return ((x + m - 1) // m) * m


# ------------------------------------------------------------------ Pallas kernels
def _conv_matmul_kernel(x_ref, w_ref, b_ref, sc_ref, sh_ref, o_ref):
    """o = relu(x @ w + b) * sc + sh.  x/w are bf16, accumulate + epilogue in f32."""
    acc = jnp.dot(x_ref[...], w_ref[...], preferred_element_type=jnp.float32)
    z = jnp.maximum(acc + b_ref[...], 0.0)
    o_ref[...] = (z * sc_ref[...] + sh_ref[...]).astype(o_ref.dtype)


def _fc_stack_kernel(x_ref, w1_ref, b1_ref, w2_ref, b2_ref, w3_ref, b3_ref, o_ref):
    """Fused FC head: relu(x@w1+b1) -> relu(.@w2+b2) -> .@w3+b3, all resident in VMEM."""
    h = jnp.dot(x_ref[...], w1_ref[...], preferred_element_type=jnp.float32) + b1_ref[...]
    h = jnp.maximum(h, 0.0).astype(jnp.bfloat16)
    # Dropout: identity in eval mode.
    h = jnp.dot(h, w2_ref[...], preferred_element_type=jnp.float32) + b2_ref[...]
    h = jnp.maximum(h, 0.0).astype(jnp.bfloat16)
    o_ref[...] = (jnp.dot(h, w3_ref[...], preferred_element_type=jnp.float32)
                  + b3_ref[...]).astype(o_ref.dtype)


def conv_matmul(patches, w, b, sc, sh, out_dtype=jnp.bfloat16):
    """Pallas fused conv-as-matmul.  patches:(M,K) bf16, w:(K,N) bf16, N % 128 == 0."""
    M, K = patches.shape
    Kw, N = w.shape
    assert K == Kw and N % LANE == 0 and K % LANE == 0

    # Prefer a single full-extent M block: no padding copy, one big DMA, no per-step
    # grid overhead (everything here fits VMEM with large margin at these sizes).
    if M <= 2048:
        TM, Mp = M, M
    else:
        TM = next((t for t in (1024, 512, 256, 128) if M % t == 0), None)
        if TM is not None:
            Mp = M
        else:                                   # rare fallback for huge, odd M
            TM = 512
            Mp = _round_up(M, TM)
            patches = jnp.pad(patches, ((0, Mp - M), (0, 0)))

    out = pl.pallas_call(
        _conv_matmul_kernel,
        out_shape=jax.ShapeDtypeStruct((Mp, N), out_dtype),
        grid=(Mp // TM,),
        in_specs=[
            pl.BlockSpec((TM, K), lambda i: (i, 0)),
            pl.BlockSpec((K, N), lambda i: (0, 0)),
            pl.BlockSpec((1, N), lambda i: (0, 0)),
            pl.BlockSpec((1, N), lambda i: (0, 0)),
            pl.BlockSpec((1, N), lambda i: (0, 0)),
        ],
        out_specs=pl.BlockSpec((TM, N), lambda i: (i, 0)),
        compiler_params=pltpu.CompilerParams(dimension_semantics=("parallel",)),
    )(patches, w, b, sc, sh)
    return out if Mp == M else out[:M]


def fc_stack(x, w1, b1, w2, b2, w3, b3):
    """Single pallas_call for the whole FC head (weights ~2 MB bf16, stay in VMEM)."""
    B = x.shape[0]
    N = w3.shape[1]
    return pl.pallas_call(
        _fc_stack_kernel,
        out_shape=jax.ShapeDtypeStruct((B, N), jnp.float32),
    )(x, w1, b1, w2, b2, w3, b3)


# ------------------------------------------------------------------ conv glue
def im2col_nhwc(x, kh, kw, stride, pad):
    """x: (B, H, W, C) NHWC -> (B*Ho*Wo, kh*kw*C) patch matrix. No transposes."""
    B, H, W, C = x.shape
    xp = jnp.pad(x, ((0, 0), (pad, pad), (pad, pad), (0, 0)))
    Ho = (H + 2 * pad - kh) // stride + 1
    Wo = (W + 2 * pad - kw) // stride + 1
    cols = [xp[:, i:i + stride * Ho:stride, j:j + stride * Wo:stride, :]
            for i in range(kh) for j in range(kw)]
    patches = jnp.stack(cols, axis=3)                      # (B, Ho, Wo, kh*kw, C)
    return patches.reshape(B * Ho * Wo, kh * kw * C), Ho, Wo


# ------------------------------------------------------------------ parameters
def kaiming_normal(key, shape, fan):
    std = jnp.sqrt(2.0) / jnp.sqrt(float(fan))   # gain for ReLU
    return std * jax.random.normal(key, shape, dtype=jnp.float32)


def _conv_spatial():
    hw = SCREEN
    for (_, k, s, p) in CONV_CFG:
        hw = (hw + 2 * p - k) // s + 1
    return hw   # 84 -> 21 -> 10 -> 5


def init_params(key):
    """PyTorch-faithful parameters: OIHW conv weights, (out,in) FC weights."""
    params = {"conv": [], "fc": []}
    in_ch = FRAME_STACK
    for (oc, k, s, p) in CONV_CFG:
        key, wk = jax.random.split(key)
        w = kaiming_normal(wk, (oc, in_ch, k, k), fan=oc * k * k)   # fan_out mode
        b = jnp.zeros((oc,), jnp.float32)
        # BatchNorm2d at init: gamma=1, beta=0, running_mean=0, running_var=1
        bn_scale = jnp.ones((oc,), jnp.float32) / jnp.sqrt(1.0 + BN_EPS)
        bn_shift = jnp.zeros((oc,), jnp.float32)
        params["conv"].append((w, b, bn_scale, bn_shift))
        in_ch = oc

    conv_output_size = CNN_CHANNELS[-1] * _conv_spatial() ** 2      # 64*5*5 = 1600
    prev = conv_output_size
    for h in FC_LAYERS + [N_ACTIONS]:
        key, wk = jax.random.split(key)
        w = kaiming_normal(wk, (h, prev), fan=prev)                 # fan_in mode
        b = jnp.zeros((h,), jnp.float32)
        params["fc"].append((w, b))
        prev = h
    return params


def prepare_params(params):
    """One-time repack: NHWC/channel-padded bf16 conv weights, lane-dense FC weights."""
    prep = {"conv": []}
    prev_cp = FRAME_STACK          # conv1 reads the raw (unpadded) 4-channel frames
    first = True
    for (w, b, sc, sh), (_, k, s, p) in zip(params["conv"], CONV_CFG):
        OC, IC, kh, kw = w.shape
        ocp = _round_up(OC, LANE)
        icp = IC if first else prev_cp
        wt = jnp.transpose(w, (2, 3, 1, 0)).astype(jnp.float32)     # (kh, kw, IC, OC)
        if first:
            wt = wt / 255.0        # fold the x/255 input scaling into conv1 weights
        wt = jnp.pad(wt, ((0, 0), (0, 0), (0, icp - IC), (0, ocp - OC)))
        wp = wt.reshape(kh * kw * icp, ocp).astype(jnp.bfloat16)
        bp = jnp.pad(b, (0, ocp - OC)).reshape(1, ocp).astype(jnp.float32)
        scp = jnp.pad(sc, (0, ocp - OC), constant_values=1.0).reshape(1, ocp).astype(jnp.float32)
        shp = jnp.pad(sh, (0, ocp - OC)).reshape(1, ocp).astype(jnp.float32)
        prep["conv"].append((wp, bp, scp, shp))
        prev_cp = ocp
        first = False

    # FC1: remap columns from NCHW flatten (c,h,w) to padded-NHWC flatten (h,w,c_pad).
    (w1, b1), (w2, b2), (w3, b3) = params["fc"]
    hw = _conv_spatial()
    c_last = CNN_CHANNELS[-1]
    w1r = w1.reshape(w1.shape[0], c_last, hw, hw)                   # (out, c, h, w)
    w1r = jnp.transpose(w1r, (2, 3, 1, 0))                          # (h, w, c, out)
    w1r = jnp.pad(w1r, ((0, 0), (0, 0), (0, prev_cp - c_last), (0, 0)))
    w1p = w1r.reshape(hw * hw * prev_cp, w1.shape[0]).astype(jnp.bfloat16)
    b1p = b1.reshape(1, -1).astype(jnp.float32)
    w2p = w2.T.astype(jnp.bfloat16)
    b2p = b2.reshape(1, -1).astype(jnp.float32)
    n_out = w3.shape[0]
    n_out_p = _round_up(n_out, LANE)
    w3p = jnp.pad(w3.T, ((0, 0), (0, n_out_p - n_out))).astype(jnp.bfloat16)
    b3p = jnp.pad(b3, (0, n_out_p - n_out)).reshape(1, n_out_p).astype(jnp.float32)
    prep["fc"] = (w1p, b1p, w2p, b2p, w3p, b3p)
    return prep


# ------------------------------------------------------------------ forward
def forward(prep, x):
    """x: uint8 (B, 4, 84, 84) NCHW -> logits (B, N_ACTIONS) float32."""
    B = x.shape[0]
    # Single layout change of the tiny raw frames; x/255 is folded into conv1 weights.
    h = jnp.transpose(x, (0, 2, 3, 1)).astype(jnp.bfloat16)         # (B, 84, 84, 4)
    for (wp, bp, scp, shp), (_, k, s, p) in zip(prep["conv"], CONV_CFG):
        patches, Ho, Wo = im2col_nhwc(h, k, k, s, p)
        y = conv_matmul(patches, wp, bp, scp, shp)                  # (B*Ho*Wo, 128) bf16
        h = y.reshape(B, Ho, Wo, -1)                                # NHWC, channel-padded
    feats = h.reshape(B, -1)                  # padded-NHWC flatten, matches prepared fc1
    w1p, b1p, w2p, b2p, w3p, b3p = prep["fc"]
    logits = fc_stack(feats, w1p, b1p, w2p, b2p, w3p, b3p)          # (B, 128) f32
    return logits[:, :N_ACTIONS]


def reference_forward(params, x):
    """Pure-JAX reference (faithful translation of the PyTorch module, eval mode)."""
    x = x.astype(jnp.float32) / 255.0
    for (w, b, sc, sh), (_, k, s, p) in zip(params["conv"], CONV_CFG):
        x = jax.lax.conv_general_dilated(
            x, w, (s, s), [(p, p), (p, p)],
            dimension_numbers=("NCHW", "OIHW", "NCHW"))
        x = jnp.maximum(x + b[None, :, None, None], 0.0)
        x = x * sc[None, :, None, None] + sh[None, :, None, None]
    x = x.reshape(x.shape[0], -1)
    n_fc = len(params["fc"])
    for idx, (w, b) in enumerate(params["fc"]):
        x = x @ w.T + b
        if idx < n_fc - 1:
            x = jnp.maximum(x, 0.0)
    return x


if __name__ == "__main__":
    key = jax.random.PRNGKey(0)
    key, pkey, xkey = jax.random.split(key, 3)

    params = init_params(pkey)
    prep = prepare_params(params)

    # Atari-style input: batch of 2 stacked-frame observations, uint8 in [0, 255].
    batch = 2
    x = jax.random.randint(xkey, (batch, FRAME_STACK, SCREEN, SCREEN), 0, 256,
                           dtype=jnp.int32).astype(jnp.uint8)

    fwd = jax.jit(forward)
    logits = jax.block_until_ready(fwd(prep, x))
    assert logits.shape == (batch, N_ACTIONS), logits.shape
    assert bool(jnp.all(jnp.isfinite(logits)))

    ref = jax.block_until_ready(reference_forward(params, x))
    max_err = float(jnp.max(jnp.abs(logits - ref)))
    assert max_err < 5e-2, f"mismatch vs reference: {max_err}"

    print("KERNEL_OK")
</pallas_src>

<mosaic_0001>
module attributes {stable_mosaic.version = 11 : i64} {
  func.func @_conv_matmul_kernel(%arg0: i32, %arg1: memref<882x256xbf16, #tpu.memory_space<vmem>>, %arg2: memref<256x128xbf16, #tpu.memory_space<vmem>>, %arg3: memref<1x128xf32, #tpu.memory_space<vmem>>, %arg4: memref<1x128xf32, #tpu.memory_space<vmem>>, %arg5: memref<1x128xf32, #tpu.memory_space<vmem>>, %arg6: memref<882x128xbf16, #tpu.memory_space<vmem>>) attributes {dimension_semantics = [#tpu.dimension_semantics<parallel>], iteration_bounds = array<i64: 1>, scalar_prefetch = 0 : i64, scratch_operands = 0 : i64, tpu.core_type = #tpu.core_type<tc>, window_params = [{transform_indices = @transform_0, window_bounds = array<i64: 882, 256>}, {pipeline_mode = #tpu.pipeline_mode<synchronous>, transform_indices = @transform_1, window_bounds = array<i64: 256, 128>}, {pipeline_mode = #tpu.pipeline_mode<synchronous>, transform_indices = @transform_2, window_bounds = array<i64: 1, 128>}, {pipeline_mode = #tpu.pipeline_mode<synchronous>, transform_indices = @transform_3, window_bounds = array<i64: 1, 128>}, {pipeline_mode = #tpu.pipeline_mode<synchronous>, transform_indices = @transform_4, window_bounds = array<i64: 1, 128>}, {transform_indices = @transform_5, window_bounds = array<i64: 882, 128>}]} {
    %c0 = arith.constant 0 : index
    %c0_0 = arith.constant 0 : index
    %0 = vector.load %arg1[%c0, %c0_0] : memref<882x256xbf16, #tpu.memory_space<vmem>>, vector<882x256xbf16>
    %c0_1 = arith.constant 0 : index
    %c0_2 = arith.constant 0 : index
    %1 = vector.load %arg2[%c0_1, %c0_2] : memref<256x128xbf16, #tpu.memory_space<vmem>>, vector<256x128xbf16>
    %cst = arith.constant dense<0.000000e+00> : vector<882x128xf32>
    %2 = tpu.matmul %0, %1, %cst {dimension_numbers = #tpu.dot_dimension_numbers<[1], [0], [0], [1], [0, 0, 1, 1], [], []>} : vector<882x256xbf16>, vector<256x128xbf16>, vector<882x128xf32> -> vector<882x128xf32>
    %c0_3 = arith.constant 0 : index
    %c0_4 = arith.constant 0 : index
    %3 = vector.load %arg3[%c0_3, %c0_4] : memref<1x128xf32, #tpu.memory_space<vmem>>, vector<1x128xf32>
    %4 = vector.broadcast %3 : vector<1x128xf32> to vector<882x128xf32>
    %5 = arith.addf %2, %4 : vector<882x128xf32>
    %cst_5 = arith.constant 0.000000e+00 : f32
    %6 = vector.broadcast %cst_5 : f32 to vector<882x128xf32>
    %7 = arith.maximumf %5, %6 : vector<882x128xf32>
    %c0_6 = arith.constant 0 : index
    %c0_7 = arith.constant 0 : index
    %8 = vector.load %arg4[%c0_6, %c0_7] : memref<1x128xf32, #tpu.memory_space<vmem>>, vector<1x128xf32>
    %9 = vector.broadcast %8 : vector<1x128xf32> to vector<882x128xf32>
    %10 = arith.mulf %7, %9 : vector<882x128xf32>
    %c0_8 = arith.constant 0 : index
    %c0_9 = arith.constant 0 : index
    %11 = vector.load %arg5[%c0_8, %c0_9] : memref<1x128xf32, #tpu.memory_space<vmem>>, vector<1x128xf32>
    %12 = vector.broadcast %11 : vector<1x128xf32> to vector<882x128xf32>
    %13 = arith.addf %10, %12 : vector<882x128xf32>
    %14 = arith.truncf %13 : vector<882x128xf32> to vector<882x128xbf16>
    %c0_10 = arith.constant 0 : index
    %c0_11 = arith.constant 0 : index
    %15 = vector.load %arg6[%c0_10, %c0_11] : memref<882x128xbf16, #tpu.memory_space<vmem>>, vector<882x128xbf16>
    tpu.vector_store %arg6[%c0_10, %c0_11], %14 {strides = array<i32>} : memref<882x128xbf16, #tpu.memory_space<vmem>>, vector<882x128xbf16>,
    return
  }
  func.func @transform_0(%arg0: i32) -> (i32, i32) {
    %c0_i32 = arith.constant 0 : i32
    %c0_i32_0 = arith.constant 0 : i32
    return %arg0, %c0_i32 : i32, i32
  }
  func.func @transform_1(%arg0: i32) -> (i32, i32) {
    %c0_i32 = arith.constant 0 : i32
    %c0_i32_0 = arith.constant 0 : i32
    %c0_i32_1 = arith.constant 0 : i32
    return %c0_i32, %c0_i32_0 : i32, i32
  }
  func.func @transform_2(%arg0: i32) -> (i32, i32) {
    %c0_i32 = arith.constant 0 : i32
    %c0_i32_0 = arith.constant 0 : i32
    %c0_i32_1 = arith.constant 0 : i32
    return %c0_i32, %c0_i32_0 : i32, i32
  }
  func.func @transform_3(%arg0: i32) -> (i32, i32) {
    %c0_i32 = arith.constant 0 : i32
    %c0_i32_0 = arith.constant 0 : i32
    %c0_i32_1 = arith.constant 0 : i32
    return %c0_i32, %c0_i32_0 : i32, i32
  }
  func.func @transform_4(%arg0: i32) -> (i32, i32) {
    %c0_i32 = arith.constant 0 : i32
    %c0_i32_0 = arith.constant 0 : i32
    %c0_i32_1 = arith.constant 0 : i32
    return %c0_i32, %c0_i32_0 : i32, i32
  }
  func.func @transform_5(%arg0: i32) -> (i32, i32) {
    %c0_i32 = arith.constant 0 : i32
    %c0_i32_0 = arith.constant 0 : i32
    return %arg0, %c0_i32 : i32, i32
  }
}

module attributes {stable_mosaic.version = 11 : i64} {
  func.func @_conv_matmul_kernel(%arg0: i32, %arg1: memref<200x2048xbf16, #tpu.memory_space<vmem>>, %arg2: memref<2048x128xbf16, #tpu.memory_space<vmem>>, %arg3: memref<1x128xf32, #tpu.memory_space<vmem>>, %arg4: memref<1x128xf32, #tpu.memory_space<vmem>>, %arg5: memref<1x128xf32, #tpu.memory_space<vmem>>, %arg6: memref<200x128xbf16, #tpu.memory_space<vmem>>) attributes {dimension_semantics = [#tpu.dimension_semantics<parallel>], iteration_bounds = array<i64: 1>, scalar_prefetch = 0 : i64, scratch_operands = 0 : i64, tpu.core_type = #tpu.core_type<tc>, window_params = [{transform_indices = @transform_0, window_bounds = array<i64: 200, 2048>}, {pipeline_mode = #tpu.pipeline_mode<synchronous>, transform_indices = @transform_1, window_bounds = array<i64: 2048, 128>}, {pipeline_mode = #tpu.pipeline_mode<synchronous>, transform_indices = @transform_2, window_bounds = array<i64: 1, 128>}, {pipeline_mode = #tpu.pipeline_mode<synchronous>, transform_indices = @transform_3, window_bounds = array<i64: 1, 128>}, {pipeline_mode = #tpu.pipeline_mode<synchronous>, transform_indices = @transform_4, window_bounds = array<i64: 1, 128>}, {transform_indices = @transform_5, window_bounds = array<i64: 200, 128>}]} {
    %c0 = arith.constant 0 : index
    %c0_0 = arith.constant 0 : index
    %0 = vector.load %arg1[%c0, %c0_0] : memref<200x2048xbf16, #tpu.memory_space<vmem>>, vector<200x2048xbf16>
    %c0_1 = arith.constant 0 : index
    %c0_2 = arith.constant 0 : index
    %1 = vector.load %arg2[%c0_1, %c0_2] : memref<2048x128xbf16, #tpu.memory_space<vmem>>, vector<2048x128xbf16>
    %cst = arith.constant dense<0.000000e+00> : vector<200x128xf32>
    %2 = tpu.matmul %0, %1, %cst {dimension_numbers = #tpu.dot_dimension_numbers<[1], [0], [0], [1], [0, 0, 1, 1], [], []>} : vector<200x2048xbf16>, vector<2048x128xbf16>, vector<200x128xf32> -> vector<200x128xf32>
    %c0_3 = arith.constant 0 : index
    %c0_4 = arith.constant 0 : index
    %3 = vector.load %arg3[%c0_3, %c0_4] : memref<1x128xf32, #tpu.memory_space<vmem>>, vector<1x128xf32>
    %4 = vector.broadcast %3 : vector<1x128xf32> to vector<200x128xf32>
    %5 = arith.addf %2, %4 : vector<200x128xf32>
    %cst_5 = arith.constant 0.000000e+00 : f32
    %6 = vector.broadcast %cst_5 : f32 to vector<200x128xf32>
    %7 = arith.maximumf %5, %6 : vector<200x128xf32>
    %c0_6 = arith.constant 0 : index
    %c0_7 = arith.constant 0 : index
    %8 = vector.load %arg4[%c0_6, %c0_7] : memref<1x128xf32, #tpu.memory_space<vmem>>, vector<1x128xf32>
    %9 = vector.broadcast %8 : vector<1x128xf32> to vector<200x128xf32>
    %10 = arith.mulf %7, %9 : vector<200x128xf32>
    %c0_8 = arith.constant 0 : index
    %c0_9 = arith.constant 0 : index
    %11 = vector.load %arg5[%c0_8, %c0_9] : memref<1x128xf32, #tpu.memory_space<vmem>>, vector<1x128xf32>
    %12 = vector.broadcast %11 : vector<1x128xf32> to vector<200x128xf32>
    %13 = arith.addf %10, %12 : vector<200x128xf32>
    %14 = arith.truncf %13 : vector<200x128xf32> to vector<200x128xbf16>
    %c0_10 = arith.constant 0 : index
    %c0_11 = arith.constant 0 : index
    %15 = vector.load %arg6[%c0_10, %c0_11] : memref<200x128xbf16, #tpu.memory_space<vmem>>, vector<200x128xbf16>
    tpu.vector_store %arg6[%c0_10, %c0_11], %14 {strides = array<i32>} : memref<200x128xbf16, #tpu.memory_space<vmem>>, vector<200x128xbf16>,
    return
  }
  func.func @transform_0(%arg0: i32) -> (i32, i32) {
    %c0_i32 = arith.constant 0 : i32
    %c0_i32_0 = arith.constant 0 : i32
    return %arg0, %c0_i32 : i32, i32
  }
  func.func @transform_1(%arg0: i32) -> (i32, i32) {
    %c0_i32 = arith.constant 0 : i32
    %c0_i32_0 = arith.constant 0 : i32
    %c0_i32_1 = arith.constant 0 : i32
    return %c0_i32, %c0_i32_0 : i32, i32
  }
  func.func @transform_2(%arg0: i32) -> (i32, i32) {
    %c0_i32 = arith.constant 0 : i32
    %c0_i32_0 = arith.constant 0 : i32
    %c0_i32_1 = arith.constant 0 : i32
    return %c0_i32, %c0_i32_0 : i32, i32
  }
  func.func @transform_3(%arg0: i32) -> (i32, i32) {
    %c0_i32 = arith.constant 0 : i32
    %c0_i32_0 = arith.constant 0 : i32
    %c0_i32_1 = arith.constant 0 : i32
    return %c0_i32, %c0_i32_0 : i32, i32
  }
  func.func @transform_4(%arg0: i32) -> (i32, i32) {
    %c0_i32 = arith.constant 0 : i32
    %c0_i32_0 = arith.constant 0 : i32
    %c0_i32_1 = arith.constant 0 : i32
    return %c0_i32, %c0_i32_0 : i32, i32
  }
  func.func @transform_5(%arg0: i32) -> (i32, i32) {
    %c0_i32 = arith.constant 0 : i32
    %c0_i32_0 = arith.constant 0 : i32
    return %arg0, %c0_i32 : i32, i32
  }
}

module attributes {stable_mosaic.version = 11 : i64} {
  func.func @_fc_stack_kernel(%arg0: memref<2x3200xbf16, #tpu.memory_space<vmem>>, %arg1: memref<3200x512xbf16, #tpu.memory_space<vmem>>, %arg2: memref<1x512xf32, #tpu.memory_space<vmem>>, %arg3: memref<512x256xbf16, #tpu.memory_space<vmem>>, %arg4: memref<1x256xf32, #tpu.memory_space<vmem>>, %arg5: memref<256x128xbf16, #tpu.memory_space<vmem>>, %arg6: memref<1x128xf32, #tpu.memory_space<vmem>>, %arg7: memref<2x128xf32, #tpu.memory_space<vmem>>) attributes {dimension_semantics = [], scalar_prefetch = 0 : i64, scratch_operands = 0 : i64, tpu.core_type = #tpu.core_type<tc>} {
    %c0 = arith.constant 0 : index
    %c0_0 = arith.constant 0 : index
    %0 = vector.load %arg0[%c0, %c0_0] : memref<2x3200xbf16, #tpu.memory_space<vmem>>, vector<2x3200xbf16>
    %c0_1 = arith.constant 0 : index
    %c0_2 = arith.constant 0 : index
    %1 = vector.load %arg1[%c0_1, %c0_2] : memref<3200x512xbf16, #tpu.memory_space<vmem>>, vector<3200x512xbf16>
    %cst = arith.constant dense<0.000000e+00> : vector<2x512xf32>
    %2 = tpu.matmul %0, %1, %cst {dimension_numbers = #tpu.dot_dimension_numbers<[1], [0], [0], [1], [0, 0, 1, 1], [], []>} : vector<2x3200xbf16>, vector<3200x512xbf16>, vector<2x512xf32> -> vector<2x512xf32>
    %c0_3 = arith.constant 0 : index
    %c0_4 = arith.constant 0 : index
    %3 = vector.load %arg2[%c0_3, %c0_4] : memref<1x512xf32, #tpu.memory_space<vmem>>, vector<1x512xf32>
    %4 = vector.broadcast %3 : vector<1x512xf32> to vector<2x512xf32>
    %5 = arith.addf %2, %4 : vector<2x512xf32>
    %cst_5 = arith.constant 0.000000e+00 : f32
    %6 = vector.broadcast %cst_5 : f32 to vector<2x512xf32>
    %7 = arith.maximumf %5, %6 : vector<2x512xf32>
    %8 = arith.truncf %7 : vector<2x512xf32> to vector<2x512xbf16>
    %c0_6 = arith.constant 0 : index
    %c0_7 = arith.constant 0 : index
    %9 = vector.load %arg3[%c0_6, %c0_7] : memref<512x256xbf16, #tpu.memory_space<vmem>>, vector<512x256xbf16>
    %cst_8 = arith.constant dense<0.000000e+00> : vector<2x256xf32>
    %10 = tpu.matmul %8, %9, %cst_8 {dimension_numbers = #tpu.dot_dimension_numbers<[1], [0], [0], [1], [0, 0, 1, 1], [], []>} : vector<2x512xbf16>, vector<512x256xbf16>, vector<2x256xf32> -> vector<2x256xf32>
    %c0_9 = arith.constant 0 : index
    %c0_10 = arith.constant 0 : index
    %11 = vector.load %arg4[%c0_9, %c0_10] : memref<1x256xf32, #tpu.memory_space<vmem>>, vector<1x256xf32>
    %12 = vector.broadcast %11 : vector<1x256xf32> to vector<2x256xf32>
    %13 = arith.addf %10, %12 : vector<2x256xf32>
    %cst_11 = arith.constant 0.000000e+00 : f32
    %14 = vector.broadcast %cst_11 : f32 to vector<2x256xf32>
    %15 = arith.maximumf %13, %14 : vector<2x256xf32>
    %16 = arith.truncf %15 : vector<2x256xf32> to vector<2x256xbf16>
    %c0_12 = arith.constant 0 : index
    %c0_13 = arith.constant 0 : index
    %17 = vector.load %arg5[%c0_12, %c0_13] : memref<256x128xbf16, #tpu.memory_space<vmem>>, vector<256x128xbf16>
    %cst_14 = arith.constant dense<0.000000e+00> : vector<2x128xf32>
    %18 = tpu.matmul %16, %17, %cst_14 {dimension_numbers = #tpu.dot_dimension_numbers<[1], [0], [0], [1], [0, 0, 1, 1], [], []>} : vector<2x256xbf16>, vector<256x128xbf16>, vector<2x128xf32> -> vector<2x128xf32>
    %c0_15 = arith.constant 0 : index
    %c0_16 = arith.constant 0 : index
    %19 = vector.load %arg6[%c0_15, %c0_16] : memref<1x128xf32, #tpu.memory_space<vmem>>, vector<1x128xf32>
    %20 = vector.broadcast %19 : vector<1x128xf32> to vector<2x128xf32>
    %21 = arith.addf %18, %20 : vector<2x128xf32>
    %c0_17 = arith.constant 0 : index
    %c0_18 = arith.constant 0 : index
    %22 = vector.load %arg7[%c0_17, %c0_18] : memref<2x128xf32, #tpu.memory_space<vmem>>, vector<2x128xf32>
    tpu.vector_store %arg7[%c0_17, %c0_18], %21 {strides = array<i32>} : memref<2x128xf32, #tpu.memory_space<vmem>>, vector<2x128xf32>,
    return
  }
}

module attributes {stable_mosaic.version = 11 : i64} {
  func.func @_conv_matmul_kernel(%arg0: i32, %arg1: memref<50x2048xbf16, #tpu.memory_space<vmem>>, %arg2: memref<2048x128xbf16, #tpu.memory_space<vmem>>, %arg3: memref<1x128xf32, #tpu.memory_space<vmem>>, %arg4: memref<1x128xf32, #tpu.memory_space<vmem>>, %arg5: memref<1x128xf32, #tpu.memory_space<vmem>>, %arg6: memref<50x128xbf16, #tpu.memory_space<vmem>>) attributes {dimension_semantics = [#tpu.dimension_semantics<parallel>], iteration_bounds = array<i64: 1>, scalar_prefetch = 0 : i64, scratch_operands = 0 : i64, tpu.core_type = #tpu.core_type<tc>, window_params = [{transform_indices = @transform_0, window_bounds = array<i64: 50, 2048>}, {pipeline_mode = #tpu.pipeline_mode<synchronous>, transform_indices = @transform_1, window_bounds = array<i64: 2048, 128>}, {pipeline_mode = #tpu.pipeline_mode<synchronous>, transform_indices = @transform_2, window_bounds = array<i64: 1, 128>}, {pipeline_mode = #tpu.pipeline_mode<synchronous>, transform_indices = @transform_3, window_bounds = array<i64: 1, 128>}, {pipeline_mode = #tpu.pipeline_mode<synchronous>, transform_indices = @transform_4, window_bounds = array<i64: 1, 128>}, {transform_indices = @transform_5, window_bounds = array<i64: 50, 128>}]} {
    %c0 = arith.constant 0 : index
    %c0_0 = arith.constant 0 : index
    %0 = vector.load %arg1[%c0, %c0_0] : memref<50x2048xbf16, #tpu.memory_space<vmem>>, vector<50x2048xbf16>
    %c0_1 = arith.constant 0 : index
    %c0_2 = arith.constant 0 : index
    %1 = vector.load %arg2[%c0_1, %c0_2] : memref<2048x128xbf16, #tpu.memory_space<vmem>>, vector<2048x128xbf16>
    %cst = arith.constant dense<0.000000e+00> : vector<50x128xf32>
    %2 = tpu.matmul %0, %1, %cst {dimension_numbers = #tpu.dot_dimension_numbers<[1], [0], [0], [1], [0, 0, 1, 1], [], []>} : vector<50x2048xbf16>, vector<2048x128xbf16>, vector<50x128xf32> -> vector<50x128xf32>
    %c0_3 = arith.constant 0 : index
    %c0_4 = arith.constant 0 : index
    %3 = vector.load %arg3[%c0_3, %c0_4] : memref<1x128xf32, #tpu.memory_space<vmem>>, vector<1x128xf32>
    %4 = vector.broadcast %3 : vector<1x128xf32> to vector<50x128xf32>
    %5 = arith.addf %2, %4 : vector<50x128xf32>
    %cst_5 = arith.constant 0.000000e+00 : f32
    %6 = vector.broadcast %cst_5 : f32 to vector<50x128xf32>
    %7 = arith.maximumf %5, %6 : vector<50x128xf32>
    %c0_6 = arith.constant 0 : index
    %c0_7 = arith.constant 0 : index
    %8 = vector.load %arg4[%c0_6, %c0_7] : memref<1x128xf32, #tpu.memory_space<vmem>>, vector<1x128xf32>
    %9 = vector.broadcast %8 : vector<1x128xf32> to vector<50x128xf32>
    %10 = arith.mulf %7, %9 : vector<50x128xf32>
    %c0_8 = arith.constant 0 : index
    %c0_9 = arith.constant 0 : index
    %11 = vector.load %arg5[%c0_8, %c0_9] : memref<1x128xf32, #tpu.memory_space<vmem>>, vector<1x128xf32>
    %12 = vector.broadcast %11 : vector<1x128xf32> to vector<50x128xf32>
    %13 = arith.addf %10, %12 : vector<50x128xf32>
    %14 = arith.truncf %13 : vector<50x128xf32> to vector<50x128xbf16>
    %c0_10 = arith.constant 0 : index
    %c0_11 = arith.constant 0 : index
    %15 = vector.load %arg6[%c0_10, %c0_11] : memref<50x128xbf16, #tpu.memory_space<vmem>>, vector<50x128xbf16>
    tpu.vector_store %arg6[%c0_10, %c0_11], %14 {strides = array<i32>} : memref<50x128xbf16, #tpu.memory_space<vmem>>, vector<50x128xbf16>,
    return
  }
  func.func @transform_0(%arg0: i32) -> (i32, i32) {
    %c0_i32 = arith.constant 0 : i32
    %c0_i32_0 = arith.constant 0 : i32
    return %arg0, %c0_i32 : i32, i32
  }
  func.func @transform_1(%arg0: i32) -> (i32, i32) {
    %c0_i32 = arith.constant 0 : i32
    %c0_i32_0 = arith.constant 0 : i32
    %c0_i32_1 = arith.constant 0 : i32
    return %c0_i32, %c0_i32_0 : i32, i32
  }
  func.func @transform_2(%arg0: i32) -> (i32, i32) {
    %c0_i32 = arith.constant 0 : i32
    %c0_i32_0 = arith.constant 0 : i32
    %c0_i32_1 = arith.constant 0 : i32
    return %c0_i32, %c0_i32_0 : i32, i32
  }
  func.func @transform_3(%arg0: i32) -> (i32, i32) {
    %c0_i32 = arith.constant 0 : i32
    %c0_i32_0 = arith.constant 0 : i32
    %c0_i32_1 = arith.constant 0 : i32
    return %c0_i32, %c0_i32_0 : i32, i32
  }
  func.func @transform_4(%arg0: i32) -> (i32, i32) {
    %c0_i32 = arith.constant 0 : i32
    %c0_i32_0 = arith.constant 0 : i32
    %c0_i32_1 = arith.constant 0 : i32
    return %c0_i32, %c0_i32_0 : i32, i32
  }
  func.func @transform_5(%arg0: i32) -> (i32, i32) {
    %c0_i32 = arith.constant 0 : i32
    %c0_i32_0 = arith.constant 0 : i32
    return %arg0, %c0_i32 : i32, i32
  }
}

</mosaic_0001>

<bundles_post_ra>
// kernel: forward.4
= control target key start
LH: loop header
LB: loop body
LE: loop exit
PB: predicated region body
PF: predicated region fallthrough
CT: control target
= control target key end

     0   :  { %v3112_v0 = vmov 0   ;;  %s4087_s1 = inlined_call_operand.vmem [shape: bf16[256,128], index: 1, kind: input, shape index: {}]   ;;  %s4088_s0 = inlined_call_operand.vmem [shape: bf16[882,256], index: 0, kind: input, shape index: {}]   ;;  %s4089_s2 = inlined_call_operand.vmem [shape: f32[1,128], index: 2, kind: input, shape index: {}]   ;;  %s4090_s3 = inlined_call_operand.vmem [shape: f32[1,128], index: 3, kind: input, shape index: {}]   ;;  %s4091_s4 = inlined_call_operand.vmem [shape: f32[1,128], index: 4, kind: input, shape index: {}]   ;;  %s4092_s5 = inlined_call_operand.vmem [shape: bf16[882,128], index: 5, kind: output, shape index: {}]  }
   0x1   :  { %824 = vmatprep.subr.bf16.mxu0 %v3112_v0  ;;  %2893 = vmatprep.subr.bf16.mxu1 %v3112_v0  ;;  %v2926_v1 = vld [vmem:[%s4087_s1] sm:$0xff]   ;;  %v2927_v2 = vld [vmem:[%s4087_s1 + $0x8] sm:$0xff]   ;;  %v2928_v3 = vld [vmem:[%s4087_s1 + $0x10] sm:$0xff]  }
   0x2   :  { %825 = vmatpush1.bf16.msra.mxu0 %v2926_v1  ;;  %2909 = vmatpush1.bf16.msra.mxu1 %v2926_v1  ;;  %v2929_v4 = vld [vmem:[%s4087_s1 + $0x18] sm:$0xff]   ;;  %v2930_v5 = vld [vmem:[%s4087_s1 + $0x20] sm:$0xff]   ;;  %v2931_v7 = vld [vmem:[%s4087_s1 + $0x28] sm:$0xff]  }
   0x3   :  { %826 = vmatprep.subr.bf16.mxu0 %v3112_v0  ;;  %2894 = vmatprep.subr.bf16.mxu1 %v3112_v0  ;;  %v2944_v6 = vld [vmem:[%s4088_s0 + $0x4] ss:$8 sps:$4 sm:$0xff]   ;;  %v2932_v9 = vld [vmem:[%s4087_s1 + $0x30] sm:$0xff]   ;;  %v2933_v10 = vld [vmem:[%s4087_s1 + $0x38] sm:$0xff]  }
   0x4   :  { %v2947_v8 = vld [vmem:[%s4088_s0 + $0x1c4] ss:$8 sps:$4 sm:$0xff]   ;;  %856 = vmatprep.mubr.bf16.mxu0 %v2944_v6  ;;  %v2936_v13 = vld [vmem:[%s4087_s1 + $0x50] sm:$0xff]   ;;  %v2937_v14 = vld [vmem:[%s4087_s1 + $0x58] sm:$0xff]  }
   0x5   :  { %1080 = vmatprep.mubr.bf16.mxu1 %v2947_v8  ;;  %v2934_v11 = vld [vmem:[%s4087_s1 + $0x40] sm:$0xff]   ;;  %v2935_v12 = vld [vmem:[%s4087_s1 + $0x48] sm:$0xff]   ;;  %v2940_v17 = vld [vmem:[%s4087_s1 + $0x70] sm:$0xff]  }
   0x6   :  { %827 = vmatpush1.bf16.msra.mxu0 %v2927_v2  ;;  %2910 = vmatpush1.bf16.msra.mxu1 %v2927_v2  ;;  %v2938_v15 = vld [vmem:[%s4087_s1 + $0x60] sm:$0xff]   ;;  %v2939_v16 = vld [vmem:[%s4087_s1 + $0x68] sm:$0xff]   ;;  %v2941_v18 = vld [vmem:[%s4087_s1 + $0x78] sm:$0xff]  }
   0x7   :  { %828 = vmatprep.subr.bf16.mxu0 %v3112_v0  ;;  %2895 = vmatprep.subr.bf16.mxu1 %v3112_v0  ;;  %v2942_v19 = vld [vmem:[%s4088_s0] ss:$8 sps:$4 sm:$0xff]   ;;  %v2948_v21 = vld [vmem:[%s4088_s0 + $0x14] ss:$8 sps:$4 sm:$0xff]   ;;  %v2952_v23 = vld [vmem:[%s4088_s0 + $0x10] ss:$8 sps:$4 sm:$0xff]  }
   0x8   :  { %v2945_v20 = vld [vmem:[%s4088_s0 + $0x1c0] ss:$8 sps:$4 sm:$0xff]   ;;  %v2950_v22 = vld [vmem:[%s4088_s0 + $0x1d4] ss:$8 sps:$4 sm:$0xff]   ;;  %v2953_v24 = vld [vmem:[%s4088_s0 + $0x1d0] ss:$8 sps:$4 sm:$0xff]  }
   0x9   :  { %v2954_v25 = vld [vmem:[%s4088_s0 + $0x24] ss:$8 sps:$4 sm:$0xff]   ;;  %v2958_v27 = vld [vmem:[%s4088_s0 + $0x20] ss:$8 sps:$4 sm:$0xff]   ;;  %v2960_v29 = vld [vmem:[%s4088_s0 + $0x34] ss:$8 sps:$4 sm:$0xff]  }
   0xa   :  { %829 = vmatpush1.bf16.msra.mxu0 %v2928_v3  ;;  %2911 = vmatpush1.bf16.msra.mxu1 %v2928_v3  ;;  %v2956_v26 = vld [vmem:[%s4088_s0 + $0x1e4] ss:$8 sps:$4 sm:$0xff]   ;;  %v2959_v28 = vld [vmem:[%s4088_s0 + $0x1e0] ss:$8 sps:$4 sm:$0xff]   ;;  %v2962_v30 = vld [vmem:[%s4088_s0 + $0x1f4] ss:$8 sps:$4 sm:$0xff]  }
   0xb   :  { %830 = vmatprep.subr.bf16.mxu0 %v3112_v0  ;;  %2896 = vmatprep.subr.bf16.mxu1 %v3112_v0  ;;  %v2964_v31 = vld [vmem:[%s4088_s0 + $0x30] ss:$8 sps:$4 sm:$0xff]   ;;  %v2966_v33 = vld [vmem:[%s4088_s0 + $0x44] ss:$8 sps:$4 sm:$0xff]   ;;  %v2970_v35 = vld [vmem:[%s4088_s0 + $0x40] ss:$8 sps:$4 sm:$0xff]  }
   0xc   :  { %v2965_v32 = vld [vmem:[%s4088_s0 + $0x1f0] ss:$8 sps:$4 sm:$0xff]   ;;  %v2968_v34 = vld [vmem:[%s4088_s0 + $0x204] ss:$8 sps:$4 sm:$0xff]   ;;  %v2971_v36 = vld [vmem:[%s4088_s0 + $0x200] ss:$8 sps:$4 sm:$0xff]  }
   0xd   :  { %v2972_v37 = vld [vmem:[%s4088_s0 + $0x54] ss:$8 sps:$4 sm:$0xff]   ;;  %v2976_v39 = vld [vmem:[%s4088_s0 + $0x50] ss:$8 sps:$4 sm:$0xff]   ;;  %v2978_v41 = vld [vmem:[%s4088_s0 + $0x64] ss:$8 sps:$4 sm:$0xff]  }
   0xe   :  { %831 = vmatpush1.bf16.msra.mxu0 %v2929_v4  ;;  %2912 = vmatpush1.bf16.msra.mxu1 %v2929_v4  ;;  %v2974_v38 = vld [vmem:[%s4088_s0 + $0x214] ss:$8 sps:$4 sm:$0xff]   ;;  %v2977_v40 = vld [vmem:[%s4088_s0 + $0x210] ss:$8 sps:$4 sm:$0xff]   ;;  %v2980_v42 = vld [vmem:[%s4088_s0 + $0x224] ss:$8 sps:$4 sm:$0xff]  }
   0xf   :  { %832 = vmatprep.subr.bf16.mxu0 %v3112_v0  ;;  %2897 = vmatprep.subr.bf16.mxu1 %v3112_v0  ;;  %v2982_v43 = vld [vmem:[%s4088_s0 + $0x60] ss:$8 sps:$4 sm:$0xff]   ;;  %v2984_v45 = vld [vmem:[%s4088_s0 + $0x74] ss:$8 sps:$4 sm:$0xff]   ;;  %v2988_v47 = vld [vmem:[%s4088_s0 + $0x70] ss:$8 sps:$4 sm:$0xff]  }
  0x10   :  { %v2983_v44 = vld [vmem:[%s4088_s0 + $0x220] ss:$8 sps:$4 sm:$0xff]   ;;  %v2986_v46 = vld [vmem:[%s4088_s0 + $0x234] ss:$8 sps:$4 sm:$0xff]   ;;  %v2989_v48 = vld [vmem:[%s4088_s0 + $0x230] ss:$8 sps:$4 sm:$0xff]  }
  0x11   :  { %v2990_v49 = vld [vmem:[%s4088_s0 + $0x84] ss:$8 sps:$4 sm:$0xff]   ;;  %v2994_v51 = vld [vmem:[%s4088_s0 + $0x80] ss:$8 sps:$4 sm:$0xff]   ;;  %v2996_v53 = vld [vmem:[%s4088_s0 + $0x94] ss:$8 sps:$4 sm:$0xff]  }
  0x12   :  { %833 = vmatpush1.bf16.msra.mxu0 %v2930_v5  ;;  %2913 = vmatpush1.bf16.msra.mxu1 %v2930_v5  ;;  %v2992_v50 = vld [vmem:[%s4088_s0 + $0x244] ss:$8 sps:$4 sm:$0xff]   ;;  %v2995_v52 = vld [vmem:[%s4088_s0 + $0x240] ss:$8 sps:$4 sm:$0xff]   ;;  %v2998_v54 = vld [vmem:[%s4088_s0 + $0x254] ss:$8 sps:$4 sm:$0xff]  }
  0x13   :  { %834 = vmatprep.subr.bf16.mxu0 %v3112_v0  ;;  %2898 = vmatprep.subr.bf16.mxu1 %v3112_v0  ;;  %v3000_v55 = vld [vmem:[%s4088_s0 + $0x90] ss:$8 sps:$4 sm:$0xff]   ;;  %v3002_v57 = vld [vmem:[%s4088_s0 + $0xa4] ss:$8 sps:$4 sm:$0xff]   ;;  %v3006_v59 = vld [vmem:[%s4088_s0 + $0xa0] ss:$8 sps:$4 sm:$0xff]  }
  0x14   :  { %v3001_v56 = vld [vmem:[%s4088_s0 + $0x250] ss:$8 sps:$4 sm:$0xff]   ;;  %v3004_v58 = vld [vmem:[%s4088_s0 + $0x264] ss:$8 sps:$4 sm:$0xff]   ;;  %v3007_v60 = vld [vmem:[%s4088_s0 + $0x260] ss:$8 sps:$4 sm:$0xff]  }
  0x15   :  { %v3008_v61 = vld [vmem:[%s4088_s0 + $0xb4] ss:$8 sps:$4 sm:$0xff]   ;;  %v3012_v63 = vld [vmem:[%s4088_s0 + $0xb0] ss:$8 sps:$4 sm:$0xff]   ;;  %v3014_v1 = vld [vmem:[%s4088_s0 + $0xc4] ss:$8 sps:$4 sm:$0xff]  }
  0x16   :  { %835 = vmatpush1.bf16.msra.mxu0 %v2931_v7  ;;  %2914 = vmatpush1.bf16.msra.mxu1 %v2931_v7  ;;  %v3010_v62 = vld [vmem:[%s4088_s0 + $0x274] ss:$8 sps:$4 sm:$0xff]   ;;  %v3016_v2 = vld [vmem:[%s4088_s0 + $0x284] ss:$8 sps:$4 sm:$0xff]   ;;  %v3018_v3 = vld [vmem:[%s4088_s0 + $0xc0] ss:$8 sps:$4 sm:$0xff]  }
  0x17   :  { %836 = vmatprep.subr.bf16.mxu0 %v3112_v0  ;;  %2899 = vmatprep.subr.bf16.mxu1 %v3112_v0  ;;  %v3019_v4 = vld [vmem:[%s4088_s0 + $0x280] ss:$8 sps:$4 sm:$0xff]   ;;  %v3020_v5 = vld [vmem:[%s4088_s0 + $0xd4] ss:$8 sps:$4 sm:$0xff]   ;;  %v3024_v7 = vld [vmem:[%s4088_s0 + $0xd0] ss:$8 sps:$4 sm:$0xff]  }
  0x18   :  { %v3022_v6 = vld [vmem:[%s4088_s0 + $0x294] ss:$8 sps:$4 sm:$0xff]   ;;  %v3025_v8 = vld [vmem:[%s4088_s0 + $0x290] ss:$8 sps:$4 sm:$0xff]  }
  0x1a   :  { %837 = vmatpush1.bf16.msra.mxu0 %v2932_v9  ;;  %2915 = vmatpush1.bf16.msra.mxu1 %v2932_v9  ;;  %v3026_v9 = vld [vmem:[%s4088_s0 + $0xe4] ss:$8 sps:$4 sm:$0xff]  }
  0x1b   :  { %838 = vmatprep.subr.bf16.mxu0 %v3112_v0  ;;  %2900 = vmatprep.subr.bf16.mxu1 %v3112_v0 }
  0x1e   :  { %839 = vmatpush1.bf16.msra.mxu0 %v2933_v10  ;;  %2916 = vmatpush1.bf16.msra.mxu1 %v2933_v10  ;;  %v3028_v10 = vld [vmem:[%s4088_s0 + $0x2a4] ss:$8 sps:$4 sm:$0xff]  }
  0x1f   :  { %840 = vmatprep.subr.bf16.mxu0 %v3112_v0  ;;  %2901 = vmatprep.subr.bf16.mxu1 %v3112_v0 }
  0x22   :  { %841 = vmatpush1.bf16.msra.mxu0 %v2934_v11  ;;  %2917 = vmatpush1.bf16.msra.mxu1 %v2934_v11  ;;  %v3030_v11 = vld [vmem:[%s4088_s0 + $0xe0] ss:$8 sps:$4 sm:$0xff]  }
  0x23   :  { %842 = vmatprep.subr.bf16.mxu0 %v3112_v0  ;;  %2902 = vmatprep.subr.bf16.mxu1 %v3112_v0 }
  0x26   :  { %843 = vmatpush1.bf16.msra.mxu0 %v2935_v12  ;;  %2918 = vmatpush1.bf16.msra.mxu1 %v2935_v12  ;;  %v3031_v12 = vld [vmem:[%s4088_s0 + $0x2a0] ss:$8 sps:$4 sm:$0xff]  }
  0x27   :  { %844 = vmatprep.subr.bf16.mxu0 %v3112_v0  ;;  %2903 = vmatprep.subr.bf16.mxu1 %v3112_v0 }
  0x2a   :  { %845 = vmatpush1.bf16.msra.mxu0 %v2936_v13  ;;  %2919 = vmatpush1.bf16.msra.mxu1 %v2936_v13  ;;  %v3032_v13 = vld [vmem:[%s4088_s0 + $0xf4] ss:$8 sps:$4 sm:$0xff]  }
  0x2b   :  { %846 = vmatprep.subr.bf16.mxu0 %v3112_v0  ;;  %2904 = vmatprep.subr.bf16.mxu1 %v3112_v0 }
  0x2e   :  { %847 = vmatpush1.bf16.msra.mxu0 %v2937_v14  ;;  %2920 = vmatpush1.bf16.msra.mxu1 %v2937_v14  ;;  %v3034_v14 = vld [vmem:[%s4088_s0 + $0x2b4] ss:$8 sps:$4 sm:$0xff]  }
  0x2f   :  { %848 = vmatprep.subr.bf16.mxu0 %v3112_v0  ;;  %2905 = vmatprep.subr.bf16.mxu1 %v3112_v0 }
  0x32   :  { %849 = vmatpush1.bf16.msra.mxu0 %v2938_v15  ;;  %2921 = vmatpush1.bf16.msra.mxu1 %v2938_v15  ;;  %v3036_v15 = vld [vmem:[%s4088_s0 + $0xf0] ss:$8 sps:$4 sm:$0xff]  }
  0x33   :  { %850 = vmatprep.subr.bf16.mxu0 %v3112_v0  ;;  %2906 = vmatprep.subr.bf16.mxu1 %v3112_v0 }
  0x36   :  { %851 = vmatpush1.bf16.msra.mxu0 %v2939_v16  ;;  %2922 = vmatpush1.bf16.msra.mxu1 %v2939_v16  ;;  %v3037_v16 = vld [vmem:[%s4088_s0 + $0x2b0] ss:$8 sps:$4 sm:$0xff]  }
  0x37   :  { %852 = vmatprep.subr.bf16.mxu0 %v3112_v0  ;;  %2907 = vmatprep.subr.bf16.mxu1 %v3112_v0 }
  0x3a   :  { %853 = vmatpush1.bf16.msra.mxu0 %v2940_v17  ;;  %2923 = vmatpush1.bf16.msra.mxu1 %v2940_v17  ;;  %v3038_v17 = vld [vmem:[%s4088_s0 + $0x104] ss:$8 sps:$4 sm:$0xff]  }
  0x3b   :  { %854 = vmatprep.subr.bf16.mxu0 %v3112_v0  ;;  %2908 = vmatprep.subr.bf16.mxu1 %v3112_v0  ;;  %v3013_v0 = vld [vmem:[%s4088_s0 + $0x270] ss:$8 sps:$4 sm:$0xff]  }
  0x3e   :  { %855 = vmatpush1.bf16.msra.mxu0 %v2941_v18  ;;  %2924 = vmatpush1.bf16.msra.mxu1 %v2941_v18  ;;  %v3040_v18 = vld [vmem:[%s4088_s0 + $0x2c4] ss:$8 sps:$4 sm:$0xff]  }
  0x41   :  { %857 = vmatmul.mubr.bf16.vlgmr.msra.gmra.mrb[0].mxu0 %v2942_v19  ;;  %1081 = vmatmul.mubr.bf16.vlgmr.msra.gmra.mrb[0].mxu1 %v2945_v20  ;;  %v3042_v19 = vld [vmem:[%s4088_s0 + $0x100] ss:$8 sps:$4 sm:$0xff]  }
  0x42   :  { %864 = vmatprep.mubr.bf16.mxu0 %v2948_v21  ;;  %1088 = vmatprep.mubr.bf16.mxu1 %v2950_v22  ;;  %v3043_v20 = vld [vmem:[%s4088_s0 + $0x2c0] ss:$8 sps:$4 sm:$0xff]   ;;  %v3044_v21 = vld [vmem:[%s4088_s0 + $0x114] ss:$8 sps:$4 sm:$0xff]  }
  0x43   :  { %v3046_v22 = vld [vmem:[%s4088_s0 + $0x2d4] ss:$8 sps:$4 sm:$0xff]  }
  0x49   :  { %865 = vmatmul.mubr.bf16.gmra.mrb[4].mxu0 %v2952_v23  ;;  %1089 = vmatmul.mubr.bf16.gmra.mrb[4].mxu1 %v2953_v24  ;;  %v3048_v23 = vld [vmem:[%s4088_s0 + $0x110] ss:$8 sps:$4 sm:$0xff]  }
  0x4a   :  { %872 = vmatprep.mubr.bf16.mxu0 %v2954_v25  ;;  %1096 = vmatprep.mubr.bf16.mxu1 %v2956_v26  ;;  %v3049_v24 = vld [vmem:[%s4088_s0 + $0x2d0] ss:$8 sps:$4 sm:$0xff]   ;;  %v3050_v25 = vld [vmem:[%s4088_s0 + $0x124] ss:$8 sps:$4 sm:$0xff]  }
  0x4b   :  { %v3052_v26 = vld [vmem:[%s4088_s0 + $0x2e4] ss:$8 sps:$4 sm:$0xff]  }
  0x51   :  { %873 = vmatmul.mubr.bf16.gmra.mrb[8].mxu0 %v2958_v27  ;;  %1097 = vmatmul.mubr.bf16.gmra.mrb[8].mxu1 %v2959_v28  ;;  %v3054_v27 = vld [vmem:[%s4088_s0 + $0x120] ss:$8 sps:$4 sm:$0xff]  }
  0x52   :  { %880 = vmatprep.mubr.bf16.mxu0 %v2960_v29  ;;  %1104 = vmatprep.mubr.bf16.mxu1 %v2962_v30  ;;  %v3055_v28 = vld [vmem:[%s4088_s0 + $0x2e0] ss:$8 sps:$4 sm:$0xff]   ;;  %v3056_v29 = vld [vmem:[%s4088_s0 + $0x134] ss:$8 sps:$4 sm:$0xff]  }
  0x53   :  { %v3058_v30 = vld [vmem:[%s4088_s0 + $0x2f4] ss:$8 sps:$4 sm:$0xff]  }
  0x59   :  { %881 = vmatmul.mubr.bf16.gmra.mrb[12].mxu0 %v2964_v31  ;;  %1105 = vmatmul.mubr.bf16.gmra.mrb[12].mxu1 %v2965_v32  ;;  %v3060_v31 = vld [vmem:[%s4088_s0 + $0x130] ss:$8 sps:$4 sm:$0xff]  }
  0x5a   :  { %888 = vmatprep.mubr.bf16.mxu0 %v2966_v33  ;;  %1112 = vmatprep.mubr.bf16.mxu1 %v2968_v34  ;;  %v3061_v32 = vld [vmem:[%s4088_s0 + $0x2f0] ss:$8 sps:$4 sm:$0xff]   ;;  %v3062_v33 = vld [vmem:[%s4088_s0 + $0x144] ss:$8 sps:$4 sm:$0xff]  }
  0x5b   :  { %v3064_v34 = vld [vmem:[%s4088_s0 + $0x304] ss:$8 sps:$4 sm:$0xff]  }
  0x61   :  { %889 = vmatmul.mubr.bf16.gmra.mrb[16].mxu0 %v2970_v35  ;;  %1113 = vmatmul.mubr.bf16.gmra.mrb[16].mxu1 %v2971_v36  ;;  %v3066_v35 = vld [vmem:[%s4088_s0 + $0x140] ss:$8 sps:$4 sm:$0xff]  }
  0x62   :  { %896 = vmatprep.mubr.bf16.mxu0 %v2972_v37  ;;  %1120 = vmatprep.mubr.bf16.mxu1 %v2974_v38  ;;  %v3067_v36 = vld [vmem:[%s4088_s0 + $0x300] ss:$8 sps:$4 sm:$0xff]   ;;  %v3068_v37 = vld [vmem:[%s4088_s0 + $0x154] ss:$8 sps:$4 sm:$0xff]  }
  0x63   :  { %v3070_v38 = vld [vmem:[%s4088_s0 + $0x314] ss:$8 sps:$4 sm:$0xff]  }
  0x69   :  { %897 = vmatmul.mubr.bf16.gmra.mrb[20].mxu0 %v2976_v39  ;;  %1121 = vmatmul.mubr.bf16.gmra.mrb[20].mxu1 %v2977_v40  ;;  %v3072_v39 = vld [vmem:[%s4088_s0 + $0x150] ss:$8 sps:$4 sm:$0xff]  }
  0x6a   :  { %904 = vmatprep.mubr.bf16.mxu0 %v2978_v41  ;;  %1128 = vmatprep.mubr.bf16.mxu1 %v2980_v42  ;;  %v3073_v40 = vld [vmem:[%s4088_s0 + $0x310] ss:$8 sps:$4 sm:$0xff]   ;;  %v3074_v41 = vld [vmem:[%s4088_s0 + $0x164] ss:$8 sps:$4 sm:$0xff]  }
  0x6b   :  { %v3076_v42 = vld [vmem:[%s4088_s0 + $0x324] ss:$8 sps:$4 sm:$0xff]  }
  0x71   :  { %905 = vmatmul.mubr.bf16.gmra.mrb[24].mxu0 %v2982_v43  ;;  %1129 = vmatmul.mubr.bf16.gmra.mrb[24].mxu1 %v2983_v44  ;;  %v3078_v43 = vld [vmem:[%s4088_s0 + $0x160] ss:$8 sps:$4 sm:$0xff]  }
  0x72   :  { %912 = vmatprep.mubr.bf16.mxu0 %v2984_v45  ;;  %1136 = vmatprep.mubr.bf16.mxu1 %v2986_v46  ;;  %v3079_v44 = vld [vmem:[%s4088_s0 + $0x320] ss:$8 sps:$4 sm:$0xff]   ;;  %v3080_v45 = vld [vmem:[%s4088_s0 + $0x174] ss:$8 sps:$4 sm:$0xff]  }
  0x73   :  { %v3082_v46 = vld [vmem:[%s4088_s0 + $0x334] ss:$8 sps:$4 sm:$0xff]  }
  0x79   :  { %913 = vmatmul.mubr.bf16.gmra.mrb[28].mxu0 %v2988_v47  ;;  %1137 = vmatmul.mubr.bf16.gmra.mrb[28].mxu1 %v2989_v48  ;;  %v3084_v47 = vld [vmem:[%s4088_s0 + $0x170] ss:$8 sps:$4 sm:$0xff]  }
  0x7a   :  { %920 = vmatprep.mubr.bf16.mxu0 %v2990_v49  ;;  %1144 = vmatprep.mubr.bf16.mxu1 %v2992_v50  ;;  %v3085_v48 = vld [vmem:[%s4088_s0 + $0x330] ss:$8 sps:$4 sm:$0xff]   ;;  %v3086_v49 = vld [vmem:[%s4088_s0 + $0x184] ss:$8 sps:$4 sm:$0xff]  }
  0x7b   :  { %v3088_v50 = vld [vmem:[%s4088_s0 + $0x344] ss:$8 sps:$4 sm:$0xff]  }
  0x81   :  { %921 = vmatmul.mubr.bf16.gmra.mrb[32].mxu0 %v2994_v51  ;;  %1145 = vmatmul.mubr.bf16.gmra.mrb[32].mxu1 %v2995_v52  ;;  %v3090_v51 = vld [vmem:[%s4088_s0 + $0x180] ss:$8 sps:$4 sm:$0xff]  }
  0x82   :  { %928 = vmatprep.mubr.bf16.mxu0 %v2996_v53  ;;  %1152 = vmatprep.mubr.bf16.mxu1 %v2998_v54  ;;  %v3091_v52 = vld [vmem:[%s4088_s0 + $0x340] ss:$8 sps:$4 sm:$0xff]   ;;  %v3092_v53 = vld [vmem:[%s4088_s0 + $0x194] ss:$8 sps:$4 sm:$0xff]  }
  0x83   :  { %v3094_v54 = vld [vmem:[%s4088_s0 + $0x354] ss:$8 sps:$4 sm:$0xff]  }
  0x89   :  { %929 = vmatmul.mubr.bf16.gmra.mrb[36].mxu0 %v3000_v55  ;;  %1153 = vmatmul.mubr.bf16.gmra.mrb[36].mxu1 %v3001_v56  ;;  %v3096_v55 = vld [vmem:[%s4088_s0 + $0x190] ss:$8 sps:$4 sm:$0xff]  }
  0x8a   :  { %936 = vmatprep.mubr.bf16.mxu0 %v3002_v57  ;;  %1160 = vmatprep.mubr.bf16.mxu1 %v3004_v58  ;;  %v3097_v56 = vld [vmem:[%s4088_s0 + $0x350] ss:$8 sps:$4 sm:$0xff]   ;;  %v3098_v57 = vld [vmem:[%s4088_s0 + $0x1a4] ss:$8 sps:$4 sm:$0xff]  }
  0x8b   :  { %v3100_v58 = vld [vmem:[%s4088_s0 + $0x364] ss:$8 sps:$4 sm:$0xff]  }
  0x91   :  { %937 = vmatmul.mubr.bf16.gmra.mrb[40].mxu0 %v3006_v59  ;;  %1161 = vmatmul.mubr.bf16.gmra.mrb[40].mxu1 %v3007_v60  ;;  %v131_v59 = vld [vmem:[%s4088_s0 + $0x370] sm:$0x11]  ;;  %v3102_v60 = vld [vmem:[%s4088_s0 + $0x1a0] ss:$8 sps:$4 sm:$0xff]  }
  0x92   :  { %944 = vmatprep.mubr.bf16.mxu0 %v3008_v61  ;;  %1168 = vmatprep.mubr.bf16.mxu1 %v3010_v62  ;;  %v3103_v61 = vld [vmem:[%s4088_s0 + $0x360] ss:$8 sps:$4 sm:$0xff]   ;;  %v3104_v62 = vld [vmem:[%s4088_s0 + $0x1b4] ss:$8 sps:$4 sm:$0xff]  }
  0x99   :  { %945 = vmatmul.mubr.bf16.gmra.mrb[44].mxu0 %v3012_v63  ;;  %1169 = vmatmul.mubr.bf16.gmra.mrb[44].mxu1 %v3013_v0  ;;  %v2323_v63 = vcombine.high %v131_v59, %v131_v59  ;;  %v3556_v0 = vld [vmem:[%s4089_s2] ss:$0 sm:$0xff] }
  0x9a   :  { %952 = vmatprep.mubr.bf16.mxu0 %v3014_v1  ;;  %1176 = vmatprep.mubr.bf16.mxu1 %v3016_v2 }
  0xa1   :  { %953 = vmatmul.mubr.bf16.gmra.mrb[48].mxu0 %v3018_v3  ;;  %1177 = vmatmul.mubr.bf16.gmra.mrb[48].mxu1 %v3019_v4 }
  0xa2   :  { %960 = vmatprep.mubr.bf16.mxu0 %v3020_v5  ;;  %1184 = vmatprep.mubr.bf16.mxu1 %v3022_v6 }
  0xa9   :  { %961 = vmatmul.mubr.bf16.gmra.mrb[52].mxu0 %v3024_v7  ;;  %1185 = vmatmul.mubr.bf16.gmra.mrb[52].mxu1 %v3025_v8  ;;  %v3107_v7 = vld [vmem:[%s4088_s0 + $0x1b0] ss:$8 sps:$4 sm:$0xff]   ;;  %v2322_v8 = vcombine.low %v131_v59, %v131_v59 }
  0xaa   :  { %968 = vmatprep.mubr.bf16.mxu0 %v3026_v9  ;;  %1192 = vmatprep.mubr.bf16.mxu1 %v3028_v10  ;;  %v3566_v9 = vld [vmem:[%s4090_s3] ss:$0 sm:$0xff] }
  0xb1   :  { %969 = vmatmul.mubr.bf16.gmra.mrb[56].mxu0 %v3030_v11  ;;  %1193 = vmatmul.mubr.bf16.gmra.mrb[56].mxu1 %v3031_v12 }
  0xb2   :  { %976 = vmatprep.mubr.bf16.mxu0 %v3032_v13  ;;  %1200 = vmatprep.mubr.bf16.mxu1 %v3034_v14 }
  0xb9   :  { %977 = vmatmul.mubr.bf16.gmra.mrb[60].mxu0 %v3036_v15  ;;  %1201 = vmatmul.mubr.bf16.gmra.mrb[60].mxu1 %v3037_v16 }
  0xba   :  { %984 = vmatprep.mubr.bf16.mxu0 %v3038_v17  ;;  %1208 = vmatprep.mubr.bf16.mxu1 %v3040_v18 }
  0xc1   :  { %985 = vmatmul.mubr.bf16.gmra.mrb[64].mxu0 %v3042_v19  ;;  %1209 = vmatmul.mubr.bf16.gmra.mrb[64].mxu1 %v3043_v20  ;;  %v3574_v19 = vld [vmem:[%s4091_s4] ss:$0 sm:$0xff] }
  0xc2   :  { %992 = vmatprep.mubr.bf16.mxu0 %v3044_v21  ;;  %1216 = vmatprep.mubr.bf16.mxu1 %v3046_v22 }
  0xc9   :  { %993 = vmatmul.mubr.bf16.gmra.mrb[68].mxu0 %v3048_v23  ;;  %1217 = vmatmul.mubr.bf16.gmra.mrb[68].mxu1 %v3049_v24 }
  0xca   :  { %1000 = vmatprep.mubr.bf16.mxu0 %v3050_v25  ;;  %1224 = vmatprep.mubr.bf16.mxu1 %v3052_v26 }
  0xd1   :  { %1001 = vmatmul.mubr.bf16.gmra.mrb[72].mxu0 %v3054_v27  ;;  %1225 = vmatmul.mubr.bf16.gmra.mrb[72].mxu1 %v3055_v28 }
  0xd2   :  { %1008 = vmatprep.mubr.bf16.mxu0 %v3056_v29  ;;  %1232 = vmatprep.mubr.bf16.mxu1 %v3058_v30 }
  0xd9   :  { %1009 = vmatmul.mubr.bf16.gmra.mrb[76].mxu0 %v3060_v31  ;;  %1233 = vmatmul.mubr.bf16.gmra.mrb[76].mxu1 %v3061_v32 }
  0xda   :  { %1016 = vmatprep.mubr.bf16.mxu0 %v3062_v33  ;;  %1240 = vmatprep.mubr.bf16.mxu1 %v3064_v34 }
  0xe1   :  { %1017 = vmatmul.mubr.bf16.gmra.mrb[80].mxu0 %v3066_v35  ;;  %1241 = vmatmul.mubr.bf16.gmra.mrb[80].mxu1 %v3067_v36 }
  0xe2   :  { %1024 = vmatprep.mubr.bf16.mxu0 %v3068_v37  ;;  %1248 = vmatprep.mubr.bf16.mxu1 %v3070_v38 }
  0xe9   :  { %1025 = vmatmul.mubr.bf16.gmra.mrb[84].mxu0 %v3072_v39  ;;  %1249 = vmatmul.mubr.bf16.gmra.mrb[84].mxu1 %v3073_v40 }
  0xea   :  { %1032 = vmatprep.mubr.bf16.mxu0 %v3074_v41  ;;  %1256 = vmatprep.mubr.bf16.mxu1 %v3076_v42 }
  0xf1   :  { %1033 = vmatmul.mubr.bf16.gmra.mrb[88].mxu0 %v3078_v43  ;;  %1257 = vmatmul.mubr.bf16.gmra.mrb[88].mxu1 %v3079_v44 }
  0xf2   :  { %1040 = vmatprep.mubr.bf16.mxu0 %v3080_v45  ;;  %1264 = vmatprep.mubr.bf16.mxu1 %v3082_v46 }
  0xf9   :  { %1041 = vmatmul.mubr.bf16.gmra.mrb[92].mxu0 %v3084_v47  ;;  %1265 = vmatmul.mubr.bf16.gmra.mrb[92].mxu1 %v3085_v48 }
  0xfa   :  { %1048 = vmatprep.mubr.bf16.mxu0 %v3086_v49  ;;  %1272 = vmatprep.mubr.bf16.mxu1 %v3088_v50 }
 0x101   :  { %1049 = vmatmul.mubr.bf16.gmra.mrb[96].mxu0 %v3090_v51  ;;  %1273 = vmatmul.mubr.bf16.gmra.mrb[96].mxu1 %v3091_v52 }
 0x102   :  { %1056 = vmatprep.mubr.bf16.mxu0 %v3092_v53  ;;  %1280 = vmatprep.mubr.bf16.mxu1 %v3094_v54 }
 0x109   :  { %1057 = vmatmul.mubr.bf16.gmra.mrb[100].mxu0 %v3096_v55  ;;  %1281 = vmatmul.mubr.bf16.gmra.mrb[100].mxu1 %v3097_v56 }
 0x10a   :  { %1064 = vmatprep.mubr.bf16.mxu0 %v3098_v57  ;;  %1288 = vmatprep.mubr.bf16.mxu1 %v3100_v58 }
 0x111   :  { %1065 = vmatmul.mubr.bf16.gmra.mrb[104].mxu0 %v3102_v60  ;;  %1289 = vmatmul.mubr.bf16.gmra.mrb[104].mxu1 %v3103_v61 }
 0x112   :  { %1072 = vmatprep.mubr.bf16.mxu0 %v3104_v62  ;;  %1296 = vmatprep.mubr.bf16.mxu1 %v2323_v63 }
 0x114   :  { %v858_v1 = vpop.f32.mrb[0].mxu0  ;;  %v1082_v2 = vpop.f32.mrb[0].mxu1 }
 0x115   :  { %v859_v3 = vadd.f32 %v3556_v0, %v858_v1  ;;  %v1083_v4 = vadd.f32 %v3556_v0, %v1082_v2  ;;  %v860_v5 = vpop.f32.mrb[1].mxu0  ;;  %v1084_v6 = vpop.f32.mrb[1].mxu1 }
 0x116   :  { %v861_v10 = vpop.f32.mrb[2].mxu0  ;;  %v1085_v11 = vpop.f32.mrb[2].mxu1 }
 0x117   :  { %v1304_v12 = vmax.f32 %v859_v3, 0.0  ;;  %v1360_v13 = vmax.f32 %v1083_v4, 0.0  ;;  %v862_v14 = vadd.f32 %v3556_v0, %v861_v10  ;;  %v1086_v15 = vadd.f32 %v3556_v0, %v1085_v11  ;;  %v863_v16 = vpop.f32.mrb[3].mxu0  ;;  %v1087_v17 = vpop.f32.mrb[3].mxu1 }
 0x119   :  { %v1422_v18 = vmul.f32 %v3566_v9, %v1304_v12  ;;  %v1478_v20 = vmul.f32 %v3566_v9, %v1360_v13  ;;  %v1305_v21 = vmax.f32 %v862_v14, 0.0  ;;  %v1361_v22 = vmax.f32 %v1086_v15, 0.0  ;;  %1073 = vmatmul.mubr.bf16.gmra.mrb[108].mxu0 %v3107_v7  ;;  %1297 = vmatmul.mubr.bf16.gmra.mrb[108].mxu1 %v2322_v8 }
 0x11b   :  { %v1596_v23 = vadd.f32 %v3574_v19, %v1478_v20  ;;  %v1423_v24 = vmul.f32 %v3566_v9, %v1305_v21  ;;  %v1479_v25 = vmul.f32 %v3566_v9, %v1361_v22  ;;  %v1540_v26 = vadd.f32 %v3574_v19, %v1422_v18 }
 0x11c   :  { %v866_v27 = vpop.f32.mrb[4].mxu0  ;;  %v1090_v28 = vpop.f32.mrb[4].mxu1 }
 0x11d   :  { %v1541_v29 = vadd.f32 %v3574_v19, %v1423_v24  ;;  %v1597_v30 = vadd.f32 %v3574_v19, %v1479_v25  ;;  %v867_v31 = vadd.f32 %v3556_v0, %v866_v27  ;;  %v1091_v32 = vadd.f32 %v3556_v0, %v1090_v28  ;;  %v868_v33 = vpop.f32.mrb[5].mxu0  ;;  %v1092_v34 = vpop.f32.mrb[5].mxu1 }
 0x11e   :  { %v869_v35 = vpop.f32.mrb[6].mxu0  ;;  %v1093_v36 = vpop.f32.mrb[6].mxu1 }
 0x11f   :  { %v2567_v37 = vpack.c.bf16 %v1541_v29, %v1540_v26  ;;  %v2707_v38 = vpack.c.bf16 %v1597_v30, %v1596_v23  ;;  %v1306_v39 = vmax.f32 %v867_v31, 0.0  ;;  %v1362_v40 = vmax.f32 %v1091_v32, 0.0  ;;  %v871_v41 = vpop.f32.mrb[7].mxu0  ;;  %v1095_v42 = vpop.f32.mrb[7].mxu1 }
 0x120   :  { %v870_v43 = vadd.f32 %v3556_v0, %v869_v35  ;;  %v1094_v44 = vadd.f32 %v3556_v0, %v1093_v36 }
 0x121   :  { %2568 = vst [vmem:[%s4092_s5] sm:$0xff] %v2567_v37   ;;  %2866 = vst [vmem:[%s4092_s5 + $0xe0] sm:$0xff] %v2707_v38   ;;  %v1480_v45 = vmul.f32 %v3566_v9, %v1362_v40  ;;  %v1424_v46 = vmul.f32 %v3566_v9, %v1306_v39 }
 0x122   :  { %v1307_v47 = vmax.f32 %v870_v43, 0.0  ;;  %v1363_v48 = vmax.f32 %v1094_v44, 0.0 }
 0x123   :  { %v1598_v49 = vadd.f32 %v3574_v19, %v1480_v45  ;;  %v1542_v58 = vadd.f32 %v3574_v19, %v1424_v46 }
 0x124   :  { %v1425_v50 = vmul.f32 %v3566_v9, %v1307_v47  ;;  %v1481_v51 = vmul.f32 %v3566_v9, %v1363_v48  ;;  %v874_v52 = vpop.f32.mrb[8].mxu0  ;;  %v1098_v53 = vpop.f32.mrb[8].mxu1 }
 0x125   :  { %v875_v54 = vadd.f32 %v3556_v0, %v874_v52  ;;  %v1099_v55 = vadd.f32 %v3556_v0, %v1098_v53  ;;  %v876_v56 = vpop.f32.mrb[9].mxu0  ;;  %v1100_v57 = vpop.f32.mrb[9].mxu1 }
 0x126   :  { %v1543_v59 = vadd.f32 %v3574_v19, %v1425_v50  ;;  %v1599_v60 = vadd.f32 %v3574_v19, %v1481_v51  ;;  %v877_v61 = vpop.f32.mrb[10].mxu0  ;;  %v1101_v62 = vpop.f32.mrb[10].mxu1 }
 0x127   :  { %v1308_v63 = vmax.f32 %v875_v54, 0.0  ;;  %v1364_v1 = vmax.f32 %v1099_v55, 0.0  ;;  %v878_v2 = vadd.f32 %v3556_v0, %v877_v61  ;;  %v1102_v3 = vadd.f32 %v3556_v0, %v1101_v62  ;;  %v879_v4 = vpop.f32.mrb[11].mxu0  ;;  %v1103_v5 = vpop.f32.mrb[11].mxu1 }
 0x128   :  { %v2572_v6 = vpack.c.bf16 %v1543_v59, %v1542_v58  ;;  %v2712_v7 = vpack.c.bf16 %v1599_v60, %v1598_v49 }
 0x129   :  { %v1426_v8 = vmul.f32 %v3566_v9, %v1308_v63  ;;  %v1482_v10 = vmul.f32 %v3566_v9, %v1364_v1  ;;  %v1309_v11 = vmax.f32 %v878_v2, 0.0  ;;  %v1365_v12 = vmax.f32 %v1102_v3, 0.0 }
 0x12a   :  { %2839 = vst [vmem:[%s4092_s5 + $0x8] sm:$0xff] %v2572_v6   ;;  %2867 = vst [vmem:[%s4092_s5 + $0xe8] sm:$0xff] %v2712_v7  }
 0x12b   :  { %v1600_v13 = vadd.f32 %v3574_v19, %v1482_v10  ;;  %v1427_v14 = vmul.f32 %v3566_v9, %v1309_v11  ;;  %v1483_v15 = vmul.f32 %v3566_v9, %v1365_v12  ;;  %v1544_v16 = vadd.f32 %v3574_v19, %v1426_v8 }
 0x12c   :  { %v882_v17 = vpop.f32.mrb[12].mxu0  ;;  %v1106_v18 = vpop.f32.mrb[12].mxu1 }
 0x12d   :  { %v1545_v20 = vadd.f32 %v3574_v19, %v1427_v14  ;;  %v1601_v21 = vadd.f32 %v3574_v19, %v1483_v15  ;;  %v883_v22 = vadd.f32 %v3556_v0, %v882_v17  ;;  %v1107_v23 = vadd.f32 %v3556_v0, %v1106_v18  ;;  %v884_v24 = vpop.f32.mrb[13].mxu0  ;;  %v1108_v25 = vpop.f32.mrb[13].mxu1 }
 0x12e   :  { %v885_v26 = vpop.f32.mrb[14].mxu0  ;;  %v1109_v27 = vpop.f32.mrb[14].mxu1 }
 0x12f   :  { %v2577_v28 = vpack.c.bf16 %v1545_v20, %v1544_v16  ;;  %v2717_v29 = vpack.c.bf16 %v1601_v21, %v1600_v13  ;;  %v1310_v30 = vmax.f32 %v883_v22, 0.0  ;;  %v1366_v31 = vmax.f32 %v1107_v23, 0.0  ;;  %v887_v32 = vpop.f32.mrb[15].mxu0  ;;  %v1111_v33 = vpop.f32.mrb[15].mxu1 }
 0x130   :  { %v886_v34 = vadd.f32 %v3556_v0, %v885_v26  ;;  %v1110_v35 = vadd.f32 %v3556_v0, %v1109_v27 }
 0x131   :  { %2840 = vst [vmem:[%s4092_s5 + $0x10] sm:$0xff] %v2577_v28   ;;  %2868 = vst [vmem:[%s4092_s5 + $0xf0] sm:$0xff] %v2717_v29   ;;  %v1484_v36 = vmul.f32 %v3566_v9, %v1366_v31  ;;  %v1428_v37 = vmul.f32 %v3566_v9, %v1310_v30 }
 0x132   :  { %v1311_v38 = vmax.f32 %v886_v34, 0.0  ;;  %v1367_v39 = vmax.f32 %v1110_v35, 0.0 }
 0x133   :  { %v1602_v40 = vadd.f32 %v3574_v19, %v1484_v36  ;;  %v1546_v49 = vadd.f32 %v3574_v19, %v1428_v37 }
 0x134   :  { %v1429_v41 = vmul.f32 %v3566_v9, %v1311_v38  ;;  %v1485_v42 = vmul.f32 %v3566_v9, %v1367_v39  ;;  %v890_v43 = vpop.f32.mrb[16].mxu0  ;;  %v1114_v44 = vpop.f32.mrb[16].mxu1 }
 0x135   :  { %v891_v45 = vadd.f32 %v3556_v0, %v890_v43  ;;  %v1115_v46 = vadd.f32 %v3556_v0, %v1114_v44  ;;  %v892_v47 = vpop.f32.mrb[17].mxu0  ;;  %v1116_v48 = vpop.f32.mrb[17].mxu1 }
 0x136   :  { %v1547_v50 = vadd.f32 %v3574_v19, %v1429_v41  ;;  %v1603_v51 = vadd.f32 %v3574_v19, %v1485_v42  ;;  %v893_v52 = vpop.f32.mrb[18].mxu0  ;;  %v1117_v53 = vpop.f32.mrb[18].mxu1 }
 0x137   :  { %v1312_v54 = vmax.f32 %v891_v45, 0.0  ;;  %v1368_v55 = vmax.f32 %v1115_v46, 0.0  ;;  %v894_v56 = vadd.f32 %v3556_v0, %v893_v52  ;;  %v1118_v57 = vadd.f32 %v3556_v0, %v1117_v53  ;;  %v895_v58 = vpop.f32.mrb[19].mxu0  ;;  %v1119_v59 = vpop.f32.mrb[19].mxu1 }
 0x138   :  { %v2582_v60 = vpack.c.bf16 %v1547_v50, %v1546_v49  ;;  %v2722_v61 = vpack.c.bf16 %v1603_v51, %v1602_v40 }
 0x139   :  { %v1430_v62 = vmul.f32 %v3566_v9, %v1312_v54  ;;  %v1486_v63 = vmul.f32 %v3566_v9, %v1368_v55  ;;  %v1313_v1 = vmax.f32 %v894_v56, 0.0  ;;  %v1369_v2 = vmax.f32 %v1118_v57, 0.0 }
 0x13a   :  { %2841 = vst [vmem:[%s4092_s5 + $0x18] sm:$0xff] %v2582_v60   ;;  %2869 = vst [vmem:[%s4092_s5 + $0xf8] sm:$0xff] %v2722_v61  }
 0x13b   :  { %v1604_v3 = vadd.f32 %v3574_v19, %v1486_v63  ;;  %v1431_v4 = vmul.f32 %v3566_v9, %v1313_v1  ;;  %v1487_v5 = vmul.f32 %v3566_v9, %v1369_v2  ;;  %v1548_v6 = vadd.f32 %v3574_v19, %v1430_v62 }
 0x13c   :  { %v898_v7 = vpop.f32.mrb[20].mxu0  ;;  %v1122_v8 = vpop.f32.mrb[20].mxu1 }
 0x13d   :  { %v1549_v10 = vadd.f32 %v3574_v19, %v1431_v4  ;;  %v1605_v11 = vadd.f32 %v3574_v19, %v1487_v5  ;;  %v899_v12 = vadd.f32 %v3556_v0, %v898_v7  ;;  %v1123_v13 = vadd.f32 %v3556_v0, %v1122_v8  ;;  %v900_v14 = vpop.f32.mrb[21].mxu0  ;;  %v1124_v15 = vpop.f32.mrb[21].mxu1 }
 0x13e   :  { %v901_v16 = vpop.f32.mrb[22].mxu0  ;;  %v1125_v17 = vpop.f32.mrb[22].mxu1 }
 0x13f   :  { %v2587_v18 = vpack.c.bf16 %v1549_v10, %v1548_v6  ;;  %v2727_v20 = vpack.c.bf16 %v1605_v11, %v1604_v3  ;;  %v1314_v21 = vmax.f32 %v899_v12, 0.0  ;;  %v1370_v22 = vmax.f32 %v1123_v13, 0.0  ;;  %v903_v23 = vpop.f32.mrb[23].mxu0  ;;  %v1127_v24 = vpop.f32.mrb[23].mxu1 }
 0x140   :  { %v902_v25 = vadd.f32 %v3556_v0, %v901_v16  ;;  %v1126_v26 = vadd.f32 %v3556_v0, %v1125_v17 }
 0x141   :  { %2842 = vst [vmem:[%s4092_s5 + $0x20] sm:$0xff] %v2587_v18   ;;  %2870 = vst [vmem:[%s4092_s5 + $0x100] sm:$0xff] %v2727_v20   ;;  %v1488_v27 = vmul.f32 %v3566_v9, %v1370_v22  ;;  %v1432_v28 = vmul.f32 %v3566_v9, %v1314_v21 }
 0x142   :  { %v1315_v29 = vmax.f32 %v902_v25, 0.0  ;;  %v1371_v30 = vmax.f32 %v1126_v26, 0.0 }
 0x143   :  { %v1606_v31 = vadd.f32 %v3574_v19, %v1488_v27  ;;  %v1550_v40 = vadd.f32 %v3574_v19, %v1432_v28 }
 0x144   :  { %v1433_v32 = vmul.f32 %v3566_v9, %v1315_v29  ;;  %v1489_v33 = vmul.f32 %v3566_v9, %v1371_v30  ;;  %v906_v34 = vpop.f32.mrb[24].mxu0  ;;  %v1130_v35 = vpop.f32.mrb[24].mxu1 }
 0x145   :  { %v907_v36 = vadd.f32 %v3556_v0, %v906_v34  ;;  %v1131_v37 = vadd.f32 %v3556_v0, %v1130_v35  ;;  %v908_v38 = vpop.f32.mrb[25].mxu0  ;;  %v1132_v39 = vpop.f32.mrb[25].mxu1 }
 0x146   :  { %v1551_v41 = vadd.f32 %v3574_v19, %v1433_v32  ;;  %v1607_v42 = vadd.f32 %v3574_v19, %v1489_v33  ;;  %v909_v43 = vpop.f32.mrb[26].mxu0  ;;  %v1133_v44 = vpop.f32.mrb[26].mxu1 }
 0x147   :  { %v1316_v45 = vmax.f32 %v907_v36, 0.0  ;;  %v1372_v46 = vmax.f32 %v1131_v37, 0.0  ;;  %v910_v47 = vadd.f32 %v3556_v0, %v909_v43  ;;  %v1134_v48 = vadd.f32 %v3556_v0, %v1133_v44  ;;  %v911_v49 = vpop.f32.mrb[27].mxu0  ;;  %v1135_v50 = vpop.f32.mrb[27].mxu1 }
 0x148   :  { %v2592_v51 = vpack.c.bf16 %v1551_v41, %v1550_v40  ;;  %v2732_v52 = vpack.c.bf16 %v1607_v42, %v1606_v31 }
 0x149   :  { %v1434_v53 = vmul.f32 %v3566_v9, %v1316_v45  ;;  %v1490_v54 = vmul.f32 %v3566_v9, %v1372_v46  ;;  %v1317_v55 = vmax.f32 %v910_v47, 0.0  ;;  %v1373_v56 = vmax.f32 %v1134_v48, 0.0 }
 0x14a   :  { %2843 = vst [vmem:[%s4092_s5 + $0x28] sm:$0xff] %v2592_v51   ;;  %2871 = vst [vmem:[%s4092_s5 + $0x108] sm:$0xff] %v2732_v52  }
 0x14b   :  { %v1608_v57 = vadd.f32 %v3574_v19, %v1490_v54  ;;  %v1435_v58 = vmul.f32 %v3566_v9, %v1317_v55  ;;  %v1491_v59 = vmul.f32 %v3566_v9, %v1373_v56  ;;  %v1552_v60 = vadd.f32 %v3574_v19, %v1434_v53 }
 0x14c   :  { %v914_v61 = vpop.f32.mrb[28].mxu0  ;;  %v1138_v62 = vpop.f32.mrb[28].mxu1 }
 0x14d   :  { %v1553_v63 = vadd.f32 %v3574_v19, %v1435_v58  ;;  %v1609_v1 = vadd.f32 %v3574_v19, %v1491_v59  ;;  %v915_v2 = vadd.f32 %v3556_v0, %v914_v61  ;;  %v1139_v3 = vadd.f32 %v3556_v0, %v1138_v62  ;;  %v916_v4 = vpop.f32.mrb[29].mxu0  ;;  %v1140_v5 = vpop.f32.mrb[29].mxu1 }
 0x14e   :  { %v917_v6 = vpop.f32.mrb[30].mxu0  ;;  %v1141_v7 = vpop.f32.mrb[30].mxu1 }
 0x14f   :  { %v2597_v8 = vpack.c.bf16 %v1553_v63, %v1552_v60  ;;  %v2737_v10 = vpack.c.bf16 %v1609_v1, %v1608_v57  ;;  %v1318_v11 = vmax.f32 %v915_v2, 0.0  ;;  %v1374_v12 = vmax.f32 %v1139_v3, 0.0  ;;  %v919_v13 = vpop.f32.mrb[31].mxu0  ;;  %v1143_v14 = vpop.f32.mrb[31].mxu1 }
 0x150   :  { %v918_v15 = vadd.f32 %v3556_v0, %v917_v6  ;;  %v1142_v16 = vadd.f32 %v3556_v0, %v1141_v7 }
 0x151   :  { %2844 = vst [vmem:[%s4092_s5 + $0x30] sm:$0xff] %v2597_v8   ;;  %2872 = vst [vmem:[%s4092_s5 + $0x110] sm:$0xff] %v2737_v10   ;;  %v1492_v17 = vmul.f32 %v3566_v9, %v1374_v12  ;;  %v1436_v18 = vmul.f32 %v3566_v9, %v1318_v11 }
 0x152   :  { %v1319_v20 = vmax.f32 %v918_v15, 0.0  ;;  %v1375_v21 = vmax.f32 %v1142_v16, 0.0 }
 0x153   :  { %v1610_v22 = vadd.f32 %v3574_v19, %v1492_v17  ;;  %v1554_v31 = vadd.f32 %v3574_v19, %v1436_v18 }
 0x154   :  { %v1437_v23 = vmul.f32 %v3566_v9, %v1319_v20  ;;  %v1493_v24 = vmul.f32 %v3566_v9, %v1375_v21  ;;  %v922_v25 = vpop.f32.mrb[32].mxu0  ;;  %v1146_v26 = vpop.f32.mrb[32].mxu1 }
 0x155   :  { %v923_v27 = vadd.f32 %v3556_v0, %v922_v25  ;;  %v1147_v28 = vadd.f32 %v3556_v0, %v1146_v26  ;;  %v924_v29 = vpop.f32.mrb[33].mxu0  ;;  %v1148_v30 = vpop.f32.mrb[33].mxu1 }
 0x156   :  { %v1555_v32 = vadd.f32 %v3574_v19, %v1437_v23  ;;  %v1611_v33 = vadd.f32 %v3574_v19, %v1493_v24  ;;  %v925_v34 = vpop.f32.mrb[34].mxu0  ;;  %v1149_v35 = vpop.f32.mrb[34].mxu1 }
 0x157   :  { %v1320_v36 = vmax.f32 %v923_v27, 0.0  ;;  %v1376_v37 = vmax.f32 %v1147_v28, 0.0  ;;  %v926_v38 = vadd.f32 %v3556_v0, %v925_v34  ;;  %v1150_v39 = vadd.f32 %v3556_v0, %v1149_v35  ;;  %v927_v40 = vpop.f32.mrb[35].mxu0  ;;  %v1151_v41 = vpop.f32.mrb[35].mxu1 }
 0x158   :  { %v2602_v42 = vpack.c.bf16 %v1555_v32, %v1554_v31  ;;  %v2742_v43 = vpack.c.bf16 %v1611_v33, %v1610_v22 }
 0x159   :  { %v1438_v44 = vmul.f32 %v3566_v9, %v1320_v36  ;;  %v1494_v45 = vmul.f32 %v3566_v9, %v1376_v37  ;;  %v1321_v46 = vmax.f32 %v926_v38, 0.0  ;;  %v1377_v47 = vmax.f32 %v1150_v39, 0.0 }
 0x15a   :  { %2845 = vst [vmem:[%s4092_s5 + $0x38] sm:$0xff] %v2602_v42   ;;  %2873 = vst [vmem:[%s4092_s5 + $0x118] sm:$0xff] %v2742_v43  }
 0x15b   :  { %v1612_v48 = vadd.f32 %v3574_v19, %v1494_v45  ;;  %v1439_v49 = vmul.f32 %v3566_v9, %v1321_v46  ;;  %v1495_v50 = vmul.f32 %v3566_v9, %v1377_v47  ;;  %v1556_v51 = vadd.f32 %v3574_v19, %v1438_v44 }
 0x15c   :  { %v930_v52 = vpop.f32.mrb[36].mxu0  ;;  %v1154_v53 = vpop.f32.mrb[36].mxu1 }
 0x15d   :  { %v1557_v54 = vadd.f32 %v3574_v19, %v1439_v49  ;;  %v1613_v55 = vadd.f32 %v3574_v19, %v1495_v50  ;;  %v931_v56 = vadd.f32 %v3556_v0, %v930_v52  ;;  %v1155_v57 = vadd.f32 %v3556_v0, %v1154_v53  ;;  %v932_v58 = vpop.f32.mrb[37].mxu0  ;;  %v1156_v59 = vpop.f32.mrb[37].mxu1 }
 0x15e   :  { %v933_v60 = vpop.f32.mrb[38].mxu0  ;;  %v1157_v61 = vpop.f32.mrb[38].mxu1 }
 0x15f   :  { %v2607_v62 = vpack.c.bf16 %v1557_v54, %v1556_v51  ;;  %v2747_v63 = vpack.c.bf16 %v1613_v55, %v1612_v48  ;;  %v1322_v1 = vmax.f32 %v931_v56, 0.0  ;;  %v1378_v2 = vmax.f32 %v1155_v57, 0.0  ;;  %v935_v3 = vpop.f32.mrb[39].mxu0  ;;  %v1159_v4 = vpop.f32.mrb[39].mxu1 }
 0x160   :  { %v934_v5 = vadd.f32 %v3556_v0, %v933_v60  ;;  %v1158_v6 = vadd.f32 %v3556_v0, %v1157_v61 }
 0x161   :  { %2846 = vst [vmem:[%s4092_s5 + $0x40] sm:$0xff] %v2607_v62   ;;  %2874 = vst [vmem:[%s4092_s5 + $0x120] sm:$0xff] %v2747_v63   ;;  %v1496_v7 = vmul.f32 %v3566_v9, %v1378_v2  ;;  %v1440_v8 = vmul.f32 %v3566_v9, %v1322_v1 }
 0x162   :  { %v1323_v10 = vmax.f32 %v934_v5, 0.0  ;;  %v1379_v11 = vmax.f32 %v1158_v6, 0.0 }
 0x163   :  { %v1614_v12 = vadd.f32 %v3574_v19, %v1496_v7  ;;  %v1558_v22 = vadd.f32 %v3574_v19, %v1440_v8 }
 0x164   :  { %v1441_v13 = vmul.f32 %v3566_v9, %v1323_v10  ;;  %v1497_v14 = vmul.f32 %v3566_v9, %v1379_v11  ;;  %v938_v15 = vpop.f32.mrb[40].mxu0  ;;  %v1162_v16 = vpop.f32.mrb[40].mxu1 }
 0x165   :  { %v939_v17 = vadd.f32 %v3556_v0, %v938_v15  ;;  %v1163_v18 = vadd.f32 %v3556_v0, %v1162_v16  ;;  %v940_v20 = vpop.f32.mrb[41].mxu0  ;;  %v1164_v21 = vpop.f32.mrb[41].mxu1 }
 0x166   :  { %v1559_v23 = vadd.f32 %v3574_v19, %v1441_v13  ;;  %v1615_v24 = vadd.f32 %v3574_v19, %v1497_v14  ;;  %v941_v25 = vpop.f32.mrb[42].mxu0  ;;  %v1165_v26 = vpop.f32.mrb[42].mxu1 }
 0x167   :  { %v1324_v27 = vmax.f32 %v939_v17, 0.0  ;;  %v1380_v28 = vmax.f32 %v1163_v18, 0.0  ;;  %v942_v29 = vadd.f32 %v3556_v0, %v941_v25  ;;  %v1166_v30 = vadd.f32 %v3556_v0, %v1165_v26  ;;  %v943_v31 = vpop.f32.mrb[43].mxu0  ;;  %v1167_v32 = vpop.f32.mrb[43].mxu1 }
 0x168   :  { %v2612_v33 = vpack.c.bf16 %v1559_v23, %v1558_v22  ;;  %v2752_v34 = vpack.c.bf16 %v1615_v24, %v1614_v12 }
 0x169   :  { %v1442_v35 = vmul.f32 %v3566_v9, %v1324_v27  ;;  %v1498_v36 = vmul.f32 %v3566_v9, %v1380_v28  ;;  %v1325_v37 = vmax.f32 %v942_v29, 0.0  ;;  %v1381_v38 = vmax.f32 %v1166_v30, 0.0 }
 0x16a   :  { %2847 = vst [vmem:[%s4092_s5 + $0x48] sm:$0xff] %v2612_v33   ;;  %2875 = vst [vmem:[%s4092_s5 + $0x128] sm:$0xff] %v2752_v34  }
 0x16b   :  { %v1616_v39 = vadd.f32 %v3574_v19, %v1498_v36  ;;  %v1443_v40 = vmul.f32 %v3566_v9, %v1325_v37  ;;  %v1499_v41 = vmul.f32 %v3566_v9, %v1381_v38  ;;  %v1560_v42 = vadd.f32 %v3574_v19, %v1442_v35 }
 0x16c   :  { %v946_v43 = vpop.f32.mrb[44].mxu0  ;;  %v1170_v44 = vpop.f32.mrb[44].mxu1 }
 0x16d   :  { %v1561_v45 = vadd.f32 %v3574_v19, %v1443_v40  ;;  %v1617_v46 = vadd.f32 %v3574_v19, %v1499_v41  ;;  %v947_v47 = vadd.f32 %v3556_v0, %v946_v43  ;;  %v1171_v48 = vadd.f32 %v3556_v0, %v1170_v44  ;;  %v948_v49 = vpop.f32.mrb[45].mxu0  ;;  %v1172_v50 = vpop.f32.mrb[45].mxu1 }
 0x16e   :  { %v949_v51 = vpop.f32.mrb[46].mxu0  ;;  %v1173_v52 = vpop.f32.mrb[46].mxu1 }
 0x16f   :  { %v2617_v53 = vpack.c.bf16 %v1561_v45, %v1560_v42  ;;  %v2757_v54 = vpack.c.bf16 %v1617_v46, %v1616_v39  ;;  %v1326_v55 = vmax.f32 %v947_v47, 0.0  ;;  %v1382_v56 = vmax.f32 %v1171_v48, 0.0  ;;  %v951_v57 = vpop.f32.mrb[47].mxu0  ;;  %v1175_v58 = vpop.f32.mrb[47].mxu1 }
 0x170   :  { %v950_v59 = vadd.f32 %v3556_v0, %v949_v51  ;;  %v1174_v60 = vadd.f32 %v3556_v0, %v1173_v52 }
 0x171   :  { %2848 = vst [vmem:[%s4092_s5 + $0x50] sm:$0xff] %v2617_v53   ;;  %2876 = vst [vmem:[%s4092_s5 + $0x130] sm:$0xff] %v2757_v54   ;;  %v1500_v61 = vmul.f32 %v3566_v9, %v1382_v56  ;;  %v1444_v62 = vmul.f32 %v3566_v9, %v1326_v55 }
 0x172   :  { %v1327_v63 = vmax.f32 %v950_v59, 0.0  ;;  %v1383_v1 = vmax.f32 %v1174_v60, 0.0 }
 0x173   :  { %v1618_v2 = vadd.f32 %v3574_v19, %v1500_v61  ;;  %v1562_v12 = vadd.f32 %v3574_v19, %v1444_v62 }
 0x174   :  { %v1445_v3 = vmul.f32 %v3566_v9, %v1327_v63  ;;  %v1501_v4 = vmul.f32 %v3566_v9, %v1383_v1  ;;  %v954_v5 = vpop.f32.mrb[48].mxu0  ;;  %v1178_v6 = vpop.f32.mrb[48].mxu1 }
 0x175   :  { %v955_v7 = vadd.f32 %v3556_v0, %v954_v5  ;;  %v1179_v8 = vadd.f32 %v3556_v0, %v1178_v6  ;;  %v956_v10 = vpop.f32.mrb[49].mxu0  ;;  %v1180_v11 = vpop.f32.mrb[49].mxu1 }
 0x176   :  { %v1563_v13 = vadd.f32 %v3574_v19, %v1445_v3  ;;  %v1619_v14 = vadd.f32 %v3574_v19, %v1501_v4  ;;  %v957_v15 = vpop.f32.mrb[50].mxu0  ;;  %v1181_v16 = vpop.f32.mrb[50].mxu1 }
 0x177   :  { %v1328_v17 = vmax.f32 %v955_v7, 0.0  ;;  %v1384_v18 = vmax.f32 %v1179_v8, 0.0  ;;  %v958_v20 = vadd.f32 %v3556_v0, %v957_v15  ;;  %v1182_v21 = vadd.f32 %v3556_v0, %v1181_v16  ;;  %v959_v22 = vpop.f32.mrb[51].mxu0  ;;  %v1183_v23 = vpop.f32.mrb[51].mxu1 }
 0x178   :  { %v2622_v24 = vpack.c.bf16 %v1563_v13, %v1562_v12  ;;  %v2762_v25 = vpack.c.bf16 %v1619_v14, %v1618_v2 }
 0x179   :  { %v1446_v26 = vmul.f32 %v3566_v9, %v1328_v17  ;;  %v1502_v27 = vmul.f32 %v3566_v9, %v1384_v18  ;;  %v1329_v28 = vmax.f32 %v958_v20, 0.0  ;;  %v1385_v29 = vmax.f32 %v1182_v21, 0.0 }
 0x17a   :  { %2849 = vst [vmem:[%s4092_s5 + $0x58] sm:$0xff] %v2622_v24   ;;  %2877 = vst [vmem:[%s4092_s5 + $0x138] sm:$0xff] %v2762_v25  }
 0x17b   :  { %v1620_v30 = vadd.f32 %v3574_v19, %v1502_v27  ;;  %v1447_v31 = vmul.f32 %v3566_v9, %v1329_v28  ;;  %v1503_v32 = vmul.f32 %v3566_v9, %v1385_v29  ;;  %v1564_v33 = vadd.f32 %v3574_v19, %v1446_v26 }
 0x17c   :  { %v962_v34 = vpop.f32.mrb[52].mxu0  ;;  %v1186_v35 = vpop.f32.mrb[52].mxu1 }
 0x17d   :  { %v1565_v36 = vadd.f32 %v3574_v19, %v1447_v31  ;;  %v1621_v37 = vadd.f32 %v3574_v19, %v1503_v32  ;;  %v963_v38 = vadd.f32 %v3556_v0, %v962_v34  ;;  %v1187_v39 = vadd.f32 %v3556_v0, %v1186_v35  ;;  %v964_v40 = vpop.f32.mrb[53].mxu0  ;;  %v1188_v41 = vpop.f32.mrb[53].mxu1 }
 0x17e   :  { %v965_v42 = vpop.f32.mrb[54].mxu0  ;;  %v1189_v43 = vpop.f32.mrb[54].mxu1 }
 0x17f   :  { %v2627_v44 = vpack.c.bf16 %v1565_v36, %v1564_v33  ;;  %v2767_v45 = vpack.c.bf16 %v1621_v37, %v1620_v30  ;;  %v1330_v46 = vmax.f32 %v963_v38, 0.0  ;;  %v1386_v47 = vmax.f32 %v1187_v39, 0.0  ;;  %v967_v48 = vpop.f32.mrb[55].mxu0  ;;  %v1191_v49 = vpop.f32.mrb[55].mxu1 }
 0x180   :  { %v966_v50 = vadd.f32 %v3556_v0, %v965_v42  ;;  %v1190_v51 = vadd.f32 %v3556_v0, %v1189_v43 }
 0x181   :  { %2850 = vst [vmem:[%s4092_s5 + $0x60] sm:$0xff] %v2627_v44   ;;  %2878 = vst [vmem:[%s4092_s5 + $0x140] sm:$0xff] %v2767_v45   ;;  %v1504_v52 = vmul.f32 %v3566_v9, %v1386_v47  ;;  %v1448_v53 = vmul.f32 %v3566_v9, %v1330_v46 }
 0x182   :  { %v1331_v54 = vmax.f32 %v966_v50, 0.0  ;;  %v1387_v55 = vmax.f32 %v1190_v51, 0.0 }
 0x183   :  { %v1622_v56 = vadd.f32 %v3574_v19, %v1504_v52  ;;  %v1566_v2 = vadd.f32 %v3574_v19, %v1448_v53 }
 0x184   :  { %v1449_v57 = vmul.f32 %v3566_v9, %v1331_v54  ;;  %v1505_v58 = vmul.f32 %v3566_v9, %v1387_v55  ;;  %v970_v59 = vpop.f32.mrb[56].mxu0  ;;  %v1194_v60 = vpop.f32.mrb[56].mxu1 }
 0x185   :  { %v971_v61 = vadd.f32 %v3556_v0, %v970_v59  ;;  %v1195_v62 = vadd.f32 %v3556_v0, %v1194_v60  ;;  %v972_v63 = vpop.f32.mrb[57].mxu0  ;;  %v1196_v1 = vpop.f32.mrb[57].mxu1 }
 0x186   :  { %v1567_v3 = vadd.f32 %v3574_v19, %v1449_v57  ;;  %v1623_v4 = vadd.f32 %v3574_v19, %v1505_v58  ;;  %v973_v5 = vpop.f32.mrb[58].mxu0  ;;  %v1197_v6 = vpop.f32.mrb[58].mxu1 }
 0x187   :  { %v1332_v7 = vmax.f32 %v971_v61, 0.0  ;;  %v1388_v8 = vmax.f32 %v1195_v62, 0.0  ;;  %v974_v10 = vadd.f32 %v3556_v0, %v973_v5  ;;  %v1198_v11 = vadd.f32 %v3556_v0, %v1197_v6  ;;  %v975_v12 = vpop.f32.mrb[59].mxu0  ;;  %v1199_v13 = vpop.f32.mrb[59].mxu1 }
 0x188   :  { %v2632_v14 = vpack.c.bf16 %v1567_v3, %v1566_v2  ;;  %v2772_v15 = vpack.c.bf16 %v1623_v4, %v1622_v56 }
 0x189   :  { %v1450_v16 = vmul.f32 %v3566_v9, %v1332_v7  ;;  %v1506_v17 = vmul.f32 %v3566_v9, %v1388_v8  ;;  %v1333_v18 = vmax.f32 %v974_v10, 0.0  ;;  %v1389_v20 = vmax.f32 %v1198_v11, 0.0 }
 0x18a   :  { %2851 = vst [vmem:[%s4092_s5 + $0x68] sm:$0xff] %v2632_v14   ;;  %2879 = vst [vmem:[%s4092_s5 + $0x148] sm:$0xff] %v2772_v15  }
 0x18b   :  { %v1624_v21 = vadd.f32 %v3574_v19, %v1506_v17  ;;  %v1451_v22 = vmul.f32 %v3566_v9, %v1333_v18  ;;  %v1507_v23 = vmul.f32 %v3566_v9, %v1389_v20  ;;  %v1568_v24 = vadd.f32 %v3574_v19, %v1450_v16 }
 0x18c   :  { %v978_v25 = vpop.f32.mrb[60].mxu0  ;;  %v1202_v26 = vpop.f32.mrb[60].mxu1 }
 0x18d   :  { %v1569_v27 = vadd.f32 %v3574_v19, %v1451_v22  ;;  %v1625_v28 = vadd.f32 %v3574_v19, %v1507_v23  ;;  %v979_v29 = vadd.f32 %v3556_v0, %v978_v25  ;;  %v1203_v30 = vadd.f32 %v3556_v0, %v1202_v26  ;;  %v980_v31 = vpop.f32.mrb[61].mxu0  ;;  %v1204_v32 = vpop.f32.mrb[61].mxu1 }
 0x18e   :  { %v981_v33 = vpop.f32.mrb[62].mxu0  ;;  %v1205_v34 = vpop.f32.mrb[62].mxu1 }
 0x18f   :  { %v2637_v35 = vpack.c.bf16 %v1569_v27, %v1568_v24  ;;  %v2777_v36 = vpack.c.bf16 %v1625_v28, %v1624_v21  ;;  %v1334_v37 = vmax.f32 %v979_v29, 0.0  ;;  %v1390_v38 = vmax.f32 %v1203_v30, 0.0  ;;  %v983_v39 = vpop.f32.mrb[63].mxu0  ;;  %v1207_v40 = vpop.f32.mrb[63].mxu1 }
 0x190   :  { %v982_v41 = vadd.f32 %v3556_v0, %v981_v33  ;;  %v1206_v42 = vadd.f32 %v3556_v0, %v1205_v34 }
 0x191   :  { %2852 = vst [vmem:[%s4092_s5 + $0x70] sm:$0xff] %v2637_v35   ;;  %2880 = vst [vmem:[%s4092_s5 + $0x150] sm:$0xff] %v2777_v36   ;;  %v1508_v43 = vmul.f32 %v3566_v9, %v1390_v38  ;;  %v1452_v44 = vmul.f32 %v3566_v9, %v1334_v37 }
 0x192   :  { %v1335_v45 = vmax.f32 %v982_v41, 0.0  ;;  %v1391_v46 = vmax.f32 %v1206_v42, 0.0 }
 0x193   :  { %v1626_v47 = vadd.f32 %v3574_v19, %v1508_v43  ;;  %v1570_v56 = vadd.f32 %v3574_v19, %v1452_v44  ;;  %v3890_v44 = vld [vmem:[%s4089_s2] ss:$0 sm:$0xff] }
 0x194   :  { %v1453_v48 = vmul.f32 %v3566_v9, %v1335_v45  ;;  %v1509_v49 = vmul.f32 %v3566_v9, %v1391_v46  ;;  %v986_v50 = vpop.f32.mrb[64].mxu0  ;;  %v1210_v51 = vpop.f32.mrb[64].mxu1 }
 0x195   :  { %v987_v52 = vadd.f32 %v3556_v0, %v986_v50  ;;  %v1211_v53 = vadd.f32 %v3556_v0, %v1210_v51  ;;  %v988_v54 = vpop.f32.mrb[65].mxu0  ;;  %v1212_v55 = vpop.f32.mrb[65].mxu1 }
 0x196   :  { %v1571_v57 = vadd.f32 %v3574_v19, %v1453_v48  ;;  %v1627_v58 = vadd.f32 %v3574_v19, %v1509_v49  ;;  %v989_v59 = vpop.f32.mrb[66].mxu0  ;;  %v1213_v60 = vpop.f32.mrb[66].mxu1 }
 0x197   :  { %v1336_v61 = vmax.f32 %v987_v52, 0.0  ;;  %v1392_v62 = vmax.f32 %v1211_v53, 0.0  ;;  %v990_v63 = vadd.f32 %v3556_v0, %v989_v59  ;;  %v1214_v1 = vadd.f32 %v3556_v0, %v1213_v60  ;;  %v991_v2 = vpop.f32.mrb[67].mxu0  ;;  %v1215_v3 = vpop.f32.mrb[67].mxu1  ;;  %v3901_v59 = vld [vmem:[%s4090_s3] ss:$0 sm:$0xff] }
 0x198   :  { %v2642_v4 = vpack.c.bf16 %v1571_v57, %v1570_v56  ;;  %v2782_v5 = vpack.c.bf16 %v1627_v58, %v1626_v47 }
 0x199   :  { %v1454_v6 = vmul.f32 %v3566_v9, %v1336_v61  ;;  %v1510_v7 = vmul.f32 %v3566_v9, %v1392_v62  ;;  %v1337_v8 = vmax.f32 %v990_v63, 0.0  ;;  %v1393_v10 = vmax.f32 %v1214_v1, 0.0 }
 0x19a   :  { %2853 = vst [vmem:[%s4092_s5 + $0x78] sm:$0xff] %v2642_v4   ;;  %2881 = vst [vmem:[%s4092_s5 + $0x158] sm:$0xff] %v2782_v5   ;;  %v3917_v4 = vld [vmem:[%s4091_s4] ss:$0 sm:$0xff] }
 0x19b   :  { %v1628_v11 = vadd.f32 %v3574_v19, %v1510_v7  ;;  %v1455_v12 = vmul.f32 %v3566_v9, %v1337_v8  ;;  %v1511_v13 = vmul.f32 %v3566_v9, %v1393_v10  ;;  %v1572_v14 = vadd.f32 %v3574_v19, %v1454_v6 }
 0x19c   :  { %v994_v15 = vpop.f32.mrb[68].mxu0  ;;  %v1218_v16 = vpop.f32.mrb[68].mxu1 }
 0x19d   :  { %v1573_v17 = vadd.f32 %v3574_v19, %v1455_v12  ;;  %v1629_v18 = vadd.f32 %v3574_v19, %v1511_v13  ;;  %v995_v20 = vadd.f32 %v3556_v0, %v994_v15  ;;  %v1219_v21 = vadd.f32 %v3556_v0, %v1218_v16  ;;  %v996_v22 = vpop.f32.mrb[69].mxu0  ;;  %v1220_v23 = vpop.f32.mrb[69].mxu1 }
 0x19e   :  { %v997_v24 = vpop.f32.mrb[70].mxu0  ;;  %v1221_v25 = vpop.f32.mrb[70].mxu1 }
 0x19f   :  { %v2647_v26 = vpack.c.bf16 %v1573_v17, %v1572_v14  ;;  %v2787_v27 = vpack.c.bf16 %v1629_v18, %v1628_v11  ;;  %v1338_v28 = vmax.f32 %v995_v20, 0.0  ;;  %v1394_v29 = vmax.f32 %v1219_v21, 0.0  ;;  %v999_v30 = vpop.f32.mrb[71].mxu0  ;;  %v1223_v31 = vpop.f32.mrb[71].mxu1 }
 0x1a0   :  { %v998_v32 = vadd.f32 %v3556_v0, %v997_v24  ;;  %v1222_v33 = vadd.f32 %v3556_v0, %v1221_v25 }
 0x1a1   :  { %2854 = vst [vmem:[%s4092_s5 + $0x80] sm:$0xff] %v2647_v26   ;;  %2882 = vst [vmem:[%s4092_s5 + $0x160] sm:$0xff] %v2787_v27   ;;  %v1512_v34 = vmul.f32 %v3566_v9, %v1394_v29  ;;  %v1456_v35 = vmul.f32 %v3566_v9, %v1338_v28 }
 0x1a2   :  { %v1339_v36 = vmax.f32 %v998_v32, 0.0  ;;  %v1395_v37 = vmax.f32 %v1222_v33, 0.0 }
 0x1a3   :  { %v1630_v38 = vadd.f32 %v3574_v19, %v1512_v34  ;;  %v1574_v48 = vadd.f32 %v3574_v19, %v1456_v35 }
 0x1a4   :  { %v1457_v39 = vmul.f32 %v3566_v9, %v1339_v36  ;;  %v1513_v40 = vmul.f32 %v3566_v9, %v1395_v37  ;;  %v1002_v41 = vpop.f32.mrb[72].mxu0  ;;  %v1226_v42 = vpop.f32.mrb[72].mxu1 }
 0x1a5   :  { %v1003_v43 = vadd.f32 %v3556_v0, %v1002_v41  ;;  %v1227_v45 = vadd.f32 %v3890_v44, %v1226_v42  ;;  %v1004_v46 = vpop.f32.mrb[73].mxu0  ;;  %v1228_v47 = vpop.f32.mrb[73].mxu1 }
 0x1a6   :  { %v1575_v49 = vadd.f32 %v3574_v19, %v1457_v39  ;;  %v1631_v50 = vadd.f32 %v3574_v19, %v1513_v40  ;;  %v1005_v9 = vpop.f32.mrb[74].mxu0  ;;  %v1229_v51 = vpop.f32.mrb[74].mxu1 }
 0x1a7   :  { %v1340_v52 = vmax.f32 %v1003_v43, 0.0  ;;  %v1396_v53 = vmax.f32 %v1227_v45, 0.0  ;;  %v1006_v0 = vadd.f32 %v3890_v44, %v1005_v9  ;;  %v1230_v54 = vadd.f32 %v3890_v44, %v1229_v51  ;;  %v1007_v55 = vpop.f32.mrb[75].mxu0  ;;  %v1231_v56 = vpop.f32.mrb[75].mxu1 }
 0x1a8   :  { %v2652_v57 = vpack.c.bf16 %v1575_v49, %v1574_v48  ;;  %v2792_v58 = vpack.c.bf16 %v1631_v50, %v1630_v38 }
 0x1a9   :  { %v1458_v60 = vmul.f32 %v3901_v59, %v1340_v52  ;;  %v1514_v61 = vmul.f32 %v3901_v59, %v1396_v53  ;;  %v1341_v62 = vmax.f32 %v1006_v0, 0.0  ;;  %v1397_v63 = vmax.f32 %v1230_v54, 0.0 }
 0x1aa   :  { %2855 = vst [vmem:[%s4092_s5 + $0x88] sm:$0xff] %v2652_v57   ;;  %2883 = vst [vmem:[%s4092_s5 + $0x168] sm:$0xff] %v2792_v58  }
 0x1ab   :  { %v1632_v1 = vadd.f32 %v3574_v19, %v1514_v61  ;;  %v1459_v2 = vmul.f32 %v3901_v59, %v1341_v62  ;;  %v1515_v3 = vmul.f32 %v3901_v59, %v1397_v63  ;;  %v1576_v5 = vadd.f32 %v3917_v4, %v1458_v60 }
 0x1ac   :  { %v1010_v6 = vpop.f32.mrb[76].mxu0  ;;  %v1234_v7 = vpop.f32.mrb[76].mxu1 }
 0x1ad   :  { %v1577_v8 = vadd.f32 %v3917_v4, %v1459_v2  ;;  %v1633_v10 = vadd.f32 %v3917_v4, %v1515_v3  ;;  %v1011_v11 = vadd.f32 %v3890_v44, %v1010_v6  ;;  %v1235_v19 = vadd.f32 %v3890_v44, %v1234_v7  ;;  %v1012_v12 = vpop.f32.mrb[77].mxu0  ;;  %v1236_v13 = vpop.f32.mrb[77].mxu1 }
 0x1ae   :  { %v1013_v14 = vpop.f32.mrb[78].mxu0  ;;  %v1237_v15 = vpop.f32.mrb[78].mxu1 }
 0x1af   :  { %v2657_v16 = vpack.c.bf16 %v1577_v8, %v1576_v5  ;;  %v2797_v17 = vpack.c.bf16 %v1633_v10, %v1632_v1  ;;  %v1342_v18 = vmax.f32 %v1011_v11, 0.0  ;;  %v1398_v20 = vmax.f32 %v1235_v19, 0.0  ;;  %v1015_v21 = vpop.f32.mrb[79].mxu0  ;;  %v1239_v22 = vpop.f32.mrb[79].mxu1 }
 0x1b0   :  { %v1014_v23 = vadd.f32 %v3890_v44, %v1013_v14  ;;  %v1238_v24 = vadd.f32 %v3890_v44, %v1237_v15 }
 0x1b1   :  { %2856 = vst [vmem:[%s4092_s5 + $0x90] sm:$0xff] %v2657_v16   ;;  %2884 = vst [vmem:[%s4092_s5 + $0x170] sm:$0xff] %v2797_v17   ;;  %v1516_v25 = vmul.f32 %v3901_v59, %v1398_v20  ;;  %v1460_v26 = vmul.f32 %v3901_v59, %v1342_v18 }
 0x1b2   :  { %v1343_v27 = vmax.f32 %v1014_v23, 0.0  ;;  %v1399_v28 = vmax.f32 %v1238_v24, 0.0 }
 0x1b3   :  { %v1634_v29 = vadd.f32 %v3917_v4, %v1516_v25  ;;  %v1578_v38 = vadd.f32 %v3917_v4, %v1460_v26 }
 0x1b4   :  { %v1461_v30 = vmul.f32 %v3901_v59, %v1343_v27  ;;  %v1517_v31 = vmul.f32 %v3901_v59, %v1399_v28  ;;  %v1018_v32 = vpop.f32.mrb[80].mxu0  ;;  %v1242_v33 = vpop.f32.mrb[80].mxu1 }
 0x1b5   :  { %v1019_v34 = vadd.f32 %v3890_v44, %v1018_v32  ;;  %v1243_v35 = vadd.f32 %v3890_v44, %v1242_v33  ;;  %v1020_v36 = vpop.f32.mrb[81].mxu0  ;;  %v1244_v37 = vpop.f32.mrb[81].mxu1 }
 0x1b6   :  { %v1579_v39 = vadd.f32 %v3917_v4, %v1461_v30  ;;  %v1635_v40 = vadd.f32 %v3917_v4, %v1517_v31  ;;  %v1021_v41 = vpop.f32.mrb[82].mxu0  ;;  %v1245_v42 = vpop.f32.mrb[82].mxu1 }
 0x1b7   :  { %v1344_v43 = vmax.f32 %v1019_v34, 0.0  ;;  %v1400_v45 = vmax.f32 %v1243_v35, 0.0  ;;  %v1022_v46 = vadd.f32 %v3890_v44, %v1021_v41  ;;  %v1246_v47 = vadd.f32 %v3890_v44, %v1245_v42  ;;  %v1023_v48 = vpop.f32.mrb[83].mxu0  ;;  %v1247_v49 = vpop.f32.mrb[83].mxu1 }
 0x1b8   :  { %v2662_v50 = vpack.c.bf16 %v1579_v39, %v1578_v38  ;;  %v2802_v9 = vpack.c.bf16 %v1635_v40, %v1634_v29 }
 0x1b9   :  { %v1462_v51 = vmul.f32 %v3901_v59, %v1344_v43  ;;  %v1518_v52 = vmul.f32 %v3901_v59, %v1400_v45  ;;  %v1345_v53 = vmax.f32 %v1022_v46, 0.0  ;;  %v1401_v0 = vmax.f32 %v1246_v47, 0.0 }
 0x1ba   :  { %2857 = vst [vmem:[%s4092_s5 + $0x98] sm:$0xff] %v2662_v50   ;;  %2885 = vst [vmem:[%s4092_s5 + $0x178] sm:$0xff] %v2802_v9  }
 0x1bb   :  { %v1636_v54 = vadd.f32 %v3917_v4, %v1518_v52  ;;  %v1463_v55 = vmul.f32 %v3901_v59, %v1345_v53  ;;  %v1519_v56 = vmul.f32 %v3901_v59, %v1401_v0  ;;  %v1580_v57 = vadd.f32 %v3917_v4, %v1462_v51 }
 0x1bc   :  { %v1026_v58 = vpop.f32.mrb[84].mxu0  ;;  %v1250_v60 = vpop.f32.mrb[84].mxu1 }
 0x1bd   :  { %v1581_v61 = vadd.f32 %v3917_v4, %v1463_v55  ;;  %v1637_v62 = vadd.f32 %v3917_v4, %v1519_v56  ;;  %v1027_v63 = vadd.f32 %v3890_v44, %v1026_v58  ;;  %v1251_v1 = vadd.f32 %v3890_v44, %v1250_v60  ;;  %v1028_v2 = vpop.f32.mrb[85].mxu0  ;;  %v1252_v3 = vpop.f32.mrb[85].mxu1 }
 0x1be   :  { %v1029_v5 = vpop.f32.mrb[86].mxu0  ;;  %v1253_v6 = vpop.f32.mrb[86].mxu1 }
 0x1bf   :  { %v2667_v7 = vpack.c.bf16 %v1581_v61, %v1580_v57  ;;  %v2807_v8 = vpack.c.bf16 %v1637_v62, %v1636_v54  ;;  %v1346_v10 = vmax.f32 %v1027_v63, 0.0  ;;  %v1402_v11 = vmax.f32 %v1251_v1, 0.0  ;;  %v1031_v19 = vpop.f32.mrb[87].mxu0  ;;  %v1255_v12 = vpop.f32.mrb[87].mxu1 }
 0x1c0   :  { %v1030_v13 = vadd.f32 %v3890_v44, %v1029_v5  ;;  %v1254_v14 = vadd.f32 %v3890_v44, %v1253_v6 }
 0x1c1   :  { %2858 = vst [vmem:[%s4092_s5 + $0xa0] sm:$0xff] %v2667_v7   ;;  %2886 = vst [vmem:[%s4092_s5 + $0x180] sm:$0xff] %v2807_v8   ;;  %v1520_v15 = vmul.f32 %v3901_v59, %v1402_v11  ;;  %v1464_v16 = vmul.f32 %v3901_v59, %v1346_v10 }
 0x1c2   :  { %v1347_v17 = vmax.f32 %v1030_v13, 0.0  ;;  %v1403_v18 = vmax.f32 %v1254_v14, 0.0 }
 0x1c3   :  { %v1638_v20 = vadd.f32 %v3917_v4, %v1520_v15  ;;  %v1582_v29 = vadd.f32 %v3917_v4, %v1464_v16 }
 0x1c4   :  { %v1465_v21 = vmul.f32 %v3901_v59, %v1347_v17  ;;  %v1521_v22 = vmul.f32 %v3901_v59, %v1403_v18  ;;  %v1034_v23 = vpop.f32.mrb[88].mxu0  ;;  %v1258_v24 = vpop.f32.mrb[88].mxu1 }
 0x1c5   :  { %v1035_v25 = vadd.f32 %v3890_v44, %v1034_v23  ;;  %v1259_v26 = vadd.f32 %v3890_v44, %v1258_v24  ;;  %v1036_v27 = vpop.f32.mrb[89].mxu0  ;;  %v1260_v28 = vpop.f32.mrb[89].mxu1 }
 0x1c6   :  { %v1583_v30 = vadd.f32 %v3917_v4, %v1465_v21  ;;  %v1639_v31 = vadd.f32 %v3917_v4, %v1521_v22  ;;  %v1037_v32 = vpop.f32.mrb[90].mxu0  ;;  %v1261_v33 = vpop.f32.mrb[90].mxu1 }
 0x1c7   :  { %v1348_v34 = vmax.f32 %v1035_v25, 0.0  ;;  %v1404_v35 = vmax.f32 %v1259_v26, 0.0  ;;  %v1038_v36 = vadd.f32 %v3890_v44, %v1037_v32  ;;  %v1262_v37 = vadd.f32 %v3890_v44, %v1261_v33  ;;  %v1039_v38 = vpop.f32.mrb[91].mxu0  ;;  %v1263_v39 = vpop.f32.mrb[91].mxu1 }
 0x1c8   :  { %v2672_v40 = vpack.c.bf16 %v1583_v30, %v1582_v29  ;;  %v2812_v41 = vpack.c.bf16 %v1639_v31, %v1638_v20 }
 0x1c9   :  { %v1466_v42 = vmul.f32 %v3901_v59, %v1348_v34  ;;  %v1522_v43 = vmul.f32 %v3901_v59, %v1404_v35  ;;  %v1349_v45 = vmax.f32 %v1038_v36, 0.0  ;;  %v1405_v46 = vmax.f32 %v1262_v37, 0.0 }
 0x1ca   :  { %2859 = vst [vmem:[%s4092_s5 + $0xa8] sm:$0xff] %v2672_v40   ;;  %2887 = vst [vmem:[%s4092_s5 + $0x188] sm:$0xff] %v2812_v41  }
 0x1cb   :  { %v1640_v47 = vadd.f32 %v3917_v4, %v1522_v43  ;;  %v1467_v48 = vmul.f32 %v3901_v59, %v1349_v45  ;;  %v1523_v49 = vmul.f32 %v3901_v59, %v1405_v46  ;;  %v1584_v50 = vadd.f32 %v3917_v4, %v1466_v42 }
 0x1cc   :  { %v1042_v9 = vpop.f32.mrb[92].mxu0  ;;  %v1266_v51 = vpop.f32.mrb[92].mxu1 }
 0x1cd   :  { %v1585_v52 = vadd.f32 %v3917_v4, %v1467_v48  ;;  %v1641_v53 = vadd.f32 %v3917_v4, %v1523_v49  ;;  %v1043_v0 = vadd.f32 %v3890_v44, %v1042_v9  ;;  %v1267_v54 = vadd.f32 %v3890_v44, %v1266_v51  ;;  %v1044_v55 = vpop.f32.mrb[93].mxu0  ;;  %v1268_v56 = vpop.f32.mrb[93].mxu1 }
 0x1ce   :  { %v1045_v57 = vpop.f32.mrb[94].mxu0  ;;  %v1269_v58 = vpop.f32.mrb[94].mxu1 }
 0x1cf   :  { %v2677_v60 = vpack.c.bf16 %v1585_v52, %v1584_v50  ;;  %v2817_v61 = vpack.c.bf16 %v1641_v53, %v1640_v47  ;;  %v1350_v62 = vmax.f32 %v1043_v0, 0.0  ;;  %v1406_v63 = vmax.f32 %v1267_v54, 0.0  ;;  %v1047_v1 = vpop.f32.mrb[95].mxu0  ;;  %v1271_v2 = vpop.f32.mrb[95].mxu1 }
 0x1d0   :  { %v1046_v3 = vadd.f32 %v3890_v44, %v1045_v57  ;;  %v1270_v5 = vadd.f32 %v3890_v44, %v1269_v58 }
 0x1d1   :  { %2860 = vst [vmem:[%s4092_s5 + $0xb0] sm:$0xff] %v2677_v60   ;;  %2888 = vst [vmem:[%s4092_s5 + $0x190] sm:$0xff] %v2817_v61   ;;  %v1524_v6 = vmul.f32 %v3901_v59, %v1406_v63  ;;  %v1468_v7 = vmul.f32 %v3901_v59, %v1350_v62 }
 0x1d2   :  { %v1351_v8 = vmax.f32 %v1046_v3, 0.0  ;;  %v1407_v10 = vmax.f32 %v1270_v5, 0.0 }
 0x1d3   :  { %v1642_v11 = vadd.f32 %v3917_v4, %v1524_v6  ;;  %v1586_v20 = vadd.f32 %v3917_v4, %v1468_v7 }
 0x1d4   :  { %v1469_v19 = vmul.f32 %v3901_v59, %v1351_v8  ;;  %v1525_v12 = vmul.f32 %v3901_v59, %v1407_v10  ;;  %v1050_v13 = vpop.f32.mrb[96].mxu0  ;;  %v1274_v14 = vpop.f32.mrb[96].mxu1 }
 0x1d5   :  { %v1051_v15 = vadd.f32 %v3890_v44, %v1050_v13  ;;  %v1275_v16 = vadd.f32 %v3890_v44, %v1274_v14  ;;  %v1052_v17 = vpop.f32.mrb[97].mxu0  ;;  %v1276_v18 = vpop.f32.mrb[97].mxu1 }
 0x1d6   :  { %v1587_v21 = vadd.f32 %v3917_v4, %v1469_v19  ;;  %v1643_v22 = vadd.f32 %v3917_v4, %v1525_v12  ;;  %v1053_v23 = vpop.f32.mrb[98].mxu0  ;;  %v1277_v24 = vpop.f32.mrb[98].mxu1 }
 0x1d7   :  { %v1352_v25 = vmax.f32 %v1051_v15, 0.0  ;;  %v1408_v26 = vmax.f32 %v1275_v16, 0.0  ;;  %v1054_v27 = vadd.f32 %v3890_v44, %v1053_v23  ;;  %v1278_v28 = vadd.f32 %v3890_v44, %v1277_v24  ;;  %v1055_v29 = vpop.f32.mrb[99].mxu0  ;;  %v1279_v30 = vpop.f32.mrb[99].mxu1 }
 0x1d8   :  { %v2682_v31 = vpack.c.bf16 %v1587_v21, %v1586_v20  ;;  %v2822_v32 = vpack.c.bf16 %v1643_v22, %v1642_v11 }
 0x1d9   :  { %v1470_v33 = vmul.f32 %v3901_v59, %v1352_v25  ;;  %v1526_v34 = vmul.f32 %v3901_v59, %v1408_v26  ;;  %v1353_v35 = vmax.f32 %v1054_v27, 0.0  ;;  %v1409_v36 = vmax.f32 %v1278_v28, 0.0 }
 0x1da   :  { %2861 = vst [vmem:[%s4092_s5 + $0xb8] sm:$0xff] %v2682_v31   ;;  %2889 = vst [vmem:[%s4092_s5 + $0x198] sm:$0xff] %v2822_v32  }
 0x1db   :  { %v1644_v37 = vadd.f32 %v3917_v4, %v1526_v34  ;;  %v1471_v38 = vmul.f32 %v3901_v59, %v1353_v35  ;;  %v1527_v39 = vmul.f32 %v3901_v59, %v1409_v36  ;;  %v1588_v40 = vadd.f32 %v3917_v4, %v1470_v33 }
 0x1dc   :  { %v1058_v41 = vpop.f32.mrb[100].mxu0  ;;  %v1282_v42 = vpop.f32.mrb[100].mxu1 }
 0x1dd   :  { %v1589_v43 = vadd.f32 %v3917_v4, %v1471_v38  ;;  %v1645_v45 = vadd.f32 %v3917_v4, %v1527_v39  ;;  %v1059_v46 = vadd.f32 %v3890_v44, %v1058_v41  ;;  %v1283_v47 = vadd.f32 %v3890_v44, %v1282_v42  ;;  %v1060_v48 = vpop.f32.mrb[101].mxu0  ;;  %v1284_v49 = vpop.f32.mrb[101].mxu1 }
 0x1de   :  { %v1061_v50 = vpop.f32.mrb[102].mxu0  ;;  %v1285_v9 = vpop.f32.mrb[102].mxu1 }
 0x1df   :  { %v2687_v51 = vpack.c.bf16 %v1589_v43, %v1588_v40  ;;  %v2827_v52 = vpack.c.bf16 %v1645_v45, %v1644_v37  ;;  %v1354_v53 = vmax.f32 %v1059_v46, 0.0  ;;  %v1410_v0 = vmax.f32 %v1283_v47, 0.0  ;;  %v1063_v54 = vpop.f32.mrb[103].mxu0  ;;  %v1287_v55 = vpop.f32.mrb[103].mxu1 }
 0x1e0   :  { %v1062_v56 = vadd.f32 %v3890_v44, %v1061_v50  ;;  %v1286_v57 = vadd.f32 %v3890_v44, %v1285_v9 }
 0x1e1   :  { %2862 = vst [vmem:[%s4092_s5 + $0xc0] sm:$0xff] %v2687_v51   ;;  %2890 = vst [vmem:[%s4092_s5 + $0x1a0] sm:$0xff] %v2827_v52   ;;  %v1528_v58 = vmul.f32 %v3901_v59, %v1410_v0  ;;  %v1472_v60 = vmul.f32 %v3901_v59, %v1354_v53 }
 0x1e2   :  { %v1355_v61 = vmax.f32 %v1062_v56, 0.0  ;;  %v1411_v62 = vmax.f32 %v1286_v57, 0.0 }
 0x1e3   :  { %v1646_v63 = vadd.f32 %v3917_v4, %v1528_v58  ;;  %v1590_v11 = vadd.f32 %v3917_v4, %v1472_v60 }
 0x1e4   :  { %v1473_v1 = vmul.f32 %v3901_v59, %v1355_v61  ;;  %v1529_v2 = vmul.f32 %v3901_v59, %v1411_v62  ;;  %v1066_v3 = vpop.f32.mrb[104].mxu0  ;;  %v1290_v5 = vpop.f32.mrb[104].mxu1 }
 0x1e5   :  { %v1067_v6 = vadd.f32 %v3890_v44, %v1066_v3  ;;  %v1291_v7 = vadd.f32 %v3890_v44, %v1290_v5  ;;  %v1068_v8 = vpop.f32.mrb[105].mxu0  ;;  %v1292_v10 = vpop.f32.mrb[105].mxu1 }
 0x1e6   :  { %v1591_v19 = vadd.f32 %v3917_v4, %v1473_v1  ;;  %v1647_v12 = vadd.f32 %v3917_v4, %v1529_v2  ;;  %v1069_v13 = vpop.f32.mrb[106].mxu0  ;;  %v1293_v14 = vpop.f32.mrb[106].mxu1 }
 0x1e7   :  { %v1356_v15 = vmax.f32 %v1067_v6, 0.0  ;;  %v1412_v16 = vmax.f32 %v1291_v7, 0.0  ;;  %v1070_v17 = vadd.f32 %v3890_v44, %v1069_v13  ;;  %v1294_v18 = vadd.f32 %v3890_v44, %v1293_v14  ;;  %v1071_v20 = vpop.f32.mrb[107].mxu0  ;;  %v1295_v21 = vpop.f32.mrb[107].mxu1 }
 0x1e8   :  { %v2692_v22 = vpack.c.bf16 %v1591_v19, %v1590_v11  ;;  %v2832_v23 = vpack.c.bf16 %v1647_v12, %v1646_v63 }
 0x1e9   :  { %v1474_v24 = vmul.f32 %v3901_v59, %v1356_v15  ;;  %v1530_v25 = vmul.f32 %v3901_v59, %v1412_v16  ;;  %v1357_v26 = vmax.f32 %v1070_v17, 0.0  ;;  %v1413_v27 = vmax.f32 %v1294_v18, 0.0 }
 0x1ea   :  { %2863 = vst [vmem:[%s4092_s5 + $0xc8] sm:$0xff] %v2692_v22   ;;  %2891 = vst [vmem:[%s4092_s5 + $0x1a8] sm:$0xff] %v2832_v23  }
 0x1eb   :  { %v1648_v28 = vadd.f32 %v3917_v4, %v1530_v25  ;;  %v1475_v29 = vmul.f32 %v3901_v59, %v1357_v26  ;;  %v1531_v30 = vmul.f32 %v3901_v59, %v1413_v27  ;;  %v1592_v31 = vadd.f32 %v3917_v4, %v1474_v24 }
 0x1ec   :  { %v1074_v32 = vpop.f32.mrb[108].mxu0  ;;  %v1298_v33 = vpop.f32.mrb[108].mxu1 }
 0x1ed   :  { %v1593_v34 = vadd.f32 %v3917_v4, %v1475_v29  ;;  %v1649_v35 = vadd.f32 %v3917_v4, %v1531_v30  ;;  %v1075_v36 = vadd.f32 %v3890_v44, %v1074_v32  ;;  %v1299_v37 = vadd.f32 %v3890_v44, %v1298_v33  ;;  %v1076_v38 = vpop.f32.mrb[109].mxu0  ;;  %v1300_v39 = vpop.f32.mrb[109].mxu1 }
 0x1ee   :  { %v1077_v40 = vpop.f32.mrb[110].mxu0  ;;  %v1301_v41 = vpop.f32.mrb[110].mxu1 }
 0x1ef   :  { %v2697_v42 = vpack.c.bf16 %v1593_v34, %v1592_v31  ;;  %v2837_v43 = vpack.c.bf16 %v1649_v35, %v1648_v28  ;;  %v1358_v45 = vmax.f32 %v1075_v36, 0.0  ;;  %v1414_v46 = vmax.f32 %v1299_v37, 0.0  ;;  %v1079_v47 = vpop.f32.mrb[111].mxu0  ;;  %v1302_v48 = vpop.f32.mrb[111].mxu1 }
 0x1f0   :  { %v1078_v49 = vadd.f32 %v3890_v44, %v1077_v40 }
 0x1f1   :  { %2864 = vst [vmem:[%s4092_s5 + $0xd0] sm:$0xff] %v2697_v42   ;;  %2892 = vst [vmem:[%s4092_s5 + $0x1b0] sm:$0xff] %v2837_v43   ;;  %v1532_v50 = vmul.f32 %v3901_v59, %v1414_v46  ;;  %v1476_v9 = vmul.f32 %v3901_v59, %v1358_v45 }
 0x1f2   :  { %v1359_v51 = vmax.f32 %v1078_v49, 0.0 }
 0x1f3   :  { %v1650_v52 = vadd.f32 %v3917_v4, %v1532_v50  ;;  %v1594_v44 = vadd.f32 %v3917_v4, %v1476_v9 }
 0x1f4   :  { %v1477_v53 = vmul.f32 %v3901_v59, %v1359_v51 }
 0x1f5   :  { %v2563_v0 = vpack.c.bf16 %v1650_v52, %v1650_v52 }
 0x1f6   :  { %v1595_v54 = vadd.f32 %v3917_v4, %v1477_v53 }
 0x1f7   :  { %2206 = vst [vmem:[%s4092_s5 + $0x1b8] sm:$0x1] %v2563_v0 }
 0x1f8   :  { %v2702_v55 = vpack.c.bf16 %v1595_v54, %v1594_v44 }
 0x1fa   :  { %2865 = vst [vmem:[%s4092_s5 + $0xd8] sm:$0xff] %v2702_v55  }

// kernel: forward.5
= control target key start
LH: loop header
LB: loop body
LE: loop exit
PB: predicated region body
PF: predicated region fallthrough
CT: control target
= control target key end

     0   :  { %s6347_s1 = inlined_call_operand.vmem [shape: bf16[2048,128], index: 1, kind: input, shape index: {}]   ;;  %s6348_s0 = inlined_call_operand.vmem [shape: bf16[200,2048], index: 0, kind: input, shape index: {}]   ;;  %s6349_s2 = inlined_call_operand.vmem [shape: f32[1,128], index: 2, kind: input, shape index: {}]   ;;  %s6350_s3 = inlined_call_operand.vmem [shape: f32[1,128], index: 3, kind: input, shape index: {}]   ;;  %s6351_s4 = inlined_call_operand.vmem [shape: f32[1,128], index: 4, kind: input, shape index: {}]   ;;  %s6352_s5 = inlined_call_operand.vmem [shape: bf16[200,128], index: 5, kind: output, shape index: {}]  }
   0x1   :  { %v4787_v0 = vld [vmem:[%s6347_s1 + $0x40] sm:$0xff]   ;;  %v4791_v4 = vld [vmem:[%s6347_s1 + $0x48] sm:$0xff]   ;;  %v4795_v8 = vld [vmem:[%s6347_s1 + $0x50] sm:$0xff]  }
   0x2   :  { %v4788_v1 = vld [vmem:[%s6347_s1 + $0xc0] sm:$0xff]   ;;  %4035 = vmatprep.subr.bf16.mxu0 %v4787_v0  ;;  %v4792_v5 = vld [vmem:[%s6347_s1 + $0xc8] sm:$0xff]   ;;  %v4796_v9 = vld [vmem:[%s6347_s1 + $0xd0] sm:$0xff]  }
   0x3   :  { %v4789_v2 = vld [vmem:[%s6347_s1] sm:$0xff]   ;;  %4129 = vmatprep.subr.bf16.mxu1 %v4788_v1  ;;  %v4793_v6 = vld [vmem:[%s6347_s1 + $0x8] sm:$0xff]   ;;  %v4797_v10 = vld [vmem:[%s6347_s1 + $0x10] sm:$0xff]  }
   0x4   :  { %v4790_v3 = vld [vmem:[%s6347_s1 + $0x80] sm:$0xff]   ;;  %4036 = vmatpush3.bf16.msra.mxu0 %v4789_v2  ;;  %v4794_v7 = vld [vmem:[%s6347_s1 + $0x88] sm:$0xff]   ;;  %v4798_v11 = vld [vmem:[%s6347_s1 + $0x90] sm:$0xff]  }
   0x5   :  { %4130 = vmatpush3.bf16.msra.mxu1 %v4790_v3  ;;  %4037 = vmatprep.subr.bf16.mxu0 %v4791_v4  ;;  %v4799_v12 = vld [vmem:[%s6347_s1 + $0x58] sm:$0xff]   ;;  %v4803_v16 = vld [vmem:[%s6347_s1 + $0x60] sm:$0xff]   ;;  %v4807_v20 = vld [vmem:[%s6347_s1 + $0x68] sm:$0xff]  }
   0x6   :  { %4131 = vmatprep.subr.bf16.mxu1 %v4792_v5  ;;  %v4800_v13 = vld [vmem:[%s6347_s1 + $0xd8] sm:$0xff]   ;;  %v4804_v17 = vld [vmem:[%s6347_s1 + $0xe0] sm:$0xff]   ;;  %v4808_v21 = vld [vmem:[%s6347_s1 + $0xe8] sm:$0xff]  }
   0x7   :  { %v4801_v14 = vld [vmem:[%s6347_s1 + $0x18] sm:$0xff]   ;;  %v4805_v18 = vld [vmem:[%s6347_s1 + $0x20] sm:$0xff]   ;;  %v4809_v22 = vld [vmem:[%s6347_s1 + $0x28] sm:$0xff]  }
   0x8   :  { %4038 = vmatpush3.bf16.msra.mxu0 %v4793_v6  ;;  %v4802_v15 = vld [vmem:[%s6347_s1 + $0x98] sm:$0xff]   ;;  %v4806_v19 = vld [vmem:[%s6347_s1 + $0xa0] sm:$0xff]   ;;  %v4810_v23 = vld [vmem:[%s6347_s1 + $0xa8] sm:$0xff]  }
   0x9   :  { %4132 = vmatpush3.bf16.msra.mxu1 %v4794_v7  ;;  %4039 = vmatprep.subr.bf16.mxu0 %v4795_v8  ;;  %v4811_v24 = vld [vmem:[%s6347_s1 + $0x70] sm:$0xff]   ;;  %v4815_v28 = vld [vmem:[%s6347_s1 + $0x78] sm:$0xff]   ;;  %v21_v32 = vld [vmem:[%s6348_s0] sm:$0xff] }
   0xa   :  { %4133 = vmatprep.subr.bf16.mxu1 %v4796_v9  ;;  %v4812_v25 = vld [vmem:[%s6347_s1 + $0xf0] sm:$0xff]   ;;  %v4816_v29 = vld [vmem:[%s6347_s1 + $0xf8] sm:$0xff]   ;;  %v29_v33 = vld [vmem:[%s6348_s0 + $0x40] sm:$0xff] }
   0xb   :  { %v4813_v26 = vld [vmem:[%s6347_s1 + $0x30] sm:$0xff]   ;;  %v4817_v30 = vld [vmem:[%s6347_s1 + $0x38] sm:$0xff]   ;;  %v22_v34 = vld [vmem:[%s6348_s0 + $0x8] sm:$0xff]  ;;  %v3576_v35 = vcombine.low %v21_v32, %v29_v33  ;;  %v3577_v36 = vcombine.high %v21_v32, %v29_v33 }
   0xc   :  { %4040 = vmatpush3.bf16.msra.mxu0 %v4797_v10  ;;  %v4814_v27 = vld [vmem:[%s6347_s1 + $0xb0] sm:$0xff]   ;;  %v4818_v31 = vld [vmem:[%s6347_s1 + $0xb8] sm:$0xff]   ;;  %v30_v37 = vld [vmem:[%s6348_s0 + $0x48] sm:$0xff] }
   0xd   :  { %4134 = vmatpush3.bf16.msra.mxu1 %v4798_v11  ;;  %4041 = vmatprep.subr.bf16.mxu0 %v4799_v12  ;;  %v3578_v38 = vcombine.low %v22_v34, %v30_v37  ;;  %v3579_v39 = vcombine.high %v22_v34, %v30_v37  ;;  %v4819_v40 = vld [vmem:[%s6347_s1 + $0x140] sm:$0xff]   ;;  %v38_v47 = vld [vmem:[%s6348_s0 + $0x88] sm:$0xff]  ;;  %v4827_v2 = vld [vmem:[%s6347_s1 + $0x150] sm:$0xff]  }
   0xe   :  { %4135 = vmatprep.subr.bf16.mxu1 %v4800_v13  ;;  %2300 = vmatprep.mubr.bf16.mxu0 %v3577_v36  ;;  %v4820_v41 = vld [vmem:[%s6347_s1 + $0x100] sm:$0xff]   ;;  %v46_v48 = vld [vmem:[%s6348_s0 + $0xc8] sm:$0xff]  ;;  %v4828_v3 = vld [vmem:[%s6347_s1 + $0x110] sm:$0xff]  }
   0xf   :  { %2436 = vmatprep.mubr.bf16.mxu1 %v3579_v39  ;;  %v4821_v42 = vld [vmem:[%s6347_s1 + $0x1c0] sm:$0xff]   ;;  %v3595_v49 = vcombine.high %v38_v47, %v46_v48  ;;  %v4823_v50 = vld [vmem:[%s6347_s1 + $0x148] sm:$0xff]   ;;  %v3594_v54 = vcombine.low %v38_v47, %v46_v48  ;;  %v4829_v5 = vld [vmem:[%s6347_s1 + $0x1d0] sm:$0xff]  }
  0x10   :  { %4042 = vmatpush3.bf16.msra.mxu0 %v4801_v14  ;;  %v4822_v43 = vld [vmem:[%s6347_s1 + $0x180] sm:$0xff]   ;;  %v4824_v52 = vld [vmem:[%s6347_s1 + $0x108] sm:$0xff]   ;;  %v4830_v8 = vld [vmem:[%s6347_s1 + $0x190] sm:$0xff]  }
  0x11   :  { %4136 = vmatpush3.bf16.msra.mxu1 %v4802_v15  ;;  %4043 = vmatprep.subr.bf16.mxu0 %v4803_v16  ;;  %v37_v44 = vld [vmem:[%s6348_s0 + $0x80] sm:$0xff]  ;;  %v54_v56 = vld [vmem:[%s6348_s0 + $0x108] sm:$0xff]  ;;  %v4831_v12 = vld [vmem:[%s6347_s1 + $0x158] sm:$0xff]  }
  0x12   :  { %4137 = vmatprep.subr.bf16.mxu1 %v4804_v17  ;;  %v45_v45 = vld [vmem:[%s6348_s0 + $0xc0] sm:$0xff]  ;;  %v62_v57 = vld [vmem:[%s6348_s0 + $0x148] sm:$0xff]  ;;  %v4832_v15 = vld [vmem:[%s6347_s1 + $0x118] sm:$0xff]  }
  0x13   :  { %v3593_v46 = vcombine.high %v37_v44, %v45_v45  ;;  %v3592_v51 = vcombine.low %v37_v44, %v45_v45  ;;  %v53_v53 = vld [vmem:[%s6348_s0 + $0x100] sm:$0xff]  ;;  %v3611_v59 = vcombine.high %v54_v56, %v62_v57  ;;  %v4825_v60 = vld [vmem:[%s6347_s1 + $0x1c8] sm:$0xff]   ;;  %v3610_v6 = vcombine.low %v54_v56, %v62_v57  ;;  %v4833_v16 = vld [vmem:[%s6347_s1 + $0x1d8] sm:$0xff]  }
  0x14   :  { %4044 = vmatpush3.bf16.msra.mxu0 %v4805_v18  ;;  %v61_v55 = vld [vmem:[%s6348_s0 + $0x140] sm:$0xff]  ;;  %v4826_v61 = vld [vmem:[%s6347_s1 + $0x188] sm:$0xff]   ;;  %v4834_v17 = vld [vmem:[%s6347_s1 + $0x198] sm:$0xff]  }
  0x15   :  { %4138 = vmatpush3.bf16.msra.mxu1 %v4806_v19  ;;  %4045 = vmatprep.subr.bf16.mxu0 %v4807_v20  ;;  %v3609_v58 = vcombine.high %v53_v53, %v61_v55  ;;  %v69_v62 = vld [vmem:[%s6348_s0 + $0x180] sm:$0xff]  ;;  %v70_v0 = vld [vmem:[%s6348_s0 + $0x188] sm:$0xff]  ;;  %v3608_v4 = vcombine.low %v53_v53, %v61_v55  ;;  %v4844_v44 = vld [vmem:[%s6347_s1 + $0x130] sm:$0xff]  }
  0x16   :  { %4139 = vmatprep.subr.bf16.mxu1 %v4808_v21  ;;  %v77_v63 = vld [vmem:[%s6348_s0 + $0x1c0] sm:$0xff]  ;;  %v78_v1 = vld [vmem:[%s6348_s0 + $0x1c8] sm:$0xff]  ;;  %v4845_v47 = vld [vmem:[%s6347_s1 + $0x1f0] sm:$0xff]  }
  0x17   :  { %v3625_v7 = vcombine.high %v69_v62, %v77_v63  ;;  %v3627_v9 = vcombine.high %v70_v0, %v78_v1  ;;  %v85_v10 = vld [vmem:[%s6348_s0 + $0x200] sm:$0xff]  ;;  %v86_v13 = vld [vmem:[%s6348_s0 + $0x208] sm:$0xff]  ;;  %v3624_v18 = vcombine.low %v69_v62, %v77_v63  ;;  %v3626_v19 = vcombine.low %v70_v0, %v78_v1  ;;  %v4848_v55 = vld [vmem:[%s6347_s1 + $0x138] sm:$0xff]  }
  0x18   :  { %4046 = vmatpush3.bf16.msra.mxu0 %v4809_v22  ;;  %v93_v11 = vld [vmem:[%s6348_s0 + $0x240] sm:$0xff]  ;;  %v94_v14 = vld [vmem:[%s6348_s0 + $0x248] sm:$0xff]  ;;  %v4849_v56 = vld [vmem:[%s6347_s1 + $0x1f8] sm:$0xff]  }
  0x19   :  { %4140 = vmatpush3.bf16.msra.mxu1 %v4810_v23  ;;  %4047 = vmatprep.subr.bf16.mxu0 %v4811_v24  ;;  %v3641_v20 = vcombine.high %v85_v10, %v93_v11  ;;  %v3643_v21 = vcombine.high %v86_v13, %v94_v14  ;;  %v4835_v22 = vld [vmem:[%s6347_s1 + $0x160] sm:$0xff]   ;;  %v3642_v32 = vcombine.low %v86_v13, %v94_v14  ;;  %v4840_v34 = vld [vmem:[%s6347_s1 + $0x128] sm:$0xff]   ;;  %v4850_v57 = vld [vmem:[%s6347_s1 + $0x1b8] sm:$0xff]  }
  0x1a   :  { %4141 = vmatprep.subr.bf16.mxu1 %v4812_v25  ;;  %v4836_v23 = vld [vmem:[%s6347_s1 + $0x120] sm:$0xff]   ;;  %v4841_v36 = vld [vmem:[%s6347_s1 + $0x1e8] sm:$0xff]  }
  0x1b   :  { %v4837_v24 = vld [vmem:[%s6347_s1 + $0x1e0] sm:$0xff]   ;;  %v4842_v37 = vld [vmem:[%s6347_s1 + $0x1a8] sm:$0xff]  }
  0x1c   :  { %4048 = vmatpush3.bf16.msra.mxu0 %v4813_v26  ;;  %v101_v25 = vld [vmem:[%s6348_s0 + $0x280] sm:$0xff]  ;;  %v134_v53 = vld [vmem:[%s6348_s0 + $0x388] sm:$0xff] }
  0x1d   :  { %4142 = vmatpush3.bf16.msra.mxu1 %v4814_v27  ;;  %4049 = vmatprep.subr.bf16.mxu0 %v4815_v28  ;;  %v109_v26 = vld [vmem:[%s6348_s0 + $0x2c0] sm:$0xff]  ;;  %v102_v28 = vld [vmem:[%s6348_s0 + $0x288] sm:$0xff] }
  0x1e   :  { %4143 = vmatprep.subr.bf16.mxu1 %v4816_v29  ;;  %v4838_v27 = vld [vmem:[%s6347_s1 + $0x1a0] sm:$0xff]   ;;  %v110_v29 = vld [vmem:[%s6348_s0 + $0x2c8] sm:$0xff]  ;;  %v3657_v33 = vcombine.high %v101_v25, %v109_v26 }
  0x1f   :  { %v125_v39 = vld [vmem:[%s6348_s0 + $0x340] sm:$0xff]  ;;  %v3658_v45 = vcombine.low %v102_v28, %v110_v29 }
  0x20   :  { %4050 = vmatpush3.bf16.msra.mxu0 %v4817_v30  ;;  %v3640_v30 = vcombine.low %v85_v10, %v93_v11  ;;  %v4855_v62 = vld [vmem:[%s6347_s1 + $0x240] sm:$0xff]   ;;  %v166_v10 = vld [vmem:[%s6348_s0 + $0x488] sm:$0xff] }
  0x21   :  { %4144 = vmatpush3.bf16.msra.mxu1 %v4818_v31  ;;  %4223 = vmatprep.subr.bf16.mxu0 %v4819_v40  ;;  %v4839_v31 = vld [vmem:[%s6347_s1 + $0x168] sm:$0xff]   ;;  %v4843_v40 = vld [vmem:[%s6347_s1 + $0x170] sm:$0xff]   ;;  %v4857_v63 = vld [vmem:[%s6347_s1 + $0x2c0] sm:$0xff]  }
  0x22   :  { %4317 = vmatprep.subr.bf16.mxu1 %v4821_v42  ;;  %v126_v42 = vld [vmem:[%s6348_s0 + $0x348] sm:$0xff]  ;;  %v149_v0 = vld [vmem:[%s6348_s0 + $0x400] sm:$0xff] }
  0x23   :  { %2301 = vmatmul.mubr.bf16.vlgmr.msra.gmra.mrb[0].mxu0 %v3576_v35  ;;  %v3659_v35 = vcombine.high %v102_v28, %v110_v29  ;;  %v157_v1 = vld [vmem:[%s6348_s0 + $0x440] sm:$0xff]  ;;  %v174_v11 = vld [vmem:[%s6348_s0 + $0x4c8] sm:$0xff] }
  0x24   :  { %2437 = vmatmul.mubr.bf16.vlgmr.msra.gmra.mrb[0].mxu1 %v3578_v38  ;;  %4224 = vmatpush3.bf16.msra.mxu0 %v4820_v41  ;;  %v117_v38 = vld [vmem:[%s6348_s0 + $0x300] sm:$0xff]  ;;  %v118_v41 = vld [vmem:[%s6348_s0 + $0x308] sm:$0xff] }
  0x25   :  { %4318 = vmatpush3.bf16.msra.mxu1 %v4822_v43  ;;  %2308 = vmatprep.mubr.bf16.mxu0 %v3593_v46  ;;  %v3656_v43 = vcombine.low %v101_v25, %v109_v26  ;;  %v3673_v46 = vcombine.high %v117_v38, %v125_v39  ;;  %v3675_v48 = vcombine.high %v118_v41, %v126_v42  ;;  %v205_v25 = vld [vmem:[%s6348_s0 + $0x5c0] sm:$0xff]  ;;  %v198_v26 = vld [vmem:[%s6348_s0 + $0x588] sm:$0xff] }
  0x26   :  { %2444 = vmatprep.mubr.bf16.mxu1 %v3595_v49  ;;  %4225 = vmatprep.subr.bf16.mxu0 %v4823_v50  ;;  %v4846_v49 = vld [vmem:[%s6347_s1 + $0x1b0] sm:$0xff]   ;;  %v133_v50 = vld [vmem:[%s6348_s0 + $0x380] sm:$0xff] }
  0x27   :  { %4319 = vmatprep.subr.bf16.mxu1 %v4825_v60 }
  0x28   :  { %4226 = vmatpush3.bf16.msra.mxu0 %v4824_v52  ;;  %v4847_v52 = vld [vmem:[%s6347_s1 + $0x178] sm:$0xff]  }
  0x29   :  { %4320 = vmatpush3.bf16.msra.mxu1 %v4826_v61  ;;  %4227 = vmatprep.subr.bf16.mxu0 %v4827_v2  ;;  %v150_v2 = vld [vmem:[%s6348_s0 + $0x408] sm:$0xff] }
  0x2a   :  { %4321 = vmatprep.subr.bf16.mxu1 %v4829_v5 }
  0x2b   :  { %2309 = vmatmul.mubr.bf16.gmra.mrb[4].mxu0 %v3592_v51  ;;  %v141_v51 = vld [vmem:[%s6348_s0 + $0x3c0] sm:$0xff] }
  0x2c   :  { %2445 = vmatmul.mubr.bf16.gmra.mrb[4].mxu1 %v3594_v54  ;;  %2316 = vmatprep.mubr.bf16.mxu0 %v3609_v58  ;;  %v142_v54 = vld [vmem:[%s6348_s0 + $0x3c8] sm:$0xff]  ;;  %v3672_v58 = vcombine.low %v117_v38, %v125_v39  ;;  %v3689_v60 = vcombine.high %v133_v50, %v141_v51  ;;  %v23_v38 = vld [vmem:[%s6348_s0 + $0x10] sm:$0xff] }
  0x2d   :  { %2452 = vmatprep.mubr.bf16.mxu1 %v3611_v59  ;;  %4228 = vmatpush3.bf16.msra.mxu0 %v4828_v3  ;;  %v3674_v59 = vcombine.low %v118_v41, %v126_v42  ;;  %v3691_v61 = vcombine.high %v134_v53, %v142_v54  ;;  %v158_v3 = vld [vmem:[%s6348_s0 + $0x448] sm:$0xff]  ;;  %v3690_v5 = vcombine.low %v134_v53, %v142_v54  ;;  %v31_v39 = vld [vmem:[%s6348_s0 + $0x50] sm:$0xff]  ;;  %v32_v41 = vld [vmem:[%s6348_s0 + $0x58] sm:$0xff] }
  0x2e   :  { %4322 = vmatpush3.bf16.msra.mxu1 %v4830_v8  ;;  %4229 = vmatprep.subr.bf16.mxu0 %v4831_v12  ;;  %v165_v8 = vld [vmem:[%s6348_s0 + $0x480] sm:$0xff]  ;;  %v3704_v12 = vcombine.low %v149_v0, %v157_v1  ;;  %v3706_v13 = vcombine.low %v150_v2, %v158_v3 }
  0x2f   :  { %4323 = vmatprep.subr.bf16.mxu1 %v4833_v16  ;;  %v181_v16 = vld [vmem:[%s6348_s0 + $0x500] sm:$0xff] }
  0x30   :  { %v4858_v53 = vld [vmem:[%s6347_s1 + $0x280] sm:$0xff]  }
  0x31   :  { %4230 = vmatpush3.bf16.msra.mxu0 %v4832_v15  ;;  %v3723_v15 = vcombine.high %v166_v10, %v174_v11 }
  0x32   :  { %4324 = vmatpush3.bf16.msra.mxu1 %v4834_v17  ;;  %4231 = vmatprep.subr.bf16.mxu0 %v4835_v22  ;;  %v189_v17 = vld [vmem:[%s6348_s0 + $0x540] sm:$0xff] }
  0x33   :  { %2317 = vmatmul.mubr.bf16.gmra.mrb[8].mxu0 %v3608_v4  ;;  %4325 = vmatprep.subr.bf16.mxu1 %v4837_v24  ;;  %v3688_v4 = vcombine.low %v133_v50, %v141_v51  ;;  %v3737_v22 = vcombine.high %v181_v16, %v189_v17  ;;  %v197_v24 = vld [vmem:[%s6348_s0 + $0x580] sm:$0xff]  ;;  %v3736_v28 = vcombine.low %v181_v16, %v189_v17  ;;  %v48_v50 = vld [vmem:[%s6348_s0 + $0xd8] sm:$0xff] }
  0x34   :  { %2453 = vmatmul.mubr.bf16.gmra.mrb[8].mxu1 %v3610_v6  ;;  %2324 = vmatprep.mubr.bf16.mxu0 %v3625_v7  ;;  %v3705_v6 = vcombine.high %v149_v0, %v157_v1  ;;  %v3707_v7 = vcombine.high %v150_v2, %v158_v3  ;;  %v4863_v0 = vld [vmem:[%s6347_s1 + $0x250] sm:$0xff]   ;;  %v4871_v16 = vld [vmem:[%s6347_s1 + $0x260] sm:$0xff]  }
  0x35   :  { %2460 = vmatprep.mubr.bf16.mxu1 %v3627_v9  ;;  %4232 = vmatpush3.bf16.msra.mxu0 %v4836_v23  ;;  %v173_v9 = vld [vmem:[%s6348_s0 + $0x4c0] sm:$0xff]  ;;  %v4865_v1 = vld [vmem:[%s6347_s1 + $0x2d0] sm:$0xff]  }
  0x36   :  { %4326 = vmatpush3.bf16.msra.mxu1 %v4838_v27  ;;  %4233 = vmatprep.subr.bf16.mxu0 %v4839_v31  ;;  %v3721_v14 = vcombine.high %v165_v8, %v173_v9  ;;  %v206_v27 = vld [vmem:[%s6348_s0 + $0x5c8] sm:$0xff]  ;;  %v4873_v17 = vld [vmem:[%s6347_s1 + $0x2e0] sm:$0xff]  }
  0x37   :  { %4327 = vmatprep.subr.bf16.mxu1 %v4841_v36  ;;  %v3755_v31 = vcombine.high %v198_v26, %v206_v27 }
  0x39   :  { %4234 = vmatpush3.bf16.msra.mxu0 %v4840_v34  ;;  %v3752_v34 = vcombine.low %v197_v24, %v205_v25 }
  0x3a   :  { %4328 = vmatpush3.bf16.msra.mxu1 %v4842_v37  ;;  %4235 = vmatprep.subr.bf16.mxu0 %v4843_v40  ;;  %v24_v40 = vld [vmem:[%s6348_s0 + $0x18] sm:$0xff] }
  0x3b   :  { %2325 = vmatmul.mubr.bf16.gmra.mrb[12].mxu0 %v3624_v18  ;;  %4329 = vmatprep.subr.bf16.mxu1 %v4845_v47  ;;  %v182_v18 = vld [vmem:[%s6348_s0 + $0x508] sm:$0xff]  ;;  %v47_v47 = vld [vmem:[%s6348_s0 + $0xd0] sm:$0xff]  ;;  %v3582_v51 = vcombine.low %v24_v40, %v32_v41 }
  0x3c   :  { %2461 = vmatmul.mubr.bf16.gmra.mrb[12].mxu1 %v3626_v19  ;;  %2332 = vmatprep.mubr.bf16.mxu0 %v3641_v20  ;;  %v190_v19 = vld [vmem:[%s6348_s0 + $0x548] sm:$0xff]  ;;  %v3720_v20 = vcombine.low %v165_v8, %v173_v9  ;;  %v4867_v8 = vld [vmem:[%s6347_s1 + $0x258] sm:$0xff]  }
  0x3d   :  { %2468 = vmatprep.mubr.bf16.mxu1 %v3643_v21  ;;  %4236 = vmatpush3.bf16.msra.mxu0 %v4844_v44  ;;  %v3722_v21 = vcombine.low %v166_v10, %v174_v11  ;;  %v3739_v23 = vcombine.high %v182_v18, %v190_v19  ;;  %v3738_v29 = vcombine.low %v182_v18, %v190_v19  ;;  %v4869_v9 = vld [vmem:[%s6347_s1 + $0x2d8] sm:$0xff]   ;;  %v71_v10 = vld [vmem:[%s6348_s0 + $0x190] sm:$0xff] }
  0x3e   :  { %4330 = vmatpush3.bf16.msra.mxu1 %v4846_v49  ;;  %4237 = vmatprep.subr.bf16.mxu0 %v4847_v52  ;;  %v3581_v44 = vcombine.high %v23_v38, %v31_v39  ;;  %v3580_v49 = vcombine.low %v23_v38, %v31_v39  ;;  %v4856_v52 = vld [vmem:[%s6347_s1 + $0x200] sm:$0xff]   ;;  %v79_v11 = vld [vmem:[%s6348_s0 + $0x1d0] sm:$0xff]  ;;  %v4883_v39 = vld [vmem:[%s6347_s1 + $0x278] sm:$0xff]  }
  0x3f   :  { %4331 = vmatprep.subr.bf16.mxu1 %v4849_v56  ;;  %v4859_v56 = vld [vmem:[%s6347_s1 + $0x248] sm:$0xff]   ;;  %v4882_v38 = vld [vmem:[%s6347_s1 + $0x2b0] sm:$0xff]  }
  0x41   :  { %4238 = vmatpush3.bf16.msra.mxu0 %v4848_v55 }
  0x42   :  { %4332 = vmatpush3.bf16.msra.mxu1 %v4850_v57  ;;  %4411 = vmatprep.subr.bf16.mxu0 %v4855_v62  ;;  %v4860_v57 = vld [vmem:[%s6347_s1 + $0x208] sm:$0xff]   ;;  %v64_v62 = vld [vmem:[%s6348_s0 + $0x158] sm:$0xff] }
  0x43   :  { %2333 = vmatmul.mubr.bf16.gmra.mrb[16].mxu0 %v3640_v30  ;;  %4505 = vmatprep.subr.bf16.mxu1 %v4857_v63  ;;  %v3753_v30 = vcombine.high %v197_v24, %v205_v25  ;;  %v4862_v63 = vld [vmem:[%s6347_s1 + $0x288] sm:$0xff]  }
  0x44   :  { %2469 = vmatmul.mubr.bf16.gmra.mrb[16].mxu1 %v3642_v32  ;;  %2340 = vmatprep.mubr.bf16.mxu0 %v3657_v33  ;;  %v213_v32 = vld [vmem:[%s6348_s0 + $0x600] sm:$0xff]  ;;  %v214_v33 = vld [vmem:[%s6348_s0 + $0x608] sm:$0xff] }
  0x45   :  { %2476 = vmatprep.mubr.bf16.mxu1 %v3659_v35  ;;  %v3754_v35 = vcombine.low %v198_v26, %v206_v27  ;;  %v3769_v36 = vcombine.high %v213_v32, %v213_v32  ;;  %v3771_v37 = vcombine.high %v214_v33, %v214_v33  ;;  %v3768_v42 = vcombine.low %v213_v32, %v213_v32  ;;  %v4877_v25 = vld [vmem:[%s6347_s1 + $0x2e8] sm:$0xff]   ;;  %v87_v26 = vld [vmem:[%s6348_s0 + $0x210] sm:$0xff] }
  0x46   :  { %v95_v27 = vld [vmem:[%s6348_s0 + $0x250] sm:$0xff] }
  0x47   :  { %v4879_v32 = vld [vmem:[%s6347_s1 + $0x270] sm:$0xff]  }
  0x4b   :  { %2341 = vmatmul.mubr.bf16.gmra.mrb[20].mxu0 %v3656_v43  ;;  %v3770_v43 = vcombine.low %v214_v33, %v214_v33  ;;  %v3628_v33 = vcombine.low %v71_v10, %v79_v11 }
  0x4c   :  { %2477 = vmatmul.mubr.bf16.gmra.mrb[20].mxu1 %v3658_v45  ;;  %2348 = vmatprep.mubr.bf16.mxu0 %v3673_v46  ;;  %v3583_v45 = vcombine.high %v24_v40, %v32_v41  ;;  %v39_v46 = vld [vmem:[%s6348_s0 + $0x90] sm:$0xff]  ;;  %v4885_v41 = vld [vmem:[%s6347_s1 + $0x2f8] sm:$0xff]  }
  0x4d   :  { %2484 = vmatprep.mubr.bf16.mxu1 %v3675_v48  ;;  %v40_v48 = vld [vmem:[%s6348_s0 + $0x98] sm:$0xff]  ;;  %v3597_v54 = vcombine.high %v39_v46, %v47_v47  ;;  %v3596_v2 = vcombine.low %v39_v46, %v47_v47 }
  0x4e   :  { %v3599_v55 = vcombine.high %v40_v48, %v48_v50  ;;  %v3598_v3 = vcombine.low %v40_v48, %v48_v50  ;;  %v112_v46 = vld [vmem:[%s6348_s0 + $0x2d8] sm:$0xff]  ;;  %v4891_v48 = vld [vmem:[%s6347_s1 + $0x340] sm:$0xff]  }
  0x4f   :  { %v4886_v47 = vld [vmem:[%s6347_s1 + $0x2b8] sm:$0xff]   ;;  %v4893_v50 = vld [vmem:[%s6347_s1 + $0x3c0] sm:$0xff]  }
  0x53   :  { %2349 = vmatmul.mubr.bf16.gmra.mrb[24].mxu0 %v3672_v58  ;;  %v55_v58 = vld [vmem:[%s6348_s0 + $0x110] sm:$0xff] }
  0x54   :  { %2485 = vmatmul.mubr.bf16.gmra.mrb[24].mxu1 %v3674_v59  ;;  %2356 = vmatprep.mubr.bf16.mxu0 %v3689_v60  ;;  %v4861_v59 = vld [vmem:[%s6347_s1 + $0x2c8] sm:$0xff]   ;;  %v63_v60 = vld [vmem:[%s6348_s0 + $0x150] sm:$0xff] }
  0x55   :  { %2492 = vmatprep.mubr.bf16.mxu1 %v3691_v61  ;;  %v56_v61 = vld [vmem:[%s6348_s0 + $0x118] sm:$0xff]  ;;  %v3612_v18 = vcombine.low %v55_v58, %v63_v60 }
  0x56   :  { %v3614_v19 = vcombine.low %v56_v61, %v64_v62 }
  0x5b   :  { %2357 = vmatmul.mubr.bf16.gmra.mrb[28].mxu0 %v3688_v4  ;;  %v3613_v4 = vcombine.high %v55_v58, %v63_v60 }
  0x5c   :  { %2493 = vmatmul.mubr.bf16.gmra.mrb[28].mxu1 %v3690_v5  ;;  %2364 = vmatprep.mubr.bf16.mxu0 %v3705_v6  ;;  %v3615_v5 = vcombine.high %v56_v61, %v64_v62  ;;  %v4864_v6 = vld [vmem:[%s6347_s1 + $0x210] sm:$0xff]  }
  0x5d   :  { %2500 = vmatprep.mubr.bf16.mxu1 %v3707_v7  ;;  %v4866_v7 = vld [vmem:[%s6347_s1 + $0x290] sm:$0xff]  }
  0x5e   :  { %v135_v62 = vld [vmem:[%s6348_s0 + $0x390] sm:$0xff] }
  0x63   :  { %2365 = vmatmul.mubr.bf16.gmra.mrb[32].mxu0 %v3704_v12  ;;  %v4868_v12 = vld [vmem:[%s6347_s1 + $0x218] sm:$0xff]  }
  0x64   :  { %2501 = vmatmul.mubr.bf16.gmra.mrb[32].mxu1 %v3706_v13  ;;  %2372 = vmatprep.mubr.bf16.mxu0 %v3721_v14  ;;  %v72_v13 = vld [vmem:[%s6348_s0 + $0x198] sm:$0xff] }
  0x65   :  { %2508 = vmatprep.mubr.bf16.mxu1 %v3723_v15  ;;  %v80_v14 = vld [vmem:[%s6348_s0 + $0x1d8] sm:$0xff] }
  0x66   :  { %v4870_v15 = vld [vmem:[%s6347_s1 + $0x298] sm:$0xff]   ;;  %v3631_v24 = vcombine.high %v72_v13, %v80_v14 }
  0x6b   :  { %2373 = vmatmul.mubr.bf16.gmra.mrb[36].mxu0 %v3720_v20  ;;  %v3629_v20 = vcombine.high %v71_v10, %v79_v11 }
  0x6c   :  { %2509 = vmatmul.mubr.bf16.gmra.mrb[36].mxu1 %v3722_v21  ;;  %2380 = vmatprep.mubr.bf16.mxu0 %v3737_v22  ;;  %v4872_v21 = vld [vmem:[%s6347_s1 + $0x220] sm:$0xff]  }
  0x6d   :  { %2516 = vmatprep.mubr.bf16.mxu1 %v3739_v23  ;;  %v4874_v22 = vld [vmem:[%s6347_s1 + $0x2a0] sm:$0xff]   ;;  %v4875_v23 = vld [vmem:[%s6347_s1 + $0x268] sm:$0xff]  }
  0x73   :  { %2381 = vmatmul.mubr.bf16.gmra.mrb[40].mxu0 %v3736_v28  ;;  %v4876_v28 = vld [vmem:[%s6347_s1 + $0x228] sm:$0xff]  }
  0x74   :  { %2517 = vmatmul.mubr.bf16.gmra.mrb[40].mxu1 %v3738_v29  ;;  %2388 = vmatprep.mubr.bf16.mxu0 %v3753_v30  ;;  %v88_v29 = vld [vmem:[%s6348_s0 + $0x218] sm:$0xff] }
  0x75   :  { %2524 = vmatprep.mubr.bf16.mxu1 %v3755_v31  ;;  %v96_v30 = vld [vmem:[%s6348_s0 + $0x258] sm:$0xff]  ;;  %v4878_v31 = vld [vmem:[%s6347_s1 + $0x2a8] sm:$0xff]  }
  0x76   :  { %v3647_v40 = vcombine.high %v88_v29, %v96_v30 }
  0x7b   :  { %2389 = vmatmul.mubr.bf16.gmra.mrb[44].mxu0 %v3752_v34  ;;  %v4881_v34 = vld [vmem:[%s6347_s1 + $0x2f0] sm:$0xff]  }
  0x7c   :  { %2525 = vmatmul.mubr.bf16.gmra.mrb[44].mxu1 %v3754_v35  ;;  %2396 = vmatprep.mubr.bf16.mxu0 %v3769_v36  ;;  %v3630_v35 = vcombine.low %v72_v13, %v80_v14  ;;  %v3645_v36 = vcombine.high %v87_v26, %v95_v27  ;;  %v167_v14 = vld [vmem:[%s6348_s0 + $0x490] sm:$0xff] }
  0x7d   :  { %2532 = vmatprep.mubr.bf16.mxu1 %v3771_v37  ;;  %v4880_v37 = vld [vmem:[%s6347_s1 + $0x230] sm:$0xff]  }
  0x83   :  { %2397 = vmatmul.mubr.bf16.gmra.mrb[48].mxu0 %v3768_v42  ;;  %v103_v42 = vld [vmem:[%s6348_s0 + $0x290] sm:$0xff] }
  0x84   :  { %2533 = vmatmul.mubr.bf16.gmra.mrb[48].mxu1 %v3770_v43  ;;  %2572 = vmatprep.mubr.bf16.mxu0 %v3581_v44  ;;  %v111_v43 = vld [vmem:[%s6348_s0 + $0x2d0] sm:$0xff]  ;;  %v104_v44 = vld [vmem:[%s6348_s0 + $0x298] sm:$0xff] }
  0x85   :  { %2708 = vmatprep.mubr.bf16.mxu1 %v3583_v45  ;;  %v4884_v45 = vld [vmem:[%s6347_s1 + $0x238] sm:$0xff]   ;;  %v3660_v58 = vcombine.low %v103_v42, %v111_v43 }
  0x8b   :  { %2573 = vmatmul.mubr.bf16.vlgmr.msra.gmra.mrb[52].mxu0 %v3580_v49  ;;  %v3644_v49 = vcombine.low %v87_v26, %v95_v27 }
  0x8c   :  { %2709 = vmatmul.mubr.bf16.vlgmr.msra.gmra.mrb[52].mxu1 %v3582_v51  ;;  %4412 = vmatpush3.bf16.msra.mxu0 %v4856_v52  ;;  %v3646_v51 = vcombine.low %v88_v29, %v96_v30  ;;  %v3661_v52 = vcombine.high %v103_v42, %v111_v43  ;;  %v199_v30 = vld [vmem:[%s6348_s0 + $0x590] sm:$0xff] }
  0x8d   :  { %4506 = vmatpush3.bf16.msra.mxu1 %v4858_v53  ;;  %2580 = vmatprep.mubr.bf16.mxu0 %v3597_v54  ;;  %v3663_v53 = vcombine.high %v104_v44, %v112_v46  ;;  %v119_v54 = vld [vmem:[%s6348_s0 + $0x310] sm:$0xff] }
  0x8e   :  { %2716 = vmatprep.mubr.bf16.mxu1 %v3599_v55  ;;  %4413 = vmatprep.subr.bf16.mxu0 %v4859_v56  ;;  %v127_v55 = vld [vmem:[%s6348_s0 + $0x350] sm:$0xff]  ;;  %v120_v56 = vld [vmem:[%s6348_s0 + $0x318] sm:$0xff] }
  0x8f   :  { %4507 = vmatprep.subr.bf16.mxu1 %v4861_v59  ;;  %v3662_v59 = vcombine.low %v104_v44, %v112_v46  ;;  %v3677_v60 = vcombine.high %v119_v54, %v127_v55  ;;  %v25_v44 = vld [vmem:[%s6348_s0 + $0x20] sm:$0xff]  ;;  %v26_v46 = vld [vmem:[%s6348_s0 + $0x28] sm:$0xff] }
  0x90   :  { %4414 = vmatpush3.bf16.msra.mxu0 %v4860_v57  ;;  %v128_v57 = vld [vmem:[%s6348_s0 + $0x358] sm:$0xff] }
  0x91   :  { %4508 = vmatpush3.bf16.msra.mxu1 %v4862_v63  ;;  %4415 = vmatprep.subr.bf16.mxu0 %v4863_v0  ;;  %v3679_v61 = vcombine.high %v120_v56, %v128_v57  ;;  %v143_v63 = vld [vmem:[%s6348_s0 + $0x3d0] sm:$0xff]  ;;  %v136_v0 = vld [vmem:[%s6348_s0 + $0x398] sm:$0xff] }
  0x92   :  { %4509 = vmatprep.subr.bf16.mxu1 %v4865_v1  ;;  %v144_v1 = vld [vmem:[%s6348_s0 + $0x3d8] sm:$0xff]  ;;  %v3692_v10 = vcombine.low %v135_v62, %v143_v63 }
  0x93   :  { %2581 = vmatmul.mubr.bf16.gmra.mrb[56].mxu0 %v3596_v2  ;;  %v3676_v2 = vcombine.low %v119_v54, %v127_v55  ;;  %v3694_v11 = vcombine.low %v136_v0, %v144_v1  ;;  %v42_v55 = vld [vmem:[%s6348_s0 + $0xa8] sm:$0xff] }
  0x94   :  { %2717 = vmatmul.mubr.bf16.gmra.mrb[56].mxu1 %v3598_v3  ;;  %2588 = vmatprep.mubr.bf16.mxu0 %v3613_v4  ;;  %v3678_v3 = vcombine.low %v120_v56, %v128_v57  ;;  %v3693_v4 = vcombine.high %v135_v62, %v143_v63  ;;  %v50_v56 = vld [vmem:[%s6348_s0 + $0xe8] sm:$0xff] }
  0x95   :  { %2724 = vmatprep.mubr.bf16.mxu1 %v3615_v5  ;;  %4416 = vmatpush3.bf16.msra.mxu0 %v4864_v6  ;;  %v3695_v5 = vcombine.high %v136_v0, %v144_v1  ;;  %v151_v6 = vld [vmem:[%s6348_s0 + $0x410] sm:$0xff]  ;;  %v4895_v62 = vld [vmem:[%s6347_s1 + $0x348] sm:$0xff]   ;;  %v5597_v1 = vld [vmem:[%s6348_s0 + $0x120] sm:$0xff] }
  0x96   :  { %4510 = vmatpush3.bf16.msra.mxu1 %v4866_v7  ;;  %4417 = vmatprep.subr.bf16.mxu0 %v4867_v8  ;;  %v159_v7 = vld [vmem:[%s6348_s0 + $0x450] sm:$0xff]  ;;  %v152_v8 = vld [vmem:[%s6348_s0 + $0x418] sm:$0xff]  ;;  %v4897_v63 = vld [vmem:[%s6347_s1 + $0x3c8] sm:$0xff]  }
  0x97   :  { %4511 = vmatprep.subr.bf16.mxu1 %v4869_v9  ;;  %v160_v9 = vld [vmem:[%s6348_s0 + $0x458] sm:$0xff]  ;;  %v4896_v0 = vld [vmem:[%s6347_s1 + $0x308] sm:$0xff]  }
  0x98   :  { %v3711_v13 = vcombine.high %v152_v8, %v160_v9 }
  0x99   :  { %4418 = vmatpush3.bf16.msra.mxu0 %v4868_v12  ;;  %v3709_v12 = vcombine.high %v151_v6, %v159_v7 }
  0x9a   :  { %4512 = vmatpush3.bf16.msra.mxu1 %v4870_v15  ;;  %4419 = vmatprep.subr.bf16.mxu0 %v4871_v16  ;;  %v175_v15 = vld [vmem:[%s6348_s0 + $0x4d0] sm:$0xff]  ;;  %v168_v16 = vld [vmem:[%s6348_s0 + $0x498] sm:$0xff] }
  0x9b   :  { %2589 = vmatmul.mubr.bf16.gmra.mrb[60].mxu0 %v3612_v18  ;;  %4513 = vmatprep.subr.bf16.mxu1 %v4873_v17  ;;  %v176_v17 = vld [vmem:[%s6348_s0 + $0x4d8] sm:$0xff]  ;;  %v3708_v18 = vcombine.low %v151_v6, %v159_v7  ;;  %v3724_v26 = vcombine.low %v167_v14, %v175_v15  ;;  %v5613_v6 = vld [vmem:[%s6348_s0 + $0x128] sm:$0xff] }
  0x9c   :  { %2725 = vmatmul.mubr.bf16.gmra.mrb[60].mxu1 %v3614_v19  ;;  %2596 = vmatprep.mubr.bf16.mxu0 %v3629_v20  ;;  %v3710_v19 = vcombine.low %v152_v8, %v160_v9  ;;  %v3725_v20 = vcombine.high %v167_v14, %v175_v15  ;;  %v3726_v27 = vcombine.low %v168_v16, %v176_v17  ;;  %v5618_v7 = vld [vmem:[%s6348_s0 + $0x168] sm:$0xff]  ;;  %v4901_v8 = vld [vmem:[%s6347_s1 + $0x3d0] sm:$0xff]  }
  0x9d   :  { %2732 = vmatprep.mubr.bf16.mxu1 %v3631_v24  ;;  %4420 = vmatpush3.bf16.msra.mxu0 %v4872_v21  ;;  %v3727_v21 = vcombine.high %v168_v16, %v176_v17  ;;  %v184_v24 = vld [vmem:[%s6348_s0 + $0x518] sm:$0xff]  ;;  %v3602_v16 = vcombine.low %v42_v55, %v50_v56 }
  0x9e   :  { %4514 = vmatpush3.bf16.msra.mxu1 %v4874_v22  ;;  %4421 = vmatprep.subr.bf16.mxu0 %v4875_v23  ;;  %v183_v22 = vld [vmem:[%s6348_s0 + $0x510] sm:$0xff] }
  0x9f   :  { %4515 = vmatprep.subr.bf16.mxu1 %v4877_v25  ;;  %v191_v23 = vld [vmem:[%s6348_s0 + $0x550] sm:$0xff]  ;;  %v192_v25 = vld [vmem:[%s6348_s0 + $0x558] sm:$0xff] }
  0xa0   :  { %v3743_v29 = vcombine.high %v184_v24, %v192_v25 }
  0xa1   :  { %4422 = vmatpush3.bf16.msra.mxu0 %v4876_v28  ;;  %v3741_v28 = vcombine.high %v183_v22, %v191_v23 }
  0xa2   :  { %4516 = vmatpush3.bf16.msra.mxu1 %v4878_v31  ;;  %4423 = vmatprep.subr.bf16.mxu0 %v4879_v32  ;;  %v207_v31 = vld [vmem:[%s6348_s0 + $0x5d0] sm:$0xff]  ;;  %v200_v32 = vld [vmem:[%s6348_s0 + $0x598] sm:$0xff] }
  0xa3   :  { %2597 = vmatmul.mubr.bf16.gmra.mrb[64].mxu0 %v3628_v33  ;;  %4517 = vmatprep.subr.bf16.mxu1 %v4881_v34  ;;  %v208_v33 = vld [vmem:[%s6348_s0 + $0x5d8] sm:$0xff]  ;;  %v3740_v34 = vcombine.low %v183_v22, %v191_v23  ;;  %v4900_v22 = vld [vmem:[%s6347_s1 + $0x310] sm:$0xff]  }
  0xa4   :  { %2733 = vmatmul.mubr.bf16.gmra.mrb[64].mxu1 %v3630_v35  ;;  %2604 = vmatprep.mubr.bf16.mxu0 %v3645_v36  ;;  %v3742_v35 = vcombine.low %v184_v24, %v192_v25  ;;  %v3757_v36 = vcombine.high %v199_v30, %v207_v31 }
  0xa5   :  { %2740 = vmatprep.mubr.bf16.mxu1 %v3647_v40  ;;  %4424 = vmatpush3.bf16.msra.mxu0 %v4880_v37  ;;  %v3759_v37 = vcombine.high %v200_v32, %v208_v33  ;;  %v3756_v40 = vcombine.low %v199_v30, %v207_v31 }
  0xa6   :  { %4518 = vmatpush3.bf16.msra.mxu1 %v4882_v38  ;;  %4425 = vmatprep.subr.bf16.mxu0 %v4883_v39  ;;  %v215_v38 = vld [vmem:[%s6348_s0 + $0x610] sm:$0xff]  ;;  %v216_v39 = vld [vmem:[%s6348_s0 + $0x618] sm:$0xff] }
  0xa7   :  { %4519 = vmatprep.subr.bf16.mxu1 %v4885_v41  ;;  %v3758_v41 = vcombine.low %v200_v32, %v208_v33  ;;  %v3773_v42 = vcombine.high %v215_v38, %v215_v38  ;;  %v3775_v43 = vcombine.high %v216_v39, %v216_v39  ;;  %v5651_v32 = vld [vmem:[%s6348_s0 + $0x1a0] sm:$0xff] }
  0xa8   :  { %v5656_v33 = vld [vmem:[%s6348_s0 + $0x1e0] sm:$0xff] }
  0xa9   :  { %4426 = vmatpush3.bf16.msra.mxu0 %v4884_v45  ;;  %v33_v45 = vld [vmem:[%s6348_s0 + $0x60] sm:$0xff] }
  0xaa   :  { %4520 = vmatpush3.bf16.msra.mxu1 %v4886_v47  ;;  %4599 = vmatprep.subr.bf16.mxu0 %v4891_v48  ;;  %v34_v47 = vld [vmem:[%s6348_s0 + $0x68] sm:$0xff]  ;;  %v3772_v48 = vcombine.low %v215_v38, %v215_v38  ;;  %v3584_v54 = vcombine.low %v25_v44, %v33_v45 }
  0xab   :  { %2605 = vmatmul.mubr.bf16.gmra.mrb[68].mxu0 %v3644_v49  ;;  %4693 = vmatprep.subr.bf16.mxu1 %v4893_v50  ;;  %v3774_v49 = vcombine.low %v216_v39, %v216_v39  ;;  %v3585_v50 = vcombine.high %v25_v44, %v33_v45  ;;  %v3586_v57 = vcombine.low %v26_v46, %v34_v47  ;;  %v5671_v38 = vld [vmem:[%s6348_s0 + $0x1e8] sm:$0xff]  ;;  %v4906_v39 = vld [vmem:[%s6347_s1 + $0x398] sm:$0xff]   ;;  %v4909_v44 = vld [vmem:[%s6347_s1 + $0x3e0] sm:$0xff]  }
  0xac   :  { %2741 = vmatmul.mubr.bf16.gmra.mrb[68].mxu1 %v3646_v51  ;;  %2612 = vmatprep.mubr.bf16.mxu0 %v3661_v52  ;;  %v3587_v51 = vcombine.high %v26_v46, %v34_v47  ;;  %v41_v52 = vld [vmem:[%s6348_s0 + $0xa0] sm:$0xff] }
  0xad   :  { %2748 = vmatprep.mubr.bf16.mxu1 %v3663_v53  ;;  %v49_v53 = vld [vmem:[%s6348_s0 + $0xe0] sm:$0xff] }
  0xb3   :  { %2613 = vmatmul.mubr.bf16.gmra.mrb[72].mxu0 %v3660_v58  ;;  %v4892_v58 = vld [vmem:[%s6347_s1 + $0x300] sm:$0xff]  }
  0xb4   :  { %2749 = vmatmul.mubr.bf16.gmra.mrb[72].mxu1 %v3662_v59  ;;  %2620 = vmatprep.mubr.bf16.mxu0 %v3677_v60  ;;  %v4894_v59 = vld [vmem:[%s6347_s1 + $0x380] sm:$0xff]   ;;  %v3601_v60 = vcombine.high %v41_v52, %v49_v53 }
  0xb5   :  { %2756 = vmatprep.mubr.bf16.mxu1 %v3679_v61  ;;  %v3603_v61 = vcombine.high %v42_v55, %v50_v56 }
  0xbb   :  { %2621 = vmatmul.mubr.bf16.gmra.mrb[76].mxu0 %v3676_v2  ;;  %v5602_v2 = vld [vmem:[%s6348_s0 + $0x160] sm:$0xff] }
  0xbc   :  { %2757 = vmatmul.mubr.bf16.gmra.mrb[76].mxu1 %v3678_v3  ;;  %2628 = vmatprep.mubr.bf16.mxu0 %v3693_v4  ;;  %v4898_v3 = vld [vmem:[%s6347_s1 + $0x388] sm:$0xff]   ;;  %v4899_v4 = vld [vmem:[%s6347_s1 + $0x350] sm:$0xff]   ;;  %v3617_v17 = vcombine.high %v5597_v1, %v5602_v2 }
  0xbd   :  { %2764 = vmatprep.mubr.bf16.mxu1 %v3695_v5 }
  0xc3   :  { %2629 = vmatmul.mubr.bf16.gmra.mrb[80].mxu0 %v3692_v10  ;;  %v5626_v10 = vld [vmem:[%s6349_s2] ss:$0 sm:$0xff] }
  0xc4   :  { %2765 = vmatmul.mubr.bf16.gmra.mrb[80].mxu1 %v3694_v11  ;;  %2636 = vmatprep.mubr.bf16.mxu0 %v3709_v12  ;;  %v3600_v12 = vcombine.low %v41_v52, %v49_v53 }
  0xc5   :  { %2772 = vmatprep.mubr.bf16.mxu1 %v3711_v13 }
  0xcb   :  { %2637 = vmatmul.mubr.bf16.gmra.mrb[84].mxu0 %v3708_v18 }
  0xcc   :  { %2773 = vmatmul.mubr.bf16.gmra.mrb[84].mxu1 %v3710_v19  ;;  %2644 = vmatprep.mubr.bf16.mxu0 %v3725_v20 }
  0xcd   :  { %2780 = vmatprep.mubr.bf16.mxu1 %v3727_v21  ;;  %v3619_v21 = vcombine.high %v5613_v6, %v5618_v7 }
  0xd3   :  { %2645 = vmatmul.mubr.bf16.gmra.mrb[88].mxu0 %v3724_v26  ;;  %v4902_v26 = vld [vmem:[%s6347_s1 + $0x390] sm:$0xff]  }
  0xd4   :  { %2781 = vmatmul.mubr.bf16.gmra.mrb[88].mxu1 %v3726_v27  ;;  %2652 = vmatprep.mubr.bf16.mxu0 %v3741_v28  ;;  %v4903_v27 = vld [vmem:[%s6347_s1 + $0x358] sm:$0xff]  }
  0xd5   :  { %2788 = vmatprep.mubr.bf16.mxu1 %v3743_v29  ;;  %v4905_v29 = vld [vmem:[%s6347_s1 + $0x3d8] sm:$0xff]  }
  0xdb   :  { %2653 = vmatmul.mubr.bf16.gmra.mrb[92].mxu0 %v3740_v34  ;;  %v5661_v34 = vld [vmem:[%s6348_s0 + $0x1a8] sm:$0xff] }
  0xdc   :  { %2789 = vmatmul.mubr.bf16.gmra.mrb[92].mxu1 %v3742_v35  ;;  %2660 = vmatprep.mubr.bf16.mxu0 %v3757_v36  ;;  %v4904_v35 = vld [vmem:[%s6347_s1 + $0x318] sm:$0xff]   ;;  %v3635_v53 = vcombine.high %v5661_v34, %v5671_v38 }
  0xdd   :  { %2796 = vmatprep.mubr.bf16.mxu1 %v3759_v37 }
  0xe3   :  { %2661 = vmatmul.mubr.bf16.gmra.mrb[96].mxu0 %v3756_v40  ;;  %v4907_v40 = vld [vmem:[%s6347_s1 + $0x360] sm:$0xff]  }
  0xe4   :  { %2797 = vmatmul.mubr.bf16.gmra.mrb[96].mxu1 %v3758_v41  ;;  %2668 = vmatprep.mubr.bf16.mxu0 %v3773_v42 }
  0xe5   :  { %2804 = vmatprep.mubr.bf16.mxu1 %v3775_v43  ;;  %v3616_v43 = vcombine.low %v5597_v1, %v5602_v2  ;;  %v5714_v1 = vld [vmem:[%s6348_s0 + $0x260] sm:$0xff]  ;;  %v5719_v2 = vld [vmem:[%s6348_s0 + $0x228] sm:$0xff] }
  0xeb   :  { %2669 = vmatmul.mubr.bf16.gmra.mrb[100].mxu0 %v3772_v48  ;;  %v3618_v48 = vcombine.low %v5613_v6, %v5618_v7  ;;  %v5729_v6 = vld [vmem:[%s6348_s0 + $0x268] sm:$0xff] }
  0xec   :  { %2805 = vmatmul.mubr.bf16.gmra.mrb[100].mxu1 %v3774_v49  ;;  %2844 = vmatprep.mubr.bf16.mxu0 %v3585_v50  ;;  %v3633_v49 = vcombine.high %v5651_v32, %v5656_v33  ;;  %v4914_v7 = vld [vmem:[%s6347_s1 + $0x3a8] sm:$0xff]  }
  0xed   :  { %2980 = vmatprep.mubr.bf16.mxu1 %v3587_v51 }
  0xf3   :  { %2845 = vmatmul.mubr.bf16.vlgmr.msra.gmra.mrb[104].mxu0 %v3584_v54  ;;  %v4908_v54 = vld [vmem:[%s6347_s1 + $0x320] sm:$0xff]  }
  0xf4   :  { %2981 = vmatmul.mubr.bf16.vlgmr.msra.gmra.mrb[104].mxu1 %v3586_v57  ;;  %4600 = vmatpush3.bf16.msra.mxu0 %v4892_v58  ;;  %v4910_v58 = vld [vmem:[%s6347_s1 + $0x3a0] sm:$0xff]  }
  0xf5   :  { %4694 = vmatpush3.bf16.msra.mxu1 %v4894_v59  ;;  %2852 = vmatprep.mubr.bf16.mxu0 %v3601_v60  ;;  %v4911_v59 = vld [vmem:[%s6347_s1 + $0x368] sm:$0xff]  }
  0xf6   :  { %v4051_v5 = vpop.f32.mrb[0].mxu0  ;;  %2988 = vmatprep.mubr.bf16.mxu1 %v3603_v61  ;;  %4601 = vmatprep.subr.bf16.mxu0 %v4895_v62  ;;  %v4913_v61 = vld [vmem:[%s6347_s1 + $0x3e8] sm:$0xff]  }
  0xf7   :  { %v4145_v9 = vpop.f32.mrb[0].mxu1  ;;  %v4052_v11 = vpop.f32.mrb[1].mxu0  ;;  %4695 = vmatprep.subr.bf16.mxu1 %v4897_v63 }
  0xf8   :  { %v4053_v13 = vadd.f32 %v4052_v11, %v4051_v5  ;;  %v4146_v14 = vpop.f32.mrb[1].mxu1  ;;  %v4054_v15 = vpop.f32.mrb[2].mxu0  ;;  %4602 = vmatpush3.bf16.msra.mxu0 %v4896_v0  ;;  %v5709_v0 = vld [vmem:[%s6348_s0 + $0x220] sm:$0xff] }
  0xf9   :  { %v4147_v18 = vadd.f32 %v4146_v14, %v4145_v9  ;;  %v4148_v19 = vpop.f32.mrb[2].mxu1  ;;  %v4055_v20 = vpop.f32.mrb[3].mxu0  ;;  %4696 = vmatpush3.bf16.msra.mxu1 %v4898_v3  ;;  %4603 = vmatprep.subr.bf16.mxu0 %v4899_v4  ;;  %v4912_v3 = vld [vmem:[%s6347_s1 + $0x328] sm:$0xff]  }
  0xfa   :  { %v2303_v23 = vadd.f32 %v4053_v13, %v5626_v10  ;;  %v4056_v24 = vadd.f32 %v4055_v20, %v4054_v15  ;;  %v4149_v25 = vpop.f32.mrb[3].mxu1  ;;  %4697 = vmatprep.subr.bf16.mxu1 %v4901_v8  ;;  %v4915_v8 = vld [vmem:[%s6347_s1 + $0x370] sm:$0xff]  }
  0xfb   :  { %v4150_v28 = vadd.f32 %v4149_v25, %v4148_v19  ;;  %2853 = vmatmul.mubr.bf16.gmra.mrb[108].mxu0 %v3600_v12  ;;  %v3632_v12 = vcombine.low %v5651_v32, %v5656_v33  ;;  %v4917_v13 = vld [vmem:[%s6347_s1 + $0x3f0] sm:$0xff]  }
  0xfc   :  { %v5645_v30 = vadd.f32 %v4147_v18, %v2303_v23  ;;  %v2306_v31 = vadd.f32 %v4056_v24, %v5626_v10  ;;  %2989 = vmatmul.mubr.bf16.gmra.mrb[108].mxu1 %v3602_v16  ;;  %2860 = vmatprep.mubr.bf16.mxu0 %v3617_v17  ;;  %v3634_v17 = vcombine.low %v5661_v34, %v5671_v38  ;;  %v4916_v23 = vld [vmem:[%s6347_s1 + $0x330] sm:$0xff]   ;;  %v105_v34 = vld [vmem:[%s6348_s0 + $0x2a0] sm:$0xff] }
  0xfd   :  { %2996 = vmatprep.mubr.bf16.mxu1 %v3619_v21  ;;  %4604 = vmatpush3.bf16.msra.mxu0 %v4900_v22  ;;  %v3649_v18 = vcombine.high %v5709_v0, %v5714_v1  ;;  %v3651_v22 = vcombine.high %v5719_v2, %v5729_v6 }
  0xfe   :  { %v5666_v36 = vadd.f32 %v4150_v28, %v2306_v31  ;;  %v4057_v37 = vpop.f32.mrb[4].mxu0  ;;  %4698 = vmatpush3.bf16.msra.mxu1 %v4902_v26  ;;  %4605 = vmatprep.subr.bf16.mxu0 %v4903_v27  ;;  %v4918_v27 = vld [vmem:[%s6347_s1 + $0x3b0] sm:$0xff]   ;;  %v4919_v28 = vld [vmem:[%s6347_s1 + $0x378] sm:$0xff]  }
  0xff   :  { %v4151_v41 = vpop.f32.mrb[4].mxu1  ;;  %v4058_v42 = vpop.f32.mrb[5].mxu0  ;;  %4699 = vmatprep.subr.bf16.mxu1 %v4905_v29  ;;  %v4921_v31 = vld [vmem:[%s6347_s1 + $0x3f8] sm:$0xff]  }
 0x100   :  { %v4059_v45 = vadd.f32 %v4058_v42, %v4057_v37  ;;  %v4152_v46 = vpop.f32.mrb[5].mxu1  ;;  %v4060_v47 = vpop.f32.mrb[6].mxu0  ;;  %v4920_v37 = vld [vmem:[%s6347_s1 + $0x338] sm:$0xff]  }
 0x101   :  { %v4153_v50 = vadd.f32 %v4152_v46, %v4151_v41  ;;  %v4154_v51 = vpop.f32.mrb[6].mxu1  ;;  %v4061_v52 = vpop.f32.mrb[7].mxu0  ;;  %4606 = vmatpush3.bf16.msra.mxu0 %v4904_v35  ;;  %v113_v35 = vld [vmem:[%s6348_s0 + $0x2e0] sm:$0xff]  ;;  %v114_v41 = vld [vmem:[%s6348_s0 + $0x2e8] sm:$0xff]  ;;  %v4922_v42 = vld [vmem:[%s6347_s1 + $0x3b8] sm:$0xff]  }
 0x102   :  { %v2311_v55 = vadd.f32 %v4059_v45, %v5626_v10  ;;  %v4062_v56 = vadd.f32 %v4061_v52, %v4060_v47  ;;  %v4155_v57 = vpop.f32.mrb[7].mxu1  ;;  %4700 = vmatpush3.bf16.msra.mxu1 %v4906_v39  ;;  %4607 = vmatprep.subr.bf16.mxu0 %v4907_v40  ;;  %v106_v40 = vld [vmem:[%s6348_s0 + $0x2a8] sm:$0xff]  ;;  %v3648_v45 = vcombine.low %v5709_v0, %v5714_v1 }
 0x103   :  { %v4156_v60 = vadd.f32 %v4155_v57, %v4154_v51  ;;  %2861 = vmatmul.mubr.bf16.gmra.mrb[112].mxu0 %v3616_v43  ;;  %4701 = vmatprep.subr.bf16.mxu1 %v4909_v44 }
 0x104   :  { %v5703_v62 = vadd.f32 %v4153_v50, %v2311_v55  ;;  %v2314_v63 = vadd.f32 %v4062_v56, %v5626_v10  ;;  %2997 = vmatmul.mubr.bf16.gmra.mrb[112].mxu1 %v3618_v48  ;;  %2868 = vmatprep.mubr.bf16.mxu0 %v3633_v49  ;;  %v3650_v49 = vcombine.low %v5719_v2, %v5729_v6  ;;  %v122_v2 = vld [vmem:[%s6348_s0 + $0x328] sm:$0xff] }
 0x105   :  { %3004 = vmatprep.mubr.bf16.mxu1 %v3635_v53  ;;  %4608 = vmatpush3.bf16.msra.mxu0 %v4908_v54  ;;  %v3665_v50 = vcombine.high %v105_v34, %v113_v35  ;;  %v3667_v54 = vcombine.high %v106_v40, %v114_v41 }
 0x106   :  { %v5724_v4 = vadd.f32 %v4156_v60, %v2314_v63  ;;  %v4063_v5 = vpop.f32.mrb[8].mxu0  ;;  %4702 = vmatpush3.bf16.msra.mxu1 %v4910_v58  ;;  %4609 = vmatprep.subr.bf16.mxu0 %v4911_v59  ;;  %v129_v63 = vld [vmem:[%s6348_s0 + $0x360] sm:$0xff] }
 0x107   :  { %v4157_v9 = vpop.f32.mrb[8].mxu1  ;;  %v4064_v11 = vpop.f32.mrb[9].mxu0  ;;  %4703 = vmatprep.subr.bf16.mxu1 %v4913_v61  ;;  %v121_v61 = vld [vmem:[%s6348_s0 + $0x320] sm:$0xff] }
 0x108   :  { %v4065_v14 = vadd.f32 %v4064_v11, %v4063_v5  ;;  %v4158_v15 = vpop.f32.mrb[9].mxu1  ;;  %v4066_v16 = vpop.f32.mrb[10].mxu0 }
 0x109   :  { %v4159_v19 = vadd.f32 %v4158_v15, %v4157_v9  ;;  %v4160_v20 = vpop.f32.mrb[10].mxu1  ;;  %v4067_v21 = vpop.f32.mrb[11].mxu0  ;;  %4610 = vmatpush3.bf16.msra.mxu0 %v4912_v3  ;;  %v130_v3 = vld [vmem:[%s6348_s0 + $0x368] sm:$0xff] }
 0x10a   :  { %v2319_v24 = vadd.f32 %v4065_v14, %v5626_v10  ;;  %v4068_v25 = vadd.f32 %v4067_v21, %v4066_v16  ;;  %v4161_v26 = vpop.f32.mrb[11].mxu1  ;;  %4704 = vmatpush3.bf16.msra.mxu1 %v4914_v7  ;;  %4611 = vmatprep.subr.bf16.mxu0 %v4915_v8  ;;  %v3664_v7 = vcombine.low %v105_v34, %v113_v35 }
 0x10b   :  { %v4162_v29 = vadd.f32 %v4161_v26, %v4160_v20  ;;  %2869 = vmatmul.mubr.bf16.gmra.mrb[116].mxu0 %v3632_v12  ;;  %4705 = vmatprep.subr.bf16.mxu1 %v4917_v13  ;;  %v3666_v12 = vcombine.low %v106_v40, %v114_v41  ;;  %v3681_v13 = vcombine.high %v121_v61, %v129_v63 }
 0x10c   :  { %v5761_v32 = vadd.f32 %v4159_v19, %v2319_v24  ;;  %v2322_v33 = vadd.f32 %v4068_v25, %v5626_v10  ;;  %3005 = vmatmul.mubr.bf16.gmra.mrb[116].mxu1 %v3634_v17  ;;  %2876 = vmatprep.mubr.bf16.mxu0 %v3649_v18  ;;  %v3683_v17 = vcombine.high %v122_v2, %v130_v3  ;;  %v137_v24 = vld [vmem:[%s6348_s0 + $0x3a0] sm:$0xff] }
 0x10d   :  { %3012 = vmatprep.mubr.bf16.mxu1 %v3651_v22  ;;  %4612 = vmatpush3.bf16.msra.mxu0 %v4916_v23  ;;  %v145_v25 = vld [vmem:[%s6348_s0 + $0x3e0] sm:$0xff]  ;;  %v3680_v34 = vcombine.low %v121_v61, %v129_v63  ;;  %v3682_v40 = vcombine.low %v122_v2, %v130_v3 }
 0x10e   :  { %v5773_v38 = vadd.f32 %v4162_v29, %v2322_v33  ;;  %v4069_v39 = vpop.f32.mrb[12].mxu0  ;;  %4706 = vmatpush3.bf16.msra.mxu1 %v4918_v27  ;;  %4613 = vmatprep.subr.bf16.mxu0 %v4919_v28  ;;  %v138_v28 = vld [vmem:[%s6348_s0 + $0x3a8] sm:$0xff]  ;;  %v3697_v41 = vcombine.high %v137_v24, %v145_v25  ;;  %v3696_v61 = vcombine.low %v137_v24, %v145_v25 }
 0x10f   :  { %v4163_v43 = vpop.f32.mrb[12].mxu1  ;;  %v4070_v44 = vpop.f32.mrb[13].mxu0  ;;  %4707 = vmatprep.subr.bf16.mxu1 %v4921_v31  ;;  %v146_v29 = vld [vmem:[%s6348_s0 + $0x3e8] sm:$0xff] }
 0x110   :  { %v4071_v46 = vadd.f32 %v4070_v44, %v4069_v39  ;;  %v4164_v47 = vpop.f32.mrb[13].mxu1  ;;  %v4072_v48 = vpop.f32.mrb[14].mxu0  ;;  %v3698_v3 = vcombine.low %v138_v28, %v146_v29 }
 0x111   :  { %v4165_v51 = vadd.f32 %v4164_v47, %v4163_v43  ;;  %v4166_v52 = vpop.f32.mrb[14].mxu1  ;;  %v4073_v53 = vpop.f32.mrb[15].mxu0  ;;  %4614 = vmatpush3.bf16.msra.mxu0 %v4920_v37 }
 0x112   :  { %v2327_v55 = vadd.f32 %v4071_v46, %v5626_v10  ;;  %v4074_v56 = vadd.f32 %v4073_v53, %v4072_v48  ;;  %v4167_v57 = vpop.f32.mrb[15].mxu1  ;;  %4708 = vmatpush3.bf16.msra.mxu1 %v4922_v42  ;;  %v161_v53 = vld [vmem:[%s6348_s0 + $0x460] sm:$0xff] }
 0x113   :  { %v4168_v58 = vadd.f32 %v4167_v57, %v4166_v52  ;;  %2877 = vmatmul.mubr.bf16.gmra.mrb[120].mxu0 %v3648_v45  ;;  %v3699_v45 = vcombine.high %v138_v28, %v146_v29  ;;  %v153_v52 = vld [vmem:[%s6348_s0 + $0x420] sm:$0xff]  ;;  %v162_v57 = vld [vmem:[%s6348_s0 + $0x468] sm:$0xff] }
 0x114   :  { %v5789_v59 = vadd.f32 %v4165_v51, %v2327_v55  ;;  %v2330_v60 = vadd.f32 %v4074_v56, %v5626_v10  ;;  %3013 = vmatmul.mubr.bf16.gmra.mrb[120].mxu1 %v3650_v49  ;;  %2884 = vmatprep.mubr.bf16.mxu0 %v3665_v50  ;;  %v154_v56 = vld [vmem:[%s6348_s0 + $0x428] sm:$0xff] }
 0x115   :  { %3020 = vmatprep.mubr.bf16.mxu1 %v3667_v54 }
 0x116   :  { %v5798_v0 = vadd.f32 %v4168_v58, %v2330_v60  ;;  %v4075_v1 = vpop.f32.mrb[16].mxu0 }
 0x117   :  { %v4169_v5 = vpop.f32.mrb[16].mxu1  ;;  %v4076_v6 = vpop.f32.mrb[17].mxu0 }
 0x118   :  { %v4077_v8 = vadd.f32 %v4076_v6, %v4075_v1  ;;  %v4170_v9 = vpop.f32.mrb[17].mxu1  ;;  %v4078_v11 = vpop.f32.mrb[18].mxu0 }
 0x119   :  { %v4171_v14 = vadd.f32 %v4170_v9, %v4169_v5  ;;  %v4172_v15 = vpop.f32.mrb[18].mxu1  ;;  %v4079_v16 = vpop.f32.mrb[19].mxu0  ;;  %v3713_v5 = vcombine.high %v153_v52, %v161_v53  ;;  %v3715_v9 = vcombine.high %v154_v56, %v162_v57 }
 0x11a   :  { %v2335_v18 = vadd.f32 %v4077_v8, %v5626_v10  ;;  %v4080_v19 = vadd.f32 %v4079_v16, %v4078_v11  ;;  %v4173_v20 = vpop.f32.mrb[19].mxu1 }
 0x11b   :  { %v4174_v21 = vadd.f32 %v4173_v20, %v4172_v15  ;;  %2885 = vmatmul.mubr.bf16.gmra.mrb[124].mxu0 %v3664_v7 }
 0x11c   :  { %v5807_v22 = vadd.f32 %v4171_v14, %v2335_v18  ;;  %v2338_v23 = vadd.f32 %v4080_v19, %v5626_v10  ;;  %3021 = vmatmul.mubr.bf16.gmra.mrb[124].mxu1 %v3666_v12  ;;  %2892 = vmatprep.mubr.bf16.mxu0 %v3681_v13  ;;  %v177_v18 = vld [vmem:[%s6348_s0 + $0x4e0] sm:$0xff] }
 0x11d   :  { %3028 = vmatprep.mubr.bf16.mxu1 %v3683_v17  ;;  %v169_v17 = vld [vmem:[%s6348_s0 + $0x4a0] sm:$0xff] }
 0x11e   :  { %v5816_v26 = vadd.f32 %v4174_v21, %v2338_v23  ;;  %v4081_v27 = vpop.f32.mrb[20].mxu0  ;;  %v170_v21 = vld [vmem:[%s6348_s0 + $0x4a8] sm:$0xff] }
 0x11f   :  { %v4175_v31 = vpop.f32.mrb[20].mxu1  ;;  %v4082_v33 = vpop.f32.mrb[21].mxu0  ;;  %v178_v23 = vld [vmem:[%s6348_s0 + $0x4e8] sm:$0xff] }
 0x120   :  { %v4083_v35 = vadd.f32 %v4082_v33, %v4081_v27  ;;  %v4176_v37 = vpop.f32.mrb[21].mxu1  ;;  %v4084_v39 = vpop.f32.mrb[22].mxu0  ;;  %v3712_v27 = vcombine.low %v153_v52, %v161_v53  ;;  %v3714_v33 = vcombine.low %v154_v56, %v162_v57  ;;  %v186_v52 = vld [vmem:[%s6348_s0 + $0x528] sm:$0xff]  ;;  %v3728_v57 = vcombine.low %v169_v17, %v177_v18 }
 0x121   :  { %v4177_v42 = vadd.f32 %v4176_v37, %v4175_v31  ;;  %v4178_v43 = vpop.f32.mrb[22].mxu1  ;;  %v4085_v44 = vpop.f32.mrb[23].mxu0  ;;  %v194_v53 = vld [vmem:[%s6348_s0 + $0x568] sm:$0xff] }
 0x122   :  { %v2343_v46 = vadd.f32 %v4083_v35, %v5626_v10  ;;  %v4086_v47 = vadd.f32 %v4085_v44, %v4084_v39  ;;  %v4179_v48 = vpop.f32.mrb[23].mxu1 }
 0x123   :  { %v4180_v49 = vadd.f32 %v4179_v48, %v4178_v43  ;;  %2893 = vmatmul.mubr.bf16.gmra.mrb[128].mxu0 %v3680_v34  ;;  %v3729_v34 = vcombine.high %v169_v17, %v177_v18  ;;  %v193_v48 = vld [vmem:[%s6348_s0 + $0x560] sm:$0xff] }
 0x124   :  { %v5825_v50 = vadd.f32 %v4177_v42, %v2343_v46  ;;  %v2346_v51 = vadd.f32 %v4086_v47, %v5626_v10  ;;  %3029 = vmatmul.mubr.bf16.gmra.mrb[128].mxu1 %v3682_v40  ;;  %2900 = vmatprep.mubr.bf16.mxu0 %v3697_v41  ;;  %v3731_v40 = vcombine.high %v170_v21, %v178_v23  ;;  %v185_v47 = vld [vmem:[%s6348_s0 + $0x520] sm:$0xff] }
 0x125   :  { %3036 = vmatprep.mubr.bf16.mxu1 %v3699_v45 }
 0x126   :  { %v5834_v54 = vadd.f32 %v4180_v49, %v2346_v51  ;;  %v4087_v55 = vpop.f32.mrb[24].mxu0 }
 0x127   :  { %v4181_v58 = vpop.f32.mrb[24].mxu1  ;;  %v4088_v60 = vpop.f32.mrb[25].mxu0 }
 0x128   :  { %v4089_v63 = vadd.f32 %v4088_v60, %v4087_v55  ;;  %v4182_v1 = vpop.f32.mrb[25].mxu1  ;;  %v4090_v2 = vpop.f32.mrb[26].mxu0 }
 0x129   :  { %v4183_v6 = vadd.f32 %v4182_v1, %v4181_v58  ;;  %v4184_v7 = vpop.f32.mrb[26].mxu1  ;;  %v4091_v8 = vpop.f32.mrb[27].mxu0  ;;  %v3745_v1 = vcombine.high %v185_v47, %v193_v48 }
 0x12a   :  { %v2351_v11 = vadd.f32 %v4089_v63, %v5626_v10  ;;  %v4092_v12 = vadd.f32 %v4091_v8, %v4090_v2  ;;  %v4185_v13 = vpop.f32.mrb[27].mxu1  ;;  %v3730_v63 = vcombine.low %v170_v21, %v178_v23  ;;  %v210_v21 = vld [vmem:[%s6348_s0 + $0x5e8] sm:$0xff] }
 0x12b   :  { %v4186_v14 = vadd.f32 %v4185_v13, %v4184_v7  ;;  %2901 = vmatmul.mubr.bf16.gmra.mrb[132].mxu0 %v3696_v61 }
 0x12c   :  { %v5843_v15 = vadd.f32 %v4183_v6, %v2351_v11  ;;  %v2354_v16 = vadd.f32 %v4092_v12, %v5626_v10  ;;  %3037 = vmatmul.mubr.bf16.gmra.mrb[132].mxu1 %v3698_v3  ;;  %2908 = vmatprep.mubr.bf16.mxu0 %v3713_v5  ;;  %v3747_v6 = vcombine.high %v186_v52, %v194_v53 }
 0x12d   :  { %3044 = vmatprep.mubr.bf16.mxu1 %v3715_v9 }
 0x12e   :  { %v5852_v19 = vadd.f32 %v4186_v14, %v2354_v16  ;;  %v4093_v20 = vpop.f32.mrb[28].mxu0  ;;  %v201_v14 = vld [vmem:[%s6348_s0 + $0x5a0] sm:$0xff] }
 0x12f   :  { %v4187_v24 = vpop.f32.mrb[28].mxu1  ;;  %v4094_v25 = vpop.f32.mrb[29].mxu0  ;;  %v209_v16 = vld [vmem:[%s6348_s0 + $0x5e0] sm:$0xff] }
 0x130   :  { %v4095_v28 = vadd.f32 %v4094_v25, %v4093_v20  ;;  %v4188_v29 = vpop.f32.mrb[29].mxu1  ;;  %v4096_v31 = vpop.f32.mrb[30].mxu0  ;;  %v202_v20 = vld [vmem:[%s6348_s0 + $0x5a8] sm:$0xff]  ;;  %v3744_v25 = vcombine.low %v185_v47, %v193_v48  ;;  %v217_v47 = vld [vmem:[%s6348_s0 + $0x620] sm:$0xff] }
 0x131   :  { %v4189_v35 = vadd.f32 %v4188_v29, %v4187_v24  ;;  %v4190_v37 = vpop.f32.mrb[30].mxu1  ;;  %v4097_v39 = vpop.f32.mrb[31].mxu0 }
 0x132   :  { %v2359_v41 = vadd.f32 %v4095_v28, %v5626_v10  ;;  %v4098_v42 = vadd.f32 %v4097_v39, %v4096_v31  ;;  %v4191_v43 = vpop.f32.mrb[31].mxu1  ;;  %v3746_v31 = vcombine.low %v186_v52, %v194_v53  ;;  %v3763_v39 = vcombine.high %v202_v20, %v210_v21  ;;  %v218_v52 = vld [vmem:[%s6348_s0 + $0x628] sm:$0xff] }
 0x133   :  { %v4192_v44 = vadd.f32 %v4191_v43, %v4190_v37  ;;  %2909 = vmatmul.mubr.bf16.gmra.mrb[136].mxu0 %v3712_v27 }
 0x134   :  { %v5861_v45 = vadd.f32 %v4189_v35, %v2359_v41  ;;  %v2362_v46 = vadd.f32 %v4098_v42, %v5626_v10  ;;  %3045 = vmatmul.mubr.bf16.gmra.mrb[136].mxu1 %v3714_v33  ;;  %2916 = vmatprep.mubr.bf16.mxu0 %v3729_v34  ;;  %v3761_v33 = vcombine.high %v201_v14, %v209_v16 }
 0x135   :  { %3052 = vmatprep.mubr.bf16.mxu1 %v3731_v40 }
 0x136   :  { %v5870_v49 = vadd.f32 %v4192_v44, %v2362_v46  ;;  %v4099_v51 = vpop.f32.mrb[32].mxu0 }
 0x137   :  { %v4193_v55 = vpop.f32.mrb[32].mxu1  ;;  %v4100_v56 = vpop.f32.mrb[33].mxu0 }
 0x138   :  { %v4101_v58 = vadd.f32 %v4100_v56, %v4099_v51  ;;  %v4194_v60 = vpop.f32.mrb[33].mxu1  ;;  %v4102_v61 = vpop.f32.mrb[34].mxu0  ;;  %v3760_v56 = vcombine.low %v201_v14, %v209_v16  ;;  %v27_v14 = vld [vmem:[%s6348_s0 + $0x30] sm:$0xff] }
 0x139   :  { %v4195_v2 = vadd.f32 %v4194_v60, %v4193_v55  ;;  %v4196_v3 = vpop.f32.mrb[34].mxu1  ;;  %v4103_v5 = vpop.f32.mrb[35].mxu0  ;;  %v35_v16 = vld [vmem:[%s6348_s0 + $0x70] sm:$0xff] }
 0x13a   :  { %v2367_v7 = vadd.f32 %v4101_v58, %v5626_v10  ;;  %v4104_v8 = vadd.f32 %v4103_v5, %v4102_v61  ;;  %v4197_v9 = vpop.f32.mrb[35].mxu1  ;;  %v3762_v61 = vcombine.low %v202_v20, %v210_v21  ;;  %v3779_v5 = vcombine.high %v218_v52, %v218_v52  ;;  %v28_v21 = vld [vmem:[%s6348_s0 + $0x38] sm:$0xff] }
 0x13b   :  { %v4198_v11 = vadd.f32 %v4197_v9, %v4196_v3  ;;  %2917 = vmatmul.mubr.bf16.gmra.mrb[140].mxu0 %v3728_v57 }
 0x13c   :  { %v5879_v12 = vadd.f32 %v4195_v2, %v2367_v7  ;;  %v2370_v13 = vadd.f32 %v4104_v8, %v5626_v10  ;;  %3053 = vmatmul.mubr.bf16.gmra.mrb[140].mxu1 %v3730_v63  ;;  %2924 = vmatprep.mubr.bf16.mxu0 %v3745_v1  ;;  %v3777_v63 = vcombine.high %v217_v47, %v217_v47 }
 0x13d   :  { %3060 = vmatprep.mubr.bf16.mxu1 %v3747_v6 }
 0x13e   :  { %v5888_v17 = vadd.f32 %v4198_v11, %v2370_v13  ;;  %v4105_v18 = vpop.f32.mrb[36].mxu0 }
 0x13f   :  { %v4199_v23 = vpop.f32.mrb[36].mxu1  ;;  %v4106_v24 = vpop.f32.mrb[37].mxu0 }
 0x140   :  { %v4107_v27 = vadd.f32 %v4106_v24, %v4105_v18  ;;  %v4200_v28 = vpop.f32.mrb[37].mxu1  ;;  %v4108_v29 = vpop.f32.mrb[38].mxu0 }
 0x141   :  { %v4201_v34 = vadd.f32 %v4200_v28, %v4199_v23  ;;  %v4202_v35 = vpop.f32.mrb[38].mxu1  ;;  %v4109_v37 = vpop.f32.mrb[39].mxu0  ;;  %v36_v23 = vld [vmem:[%s6348_s0 + $0x78] sm:$0xff] }
 0x142   :  { %v2375_v40 = vadd.f32 %v4107_v27, %v5626_v10  ;;  %v4110_v41 = vadd.f32 %v4109_v37, %v4108_v29  ;;  %v4203_v42 = vpop.f32.mrb[39].mxu1  ;;  %v3776_v27 = vcombine.low %v217_v47, %v217_v47  ;;  %v43_v47 = vld [vmem:[%s6348_s0 + $0xb0] sm:$0xff] }
 0x143   :  { %v4204_v43 = vadd.f32 %v4203_v42, %v4202_v35  ;;  %2925 = vmatmul.mubr.bf16.gmra.mrb[144].mxu0 %v3744_v25 }
 0x144   :  { %v5897_v44 = vadd.f32 %v4201_v34, %v2375_v40  ;;  %v2378_v46 = vadd.f32 %v4110_v41, %v5626_v10  ;;  %3061 = vmatmul.mubr.bf16.gmra.mrb[144].mxu1 %v3746_v31  ;;  %2932 = vmatprep.mubr.bf16.mxu0 %v3761_v33  ;;  %v3778_v33 = vcombine.low %v218_v52, %v218_v52  ;;  %v51_v52 = vld [vmem:[%s6348_s0 + $0xf0] sm:$0xff] }
 0x145   :  { %3068 = vmatprep.mubr.bf16.mxu1 %v3763_v39  ;;  %v3589_v34 = vcombine.high %v27_v14, %v35_v16  ;;  %v3591_v40 = vcombine.high %v28_v21, %v36_v23 }
 0x146   :  { %v5903_v48 = vadd.f32 %v4204_v43, %v2378_v46  ;;  %v4111_v51 = vpop.f32.mrb[40].mxu0 }
 0x147   :  { %v4205_v53 = vpop.f32.mrb[40].mxu1  ;;  %v4112_v55 = vpop.f32.mrb[41].mxu0 }
 0x148   :  { %v4113_v57 = vadd.f32 %v4112_v55, %v4111_v51  ;;  %v4206_v58 = vpop.f32.mrb[41].mxu1  ;;  %v4114_v60 = vpop.f32.mrb[42].mxu0 }
 0x149   :  { %v4207_v1 = vadd.f32 %v4206_v58, %v4205_v53  ;;  %v4208_v2 = vpop.f32.mrb[42].mxu1  ;;  %v4115_v3 = vpop.f32.mrb[43].mxu0  ;;  %v52_v58 = vld [vmem:[%s6348_s0 + $0xf8] sm:$0xff] }
 0x14a   :  { %v2383_v6 = vadd.f32 %v4113_v57, %v5626_v10  ;;  %v4116_v7 = vadd.f32 %v4115_v3, %v4114_v60  ;;  %v4209_v8 = vpop.f32.mrb[43].mxu1  ;;  %v44_v57 = vld [vmem:[%s6348_s0 + $0xb8] sm:$0xff] }
 0x14b   :  { %v4210_v9 = vadd.f32 %v4209_v8, %v4208_v2  ;;  %2933 = vmatmul.mubr.bf16.gmra.mrb[148].mxu0 %v3760_v56 }
 0x14c   :  { %v5909_v11 = vadd.f32 %v4207_v1, %v2383_v6  ;;  %v2386_v13 = vadd.f32 %v4116_v7, %v5626_v10  ;;  %3069 = vmatmul.mubr.bf16.gmra.mrb[148].mxu1 %v3762_v61  ;;  %2940 = vmatprep.mubr.bf16.mxu0 %v3777_v63  ;;  %v3588_v63 = vcombine.low %v27_v14, %v35_v16  ;;  %v59_v14 = vld [vmem:[%s6348_s0 + $0x130] sm:$0xff] }
 0x14d   :  { %3076 = vmatprep.mubr.bf16.mxu1 %v3779_v5  ;;  %v3590_v5 = vcombine.low %v28_v21, %v36_v23  ;;  %v3605_v6 = vcombine.high %v43_v47, %v51_v52  ;;  %v67_v16 = vld [vmem:[%s6348_s0 + $0x170] sm:$0xff]  ;;  %v68_v23 = vld [vmem:[%s6348_s0 + $0x178] sm:$0xff] }
 0x14e   :  { %v5918_v18 = vadd.f32 %v4210_v9, %v2386_v13  ;;  %v4117_v20 = vpop.f32.mrb[44].mxu0  ;;  %v3607_v13 = vcombine.high %v44_v57, %v52_v58 }
 0x14f   :  { %v4211_v24 = vpop.f32.mrb[44].mxu1  ;;  %v4118_v25 = vpop.f32.mrb[45].mxu0 }
 0x150   :  { %v4119_v28 = vadd.f32 %v4118_v25, %v4117_v20  ;;  %v4212_v29 = vpop.f32.mrb[45].mxu1  ;;  %v4120_v31 = vpop.f32.mrb[46].mxu0 }
 0x151   :  { %v4213_v35 = vadd.f32 %v4212_v29, %v4211_v24  ;;  %v4214_v37 = vpop.f32.mrb[46].mxu1  ;;  %v4121_v39 = vpop.f32.mrb[47].mxu0  ;;  %v3604_v29 = vcombine.low %v43_v47, %v51_v52  ;;  %v75_v47 = vld [vmem:[%s6348_s0 + $0x1b0] sm:$0xff] }
 0x152   :  { %v2391_v41 = vadd.f32 %v4119_v28, %v5626_v10  ;;  %v4122_v42 = vadd.f32 %v4121_v39, %v4120_v31  ;;  %v4215_v43 = vpop.f32.mrb[47].mxu1  ;;  %v83_v52 = vld [vmem:[%s6348_s0 + $0x1f0] sm:$0xff] }
 0x153   :  { %v4216_v46 = vadd.f32 %v4215_v43, %v4214_v37  ;;  %2941 = vmatmul.mubr.bf16.gmra.mrb[152].mxu0 %v3776_v27  ;;  %v3621_v37 = vcombine.high %v59_v14, %v67_v16 }
 0x154   :  { %v5927_v51 = vadd.f32 %v4213_v35, %v2391_v41  ;;  %v2394_v53 = vadd.f32 %v4122_v42, %v5626_v10  ;;  %3077 = vmatmul.mubr.bf16.gmra.mrb[152].mxu1 %v3778_v33  ;;  %3116 = vmatprep.mubr.bf16.mxu0 %v3589_v34  ;;  %v3606_v35 = vcombine.low %v44_v57, %v52_v58  ;;  %v76_v58 = vld [vmem:[%s6348_s0 + $0x1b8] sm:$0xff] }
 0x155   :  { %3252 = vmatprep.mubr.bf16.mxu1 %v3591_v40 }
 0x156   :  { %v5936_v55 = vadd.f32 %v4216_v46, %v2394_v53  ;;  %v4123_v56 = vpop.f32.mrb[48].mxu0 }
 0x157   :  { %v4217_v60 = vpop.f32.mrb[48].mxu1  ;;  %v4124_v61 = vpop.f32.mrb[49].mxu0 }
 0x158   :  { %v4125_v1 = vadd.f32 %v4124_v61, %v4123_v56  ;;  %v4218_v2 = vpop.f32.mrb[49].mxu1  ;;  %v4126_v3 = vpop.f32.mrb[50].mxu0 }
 0x159   :  { %v4219_v7 = vadd.f32 %v4218_v2, %v4217_v60  ;;  %v4220_v8 = vpop.f32.mrb[50].mxu1  ;;  %v4127_v9 = vpop.f32.mrb[51].mxu0  ;;  %v3620_v2 = vcombine.low %v59_v14, %v67_v16  ;;  %v91_v14 = vld [vmem:[%s6348_s0 + $0x230] sm:$0xff] }
 0x15a   :  { %v2399_v20 = vadd.f32 %v4125_v1, %v5626_v10  ;;  %v4221_v24 = vpop.f32.mrb[51].mxu1  ;;  %v60_v10 = vld [vmem:[%s6348_s0 + $0x138] sm:$0xff]  ;;  %v3637_v8 = vcombine.high %v75_v47, %v83_v52  ;;  %v99_v16 = vld [vmem:[%s6348_s0 + $0x270] sm:$0xff] }
 0x15b   :  { %3117 = vmatmul.mubr.bf16.vlgmr.msra.gmra.mrb[156].mxu0 %v3588_v63  ;;  %v3623_v42 = vcombine.high %v60_v10, %v68_v23 }
 0x15c   :  { %v5945_v25 = vadd.f32 %v4219_v7, %v2399_v20  ;;  %3253 = vmatmul.mubr.bf16.vlgmr.msra.gmra.mrb[156].mxu1 %v3590_v5  ;;  %3124 = vmatprep.mubr.bf16.mxu0 %v3605_v6  ;;  %v3622_v7 = vcombine.low %v60_v10, %v68_v23  ;;  %v92_v23 = vld [vmem:[%s6348_s0 + $0x238] sm:$0xff] }
 0x15d   :  { %3260 = vmatprep.mubr.bf16.mxu1 %v3607_v13 }
 0x15e   :  { %v4239_v21 = vpop.f32.mrb[52].mxu0 }
 0x15f   :  { %v4333_v27 = vpop.f32.mrb[52].mxu1  ;;  %v4240_v28 = vpop.f32.mrb[53].mxu0 }
 0x160   :  { %v4241_v31 = vadd.f32 %v4240_v28, %v4239_v21  ;;  %v4334_v33 = vpop.f32.mrb[53].mxu1  ;;  %v4242_v34 = vpop.f32.mrb[54].mxu0 }
 0x161   :  { %v4335_v39 = vadd.f32 %v4334_v33, %v4333_v27  ;;  %v4336_v40 = vpop.f32.mrb[54].mxu1  ;;  %v4243_v41 = vpop.f32.mrb[55].mxu0 }
 0x162   :  { %v2575_v43 = vadd.f32 %v4241_v31, %v5645_v30  ;;  %v4244_v46 = vadd.f32 %v4243_v41, %v4242_v34  ;;  %v4337_v53 = vpop.f32.mrb[55].mxu1 }
 0x163   :  { %v4338_v56 = vadd.f32 %v4337_v53, %v4336_v40  ;;  %3125 = vmatmul.mubr.bf16.gmra.mrb[160].mxu0 %v3604_v29 }
 0x164   :  { %v5960_v60 = vadd.f32 %v4335_v39, %v2575_v43  ;;  %v2578_v61 = vadd.f32 %v4244_v46, %v5666_v36  ;;  %3261 = vmatmul.mubr.bf16.gmra.mrb[160].mxu1 %v3606_v35  ;;  %3132 = vmatprep.mubr.bf16.mxu0 %v3621_v37  ;;  %v84_v36 = vld [vmem:[%s6348_s0 + $0x1f8] sm:$0xff]  ;;  %v3636_v37 = vcombine.low %v75_v47, %v83_v52  ;;  %v107_v47 = vld [vmem:[%s6348_s0 + $0x2b0] sm:$0xff] }
 0x165   :  { %3268 = vmatprep.mubr.bf16.mxu1 %v3623_v42  ;;  %v3639_v24 = vcombine.high %v76_v58, %v84_v36  ;;  %v3638_v42 = vcombine.low %v76_v58, %v84_v36  ;;  %v3653_v43 = vcombine.high %v91_v14, %v99_v16  ;;  %v115_v52 = vld [vmem:[%s6348_s0 + $0x2f0] sm:$0xff]  ;;  %v108_v36 = vld [vmem:[%s6348_s0 + $0x2b8] sm:$0xff] }
 0x166   :  { %v5969_v30 = vadd.f32 %v4338_v56, %v2578_v61  ;;  %v4245_v57 = vpop.f32.mrb[56].mxu0 }
 0x167   :  { %v4339_v63 = vpop.f32.mrb[56].mxu1  ;;  %v4246_v1 = vpop.f32.mrb[57].mxu0 }
 0x168   :  { %v4247_v3 = vadd.f32 %v4246_v1, %v4245_v57  ;;  %v4340_v5 = vpop.f32.mrb[57].mxu1  ;;  %v4248_v6 = vpop.f32.mrb[58].mxu0 }
 0x169   :  { %v4341_v9 = vadd.f32 %v4340_v5, %v4339_v63  ;;  %v4342_v13 = vpop.f32.mrb[58].mxu1  ;;  %v4249_v20 = vpop.f32.mrb[59].mxu0 }
 0x16a   :  { %v2583_v21 = vadd.f32 %v4247_v3, %v5703_v62  ;;  %v4250_v27 = vadd.f32 %v4249_v20, %v4248_v6  ;;  %v4343_v28 = vpop.f32.mrb[59].mxu1 }
 0x16b   :  { %v4344_v29 = vadd.f32 %v4343_v28, %v4342_v13  ;;  %3133 = vmatmul.mubr.bf16.gmra.mrb[164].mxu0 %v3620_v2 }
 0x16c   :  { %v5978_v31 = vadd.f32 %v4341_v9, %v2583_v21  ;;  %v2586_v33 = vadd.f32 %v4250_v27, %v5724_v4  ;;  %3269 = vmatmul.mubr.bf16.gmra.mrb[164].mxu1 %v3622_v7  ;;  %3140 = vmatprep.mubr.bf16.mxu0 %v3637_v8  ;;  %v100_v4 = vld [vmem:[%s6348_s0 + $0x278] sm:$0xff]  ;;  %v3652_v8 = vcombine.low %v91_v14, %v99_v16  ;;  %v123_v14 = vld [vmem:[%s6348_s0 + $0x330] sm:$0xff] }
 0x16d   :  { %3276 = vmatprep.mubr.bf16.mxu1 %v3639_v24  ;;  %v3655_v61 = vcombine.high %v92_v23, %v100_v4  ;;  %v3654_v24 = vcombine.low %v92_v23, %v100_v4  ;;  %v3669_v21 = vcombine.high %v107_v47, %v115_v52  ;;  %v131_v16 = vld [vmem:[%s6348_s0 + $0x370] sm:$0xff]  ;;  %v124_v4 = vld [vmem:[%s6348_s0 + $0x338] sm:$0xff] }
 0x16e   :  { %v5987_v62 = vadd.f32 %v4344_v29, %v2586_v33  ;;  %v4251_v10 = vpop.f32.mrb[60].mxu0 }
 0x16f   :  { %v4345_v34 = vpop.f32.mrb[60].mxu1  ;;  %v4252_v35 = vpop.f32.mrb[61].mxu0 }
 0x170   :  { %v4253_v39 = vadd.f32 %v4252_v35, %v4251_v10  ;;  %v4346_v40 = vpop.f32.mrb[61].mxu1  ;;  %v4254_v41 = vpop.f32.mrb[62].mxu0 }
 0x171   :  { %v4347_v46 = vadd.f32 %v4346_v40, %v4345_v34  ;;  %v4348_v53 = vpop.f32.mrb[62].mxu1  ;;  %v4255_v56 = vpop.f32.mrb[63].mxu0 }
 0x172   :  { %v2591_v57 = vadd.f32 %v4253_v39, %v5761_v32  ;;  %v4256_v63 = vadd.f32 %v4255_v56, %v4254_v41  ;;  %v4349_v1 = vpop.f32.mrb[63].mxu1 }
 0x173   :  { %v4350_v2 = vadd.f32 %v4349_v1, %v4348_v53  ;;  %3141 = vmatmul.mubr.bf16.gmra.mrb[168].mxu0 %v3636_v37 }
 0x174   :  { %v5996_v3 = vadd.f32 %v4347_v46, %v2591_v57  ;;  %v2594_v5 = vadd.f32 %v4256_v63, %v5773_v38  ;;  %3277 = vmatmul.mubr.bf16.gmra.mrb[168].mxu1 %v3638_v42  ;;  %3148 = vmatprep.mubr.bf16.mxu0 %v3653_v43  ;;  %v116_v38 = vld [vmem:[%s6348_s0 + $0x2f8] sm:$0xff]  ;;  %v3668_v43 = vcombine.low %v107_v47, %v115_v52  ;;  %v139_v47 = vld [vmem:[%s6348_s0 + $0x3b0] sm:$0xff] }
 0x175   :  { %3284 = vmatprep.mubr.bf16.mxu1 %v3655_v61  ;;  %v3671_v33 = vcombine.high %v108_v36, %v116_v38  ;;  %v3670_v61 = vcombine.low %v108_v36, %v116_v38  ;;  %v3685_v57 = vcombine.high %v123_v14, %v131_v16  ;;  %v147_v52 = vld [vmem:[%s6348_s0 + $0x3f0] sm:$0xff]  ;;  %v140_v38 = vld [vmem:[%s6348_s0 + $0x3b8] sm:$0xff] }
 0x176   :  { %v6005_v32 = vadd.f32 %v4350_v2, %v2594_v5  ;;  %v4257_v58 = vpop.f32.mrb[64].mxu0 }
 0x177   :  { %v4351_v6 = vpop.f32.mrb[64].mxu1  ;;  %v4258_v7 = vpop.f32.mrb[65].mxu0 }
 0x178   :  { %v4259_v9 = vadd.f32 %v4258_v7, %v4257_v58  ;;  %v4352_v13 = vpop.f32.mrb[65].mxu1  ;;  %v4260_v20 = vpop.f32.mrb[66].mxu0 }
 0x179   :  { %v4353_v27 = vadd.f32 %v4352_v13, %v4351_v6  ;;  %v4354_v28 = vpop.f32.mrb[66].mxu1  ;;  %v4261_v29 = vpop.f32.mrb[67].mxu0 }
 0x17a   :  { %v2599_v10 = vadd.f32 %v4259_v9, %v5789_v59  ;;  %v4262_v34 = vadd.f32 %v4261_v29, %v4260_v20  ;;  %v4355_v35 = vpop.f32.mrb[67].mxu1 }
 0x17b   :  { %v4356_v37 = vadd.f32 %v4355_v35, %v4354_v28  ;;  %3149 = vmatmul.mubr.bf16.gmra.mrb[172].mxu0 %v3652_v8 }
 0x17c   :  { %v6014_v39 = vadd.f32 %v4353_v27, %v2599_v10  ;;  %v2602_v40 = vadd.f32 %v4262_v34, %v5798_v0  ;;  %3285 = vmatmul.mubr.bf16.gmra.mrb[172].mxu1 %v3654_v24  ;;  %3156 = vmatprep.mubr.bf16.mxu0 %v3669_v21  ;;  %v132_v0 = vld [vmem:[%s6348_s0 + $0x378] sm:$0xff]  ;;  %v3684_v21 = vcombine.low %v123_v14, %v131_v16  ;;  %v155_v14 = vld [vmem:[%s6348_s0 + $0x430] sm:$0xff] }
 0x17d   :  { %3292 = vmatprep.mubr.bf16.mxu1 %v3671_v33  ;;  %v3687_v5 = vcombine.high %v124_v4, %v132_v0  ;;  %v3686_v33 = vcombine.low %v124_v4, %v132_v0  ;;  %v3701_v10 = vcombine.high %v139_v47, %v147_v52  ;;  %v163_v16 = vld [vmem:[%s6348_s0 + $0x470] sm:$0xff]  ;;  %v156_v0 = vld [vmem:[%s6348_s0 + $0x438] sm:$0xff] }
 0x17e   :  { %v6023_v59 = vadd.f32 %v4356_v37, %v2602_v40  ;;  %v4263_v23 = vpop.f32.mrb[68].mxu0 }
 0x17f   :  { %v4357_v41 = vpop.f32.mrb[68].mxu1  ;;  %v4264_v42 = vpop.f32.mrb[69].mxu0 }
 0x180   :  { %v4265_v46 = vadd.f32 %v4264_v42, %v4263_v23  ;;  %v4358_v53 = vpop.f32.mrb[69].mxu1  ;;  %v4266_v56 = vpop.f32.mrb[70].mxu0 }
 0x181   :  { %v4359_v63 = vadd.f32 %v4358_v53, %v4357_v41  ;;  %v4360_v1 = vpop.f32.mrb[70].mxu1  ;;  %v4267_v2 = vpop.f32.mrb[71].mxu0 }
 0x182   :  { %v2607_v58 = vadd.f32 %v4265_v46, %v5807_v22  ;;  %v4268_v6 = vadd.f32 %v4267_v2, %v4266_v56  ;;  %v4361_v7 = vpop.f32.mrb[71].mxu1 }
 0x183   :  { %v4362_v8 = vadd.f32 %v4361_v7, %v4360_v1  ;;  %3157 = vmatmul.mubr.bf16.gmra.mrb[176].mxu0 %v3668_v43 }
 0x184   :  { %v6032_v9 = vadd.f32 %v4359_v63, %v2607_v58  ;;  %v2610_v13 = vadd.f32 %v4268_v6, %v5816_v26  ;;  %3293 = vmatmul.mubr.bf16.gmra.mrb[176].mxu1 %v3670_v61  ;;  %3164 = vmatprep.mubr.bf16.mxu0 %v3685_v57  ;;  %v148_v26 = vld [vmem:[%s6348_s0 + $0x3f8] sm:$0xff]  ;;  %v3700_v57 = vcombine.low %v139_v47, %v147_v52  ;;  %v171_v47 = vld [vmem:[%s6348_s0 + $0x4b0] sm:$0xff] }
 0x185   :  { %3300 = vmatprep.mubr.bf16.mxu1 %v3687_v5  ;;  %v3703_v40 = vcombine.high %v140_v38, %v148_v26  ;;  %v3702_v5 = vcombine.low %v140_v38, %v148_v26  ;;  %v3717_v58 = vcombine.high %v155_v14, %v163_v16  ;;  %v179_v52 = vld [vmem:[%s6348_s0 + $0x4f0] sm:$0xff]  ;;  %v172_v26 = vld [vmem:[%s6348_s0 + $0x4b8] sm:$0xff] }
 0x186   :  { %v6041_v22 = vadd.f32 %v4362_v8, %v2610_v13  ;;  %v4269_v36 = vpop.f32.mrb[72].mxu0 }
 0x187   :  { %v4363_v20 = vpop.f32.mrb[72].mxu1  ;;  %v4270_v24 = vpop.f32.mrb[73].mxu0 }
 0x188   :  { %v4271_v27 = vadd.f32 %v4270_v24, %v4269_v36  ;;  %v4364_v28 = vpop.f32.mrb[73].mxu1  ;;  %v4272_v29 = vpop.f32.mrb[74].mxu0 }
 0x189   :  { %v4365_v34 = vadd.f32 %v4364_v28, %v4363_v20  ;;  %v4366_v35 = vpop.f32.mrb[74].mxu1  ;;  %v4273_v37 = vpop.f32.mrb[75].mxu0 }
 0x18a   :  { %v2615_v23 = vadd.f32 %v4271_v27, %v5825_v50  ;;  %v4274_v41 = vadd.f32 %v4273_v37, %v4272_v29  ;;  %v4367_v42 = vpop.f32.mrb[75].mxu1 }
 0x18b   :  { %v4368_v43 = vadd.f32 %v4367_v42, %v4366_v35  ;;  %3165 = vmatmul.mubr.bf16.gmra.mrb[180].mxu0 %v3684_v21 }
 0x18c   :  { %v6050_v46 = vadd.f32 %v4365_v34, %v2615_v23  ;;  %v2618_v53 = vadd.f32 %v4274_v41, %v5834_v54  ;;  %3301 = vmatmul.mubr.bf16.gmra.mrb[180].mxu1 %v3686_v33  ;;  %3172 = vmatprep.mubr.bf16.mxu0 %v3701_v10  ;;  %v164_v54 = vld [vmem:[%s6348_s0 + $0x478] sm:$0xff]  ;;  %v3716_v10 = vcombine.low %v155_v14, %v163_v16  ;;  %v187_v14 = vld [vmem:[%s6348_s0 + $0x530] sm:$0xff] }
 0x18d   :  { %3308 = vmatprep.mubr.bf16.mxu1 %v3703_v40  ;;  %v3719_v13 = vcombine.high %v156_v0, %v164_v54  ;;  %v3718_v40 = vcombine.low %v156_v0, %v164_v54  ;;  %v3733_v23 = vcombine.high %v171_v47, %v179_v52  ;;  %v195_v16 = vld [vmem:[%s6348_s0 + $0x570] sm:$0xff]  ;;  %v188_v54 = vld [vmem:[%s6348_s0 + $0x538] sm:$0xff] }
 0x18e   :  { %v6059_v50 = vadd.f32 %v4368_v43, %v2618_v53  ;;  %v4275_v4 = vpop.f32.mrb[76].mxu0 }
 0x18f   :  { %v4369_v56 = vpop.f32.mrb[76].mxu1  ;;  %v4276_v61 = vpop.f32.mrb[77].mxu0 }
 0x190   :  { %v4277_v63 = vadd.f32 %v4276_v61, %v4275_v4  ;;  %v4370_v1 = vpop.f32.mrb[77].mxu1  ;;  %v4278_v2 = vpop.f32.mrb[78].mxu0 }
 0x191   :  { %v4371_v6 = vadd.f32 %v4370_v1, %v4369_v56  ;;  %v4372_v7 = vpop.f32.mrb[78].mxu1  ;;  %v4279_v8 = vpop.f32.mrb[79].mxu0 }
 0x192   :  { %v2623_v36 = vadd.f32 %v4277_v63, %v5843_v15  ;;  %v4280_v20 = vadd.f32 %v4279_v8, %v4278_v2  ;;  %v4373_v24 = vpop.f32.mrb[79].mxu1 }
 0x193   :  { %v4374_v21 = vadd.f32 %v4373_v24, %v4372_v7  ;;  %3173 = vmatmul.mubr.bf16.gmra.mrb[184].mxu0 %v3700_v57 }
 0x194   :  { %v6068_v27 = vadd.f32 %v4371_v6, %v2623_v36  ;;  %v2626_v28 = vadd.f32 %v4280_v20, %v5852_v19  ;;  %3309 = vmatmul.mubr.bf16.gmra.mrb[184].mxu1 %v3702_v5  ;;  %3180 = vmatprep.mubr.bf16.mxu0 %v3717_v58  ;;  %v180_v19 = vld [vmem:[%s6348_s0 + $0x4f8] sm:$0xff]  ;;  %v3732_v58 = vcombine.low %v171_v47, %v179_v52  ;;  %v203_v47 = vld [vmem:[%s6348_s0 + $0x5b0] sm:$0xff] }
 0x195   :  { %3316 = vmatprep.mubr.bf16.mxu1 %v3719_v13  ;;  %v3735_v53 = vcombine.high %v172_v26, %v180_v19  ;;  %v3734_v13 = vcombine.low %v172_v26, %v180_v19  ;;  %v3749_v36 = vcombine.high %v187_v14, %v195_v16  ;;  %v211_v52 = vld [vmem:[%s6348_s0 + $0x5f0] sm:$0xff]  ;;  %v204_v19 = vld [vmem:[%s6348_s0 + $0x5b8] sm:$0xff] }
 0x196   :  { %v6077_v15 = vadd.f32 %v4374_v21, %v2626_v28  ;;  %v4281_v38 = vpop.f32.mrb[80].mxu0 }
 0x197   :  { %v4375_v29 = vpop.f32.mrb[80].mxu1  ;;  %v4282_v33 = vpop.f32.mrb[81].mxu0 }
 0x198   :  { %v4283_v34 = vadd.f32 %v4282_v33, %v4281_v38  ;;  %v4376_v35 = vpop.f32.mrb[81].mxu1  ;;  %v4284_v37 = vpop.f32.mrb[82].mxu0 }
 0x199   :  { %v4377_v41 = vadd.f32 %v4376_v35, %v4375_v29  ;;  %v4378_v42 = vpop.f32.mrb[82].mxu1  ;;  %v4285_v43 = vpop.f32.mrb[83].mxu0 }
 0x19a   :  { %v2631_v4 = vadd.f32 %v4283_v34, %v5861_v45  ;;  %v4286_v56 = vadd.f32 %v4285_v43, %v4284_v37  ;;  %v4379_v61 = vpop.f32.mrb[83].mxu1 }
 0x19b   :  { %v4380_v57 = vadd.f32 %v4379_v61, %v4378_v42  ;;  %3181 = vmatmul.mubr.bf16.gmra.mrb[188].mxu0 %v3716_v10 }
 0x19c   :  { %v6086_v63 = vadd.f32 %v4377_v41, %v2631_v4  ;;  %v2634_v1 = vadd.f32 %v4286_v56, %v5870_v49  ;;  %3317 = vmatmul.mubr.bf16.gmra.mrb[188].mxu1 %v3718_v40  ;;  %3188 = vmatprep.mubr.bf16.mxu0 %v3733_v23  ;;  %v196_v49 = vld [vmem:[%s6348_s0 + $0x578] sm:$0xff]  ;;  %v3748_v23 = vcombine.low %v187_v14, %v195_v16  ;;  %v219_v14 = vld [vmem:[%s6348_s0 + $0x630] sm:$0xff] }
 0x19d   :  { %3324 = vmatprep.mubr.bf16.mxu1 %v3735_v53  ;;  %v3751_v28 = vcombine.high %v188_v54, %v196_v49  ;;  %v3750_v53 = vcombine.low %v188_v54, %v196_v49  ;;  %v3765_v4 = vcombine.high %v203_v47, %v211_v52 }
 0x19e   :  { %v6095_v45 = vadd.f32 %v4380_v57, %v2634_v1  ;;  %v4287_v0 = vpop.f32.mrb[84].mxu0 }
 0x19f   :  { %v4381_v2 = vpop.f32.mrb[84].mxu1  ;;  %v4288_v5 = vpop.f32.mrb[85].mxu0 }
 0x1a0   :  { %v4289_v6 = vadd.f32 %v4288_v5, %v4287_v0  ;;  %v4382_v7 = vpop.f32.mrb[85].mxu1  ;;  %v4290_v8 = vpop.f32.mrb[86].mxu0 }
 0x1a1   :  { %v4383_v20 = vadd.f32 %v4382_v7, %v4381_v2  ;;  %v4384_v24 = vpop.f32.mrb[86].mxu1  ;;  %v4291_v21 = vpop.f32.mrb[87].mxu0 }
 0x1a2   :  { %v2639_v38 = vadd.f32 %v4289_v6, %v5879_v12  ;;  %v4292_v29 = vadd.f32 %v4291_v21, %v4290_v8  ;;  %v4385_v33 = vpop.f32.mrb[87].mxu1  ;;  %v3781_v21 = vcombine.high %v219_v14, %v219_v14 }
 0x1a3   :  { %v4386_v10 = vadd.f32 %v4385_v33, %v4384_v24  ;;  %3189 = vmatmul.mubr.bf16.gmra.mrb[192].mxu0 %v3732_v58 }
 0x1a4   :  { %v6104_v34 = vadd.f32 %v4383_v20, %v2639_v38  ;;  %v2642_v35 = vadd.f32 %v4292_v29, %v5888_v17  ;;  %3325 = vmatmul.mubr.bf16.gmra.mrb[192].mxu1 %v3734_v13  ;;  %3196 = vmatprep.mubr.bf16.mxu0 %v3749_v36  ;;  %v212_v17 = vld [vmem:[%s6348_s0 + $0x5f8] sm:$0xff]  ;;  %v3764_v13 = vcombine.low %v203_v47, %v211_v52 }
 0x1a5   :  { %3332 = vmatprep.mubr.bf16.mxu1 %v3751_v28  ;;  %v3767_v1 = vcombine.high %v204_v19, %v212_v17  ;;  %v3766_v24 = vcombine.low %v204_v19, %v212_v17 }
 0x1a6   :  { %v6113_v12 = vadd.f32 %v4386_v10, %v2642_v35  ;;  %v4293_v26 = vpop.f32.mrb[88].mxu0 }
 0x1a7   :  { %v4387_v37 = vpop.f32.mrb[88].mxu1  ;;  %v4294_v40 = vpop.f32.mrb[89].mxu0 }
 0x1a8   :  { %v4295_v41 = vadd.f32 %v4294_v40, %v4293_v26  ;;  %v4388_v42 = vpop.f32.mrb[89].mxu1  ;;  %v4296_v43 = vpop.f32.mrb[90].mxu0 }
 0x1a9   :  { %v4389_v56 = vadd.f32 %v4388_v42, %v4387_v37  ;;  %v4390_v61 = vpop.f32.mrb[90].mxu1  ;;  %v4297_v57 = vpop.f32.mrb[91].mxu0 }
 0x1aa   :  { %v2647_v0 = vadd.f32 %v4295_v41, %v5897_v44  ;;  %v4298_v2 = vadd.f32 %v4297_v57, %v4296_v43  ;;  %v4391_v5 = vpop.f32.mrb[91].mxu1  ;;  %v220_v44 = vld [vmem:[%s6348_s0 + $0x638] sm:$0xff]  ;;  %v3780_v41 = vcombine.low %v219_v14, %v219_v14 }
 0x1ab   :  { %v4392_v58 = vadd.f32 %v4391_v5, %v4390_v61  ;;  %3197 = vmatmul.mubr.bf16.gmra.mrb[196].mxu0 %v3748_v23  ;;  %v3783_v33 = vcombine.high %v220_v44, %v220_v44 }
 0x1ac   :  { %v6122_v6 = vadd.f32 %v4389_v56, %v2647_v0  ;;  %v2650_v7 = vadd.f32 %v4298_v2, %v5903_v48  ;;  %3333 = vmatmul.mubr.bf16.gmra.mrb[196].mxu1 %v3750_v53  ;;  %3204 = vmatprep.mubr.bf16.mxu0 %v3765_v4  ;;  %v3782_v53 = vcombine.low %v220_v44, %v220_v44 }
 0x1ad   :  { %3340 = vmatprep.mubr.bf16.mxu1 %v3767_v1 }
 0x1ae   :  { %v6128_v16 = vadd.f32 %v4392_v58, %v2650_v7  ;;  %v4299_v54 = vpop.f32.mrb[92].mxu0 }
 0x1af   :  { %v4393_v49 = vpop.f32.mrb[92].mxu1  ;;  %v4300_v8 = vpop.f32.mrb[93].mxu0 }
 0x1b0   :  { %v4301_v36 = vadd.f32 %v4300_v8, %v4299_v54  ;;  %v4394_v20 = vpop.f32.mrb[93].mxu1  ;;  %v4302_v48 = vpop.f32.mrb[94].mxu0 }
 0x1b1   :  { %v4395_v28 = vadd.f32 %v4394_v20, %v4393_v49  ;;  %v4396_v38 = vpop.f32.mrb[94].mxu1  ;;  %v4303_v29 = vpop.f32.mrb[95].mxu0 }
 0x1b2   :  { %v2655_v10 = vadd.f32 %v4301_v36, %v5909_v11  ;;  %v4304_v35 = vadd.f32 %v4303_v29, %v4302_v48  ;;  %v4397_v26 = vpop.f32.mrb[95].mxu1 }
 0x1b3   :  { %v4398_v37 = vadd.f32 %v4397_v26, %v4396_v38  ;;  %3205 = vmatmul.mubr.bf16.gmra.mrb[200].mxu0 %v3764_v13 }
 0x1b4   :  { %v6134_v40 = vadd.f32 %v4395_v28, %v2655_v10  ;;  %v2658_v23 = vadd.f32 %v4304_v35, %v5918_v18  ;;  %3341 = vmatmul.mubr.bf16.gmra.mrb[200].mxu1 %v3766_v24  ;;  %3212 = vmatprep.mubr.bf16.mxu0 %v3781_v21 }
 0x1b5   :  { %3348 = vmatprep.mubr.bf16.mxu1 %v3783_v33 }
 0x1b6   :  { %v6137_v47 = vadd.f32 %v4398_v37, %v2658_v23  ;;  %v4305_v52 = vpop.f32.mrb[96].mxu0 }
 0x1b7   :  { %v4399_v19 = vpop.f32.mrb[96].mxu1  ;;  %v4306_v17 = vpop.f32.mrb[97].mxu0 }
 0x1b8   :  { %v4307_v42 = vadd.f32 %v4306_v17, %v4305_v52  ;;  %v4400_v43 = vpop.f32.mrb[97].mxu1  ;;  %v4308_v11 = vpop.f32.mrb[98].mxu0 }
 0x1b9   :  { %v4401_v4 = vadd.f32 %v4400_v43, %v4399_v19  ;;  %v4402_v56 = vpop.f32.mrb[98].mxu1  ;;  %v4309_v61 = vpop.f32.mrb[99].mxu0 }
 0x1ba   :  { %v2663_v57 = vadd.f32 %v4307_v42, %v5927_v51  ;;  %v4310_v1 = vadd.f32 %v4309_v61, %v4308_v11  ;;  %v4403_v18 = vpop.f32.mrb[99].mxu1 }
 0x1bb   :  { %v4404_v0 = vadd.f32 %v4403_v18, %v4402_v56  ;;  %3213 = vmatmul.mubr.bf16.gmra.mrb[204].mxu0 %v3780_v41 }
 0x1bc   :  { %v6140_v2 = vadd.f32 %v4401_v4, %v2663_v57  ;;  %v2666_v5 = vadd.f32 %v4310_v1, %v5936_v55  ;;  %3349 = vmatmul.mubr.bf16.gmra.mrb[204].mxu1 %v3782_v53 }
 0x1be   :  { %v6143_v58 = vadd.f32 %v4404_v0, %v2666_v5  ;;  %v4311_v7 = vpop.f32.mrb[100].mxu0 }
 0x1bf   :  { %v4405_v14 = vpop.f32.mrb[100].mxu1  ;;  %v4312_v54 = vpop.f32.mrb[101].mxu0 }
 0x1c0   :  { %v4313_v44 = vadd.f32 %v4312_v54, %v4311_v7  ;;  %v4406_v49 = vpop.f32.mrb[101].mxu1  ;;  %v4314_v8 = vpop.f32.mrb[102].mxu0 }
 0x1c1   :  { %v4407_v13 = vadd.f32 %v4406_v49, %v4405_v14  ;;  %v4408_v36 = vpop.f32.mrb[102].mxu1  ;;  %v4315_v51 = vpop.f32.mrb[103].mxu0 }
 0x1c2   :  { %v2671_v20 = vadd.f32 %v4313_v44, %v5945_v25  ;;  %v4409_v48 = vpop.f32.mrb[103].mxu1 }
 0x1c4   :  { %v6146_v24 = vadd.f32 %v4407_v13, %v2671_v20 }
 0x1c6   :  { %v4427_v21 = vpop.f32.mrb[104].mxu0 }
 0x1c7   :  { %v4521_v28 = vpop.f32.mrb[104].mxu1  ;;  %v4428_v55 = vpop.f32.mrb[105].mxu0 }
 0x1c8   :  { %v4429_v38 = vadd.f32 %v4428_v55, %v4427_v21  ;;  %v4522_v29 = vpop.f32.mrb[105].mxu1  ;;  %v4430_v33 = vpop.f32.mrb[106].mxu0 }
 0x1c9   :  { %v4523_v10 = vadd.f32 %v4522_v29, %v4521_v28  ;;  %v4524_v35 = vpop.f32.mrb[106].mxu1  ;;  %v4431_v26 = vpop.f32.mrb[107].mxu0 }
 0x1ca   :  { %v2847_v37 = vadd.f32 %v4429_v38, %v5960_v60  ;;  %v4432_v23 = vadd.f32 %v4431_v26, %v4430_v33  ;;  %v4525_v52 = vpop.f32.mrb[107].mxu1 }
 0x1cb   :  { %v4526_v19 = vadd.f32 %v4525_v52, %v4524_v35 }
 0x1cc   :  { %v6149_v17 = vadd.f32 %v4523_v10, %v2847_v37  ;;  %v2850_v25 = vadd.f32 %v4432_v23, %v5969_v30 }
 0x1ce   :  { %v6152_v41 = vadd.f32 %v4526_v19, %v2850_v25  ;;  %v4433_v42 = vpop.f32.mrb[108].mxu0 }
 0x1cf   :  { %v4527_v43 = vpop.f32.mrb[108].mxu1  ;;  %v4434_v11 = vpop.f32.mrb[109].mxu0 }
 0x1d0   :  { %v4435_v53 = vadd.f32 %v4434_v11, %v4433_v42  ;;  %v4528_v4 = vpop.f32.mrb[109].mxu1  ;;  %v4436_v56 = vpop.f32.mrb[110].mxu0 }
 0x1d1   :  { %v4529_v61 = vadd.f32 %v4528_v4, %v4527_v43  ;;  %v4530_v57 = vpop.f32.mrb[110].mxu1  ;;  %v4437_v1 = vpop.f32.mrb[111].mxu0 }
 0x1d2   :  { %v2855_v60 = vadd.f32 %v4435_v53, %v5978_v31  ;;  %v4438_v18 = vadd.f32 %v4437_v1, %v4436_v56  ;;  %v4531_v0 = vpop.f32.mrb[111].mxu1 }
 0x1d3   :  { %v4532_v5 = vadd.f32 %v4531_v0, %v4530_v57 }
 0x1d4   :  { %v6155_v7 = vadd.f32 %v4529_v61, %v2855_v60  ;;  %v2858_v30 = vadd.f32 %v4438_v18, %v5987_v62 }
 0x1d6   :  { %v6158_v14 = vadd.f32 %v4532_v5, %v2858_v30  ;;  %v4439_v54 = vpop.f32.mrb[112].mxu0 }
 0x1d7   :  { %v4533_v44 = vpop.f32.mrb[112].mxu1  ;;  %v4440_v49 = vpop.f32.mrb[113].mxu0 }
 0x1d8   :  { %v4441_v8 = vadd.f32 %v4440_v49, %v4439_v54  ;;  %v4534_v13 = vpop.f32.mrb[113].mxu1  ;;  %v4442_v36 = vpop.f32.mrb[114].mxu0 }
 0x1d9   :  { %v4535_v51 = vadd.f32 %v4534_v13, %v4533_v44  ;;  %v4536_v20 = vpop.f32.mrb[114].mxu1  ;;  %v4443_v48 = vpop.f32.mrb[115].mxu0 }
 0x1da   :  { %v2863_v31 = vadd.f32 %v4441_v8, %v5996_v3  ;;  %v4444_v21 = vadd.f32 %v4443_v48, %v4442_v36  ;;  %v4537_v28 = vpop.f32.mrb[115].mxu1 }
 0x1db   :  { %v4538_v55 = vadd.f32 %v4537_v28, %v4536_v20 }
 0x1dc   :  { %v6161_v38 = vadd.f32 %v4535_v51, %v2863_v31  ;;  %v2866_v62 = vadd.f32 %v4444_v21, %v6005_v32 }
 0x1de   :  { %v6164_v29 = vadd.f32 %v4538_v55, %v2866_v62  ;;  %v4445_v33 = vpop.f32.mrb[116].mxu0 }
 0x1df   :  { %v4539_v10 = vpop.f32.mrb[116].mxu1  ;;  %v4446_v35 = vpop.f32.mrb[117].mxu0 }
 0x1e0   :  { %v4447_v26 = vadd.f32 %v4446_v35, %v4445_v33  ;;  %v4540_v37 = vpop.f32.mrb[117].mxu1  ;;  %v4448_v23 = vpop.f32.mrb[118].mxu0 }
 0x1e1   :  { %v4541_v52 = vadd.f32 %v4540_v37, %v4539_v10  ;;  %v4542_v19 = vpop.f32.mrb[118].mxu1  ;;  %v4449_v25 = vpop.f32.mrb[119].mxu0 }
 0x1e2   :  { %v2871_v3 = vadd.f32 %v4447_v26, %v6014_v39  ;;  %v4450_v42 = vadd.f32 %v4449_v25, %v4448_v23  ;;  %v4543_v43 = vpop.f32.mrb[119].mxu1 }
 0x1e3   :  { %v4544_v11 = vadd.f32 %v4543_v43, %v4542_v19 }
 0x1e4   :  { %v6167_v53 = vadd.f32 %v4541_v52, %v2871_v3  ;;  %v2874_v32 = vadd.f32 %v4450_v42, %v6023_v59 }
 0x1e6   :  { %v6170_v4 = vadd.f32 %v4544_v11, %v2874_v32  ;;  %v4451_v56 = vpop.f32.mrb[120].mxu0 }
 0x1e7   :  { %v4545_v61 = vpop.f32.mrb[120].mxu1  ;;  %v4452_v57 = vpop.f32.mrb[121].mxu0 }
 0x1e8   :  { %v4453_v1 = vadd.f32 %v4452_v57, %v4451_v56  ;;  %v4546_v60 = vpop.f32.mrb[121].mxu1  ;;  %v4454_v18 = vpop.f32.mrb[122].mxu0 }
 0x1e9   :  { %v4547_v0 = vadd.f32 %v4546_v60, %v4545_v61  ;;  %v4548_v5 = vpop.f32.mrb[122].mxu1  ;;  %v4455_v30 = vpop.f32.mrb[123].mxu0 }
 0x1ea   :  { %v2879_v39 = vadd.f32 %v4453_v1, %v6032_v9  ;;  %v4456_v54 = vadd.f32 %v4455_v30, %v4454_v18  ;;  %v4549_v44 = vpop.f32.mrb[123].mxu1 }
 0x1eb   :  { %v4550_v49 = vadd.f32 %v4549_v44, %v4548_v5 }
 0x1ec   :  { %v6173_v8 = vadd.f32 %v4547_v0, %v2879_v39  ;;  %v2882_v59 = vadd.f32 %v4456_v54, %v6041_v22 }
 0x1ee   :  { %v6176_v13 = vadd.f32 %v4550_v49, %v2882_v59  ;;  %v4457_v36 = vpop.f32.mrb[124].mxu0 }
 0x1ef   :  { %v4551_v51 = vpop.f32.mrb[124].mxu1  ;;  %v4458_v20 = vpop.f32.mrb[125].mxu0 }
 0x1f0   :  { %v4459_v48 = vadd.f32 %v4458_v20, %v4457_v36  ;;  %v4552_v31 = vpop.f32.mrb[125].mxu1  ;;  %v4460_v21 = vpop.f32.mrb[126].mxu0 }
 0x1f1   :  { %v4553_v28 = vadd.f32 %v4552_v31, %v4551_v51  ;;  %v4554_v55 = vpop.f32.mrb[126].mxu1  ;;  %v4461_v62 = vpop.f32.mrb[127].mxu0 }
 0x1f2   :  { %v2887_v9 = vadd.f32 %v4459_v48, %v6050_v46  ;;  %v4462_v33 = vadd.f32 %v4461_v62, %v4460_v21  ;;  %v4555_v10 = vpop.f32.mrb[127].mxu1 }
 0x1f3   :  { %v4556_v35 = vadd.f32 %v4555_v10, %v4554_v55 }
 0x1f4   :  { %v6179_v26 = vadd.f32 %v4553_v28, %v2887_v9  ;;  %v2890_v22 = vadd.f32 %v4462_v33, %v6059_v50 }
 0x1f6   :  { %v6182_v37 = vadd.f32 %v4556_v35, %v2890_v22  ;;  %v4463_v23 = vpop.f32.mrb[128].mxu0 }
 0x1f7   :  { %v4557_v52 = vpop.f32.mrb[128].mxu1  ;;  %v4464_v19 = vpop.f32.mrb[129].mxu0 }
 0x1f8   :  { %v4465_v25 = vadd.f32 %v4464_v19, %v4463_v23  ;;  %v4558_v3 = vpop.f32.mrb[129].mxu1  ;;  %v4466_v42 = vpop.f32.mrb[130].mxu0 }
 0x1f9   :  { %v4559_v43 = vadd.f32 %v4558_v3, %v4557_v52  ;;  %v4560_v11 = vpop.f32.mrb[130].mxu1  ;;  %v4467_v32 = vpop.f32.mrb[131].mxu0 }
 0x1fa   :  { %v2895_v46 = vadd.f32 %v4465_v25, %v6068_v27  ;;  %v4468_v56 = vadd.f32 %v4467_v32, %v4466_v42  ;;  %v4561_v61 = vpop.f32.mrb[131].mxu1 }
 0x1fb   :  { %v4562_v57 = vadd.f32 %v4561_v61, %v4560_v11 }
 0x1fc   :  { %v6185_v1 = vadd.f32 %v4559_v43, %v2895_v46  ;;  %v2898_v50 = vadd.f32 %v4468_v56, %v6077_v15 }
 0x1fe   :  { %v6188_v60 = vadd.f32 %v4562_v57, %v2898_v50  ;;  %v4469_v18 = vpop.f32.mrb[132].mxu0 }
 0x1ff   :  { %v4563_v0 = vpop.f32.mrb[132].mxu1  ;;  %v4470_v5 = vpop.f32.mrb[133].mxu0 }
 0x200   :  { %v4471_v30 = vadd.f32 %v4470_v5, %v4469_v18  ;;  %v4564_v39 = vpop.f32.mrb[133].mxu1  ;;  %v4472_v54 = vpop.f32.mrb[134].mxu0 }
 0x201   :  { %v4565_v44 = vadd.f32 %v4564_v39, %v4563_v0  ;;  %v4566_v49 = vpop.f32.mrb[134].mxu1  ;;  %v4473_v59 = vpop.f32.mrb[135].mxu0 }
 0x202   :  { %v2903_v27 = vadd.f32 %v4471_v30, %v6086_v63  ;;  %v4474_v36 = vadd.f32 %v4473_v59, %v4472_v54  ;;  %v4567_v51 = vpop.f32.mrb[135].mxu1 }
 0x203   :  { %v4568_v20 = vadd.f32 %v4567_v51, %v4566_v49 }
 0x204   :  { %v6191_v48 = vadd.f32 %v4565_v44, %v2903_v27  ;;  %v2906_v15 = vadd.f32 %v4474_v36, %v6095_v45 }
 0x206   :  { %v6194_v31 = vadd.f32 %v4568_v20, %v2906_v15  ;;  %v4475_v21 = vpop.f32.mrb[136].mxu0 }
 0x207   :  { %v4569_v28 = vpop.f32.mrb[136].mxu1  ;;  %v4476_v55 = vpop.f32.mrb[137].mxu0 }
 0x208   :  { %v4477_v62 = vadd.f32 %v4476_v55, %v4475_v21  ;;  %v4570_v9 = vpop.f32.mrb[137].mxu1  ;;  %v4478_v33 = vpop.f32.mrb[138].mxu0 }
 0x209   :  { %v4571_v10 = vadd.f32 %v4570_v9, %v4569_v28  ;;  %v4572_v35 = vpop.f32.mrb[138].mxu1  ;;  %v4479_v22 = vpop.f32.mrb[139].mxu0 }
 0x20a   :  { %v2911_v63 = vadd.f32 %v4477_v62, %v6104_v34  ;;  %v4480_v23 = vadd.f32 %v4479_v22, %v4478_v33  ;;  %v4573_v52 = vpop.f32.mrb[139].mxu1 }
 0x20b   :  { %v4574_v19 = vadd.f32 %v4573_v52, %v4572_v35 }
 0x20c   :  { %v6197_v25 = vadd.f32 %v4571_v10, %v2911_v63  ;;  %v2914_v45 = vadd.f32 %v4480_v23, %v6113_v12 }
 0x20e   :  { %v6200_v3 = vadd.f32 %v4574_v19, %v2914_v45  ;;  %v4481_v42 = vpop.f32.mrb[140].mxu0 }
 0x20f   :  { %v4575_v43 = vpop.f32.mrb[140].mxu1  ;;  %v4482_v11 = vpop.f32.mrb[141].mxu0 }
 0x210   :  { %v4483_v32 = vadd.f32 %v4482_v11, %v4481_v42  ;;  %v4576_v46 = vpop.f32.mrb[141].mxu1  ;;  %v4484_v56 = vpop.f32.mrb[142].mxu0 }
 0x211   :  { %v4577_v61 = vadd.f32 %v4576_v46, %v4575_v43  ;;  %v4578_v57 = vpop.f32.mrb[142].mxu1  ;;  %v4485_v50 = vpop.f32.mrb[143].mxu0 }
 0x212   :  { %v2919_v34 = vadd.f32 %v4483_v32, %v6122_v6  ;;  %v4486_v18 = vadd.f32 %v4485_v50, %v4484_v56  ;;  %v4579_v0 = vpop.f32.mrb[143].mxu1 }
 0x213   :  { %v4580_v5 = vadd.f32 %v4579_v0, %v4578_v57 }
 0x214   :  { %v6203_v30 = vadd.f32 %v4577_v61, %v2919_v34  ;;  %v2922_v12 = vadd.f32 %v4486_v18, %v6128_v16 }
 0x216   :  { %v6206_v39 = vadd.f32 %v4580_v5, %v2922_v12  ;;  %v4487_v54 = vpop.f32.mrb[144].mxu0 }
 0x217   :  { %v4581_v44 = vpop.f32.mrb[144].mxu1  ;;  %v4488_v49 = vpop.f32.mrb[145].mxu0 }
 0x218   :  { %v4489_v59 = vadd.f32 %v4488_v49, %v4487_v54  ;;  %v4582_v27 = vpop.f32.mrb[145].mxu1  ;;  %v4490_v36 = vpop.f32.mrb[146].mxu0 }
 0x219   :  { %v4583_v51 = vadd.f32 %v4582_v27, %v4581_v44  ;;  %v4584_v20 = vpop.f32.mrb[146].mxu1  ;;  %v4491_v15 = vpop.f32.mrb[147].mxu0 }
 0x21a   :  { %v2927_v6 = vadd.f32 %v4489_v59, %v6134_v40  ;;  %v4492_v21 = vadd.f32 %v4491_v15, %v4490_v36  ;;  %v4585_v28 = vpop.f32.mrb[147].mxu1 }
 0x21b   :  { %v4586_v55 = vadd.f32 %v4585_v28, %v4584_v20 }
 0x21c   :  { %v6209_v62 = vadd.f32 %v4583_v51, %v2927_v6  ;;  %v2930_v16 = vadd.f32 %v4492_v21, %v6137_v47 }
 0x21e   :  { %v6212_v9 = vadd.f32 %v4586_v55, %v2930_v16  ;;  %v4493_v33 = vpop.f32.mrb[148].mxu0 }
 0x21f   :  { %v4587_v10 = vpop.f32.mrb[148].mxu1  ;;  %v4494_v35 = vpop.f32.mrb[149].mxu0 }
 0x220   :  { %v4495_v22 = vadd.f32 %v4494_v35, %v4493_v33  ;;  %v4588_v63 = vpop.f32.mrb[149].mxu1  ;;  %v4496_v23 = vpop.f32.mrb[150].mxu0 }
 0x221   :  { %v4589_v52 = vadd.f32 %v4588_v63, %v4587_v10  ;;  %v4590_v19 = vpop.f32.mrb[150].mxu1  ;;  %v4497_v45 = vpop.f32.mrb[151].mxu0  ;;  %v6228_v10 = vld [vmem:[%s6350_s3] ss:$0 sm:$0xff] }
 0x222   :  { %v2935_v40 = vadd.f32 %v4495_v22, %v6140_v2  ;;  %v4498_v42 = vadd.f32 %v4497_v45, %v4496_v23  ;;  %v4591_v43 = vpop.f32.mrb[151].mxu1 }
 0x223   :  { %v4592_v11 = vadd.f32 %v4591_v43, %v4590_v19 }
 0x224   :  { %v6215_v32 = vadd.f32 %v4589_v52, %v2935_v40  ;;  %v2938_v47 = vadd.f32 %v4498_v42, %v6143_v58 }
 0x226   :  { %v6218_v46 = vadd.f32 %v4592_v11, %v2938_v47  ;;  %v4499_v56 = vpop.f32.mrb[152].mxu0 }
 0x227   :  { %v4593_v61 = vpop.f32.mrb[152].mxu1  ;;  %v4500_v57 = vpop.f32.mrb[153].mxu0 }
 0x228   :  { %v4501_v50 = vadd.f32 %v4500_v57, %v4499_v56  ;;  %v4594_v34 = vpop.f32.mrb[153].mxu1  ;;  %v4502_v18 = vpop.f32.mrb[154].mxu0 }
 0x229   :  { %v4595_v0 = vadd.f32 %v4594_v34, %v4593_v61  ;;  %v4596_v5 = vpop.f32.mrb[154].mxu1  ;;  %v4503_v12 = vpop.f32.mrb[155].mxu0 }
 0x22a   :  { %v2943_v2 = vadd.f32 %v4501_v50, %v6146_v24  ;;  %v4597_v54 = vpop.f32.mrb[155].mxu1 }
 0x22c   :  { %v6221_v44 = vadd.f32 %v4595_v0, %v2943_v2 }
 0x22e   :  { %v4615_v49 = vpop.f32.mrb[156].mxu0 }
 0x22f   :  { %v4709_v59 = vpop.f32.mrb[156].mxu1  ;;  %v4616_v27 = vpop.f32.mrb[157].mxu0 }
 0x230   :  { %v4617_v58 = vadd.f32 %v4616_v27, %v4615_v49  ;;  %v4710_v36 = vpop.f32.mrb[157].mxu1  ;;  %v4618_v51 = vpop.f32.mrb[158].mxu0 }
 0x231   :  { %v4711_v20 = vadd.f32 %v4710_v36, %v4709_v59  ;;  %v4712_v15 = vpop.f32.mrb[158].mxu1  ;;  %v4619_v6 = vpop.f32.mrb[159].mxu0 }
 0x232   :  { %v3119_v21 = vadd.f32 %v4617_v58, %v6149_v17  ;;  %v4620_v28 = vadd.f32 %v4619_v6, %v4618_v51  ;;  %v4713_v55 = vpop.f32.mrb[159].mxu1 }
 0x233   :  { %v4714_v16 = vadd.f32 %v4713_v55, %v4712_v15 }
 0x234   :  { %v3255_v33 = vadd.f32 %v4711_v20, %v3119_v21  ;;  %v3122_v24 = vadd.f32 %v4620_v28, %v6152_v41  ;;  %v6234_v41 = vld [vmem:[%s6351_s4] ss:$0 sm:$0xff] }
 0x236   :  { %v3356_v35 = vmax.f32 %v3255_v33, 0.0  ;;  %v3258_v22 = vadd.f32 %v4714_v16, %v3122_v24  ;;  %v4621_v63 = vpop.f32.mrb[160].mxu0 }
 0x237   :  { %v4715_v23 = vpop.f32.mrb[160].mxu1  ;;  %v4622_v52 = vpop.f32.mrb[161].mxu0 }
 0x238   :  { %v3388_v19 = vmul.f32 %v6228_v10, %v3356_v35  ;;  %v3357_v45 = vmax.f32 %v3258_v22, 0.0  ;;  %v4623_v17 = vadd.f32 %v4622_v52, %v4621_v63  ;;  %v4716_v40 = vpop.f32.mrb[161].mxu1  ;;  %v4624_v42 = vpop.f32.mrb[162].mxu0 }
 0x239   :  { %v4717_v43 = vadd.f32 %v4716_v40, %v4715_v23  ;;  %v4718_v11 = vpop.f32.mrb[162].mxu1  ;;  %v4625_v47 = vpop.f32.mrb[163].mxu0 }
 0x23a   :  { %v3389_v56 = vmul.f32 %v6228_v10, %v3357_v45  ;;  %v3127_v61 = vadd.f32 %v4623_v17, %v6155_v7  ;;  %v4626_v57 = vadd.f32 %v4625_v47, %v4624_v42  ;;  %v4719_v50 = vpop.f32.mrb[163].mxu1  ;;  %v3420_v18 = vadd.f32 %v6234_v41, %v3388_v19 }
 0x23b   :  { %v4720_v34 = vadd.f32 %v4719_v50, %v4718_v11 }
 0x23c   :  { %v3421_v0 = vadd.f32 %v6234_v41, %v3389_v56  ;;  %v3263_v5 = vadd.f32 %v4717_v43, %v3127_v61  ;;  %v3130_v12 = vadd.f32 %v4626_v57, %v6158_v14 }
 0x23e   :  { %v3967_v2 = vpack.c.bf16 %v3421_v0, %v3420_v18  ;;  %v3358_v54 = vmax.f32 %v3263_v5, 0.0  ;;  %v3266_v49 = vadd.f32 %v4720_v34, %v3130_v12  ;;  %v4627_v59 = vpop.f32.mrb[164].mxu0 }
 0x23f   :  { %v4721_v27 = vpop.f32.mrb[164].mxu1  ;;  %v4628_v58 = vpop.f32.mrb[165].mxu0 }
 0x240   :  { %3968 = vst [vmem:[%s6352_s5] sm:$0xff] %v3967_v2   ;;  %v3390_v7 = vmul.f32 %v6228_v10, %v3358_v54  ;;  %v3359_v36 = vmax.f32 %v3266_v49, 0.0  ;;  %v4629_v51 = vadd.f32 %v4628_v58, %v4627_v59  ;;  %v4722_v20 = vpop.f32.mrb[165].mxu1  ;;  %v4630_v15 = vpop.f32.mrb[166].mxu0 }
 0x241   :  { %v4723_v6 = vadd.f32 %v4722_v20, %v4721_v27  ;;  %v4724_v21 = vpop.f32.mrb[166].mxu1  ;;  %v4631_v28 = vpop.f32.mrb[167].mxu0 }
 0x242   :  { %v3391_v14 = vmul.f32 %v6228_v10, %v3359_v36  ;;  %v3135_v55 = vadd.f32 %v4629_v51, %v6161_v38  ;;  %v4632_v16 = vadd.f32 %v4631_v28, %v4630_v15  ;;  %v4725_v33 = vpop.f32.mrb[167].mxu1  ;;  %v3422_v35 = vadd.f32 %v6234_v41, %v3390_v7 }
 0x243   :  { %v4726_v24 = vadd.f32 %v4725_v33, %v4724_v21 }
 0x244   :  { %v3423_v22 = vadd.f32 %v6234_v41, %v3391_v14  ;;  %v3271_v63 = vadd.f32 %v4723_v6, %v3135_v55  ;;  %v3138_v23 = vadd.f32 %v4632_v16, %v6164_v29 }
 0x246   :  { %v3972_v52 = vpack.c.bf16 %v3423_v22, %v3422_v35  ;;  %v3360_v19 = vmax.f32 %v3271_v63, 0.0  ;;  %v3274_v45 = vadd.f32 %v4726_v24, %v3138_v23  ;;  %v4633_v17 = vpop.f32.mrb[168].mxu0 }
 0x247   :  { %v4727_v40 = vpop.f32.mrb[168].mxu1  ;;  %v4634_v42 = vpop.f32.mrb[169].mxu0 }
 0x248   :  { %4024 = vst [vmem:[%s6352_s5 + $0x8] sm:$0xff] %v3972_v52   ;;  %v3392_v38 = vmul.f32 %v6228_v10, %v3360_v19  ;;  %v3361_v43 = vmax.f32 %v3274_v45, 0.0  ;;  %v4635_v11 = vadd.f32 %v4634_v42, %v4633_v17  ;;  %v4728_v47 = vpop.f32.mrb[169].mxu1  ;;  %v4636_v56 = vpop.f32.mrb[170].mxu0 }
 0x249   :  { %v4729_v61 = vadd.f32 %v4728_v47, %v4727_v40  ;;  %v4730_v57 = vpop.f32.mrb[170].mxu1  ;;  %v4637_v50 = vpop.f32.mrb[171].mxu0 }
 0x24a   :  { %v3393_v29 = vmul.f32 %v6228_v10, %v3361_v43  ;;  %v3143_v34 = vadd.f32 %v4635_v11, %v6167_v53  ;;  %v4638_v18 = vadd.f32 %v4637_v50, %v4636_v56  ;;  %v4731_v0 = vpop.f32.mrb[171].mxu1  ;;  %v3424_v12 = vadd.f32 %v6234_v41, %v3392_v38 }
 0x24b   :  { %v4732_v5 = vadd.f32 %v4731_v0, %v4730_v57 }
 0x24c   :  { %v3425_v2 = vadd.f32 %v6234_v41, %v3393_v29  ;;  %v3279_v54 = vadd.f32 %v4729_v61, %v3143_v34  ;;  %v3146_v49 = vadd.f32 %v4638_v18, %v6170_v4 }
 0x24e   :  { %v3977_v59 = vpack.c.bf16 %v3425_v2, %v3424_v12  ;;  %v3362_v27 = vmax.f32 %v3279_v54, 0.0  ;;  %v3282_v58 = vadd.f32 %v4732_v5, %v3146_v49  ;;  %v4639_v7 = vpop.f32.mrb[172].mxu0 }
 0x24f   :  { %v4733_v36 = vpop.f32.mrb[172].mxu1  ;;  %v4640_v51 = vpop.f32.mrb[173].mxu0 }
 0x250   :  { %4025 = vst [vmem:[%s6352_s5 + $0x10] sm:$0xff] %v3977_v59   ;;  %v3394_v53 = vmul.f32 %v6228_v10, %v3362_v27  ;;  %v3363_v20 = vmax.f32 %v3282_v58, 0.0  ;;  %v4641_v15 = vadd.f32 %v4640_v51, %v4639_v7  ;;  %v4734_v6 = vpop.f32.mrb[173].mxu1  ;;  %v4642_v21 = vpop.f32.mrb[174].mxu0 }
 0x251   :  { %v4735_v28 = vadd.f32 %v4734_v6, %v4733_v36  ;;  %v4736_v14 = vpop.f32.mrb[174].mxu1  ;;  %v4643_v55 = vpop.f32.mrb[175].mxu0 }
 0x252   :  { %v3395_v4 = vmul.f32 %v6228_v10, %v3363_v20  ;;  %v3151_v16 = vadd.f32 %v4641_v15, %v6173_v8  ;;  %v4644_v33 = vadd.f32 %v4643_v55, %v4642_v21  ;;  %v4737_v24 = vpop.f32.mrb[175].mxu1  ;;  %v3426_v22 = vadd.f32 %v6234_v41, %v3394_v53 }
 0x253   :  { %v4738_v35 = vadd.f32 %v4737_v24, %v4736_v14 }
 0x254   :  { %v3427_v63 = vadd.f32 %v6234_v41, %v3395_v4  ;;  %v3287_v23 = vadd.f32 %v4735_v28, %v3151_v16  ;;  %v3154_v52 = vadd.f32 %v4644_v33, %v6176_v13 }
 0x256   :  { %v3982_v19 = vpack.c.bf16 %v3427_v63, %v3426_v22  ;;  %v3364_v45 = vmax.f32 %v3287_v23, 0.0  ;;  %v3290_v17 = vadd.f32 %v4738_v35, %v3154_v52  ;;  %v4645_v40 = vpop.f32.mrb[176].mxu0 }
 0x257   :  { %v4739_v42 = vpop.f32.mrb[176].mxu1  ;;  %v4646_v38 = vpop.f32.mrb[177].mxu0 }
 0x258   :  { %4026 = vst [vmem:[%s6352_s5 + $0x18] sm:$0xff] %v3982_v19   ;;  %v3396_v8 = vmul.f32 %v6228_v10, %v3364_v45  ;;  %v3365_v43 = vmax.f32 %v3290_v17, 0.0  ;;  %v4647_v11 = vadd.f32 %v4646_v38, %v4645_v40  ;;  %v4740_v47 = vpop.f32.mrb[177].mxu1  ;;  %v4648_v56 = vpop.f32.mrb[178].mxu0 }
 0x259   :  { %v4741_v61 = vadd.f32 %v4740_v47, %v4739_v42  ;;  %v4742_v57 = vpop.f32.mrb[178].mxu1  ;;  %v4649_v50 = vpop.f32.mrb[179].mxu0 }
 0x25a   :  { %v3397_v13 = vmul.f32 %v6228_v10, %v3365_v43  ;;  %v3159_v29 = vadd.f32 %v4647_v11, %v6179_v26  ;;  %v4650_v34 = vadd.f32 %v4649_v50, %v4648_v56  ;;  %v4743_v18 = vpop.f32.mrb[179].mxu1  ;;  %v3428_v5 = vadd.f32 %v6234_v41, %v3396_v8 }
 0x25b   :  { %v4744_v0 = vadd.f32 %v4743_v18, %v4742_v57 }
 0x25c   :  { %v3429_v12 = vadd.f32 %v6234_v41, %v3397_v13  ;;  %v3295_v2 = vadd.f32 %v4741_v61, %v3159_v29  ;;  %v3162_v54 = vadd.f32 %v4650_v34, %v6182_v37 }
 0x25e   :  { %v3987_v49 = vpack.c.bf16 %v3429_v12, %v3428_v5  ;;  %v3366_v59 = vmax.f32 %v3295_v2, 0.0  ;;  %v3298_v27 = vadd.f32 %v4744_v0, %v3162_v54  ;;  %v4651_v58 = vpop.f32.mrb[180].mxu0 }
 0x25f   :  { %v4745_v7 = vpop.f32.mrb[180].mxu1  ;;  %v4652_v36 = vpop.f32.mrb[181].mxu0 }
 0x260   :  { %4027 = vst [vmem:[%s6352_s5 + $0x20] sm:$0xff] %v3987_v49   ;;  %v3398_v26 = vmul.f32 %v6228_v10, %v3366_v59  ;;  %v3367_v51 = vmax.f32 %v3298_v27, 0.0  ;;  %v4653_v53 = vadd.f32 %v4652_v36, %v4651_v58  ;;  %v4746_v20 = vpop.f32.mrb[181].mxu1  ;;  %v4654_v15 = vpop.f32.mrb[182].mxu0 }
 0x261   :  { %v4747_v6 = vadd.f32 %v4746_v20, %v4745_v7  ;;  %v4748_v21 = vpop.f32.mrb[182].mxu1  ;;  %v4655_v28 = vpop.f32.mrb[183].mxu0 }
 0x262   :  { %v3399_v37 = vmul.f32 %v6228_v10, %v3367_v51  ;;  %v3167_v14 = vadd.f32 %v4653_v53, %v6185_v1  ;;  %v4656_v55 = vadd.f32 %v4655_v28, %v4654_v15  ;;  %v4749_v4 = vpop.f32.mrb[183].mxu1  ;;  %v3430_v33 = vadd.f32 %v6234_v41, %v3398_v26 }
 0x263   :  { %v4750_v16 = vadd.f32 %v4749_v4, %v4748_v21 }
 0x264   :  { %v3431_v24 = vadd.f32 %v6234_v41, %v3399_v37  ;;  %v3303_v35 = vadd.f32 %v4747_v6, %v3167_v14  ;;  %v3170_v22 = vadd.f32 %v4656_v55, %v6188_v60 }
 0x266   :  { %v3992_v63 = vpack.c.bf16 %v3431_v24, %v3430_v33  ;;  %v3368_v23 = vmax.f32 %v3303_v35, 0.0  ;;  %v3306_v52 = vadd.f32 %v4750_v16, %v3170_v22  ;;  %v4657_v19 = vpop.f32.mrb[184].mxu0 }
 0x267   :  { %v4751_v45 = vpop.f32.mrb[184].mxu1  ;;  %v4658_v17 = vpop.f32.mrb[185].mxu0 }
 0x268   :  { %4028 = vst [vmem:[%s6352_s5 + $0x28] sm:$0xff] %v3992_v63   ;;  %v3400_v1 = vmul.f32 %v6228_v10, %v3368_v23  ;;  %v3369_v40 = vmax.f32 %v3306_v52, 0.0  ;;  %v4659_v42 = vadd.f32 %v4658_v17, %v4657_v19  ;;  %v4752_v38 = vpop.f32.mrb[185].mxu1  ;;  %v4660_v8 = vpop.f32.mrb[186].mxu0 }
 0x269   :  { %v4753_v43 = vadd.f32 %v4752_v38, %v4751_v45  ;;  %v4754_v11 = vpop.f32.mrb[186].mxu1  ;;  %v4661_v47 = vpop.f32.mrb[187].mxu0 }
 0x26a   :  { %v3401_v60 = vmul.f32 %v6228_v10, %v3369_v40  ;;  %v3175_v56 = vadd.f32 %v4659_v42, %v6191_v48  ;;  %v4662_v61 = vadd.f32 %v4661_v47, %v4660_v8  ;;  %v4755_v57 = vpop.f32.mrb[187].mxu1  ;;  %v3432_v13 = vadd.f32 %v6234_v41, %v3400_v1 }
 0x26b   :  { %v4756_v50 = vadd.f32 %v4755_v57, %v4754_v11 }
 0x26c   :  { %v3433_v29 = vadd.f32 %v6234_v41, %v3401_v60  ;;  %v3311_v34 = vadd.f32 %v4753_v43, %v3175_v56  ;;  %v3178_v18 = vadd.f32 %v4662_v61, %v6194_v31 }
 0x26e   :  { %v3997_v0 = vpack.c.bf16 %v3433_v29, %v3432_v13  ;;  %v3370_v5 = vmax.f32 %v3311_v34, 0.0  ;;  %v3314_v12 = vadd.f32 %v4756_v50, %v3178_v18  ;;  %v4663_v2 = vpop.f32.mrb[188].mxu0 }
 0x26f   :  { %v4757_v54 = vpop.f32.mrb[188].mxu1  ;;  %v4664_v49 = vpop.f32.mrb[189].mxu0 }
 0x270   :  { %4029 = vst [vmem:[%s6352_s5 + $0x30] sm:$0xff] %v3997_v0   ;;  %v3402_v48 = vmul.f32 %v6228_v10, %v3370_v5  ;;  %v3371_v59 = vmax.f32 %v3314_v12, 0.0  ;;  %v4665_v27 = vadd.f32 %v4664_v49, %v4663_v2  ;;  %v4758_v58 = vpop.f32.mrb[189].mxu1  ;;  %v4666_v7 = vpop.f32.mrb[190].mxu0 }
 0x271   :  { %v4759_v36 = vadd.f32 %v4758_v58, %v4757_v54  ;;  %v4760_v26 = vpop.f32.mrb[190].mxu1  ;;  %v4667_v51 = vpop.f32.mrb[191].mxu0 }
 0x272   :  { %v3403_v31 = vmul.f32 %v6228_v10, %v3371_v59  ;;  %v3183_v53 = vadd.f32 %v4665_v27, %v6197_v25  ;;  %v4668_v20 = vadd.f32 %v4667_v51, %v4666_v7  ;;  %v4761_v15 = vpop.f32.mrb[191].mxu1  ;;  %v3434_v21 = vadd.f32 %v6234_v41, %v3402_v48 }
 0x273   :  { %v4762_v6 = vadd.f32 %v4761_v15, %v4760_v26 }
 0x274   :  { %v3435_v28 = vadd.f32 %v6234_v41, %v3403_v31  ;;  %v3319_v37 = vadd.f32 %v4759_v36, %v3183_v53  ;;  %v3186_v14 = vadd.f32 %v4668_v20, %v6200_v3 }
 0x276   :  { %v4002_v55 = vpack.c.bf16 %v3435_v28, %v3434_v21  ;;  %v3372_v4 = vmax.f32 %v3319_v37, 0.0  ;;  %v3322_v16 = vadd.f32 %v4762_v6, %v3186_v14  ;;  %v4669_v33 = vpop.f32.mrb[192].mxu0 }
 0x277   :  { %v4763_v24 = vpop.f32.mrb[192].mxu1  ;;  %v4670_v35 = vpop.f32.mrb[193].mxu0 }
 0x278   :  { %4030 = vst [vmem:[%s6352_s5 + $0x38] sm:$0xff] %v4002_v55   ;;  %v3404_v25 = vmul.f32 %v6228_v10, %v3372_v4  ;;  %v3373_v22 = vmax.f32 %v3322_v16, 0.0  ;;  %v4671_v63 = vadd.f32 %v4670_v35, %v4669_v33  ;;  %v4764_v23 = vpop.f32.mrb[193].mxu1  ;;  %v4672_v52 = vpop.f32.mrb[194].mxu0 }
 0x279   :  { %v4765_v19 = vadd.f32 %v4764_v23, %v4763_v24  ;;  %v4766_v45 = vpop.f32.mrb[194].mxu1  ;;  %v4673_v17 = vpop.f32.mrb[195].mxu0 }
 0x27a   :  { %v3405_v3 = vmul.f32 %v6228_v10, %v3373_v22  ;;  %v3191_v1 = vadd.f32 %v4671_v63, %v6203_v30  ;;  %v4674_v40 = vadd.f32 %v4673_v17, %v4672_v52  ;;  %v4767_v42 = vpop.f32.mrb[195].mxu1  ;;  %v3436_v8 = vadd.f32 %v6234_v41, %v3404_v25 }
 0x27b   :  { %v4768_v38 = vadd.f32 %v4767_v42, %v4766_v45 }
 0x27c   :  { %v3437_v43 = vadd.f32 %v6234_v41, %v3405_v3  ;;  %v3327_v11 = vadd.f32 %v4765_v19, %v3191_v1  ;;  %v3194_v47 = vadd.f32 %v4674_v40, %v6206_v39 }
 0x27e   :  { %v4007_v60 = vpack.c.bf16 %v3437_v43, %v3436_v8  ;;  %v3374_v56 = vmax.f32 %v3327_v11, 0.0  ;;  %v3330_v61 = vadd.f32 %v4768_v38, %v3194_v47  ;;  %v4675_v57 = vpop.f32.mrb[196].mxu0 }
 0x27f   :  { %v4769_v50 = vpop.f32.mrb[196].mxu1  ;;  %v4676_v13 = vpop.f32.mrb[197].mxu0 }
 0x280   :  { %4031 = vst [vmem:[%s6352_s5 + $0x40] sm:$0xff] %v4007_v60   ;;  %v3406_v30 = vmul.f32 %v6228_v10, %v3374_v56  ;;  %v3375_v29 = vmax.f32 %v3330_v61, 0.0  ;;  %v4677_v34 = vadd.f32 %v4676_v13, %v4675_v57  ;;  %v4770_v18 = vpop.f32.mrb[197].mxu1  ;;  %v4678_v0 = vpop.f32.mrb[198].mxu0 }
 0x281   :  { %v4771_v5 = vadd.f32 %v4770_v18, %v4769_v50  ;;  %v4772_v12 = vpop.f32.mrb[198].mxu1  ;;  %v4679_v2 = vpop.f32.mrb[199].mxu0 }
 0x282   :  { %v3407_v39 = vmul.f32 %v6228_v10, %v3375_v29  ;;  %v3199_v54 = vadd.f32 %v4677_v34, %v6209_v62  ;;  %v4680_v49 = vadd.f32 %v4679_v2, %v4678_v0  ;;  %v4773_v48 = vpop.f32.mrb[199].mxu1  ;;  %v3438_v27 = vadd.f32 %v6234_v41, %v3406_v30 }
 0x283   :  { %v4774_v59 = vadd.f32 %v4773_v48, %v4772_v12 }
 0x284   :  { %v3439_v58 = vadd.f32 %v6234_v41, %v3407_v39  ;;  %v3335_v7 = vadd.f32 %v4771_v5, %v3199_v54  ;;  %v3202_v36 = vadd.f32 %v4680_v49, %v6212_v9 }
 0x286   :  { %v4012_v26 = vpack.c.bf16 %v3439_v58, %v3438_v27  ;;  %v3376_v51 = vmax.f32 %v3335_v7, 0.0  ;;  %v3338_v31 = vadd.f32 %v4774_v59, %v3202_v36  ;;  %v4681_v53 = vpop.f32.mrb[200].mxu0 }
 0x287   :  { %v4775_v20 = vpop.f32.mrb[200].mxu1  ;;  %v4682_v15 = vpop.f32.mrb[201].mxu0 }
 0x288   :  { %4032 = vst [vmem:[%s6352_s5 + $0x48] sm:$0xff] %v4012_v26   ;;  %v3408_v62 = vmul.f32 %v6228_v10, %v3376_v51  ;;  %v3377_v6 = vmax.f32 %v3338_v31, 0.0  ;;  %v4683_v21 = vadd.f32 %v4682_v15, %v4681_v53  ;;  %v4776_v28 = vpop.f32.mrb[201].mxu1  ;;  %v4684_v37 = vpop.f32.mrb[202].mxu0 }
 0x289   :  { %v4777_v14 = vadd.f32 %v4776_v28, %v4775_v20  ;;  %v4778_v55 = vpop.f32.mrb[202].mxu1  ;;  %v4685_v4 = vpop.f32.mrb[203].mxu0 }
 0x28a   :  { %v3409_v9 = vmul.f32 %v6228_v10, %v3377_v6  ;;  %v3207_v16 = vadd.f32 %v4683_v21, %v6215_v32  ;;  %v4686_v33 = vadd.f32 %v4685_v4, %v4684_v37  ;;  %v4779_v24 = vpop.f32.mrb[203].mxu1  ;;  %v3440_v25 = vadd.f32 %v6234_v41, %v3408_v62 }
 0x28b   :  { %v4780_v35 = vadd.f32 %v4779_v24, %v4778_v55 }
 0x28c   :  { %v3441_v22 = vadd.f32 %v6234_v41, %v3409_v9  ;;  %v3343_v63 = vadd.f32 %v4777_v14, %v3207_v16  ;;  %v3210_v23 = vadd.f32 %v4686_v33, %v6218_v46 }
 0x28e   :  { %v4017_v52 = vpack.c.bf16 %v3441_v22, %v3440_v25  ;;  %v3378_v19 = vmax.f32 %v3343_v63, 0.0  ;;  %v3346_v45 = vadd.f32 %v4780_v35, %v3210_v23  ;;  %v4687_v17 = vpop.f32.mrb[204].mxu0 }
 0x28f   :  { %v4781_v3 = vpop.f32.mrb[204].mxu1  ;;  %v4688_v1 = vpop.f32.mrb[205].mxu0 }
 0x290   :  { %4033 = vst [vmem:[%s6352_s5 + $0x50] sm:$0xff] %v4017_v52   ;;  %v3410_v32 = vmul.f32 %v6228_v10, %v3378_v19  ;;  %v3379_v40 = vmax.f32 %v3346_v45, 0.0  ;;  %v4689_v42 = vadd.f32 %v4688_v1, %v4687_v17  ;;  %v4782_v38 = vpop.f32.mrb[205].mxu1  ;;  %v4690_v8 = vpop.f32.mrb[206].mxu0 }
 0x291   :  { %v4783_v43 = vadd.f32 %v4782_v38, %v4781_v3  ;;  %v4784_v11 = vpop.f32.mrb[206].mxu1  ;;  %v4691_v47 = vpop.f32.mrb[207].mxu0 }
 0x292   :  { %v3411_v46 = vmul.f32 %v6228_v10, %v3379_v40  ;;  %v3215_v60 = vadd.f32 %v4689_v42, %v6221_v44  ;;  %v4785_v56 = vpop.f32.mrb[207].mxu1  ;;  %v3442_v61 = vadd.f32 %v6234_v41, %v3410_v32 }
 0x294   :  { %v3443_v57 = vadd.f32 %v6234_v41, %v3411_v46  ;;  %v3351_v50 = vadd.f32 %v4783_v43, %v3215_v60 }
 0x296   :  { %v4022_v13 = vpack.c.bf16 %v3443_v57, %v3442_v61  ;;  %v3380_v30 = vmax.f32 %v3351_v50, 0.0 }
 0x298   :  { %4034 = vst [vmem:[%s6352_s5 + $0x58] sm:$0xff] %v4022_v13   ;;  %v3412_v29 = vmul.f32 %v6228_v10, %v3380_v30 }
 0x29a   :  { %v3444_v34 = vadd.f32 %v6234_v41, %v3412_v29 }
 0x29c   :  { %v3963_v18 = vpack.c.bf16 %v3444_v34, %v3444_v34 }
 0x29e   :  { %3570 = vst [vmem:[%s6352_s5 + $0x60] sm:$0xf] %v3963_v18 }

// kernel: forward.6
= control target key start
LH: loop header
LB: loop body
LE: loop exit
PB: predicated region body
PF: predicated region fallthrough
CT: control target
= control target key end

     0   :  { %s3317_s1 = inlined_call_operand.vmem [shape: bf16[2048,128], index: 1, kind: input, shape index: {}]   ;;  %s3318_s0 = inlined_call_operand.vmem [shape: bf16[50,2048], index: 0, kind: input, shape index: {}]   ;;  %s3319_s2 = inlined_call_operand.vmem [shape: f32[1,128], index: 2, kind: input, shape index: {}]   ;;  %s3320_s3 = inlined_call_operand.vmem [shape: f32[1,128], index: 3, kind: input, shape index: {}]   ;;  %s3321_s4 = inlined_call_operand.vmem [shape: f32[1,128], index: 4, kind: input, shape index: {}]   ;;  %s3322_s5 = inlined_call_operand.vmem [shape: bf16[50,128], index: 5, kind: output, shape index: {}]  }
   0x1   :  { %v2537_v0 = vld [vmem:[%s3317_s1 + $0x40] sm:$0xff]   ;;  %v2541_v4 = vld [vmem:[%s3317_s1 + $0x48] sm:$0xff]   ;;  %v2545_v8 = vld [vmem:[%s3317_s1 + $0x50] sm:$0xff]  }
   0x2   :  { %v2538_v1 = vld [vmem:[%s3317_s1 + $0xc0] sm:$0xff]   ;;  %2217 = vmatprep.subr.bf16.mxu0 %v2537_v0  ;;  %v2542_v5 = vld [vmem:[%s3317_s1 + $0xc8] sm:$0xff]   ;;  %v2546_v9 = vld [vmem:[%s3317_s1 + $0xd0] sm:$0xff]  }
   0x3   :  { %v2539_v2 = vld [vmem:[%s3317_s1] sm:$0xff]   ;;  %2257 = vmatprep.subr.bf16.mxu1 %v2538_v1  ;;  %v2543_v6 = vld [vmem:[%s3317_s1 + $0x8] sm:$0xff]   ;;  %v2547_v10 = vld [vmem:[%s3317_s1 + $0x10] sm:$0xff]  }
   0x4   :  { %v2540_v3 = vld [vmem:[%s3317_s1 + $0x80] sm:$0xff]   ;;  %2218 = vmatpush3.bf16.msra.mxu0 %v2539_v2  ;;  %v2544_v7 = vld [vmem:[%s3317_s1 + $0x88] sm:$0xff]   ;;  %v2548_v11 = vld [vmem:[%s3317_s1 + $0x90] sm:$0xff]  }
   0x5   :  { %2258 = vmatpush3.bf16.msra.mxu1 %v2540_v3  ;;  %2219 = vmatprep.subr.bf16.mxu0 %v2541_v4  ;;  %v2549_v12 = vld [vmem:[%s3317_s1 + $0x58] sm:$0xff]   ;;  %v2553_v16 = vld [vmem:[%s3317_s1 + $0x60] sm:$0xff]   ;;  %v2557_v20 = vld [vmem:[%s3317_s1 + $0x68] sm:$0xff]  }
   0x6   :  { %2259 = vmatprep.subr.bf16.mxu1 %v2542_v5  ;;  %v2550_v13 = vld [vmem:[%s3317_s1 + $0xd8] sm:$0xff]   ;;  %v2554_v17 = vld [vmem:[%s3317_s1 + $0xe0] sm:$0xff]   ;;  %v2558_v21 = vld [vmem:[%s3317_s1 + $0xe8] sm:$0xff]  }
   0x7   :  { %v2551_v14 = vld [vmem:[%s3317_s1 + $0x18] sm:$0xff]   ;;  %v2555_v18 = vld [vmem:[%s3317_s1 + $0x20] sm:$0xff]   ;;  %v2559_v22 = vld [vmem:[%s3317_s1 + $0x28] sm:$0xff]  }
   0x8   :  { %2220 = vmatpush3.bf16.msra.mxu0 %v2543_v6  ;;  %v2552_v15 = vld [vmem:[%s3317_s1 + $0x98] sm:$0xff]   ;;  %v2556_v19 = vld [vmem:[%s3317_s1 + $0xa0] sm:$0xff]   ;;  %v2560_v23 = vld [vmem:[%s3317_s1 + $0xa8] sm:$0xff]  }
   0x9   :  { %2260 = vmatpush3.bf16.msra.mxu1 %v2544_v7  ;;  %2221 = vmatprep.subr.bf16.mxu0 %v2545_v8  ;;  %v2561_v24 = vld [vmem:[%s3317_s1 + $0x70] sm:$0xff]   ;;  %v2565_v28 = vld [vmem:[%s3317_s1 + $0x78] sm:$0xff]   ;;  %v21_v32 = vld [vmem:[%s3318_s0] sm:$0xff] }
   0xa   :  { %2261 = vmatprep.subr.bf16.mxu1 %v2546_v9  ;;  %v2562_v25 = vld [vmem:[%s3317_s1 + $0xf0] sm:$0xff]   ;;  %v2566_v29 = vld [vmem:[%s3317_s1 + $0xf8] sm:$0xff]   ;;  %v29_v33 = vld [vmem:[%s3318_s0 + $0x40] sm:$0xff] }
   0xb   :  { %v2563_v26 = vld [vmem:[%s3317_s1 + $0x30] sm:$0xff]   ;;  %v2567_v30 = vld [vmem:[%s3317_s1 + $0x38] sm:$0xff]   ;;  %v22_v34 = vld [vmem:[%s3318_s0 + $0x8] sm:$0xff]  ;;  %v1992_v35 = vcombine.low %v21_v32, %v29_v33  ;;  %v1993_v36 = vcombine.high %v21_v32, %v29_v33 }
   0xc   :  { %2222 = vmatpush3.bf16.msra.mxu0 %v2547_v10  ;;  %v2564_v27 = vld [vmem:[%s3317_s1 + $0xb0] sm:$0xff]   ;;  %v2568_v31 = vld [vmem:[%s3317_s1 + $0xb8] sm:$0xff]   ;;  %v30_v37 = vld [vmem:[%s3318_s0 + $0x48] sm:$0xff] }
   0xd   :  { %2262 = vmatpush3.bf16.msra.mxu1 %v2548_v11  ;;  %2223 = vmatprep.subr.bf16.mxu0 %v2549_v12  ;;  %v1994_v38 = vcombine.low %v22_v34, %v30_v37  ;;  %v1995_v39 = vcombine.high %v22_v34, %v30_v37  ;;  %v2569_v40 = vld [vmem:[%s3317_s1 + $0x140] sm:$0xff]   ;;  %v2573_v44 = vld [vmem:[%s3317_s1 + $0x148] sm:$0xff]   ;;  %v2577_v56 = vld [vmem:[%s3317_s1 + $0x150] sm:$0xff]  }
   0xe   :  { %2263 = vmatprep.subr.bf16.mxu1 %v2550_v13  ;;  %1436 = vmatprep.mubr.bf16.mxu0 %v1993_v36  ;;  %v2570_v41 = vld [vmem:[%s3317_s1 + $0x1c0] sm:$0xff]   ;;  %v2574_v45 = vld [vmem:[%s3317_s1 + $0x1c8] sm:$0xff]   ;;  %v2578_v57 = vld [vmem:[%s3317_s1 + $0x1d0] sm:$0xff]  }
   0xf   :  { %1500 = vmatprep.mubr.bf16.mxu1 %v1995_v39  ;;  %v2571_v42 = vld [vmem:[%s3317_s1 + $0x100] sm:$0xff]   ;;  %v2575_v46 = vld [vmem:[%s3317_s1 + $0x108] sm:$0xff]   ;;  %v2579_v58 = vld [vmem:[%s3317_s1 + $0x110] sm:$0xff]  }
  0x10   :  { %2224 = vmatpush3.bf16.msra.mxu0 %v2551_v14  ;;  %v2572_v43 = vld [vmem:[%s3317_s1 + $0x180] sm:$0xff]   ;;  %v2576_v47 = vld [vmem:[%s3317_s1 + $0x188] sm:$0xff]   ;;  %v2580_v59 = vld [vmem:[%s3317_s1 + $0x190] sm:$0xff]  }
  0x11   :  { %2264 = vmatpush3.bf16.msra.mxu1 %v2552_v15  ;;  %2225 = vmatprep.subr.bf16.mxu0 %v2553_v16  ;;  %v37_v48 = vld [vmem:[%s3318_s0 + $0x80] sm:$0xff]  ;;  %v38_v51 = vld [vmem:[%s3318_s0 + $0x88] sm:$0xff]  ;;  %v2581_v60 = vld [vmem:[%s3317_s1 + $0x158] sm:$0xff]  }
  0x12   :  { %2265 = vmatprep.subr.bf16.mxu1 %v2554_v17  ;;  %v45_v49 = vld [vmem:[%s3318_s0 + $0xc0] sm:$0xff]  ;;  %v46_v52 = vld [vmem:[%s3318_s0 + $0xc8] sm:$0xff]  ;;  %v2582_v61 = vld [vmem:[%s3317_s1 + $0x1d8] sm:$0xff]  }
  0x13   :  { %v2009_v50 = vcombine.high %v37_v48, %v45_v49  ;;  %v2008_v53 = vcombine.low %v37_v48, %v45_v49  ;;  %v2011_v54 = vcombine.high %v38_v51, %v46_v52  ;;  %v2010_v55 = vcombine.low %v38_v51, %v46_v52  ;;  %v2583_v62 = vld [vmem:[%s3317_s1 + $0x118] sm:$0xff]   ;;  %v53_v0 = vld [vmem:[%s3318_s0 + $0x100] sm:$0xff]  ;;  %v54_v2 = vld [vmem:[%s3318_s0 + $0x108] sm:$0xff] }
  0x14   :  { %2226 = vmatpush3.bf16.msra.mxu0 %v2555_v18  ;;  %v2584_v63 = vld [vmem:[%s3317_s1 + $0x198] sm:$0xff]   ;;  %v61_v1 = vld [vmem:[%s3318_s0 + $0x140] sm:$0xff]  ;;  %v62_v3 = vld [vmem:[%s3318_s0 + $0x148] sm:$0xff] }
  0x15   :  { %2266 = vmatpush3.bf16.msra.mxu1 %v2556_v19  ;;  %2227 = vmatprep.subr.bf16.mxu0 %v2557_v20  ;;  %v2025_v4 = vcombine.high %v53_v0, %v61_v1  ;;  %v2027_v5 = vcombine.high %v54_v2, %v62_v3  ;;  %v2024_v6 = vcombine.low %v53_v0, %v61_v1  ;;  %v2585_v8 = vld [vmem:[%s3317_s1 + $0x160] sm:$0xff]   ;;  %v2589_v12 = vld [vmem:[%s3317_s1 + $0x168] sm:$0xff]   ;;  %v24_v32 = vld [vmem:[%s3318_s0 + $0x18] sm:$0xff] }
  0x16   :  { %2267 = vmatprep.subr.bf16.mxu1 %v2558_v21  ;;  %v2026_v7 = vcombine.low %v54_v2, %v62_v3  ;;  %v2586_v9 = vld [vmem:[%s3317_s1 + $0x1e0] sm:$0xff]   ;;  %v2590_v13 = vld [vmem:[%s3317_s1 + $0x1e8] sm:$0xff]   ;;  %v2597_v21 = vld [vmem:[%s3317_s1 + $0x170] sm:$0xff]  }
  0x17   :  { %v2587_v10 = vld [vmem:[%s3317_s1 + $0x120] sm:$0xff]   ;;  %v2591_v14 = vld [vmem:[%s3317_s1 + $0x128] sm:$0xff]   ;;  %v32_v33 = vld [vmem:[%s3318_s0 + $0x58] sm:$0xff] }
  0x18   :  { %2228 = vmatpush3.bf16.msra.mxu0 %v2559_v22  ;;  %v2588_v11 = vld [vmem:[%s3317_s1 + $0x1a0] sm:$0xff]   ;;  %v2592_v15 = vld [vmem:[%s3317_s1 + $0x1a8] sm:$0xff]   ;;  %v1998_v36 = vcombine.low %v24_v32, %v32_v33  ;;  %v40_v48 = vld [vmem:[%s3318_s0 + $0x98] sm:$0xff] }
  0x19   :  { %2268 = vmatpush3.bf16.msra.mxu1 %v2560_v23  ;;  %2229 = vmatprep.subr.bf16.mxu0 %v2561_v24  ;;  %v69_v16 = vld [vmem:[%s3318_s0 + $0x180] sm:$0x11]  ;;  %v70_v17 = vld [vmem:[%s3318_s0 + $0x188] sm:$0x11]  ;;  %v2598_v23 = vld [vmem:[%s3317_s1 + $0x1f0] sm:$0xff]  }
  0x1a   :  { %2269 = vmatprep.subr.bf16.mxu1 %v2562_v25  ;;  %v2041_v18 = vcombine.high %v69_v16, %v69_v16  ;;  %v2043_v19 = vcombine.high %v70_v17, %v70_v17  ;;  %v2040_v20 = vcombine.low %v69_v16, %v69_v16  ;;  %v2042_v22 = vcombine.low %v70_v17, %v70_v17  ;;  %v2599_v24 = vld [vmem:[%s3317_s1 + $0x130] sm:$0xff]   ;;  %v2605_v37 = vld [vmem:[%s3317_s1 + $0x240] sm:$0xff]   ;;  %v56_v1 = vld [vmem:[%s3318_s0 + $0x118] sm:$0xff] }
  0x1b   :  { %v2600_v25 = vld [vmem:[%s3317_s1 + $0x1b0] sm:$0xff]   ;;  %v2606_v39 = vld [vmem:[%s3317_s1 + $0x2c0] sm:$0xff]   ;;  %v64_v2 = vld [vmem:[%s3318_s0 + $0x158] sm:$0xff] }
  0x1c   :  { %2230 = vmatpush3.bf16.msra.mxu0 %v2563_v26  ;;  %v2601_v26 = vld [vmem:[%s3317_s1 + $0x178] sm:$0xff]  }
  0x1d   :  { %2270 = vmatpush3.bf16.msra.mxu1 %v2564_v27  ;;  %2231 = vmatprep.subr.bf16.mxu0 %v2565_v28  ;;  %v2602_v27 = vld [vmem:[%s3317_s1 + $0x1f8] sm:$0xff]  }
  0x1e   :  { %2271 = vmatprep.subr.bf16.mxu1 %v2566_v29  ;;  %v2603_v28 = vld [vmem:[%s3317_s1 + $0x138] sm:$0xff]  }
  0x1f   :  { %v2604_v29 = vld [vmem:[%s3317_s1 + $0x1b8] sm:$0xff]  }
  0x20   :  { %2232 = vmatpush3.bf16.msra.mxu0 %v2567_v30  ;;  %v23_v30 = vld [vmem:[%s3318_s0 + $0x10] sm:$0xff]  ;;  %v72_v16 = vld [vmem:[%s3318_s0 + $0x198] sm:$0x11] }
  0x21   :  { %2272 = vmatpush3.bf16.msra.mxu1 %v2568_v31  ;;  %2297 = vmatprep.subr.bf16.mxu0 %v2569_v40  ;;  %v31_v31 = vld [vmem:[%s3318_s0 + $0x50] sm:$0xff]  ;;  %v2607_v40 = vld [vmem:[%s3317_s1 + $0x200] sm:$0xff]  }
  0x22   :  { %2337 = vmatprep.subr.bf16.mxu1 %v2570_v41  ;;  %v1996_v34 = vcombine.low %v23_v30, %v31_v31  ;;  %v2608_v41 = vld [vmem:[%s3317_s1 + $0x280] sm:$0xff]  }
  0x23   :  { %1437 = vmatmul.mubr.bf16.vlgmr.msra.gmra.mrb[0].mxu0 %v1992_v35  ;;  %v1997_v35 = vcombine.high %v23_v30, %v31_v31 }
  0x24   :  { %1501 = vmatmul.mubr.bf16.vlgmr.msra.gmra.mrb[0].mxu1 %v1994_v38  ;;  %2298 = vmatpush3.bf16.msra.mxu0 %v2571_v42  ;;  %v1999_v38 = vcombine.high %v24_v32, %v32_v33  ;;  %v2609_v42 = vld [vmem:[%s3317_s1 + $0x248] sm:$0xff]  }
  0x25   :  { %2338 = vmatpush3.bf16.msra.mxu1 %v2572_v43  ;;  %2299 = vmatprep.subr.bf16.mxu0 %v2573_v44  ;;  %v2610_v43 = vld [vmem:[%s3317_s1 + $0x2c8] sm:$0xff]  }
  0x26   :  { %2339 = vmatprep.subr.bf16.mxu1 %v2574_v45  ;;  %1444 = vmatprep.mubr.bf16.mxu0 %v2009_v50  ;;  %v2611_v44 = vld [vmem:[%s3317_s1 + $0x208] sm:$0xff]   ;;  %v48_v50 = vld [vmem:[%s3318_s0 + $0xd8] sm:$0xff] }
  0x27   :  { %1508 = vmatprep.mubr.bf16.mxu1 %v2011_v54  ;;  %v2612_v45 = vld [vmem:[%s3317_s1 + $0x288] sm:$0xff]   ;;  %v2015_v52 = vcombine.high %v40_v48, %v48_v50  ;;  %v2613_v54 = vld [vmem:[%s3317_s1 + $0x250] sm:$0xff]  }
  0x28   :  { %2300 = vmatpush3.bf16.msra.mxu0 %v2575_v46  ;;  %v39_v46 = vld [vmem:[%s3318_s0 + $0x90] sm:$0xff]  ;;  %v26_v32 = vld [vmem:[%s3318_s0 + $0x28] sm:$0xff] }
  0x29   :  { %2340 = vmatpush3.bf16.msra.mxu1 %v2576_v47  ;;  %2301 = vmatprep.subr.bf16.mxu0 %v2577_v56  ;;  %v47_v47 = vld [vmem:[%s3318_s0 + $0xd0] sm:$0xff]  ;;  %v34_v33 = vld [vmem:[%s3318_s0 + $0x68] sm:$0xff] }
  0x2a   :  { %2341 = vmatprep.subr.bf16.mxu1 %v2578_v57  ;;  %v2013_v49 = vcombine.high %v39_v46, %v47_v47  ;;  %v2012_v51 = vcombine.low %v39_v46, %v47_v47  ;;  %v2615_v56 = vld [vmem:[%s3317_s1 + $0x210] sm:$0xff]   ;;  %v42_v46 = vld [vmem:[%s3318_s0 + $0xa8] sm:$0xff] }
  0x2b   :  { %1445 = vmatmul.mubr.bf16.gmra.mrb[4].mxu0 %v2008_v53  ;;  %v2014_v53 = vcombine.low %v40_v48, %v48_v50  ;;  %v2616_v57 = vld [vmem:[%s3317_s1 + $0x290] sm:$0xff]   ;;  %v50_v47 = vld [vmem:[%s3318_s0 + $0xe8] sm:$0xff] }
  0x2c   :  { %1509 = vmatmul.mubr.bf16.gmra.mrb[4].mxu1 %v2010_v55  ;;  %2302 = vmatpush3.bf16.msra.mxu0 %v2579_v58  ;;  %v2614_v55 = vld [vmem:[%s3317_s1 + $0x2d0] sm:$0xff]   ;;  %v2617_v58 = vld [vmem:[%s3317_s1 + $0x258] sm:$0xff]  }
  0x2d   :  { %2342 = vmatpush3.bf16.msra.mxu1 %v2580_v59  ;;  %2303 = vmatprep.subr.bf16.mxu0 %v2581_v60  ;;  %v2618_v59 = vld [vmem:[%s3317_s1 + $0x2d8] sm:$0xff]  }
  0x2e   :  { %2343 = vmatprep.subr.bf16.mxu1 %v2582_v61  ;;  %1452 = vmatprep.mubr.bf16.mxu0 %v2025_v4  ;;  %v2619_v60 = vld [vmem:[%s3317_s1 + $0x218] sm:$0xff]   ;;  %v2031_v4 = vcombine.high %v56_v1, %v64_v2 }
  0x2f   :  { %1516 = vmatprep.mubr.bf16.mxu1 %v2027_v5  ;;  %v2620_v61 = vld [vmem:[%s3317_s1 + $0x298] sm:$0xff]   ;;  %v2030_v5 = vcombine.low %v56_v1, %v64_v2 }
  0x30   :  { %2304 = vmatpush3.bf16.msra.mxu0 %v2583_v62  ;;  %v55_v62 = vld [vmem:[%s3318_s0 + $0x110] sm:$0xff] }
  0x31   :  { %2344 = vmatpush3.bf16.msra.mxu1 %v2584_v63  ;;  %2305 = vmatprep.subr.bf16.mxu0 %v2585_v8  ;;  %v63_v63 = vld [vmem:[%s3318_s0 + $0x150] sm:$0xff]  ;;  %v2623_v8 = vld [vmem:[%s3317_s1 + $0x220] sm:$0xff]  }
  0x32   :  { %2345 = vmatprep.subr.bf16.mxu1 %v2586_v9  ;;  %v2029_v0 = vcombine.high %v55_v62, %v63_v63  ;;  %v2028_v3 = vcombine.low %v55_v62, %v63_v63  ;;  %v2624_v9 = vld [vmem:[%s3317_s1 + $0x2a0] sm:$0xff]   ;;  %v58_v62 = vld [vmem:[%s3318_s0 + $0x128] sm:$0xff] }
  0x33   :  { %1453 = vmatmul.mubr.bf16.gmra.mrb[8].mxu0 %v2024_v6  ;;  %v2621_v6 = vld [vmem:[%s3317_s1 + $0x260] sm:$0xff]  }
  0x34   :  { %1517 = vmatmul.mubr.bf16.gmra.mrb[8].mxu1 %v2026_v7  ;;  %2306 = vmatpush3.bf16.msra.mxu0 %v2587_v10  ;;  %v2622_v7 = vld [vmem:[%s3317_s1 + $0x2e0] sm:$0xff]   ;;  %v2625_v10 = vld [vmem:[%s3317_s1 + $0x268] sm:$0xff]  }
  0x35   :  { %2346 = vmatpush3.bf16.msra.mxu1 %v2588_v11  ;;  %2307 = vmatprep.subr.bf16.mxu0 %v2589_v12  ;;  %v2626_v11 = vld [vmem:[%s3317_s1 + $0x2e8] sm:$0xff]  }
  0x36   :  { %2347 = vmatprep.subr.bf16.mxu1 %v2590_v13  ;;  %1460 = vmatprep.mubr.bf16.mxu0 %v2041_v18  ;;  %v2627_v12 = vld [vmem:[%s3317_s1 + $0x228] sm:$0xff]   ;;  %v2047_v18 = vcombine.high %v72_v16, %v72_v16 }
  0x37   :  { %1524 = vmatprep.mubr.bf16.mxu1 %v2043_v19  ;;  %v2628_v13 = vld [vmem:[%s3317_s1 + $0x2a8] sm:$0xff]   ;;  %v2046_v19 = vcombine.low %v72_v16, %v72_v16 }
  0x38   :  { %2308 = vmatpush3.bf16.msra.mxu0 %v2591_v14  ;;  %v71_v14 = vld [vmem:[%s3318_s0 + $0x190] sm:$0x11] }
  0x39   :  { %2348 = vmatpush3.bf16.msra.mxu1 %v2592_v15  ;;  %2309 = vmatprep.subr.bf16.mxu0 %v2597_v21  ;;  %v2045_v15 = vcombine.high %v71_v14, %v71_v14  ;;  %v2044_v17 = vcombine.low %v71_v14, %v71_v14  ;;  %v2634_v21 = vld [vmem:[%s3317_s1 + $0x2f0] sm:$0xff]  }
  0x3a   :  { %2349 = vmatprep.subr.bf16.mxu1 %v2598_v23  ;;  %v2636_v23 = vld [vmem:[%s3317_s1 + $0x2b0] sm:$0xff]  }
  0x3b   :  { %1461 = vmatmul.mubr.bf16.gmra.mrb[12].mxu0 %v2040_v20  ;;  %v2633_v20 = vld [vmem:[%s3317_s1 + $0x270] sm:$0xff]  }
  0x3c   :  { %1525 = vmatmul.mubr.bf16.gmra.mrb[12].mxu1 %v2042_v22  ;;  %2310 = vmatpush3.bf16.msra.mxu0 %v2599_v24  ;;  %v2635_v22 = vld [vmem:[%s3317_s1 + $0x230] sm:$0xff]   ;;  %v2637_v24 = vld [vmem:[%s3317_s1 + $0x278] sm:$0xff]  }
  0x3d   :  { %2350 = vmatpush3.bf16.msra.mxu1 %v2600_v25  ;;  %2311 = vmatprep.subr.bf16.mxu0 %v2601_v26  ;;  %v2638_v25 = vld [vmem:[%s3317_s1 + $0x2f8] sm:$0xff]  }
  0x3e   :  { %2351 = vmatprep.subr.bf16.mxu1 %v2602_v27  ;;  %1564 = vmatprep.mubr.bf16.mxu0 %v1997_v35  ;;  %v2639_v26 = vld [vmem:[%s3317_s1 + $0x238] sm:$0xff]   ;;  %v2003_v35 = vcombine.high %v26_v32, %v34_v33 }
  0x3f   :  { %1628 = vmatprep.mubr.bf16.mxu1 %v1999_v38  ;;  %v2640_v27 = vld [vmem:[%s3317_s1 + $0x2b8] sm:$0xff]   ;;  %v2643_v38 = vld [vmem:[%s3317_s1 + $0x300] sm:$0xff]  }
  0x40   :  { %2312 = vmatpush3.bf16.msra.mxu0 %v2603_v28  ;;  %v25_v28 = vld [vmem:[%s3318_s0 + $0x20] sm:$0xff] }
  0x41   :  { %2352 = vmatpush3.bf16.msra.mxu1 %v2604_v29  ;;  %2377 = vmatprep.subr.bf16.mxu0 %v2605_v37  ;;  %v33_v29 = vld [vmem:[%s3318_s0 + $0x60] sm:$0xff] }
  0x42   :  { %2417 = vmatprep.subr.bf16.mxu1 %v2606_v39  ;;  %v2000_v30 = vcombine.low %v25_v28, %v33_v29  ;;  %v2001_v31 = vcombine.high %v25_v28, %v33_v29  ;;  %v2642_v37 = vld [vmem:[%s3317_s1 + $0x3c0] sm:$0xff]   ;;  %v28_v28 = vld [vmem:[%s3318_s0 + $0x38] sm:$0xff] }
  0x43   :  { %1565 = vmatmul.mubr.bf16.vlgmr.msra.gmra.mrb[16].mxu0 %v1996_v34  ;;  %v2002_v34 = vcombine.low %v26_v32, %v34_v33  ;;  %v2644_v39 = vld [vmem:[%s3317_s1 + $0x380] sm:$0xff]   ;;  %v43_v32 = vld [vmem:[%s3318_s0 + $0xb0] sm:$0xff] }
  0x44   :  { %1629 = vmatmul.mubr.bf16.vlgmr.msra.gmra.mrb[16].mxu1 %v1998_v36  ;;  %2378 = vmatpush3.bf16.msra.mxu0 %v2607_v40  ;;  %v2641_v36 = vld [vmem:[%s3317_s1 + $0x340] sm:$0xff]   ;;  %v2645_v40 = vld [vmem:[%s3317_s1 + $0x348] sm:$0xff]   ;;  %v51_v33 = vld [vmem:[%s3318_s0 + $0xf0] sm:$0xff] }
  0x45   :  { %2418 = vmatpush3.bf16.msra.mxu1 %v2608_v41  ;;  %2379 = vmatprep.subr.bf16.mxu0 %v2609_v42  ;;  %v2646_v41 = vld [vmem:[%s3317_s1 + $0x3c8] sm:$0xff]  }
  0x46   :  { %2419 = vmatprep.subr.bf16.mxu1 %v2610_v43  ;;  %1572 = vmatprep.mubr.bf16.mxu0 %v2013_v49  ;;  %v2647_v42 = vld [vmem:[%s3317_s1 + $0x308] sm:$0xff]   ;;  %v2019_v49 = vcombine.high %v42_v46, %v50_v47 }
  0x47   :  { %1636 = vmatprep.mubr.bf16.mxu1 %v2015_v52  ;;  %v2648_v43 = vld [vmem:[%s3317_s1 + $0x388] sm:$0xff]   ;;  %v2649_v52 = vld [vmem:[%s3317_s1 + $0x350] sm:$0xff]  }
  0x48   :  { %2380 = vmatpush3.bf16.msra.mxu0 %v2611_v44  ;;  %v41_v44 = vld [vmem:[%s3318_s0 + $0xa0] sm:$0xff] }
  0x49   :  { %2420 = vmatpush3.bf16.msra.mxu1 %v2612_v45  ;;  %2381 = vmatprep.subr.bf16.mxu0 %v2613_v54  ;;  %v49_v45 = vld [vmem:[%s3318_s0 + $0xe0] sm:$0xff]  ;;  %v2651_v54 = vld [vmem:[%s3317_s1 + $0x310] sm:$0xff]  }
  0x4a   :  { %2421 = vmatprep.subr.bf16.mxu1 %v2614_v55  ;;  %v2017_v48 = vcombine.high %v41_v44, %v49_v45  ;;  %v2016_v50 = vcombine.low %v41_v44, %v49_v45  ;;  %v2652_v55 = vld [vmem:[%s3317_s1 + $0x390] sm:$0xff]   ;;  %v2020_v44 = vcombine.low %v43_v32, %v51_v33 }
  0x4b   :  { %1573 = vmatmul.mubr.bf16.gmra.mrb[20].mxu0 %v2012_v51  ;;  %v2018_v51 = vcombine.low %v42_v46, %v50_v47 }
  0x4c   :  { %1637 = vmatmul.mubr.bf16.gmra.mrb[20].mxu1 %v2014_v53  ;;  %2382 = vmatpush3.bf16.msra.mxu0 %v2615_v56  ;;  %v2650_v53 = vld [vmem:[%s3317_s1 + $0x3d0] sm:$0xff]   ;;  %v2653_v56 = vld [vmem:[%s3317_s1 + $0x358] sm:$0xff]  }
  0x4d   :  { %2422 = vmatpush3.bf16.msra.mxu1 %v2616_v57  ;;  %2383 = vmatprep.subr.bf16.mxu0 %v2617_v58  ;;  %v2654_v57 = vld [vmem:[%s3317_s1 + $0x3d8] sm:$0xff]  }
  0x4e   :  { %2423 = vmatprep.subr.bf16.mxu1 %v2618_v59  ;;  %1580 = vmatprep.mubr.bf16.mxu0 %v2029_v0  ;;  %v2655_v58 = vld [vmem:[%s3317_s1 + $0x318] sm:$0xff]   ;;  %v66_v0 = vld [vmem:[%s3318_s0 + $0x168] sm:$0xff] }
  0x4f   :  { %1644 = vmatprep.mubr.bf16.mxu1 %v2031_v4  ;;  %v2656_v59 = vld [vmem:[%s3317_s1 + $0x398] sm:$0xff]   ;;  %v2035_v2 = vcombine.high %v58_v62, %v66_v0  ;;  %v2657_v4 = vld [vmem:[%s3317_s1 + $0x360] sm:$0xff]  }
  0x50   :  { %2384 = vmatpush3.bf16.msra.mxu0 %v2619_v60  ;;  %v57_v60 = vld [vmem:[%s3318_s0 + $0x120] sm:$0xff] }
  0x51   :  { %2424 = vmatpush3.bf16.msra.mxu1 %v2620_v61  ;;  %2385 = vmatprep.subr.bf16.mxu0 %v2621_v6  ;;  %v65_v61 = vld [vmem:[%s3318_s0 + $0x160] sm:$0xff] }
  0x52   :  { %2425 = vmatprep.subr.bf16.mxu1 %v2622_v7  ;;  %v2033_v63 = vcombine.high %v57_v60, %v65_v61  ;;  %v2032_v1 = vcombine.low %v57_v60, %v65_v61  ;;  %v2659_v6 = vld [vmem:[%s3317_s1 + $0x320] sm:$0xff]  }
  0x53   :  { %1581 = vmatmul.mubr.bf16.gmra.mrb[24].mxu0 %v2028_v3  ;;  %v2034_v3 = vcombine.low %v58_v62, %v66_v0  ;;  %v2660_v7 = vld [vmem:[%s3317_s1 + $0x3a0] sm:$0xff]  }
  0x54   :  { %1645 = vmatmul.mubr.bf16.gmra.mrb[24].mxu1 %v2030_v5  ;;  %2386 = vmatpush3.bf16.msra.mxu0 %v2623_v8  ;;  %v2658_v5 = vld [vmem:[%s3317_s1 + $0x3e0] sm:$0xff]   ;;  %v2661_v8 = vld [vmem:[%s3317_s1 + $0x368] sm:$0xff]  }
  0x55   :  { %2426 = vmatpush3.bf16.msra.mxu1 %v2624_v9  ;;  %2387 = vmatprep.subr.bf16.mxu0 %v2625_v10  ;;  %v2662_v9 = vld [vmem:[%s3317_s1 + $0x3e8] sm:$0xff]  }
  0x56   :  { %2427 = vmatprep.subr.bf16.mxu1 %v2626_v11  ;;  %1588 = vmatprep.mubr.bf16.mxu0 %v2045_v15  ;;  %v2663_v10 = vld [vmem:[%s3317_s1 + $0x328] sm:$0xff]  }
  0x57   :  { %1652 = vmatprep.mubr.bf16.mxu1 %v2047_v18  ;;  %v2664_v11 = vld [vmem:[%s3317_s1 + $0x3a8] sm:$0xff]   ;;  %v2669_v18 = vld [vmem:[%s3317_s1 + $0x370] sm:$0xff]  }
  0x58   :  { %2388 = vmatpush3.bf16.msra.mxu0 %v2627_v12  ;;  %v73_v12 = vld [vmem:[%s3318_s0 + $0x1a0] sm:$0x11] }
  0x59   :  { %2428 = vmatpush3.bf16.msra.mxu1 %v2628_v13  ;;  %2389 = vmatprep.subr.bf16.mxu0 %v2633_v20  ;;  %v74_v13 = vld [vmem:[%s3318_s0 + $0x1a8] sm:$0x11]  ;;  %v2049_v14 = vcombine.high %v73_v12, %v73_v12  ;;  %v2048_v16 = vcombine.low %v73_v12, %v73_v12  ;;  %v2671_v20 = vld [vmem:[%s3317_s1 + $0x330] sm:$0xff]  }
  0x5a   :  { %2429 = vmatprep.subr.bf16.mxu1 %v2634_v21  ;;  %v2051_v15 = vcombine.high %v74_v13, %v74_v13  ;;  %v2672_v21 = vld [vmem:[%s3317_s1 + $0x3b0] sm:$0xff]  }
  0x5b   :  { %1589 = vmatmul.mubr.bf16.gmra.mrb[28].mxu0 %v2044_v17  ;;  %v2050_v17 = vcombine.low %v74_v13, %v74_v13 }
  0x5c   :  { %1653 = vmatmul.mubr.bf16.gmra.mrb[28].mxu1 %v2046_v19  ;;  %2390 = vmatpush3.bf16.msra.mxu0 %v2635_v22  ;;  %v2670_v19 = vld [vmem:[%s3317_s1 + $0x3f0] sm:$0xff]   ;;  %v2673_v22 = vld [vmem:[%s3317_s1 + $0x378] sm:$0xff]  }
  0x5d   :  { %2430 = vmatpush3.bf16.msra.mxu1 %v2636_v23  ;;  %2391 = vmatprep.subr.bf16.mxu0 %v2637_v24  ;;  %v2674_v23 = vld [vmem:[%s3317_s1 + $0x3f8] sm:$0xff]  }
  0x5e   :  { %2431 = vmatprep.subr.bf16.mxu1 %v2638_v25  ;;  %1692 = vmatprep.mubr.bf16.mxu0 %v2001_v31  ;;  %v2675_v24 = vld [vmem:[%s3317_s1 + $0x338] sm:$0xff]  }
  0x5f   :  { %1756 = vmatprep.mubr.bf16.mxu1 %v2003_v35  ;;  %v2676_v25 = vld [vmem:[%s3317_s1 + $0x3b8] sm:$0xff]  }
  0x60   :  { %2392 = vmatpush3.bf16.msra.mxu0 %v2639_v26  ;;  %v27_v26 = vld [vmem:[%s3318_s0 + $0x30] sm:$0xff]  ;;  %v36_v31 = vld [vmem:[%s3318_s0 + $0x78] sm:$0xff] }
  0x61   :  { %2432 = vmatpush3.bf16.msra.mxu1 %v2640_v27  ;;  %2457 = vmatprep.subr.bf16.mxu0 %v2641_v36  ;;  %v35_v27 = vld [vmem:[%s3318_s0 + $0x70] sm:$0xff]  ;;  %v2007_v35 = vcombine.high %v28_v28, %v36_v31  ;;  %v2021_v36 = vcombine.high %v43_v32, %v51_v33 }
  0x62   :  { %2497 = vmatprep.subr.bf16.mxu1 %v2642_v37  ;;  %v2004_v29 = vcombine.low %v27_v26, %v35_v27  ;;  %v44_v37 = vld [vmem:[%s3318_s0 + $0xb8] sm:$0xff] }
  0x63   :  { %1693 = vmatmul.mubr.bf16.vlgmr.msra.gmra.mrb[32].mxu0 %v2000_v30  ;;  %v2005_v30 = vcombine.high %v27_v26, %v35_v27 }
  0x64   :  { %1757 = vmatmul.mubr.bf16.vlgmr.msra.gmra.mrb[32].mxu1 %v2002_v34  ;;  %2458 = vmatpush3.bf16.msra.mxu0 %v2643_v38  ;;  %v2006_v34 = vcombine.low %v28_v28, %v36_v31  ;;  %v52_v38 = vld [vmem:[%s3318_s0 + $0xf8] sm:$0xff] }
  0x65   :  { %2498 = vmatpush3.bf16.msra.mxu1 %v2644_v39  ;;  %2459 = vmatprep.subr.bf16.mxu0 %v2645_v40  ;;  %v2023_v39 = vcombine.high %v44_v37, %v52_v38  ;;  %v59_v40 = vld [vmem:[%s3318_s0 + $0x130] sm:$0xff]  ;;  %v2022_v45 = vcombine.low %v44_v37, %v52_v38 }
  0x66   :  { %2499 = vmatprep.subr.bf16.mxu1 %v2646_v41  ;;  %1700 = vmatprep.mubr.bf16.mxu0 %v2017_v48  ;;  %v67_v41 = vld [vmem:[%s3318_s0 + $0x170] sm:$0xff] }
  0x67   :  { %1764 = vmatprep.mubr.bf16.mxu1 %v2019_v49  ;;  %v2037_v46 = vcombine.high %v59_v40, %v67_v41  ;;  %v75_v48 = vld [vmem:[%s3318_s0 + $0x1b0] sm:$0x11]  ;;  %v76_v49 = vld [vmem:[%s3318_s0 + $0x1b8] sm:$0x11] }
  0x68   :  { %2460 = vmatpush3.bf16.msra.mxu0 %v2647_v42  ;;  %v60_v42 = vld [vmem:[%s3318_s0 + $0x138] sm:$0xff] }
  0x69   :  { %2500 = vmatpush3.bf16.msra.mxu1 %v2648_v43  ;;  %2461 = vmatprep.subr.bf16.mxu0 %v2649_v52  ;;  %v68_v43 = vld [vmem:[%s3318_s0 + $0x178] sm:$0xff]  ;;  %v2053_v52 = vcombine.high %v75_v48, %v75_v48 }
  0x6a   :  { %2501 = vmatprep.subr.bf16.mxu1 %v2650_v53  ;;  %v2039_v47 = vcombine.high %v60_v42, %v68_v43  ;;  %v2055_v53 = vcombine.high %v76_v49, %v76_v49 }
  0x6b   :  { %1701 = vmatmul.mubr.bf16.gmra.mrb[36].mxu0 %v2016_v50  ;;  %v2036_v50 = vcombine.low %v59_v40, %v67_v41 }
  0x6c   :  { %1765 = vmatmul.mubr.bf16.gmra.mrb[36].mxu1 %v2018_v51  ;;  %2462 = vmatpush3.bf16.msra.mxu0 %v2651_v54  ;;  %v2038_v51 = vcombine.low %v60_v42, %v68_v43  ;;  %v2052_v54 = vcombine.low %v75_v48, %v75_v48 }
  0x6d   :  { %2502 = vmatpush3.bf16.msra.mxu1 %v2652_v55  ;;  %2463 = vmatprep.subr.bf16.mxu0 %v2653_v56  ;;  %v2054_v55 = vcombine.low %v76_v49, %v76_v49 }
  0x6e   :  { %2503 = vmatprep.subr.bf16.mxu1 %v2654_v57  ;;  %1708 = vmatprep.mubr.bf16.mxu0 %v2033_v63 }
  0x6f   :  { %1772 = vmatprep.mubr.bf16.mxu1 %v2035_v2 }
  0x70   :  { %2464 = vmatpush3.bf16.msra.mxu0 %v2655_v58  ;;  %v1991_v58 = vld [vmem:[%s3319_s2] ss:$0 sm:$0xff] }
  0x71   :  { %2504 = vmatpush3.bf16.msra.mxu1 %v2656_v59  ;;  %2465 = vmatprep.subr.bf16.mxu0 %v2657_v4 }
  0x72   :  { %2505 = vmatprep.subr.bf16.mxu1 %v2658_v5 }
  0x73   :  { %1709 = vmatmul.mubr.bf16.gmra.mrb[40].mxu0 %v2032_v1 }
  0x74   :  { %1773 = vmatmul.mubr.bf16.gmra.mrb[40].mxu1 %v2034_v3  ;;  %2466 = vmatpush3.bf16.msra.mxu0 %v2659_v6 }
  0x75   :  { %2506 = vmatpush3.bf16.msra.mxu1 %v2660_v7  ;;  %2467 = vmatprep.subr.bf16.mxu0 %v2661_v8 }
  0x76   :  { %2507 = vmatprep.subr.bf16.mxu1 %v2662_v9  ;;  %1716 = vmatprep.mubr.bf16.mxu0 %v2049_v14 }
  0x77   :  { %1780 = vmatprep.mubr.bf16.mxu1 %v2051_v15 }
  0x78   :  { %2468 = vmatpush3.bf16.msra.mxu0 %v2663_v10 }
  0x79   :  { %2508 = vmatpush3.bf16.msra.mxu1 %v2664_v11  ;;  %2469 = vmatprep.subr.bf16.mxu0 %v2669_v18 }
  0x7a   :  { %2509 = vmatprep.subr.bf16.mxu1 %v2670_v19 }
  0x7b   :  { %1717 = vmatmul.mubr.bf16.gmra.mrb[44].mxu0 %v2048_v16 }
  0x7c   :  { %1781 = vmatmul.mubr.bf16.gmra.mrb[44].mxu1 %v2050_v17  ;;  %2470 = vmatpush3.bf16.msra.mxu0 %v2671_v20 }
  0x7d   :  { %2510 = vmatpush3.bf16.msra.mxu1 %v2672_v21  ;;  %2471 = vmatprep.subr.bf16.mxu0 %v2673_v22 }
  0x7e   :  { %2511 = vmatprep.subr.bf16.mxu1 %v2674_v23  ;;  %1820 = vmatprep.mubr.bf16.mxu0 %v2005_v30 }
  0x7f   :  { %1884 = vmatprep.mubr.bf16.mxu1 %v2007_v35 }
  0x80   :  { %2472 = vmatpush3.bf16.msra.mxu0 %v2675_v24 }
  0x81   :  { %2512 = vmatpush3.bf16.msra.mxu1 %v2676_v25 }
  0x83   :  { %1821 = vmatmul.mubr.bf16.vlgmr.msra.gmra.mrb[48].mxu0 %v2004_v29 }
  0x84   :  { %1885 = vmatmul.mubr.bf16.vlgmr.msra.gmra.mrb[48].mxu1 %v2006_v34  ;;  %1828 = vmatprep.mubr.bf16.mxu0 %v2021_v36 }
  0x85   :  { %1892 = vmatprep.mubr.bf16.mxu1 %v2023_v39 }
  0x8b   :  { %1829 = vmatmul.mubr.bf16.gmra.mrb[52].mxu0 %v2020_v44 }
  0x8c   :  { %1893 = vmatmul.mubr.bf16.gmra.mrb[52].mxu1 %v2022_v45  ;;  %1836 = vmatprep.mubr.bf16.mxu0 %v2037_v46 }
  0x8d   :  { %1900 = vmatprep.mubr.bf16.mxu1 %v2039_v47 }
  0x93   :  { %1837 = vmatmul.mubr.bf16.gmra.mrb[56].mxu0 %v2036_v50 }
  0x94   :  { %1901 = vmatmul.mubr.bf16.gmra.mrb[56].mxu1 %v2038_v51  ;;  %1844 = vmatprep.mubr.bf16.mxu0 %v2053_v52 }
  0x95   :  { %1908 = vmatprep.mubr.bf16.mxu1 %v2055_v53 }
  0x9b   :  { %1845 = vmatmul.mubr.bf16.gmra.mrb[60].mxu0 %v2052_v54 }
  0x9c   :  { %1909 = vmatmul.mubr.bf16.gmra.mrb[60].mxu1 %v2054_v55 }
  0xf6   :  { %v2233_v56 = vpop.f32.mrb[0].mxu0 }
  0xf7   :  { %v2273_v57 = vpop.f32.mrb[0].mxu1  ;;  %v2234_v59 = vpop.f32.mrb[1].mxu0 }
  0xf8   :  { %v2235_v60 = vadd.f32 %v2234_v59, %v2233_v56  ;;  %v2274_v61 = vpop.f32.mrb[1].mxu1  ;;  %v2236_v62 = vpop.f32.mrb[2].mxu0 }
  0xf9   :  { %v2275_v63 = vadd.f32 %v2274_v61, %v2273_v57  ;;  %v2276_v0 = vpop.f32.mrb[2].mxu1  ;;  %v2237_v1 = vpop.f32.mrb[3].mxu0 }
  0xfa   :  { %v1439_v2 = vadd.f32 %v2235_v60, %v1991_v58  ;;  %v2238_v3 = vadd.f32 %v2237_v1, %v2236_v62  ;;  %v2277_v4 = vpop.f32.mrb[3].mxu1 }
  0xfb   :  { %v2278_v5 = vadd.f32 %v2277_v4, %v2276_v0 }
  0xfc   :  { %v1503_v6 = vadd.f32 %v2275_v63, %v1439_v2  ;;  %v1442_v7 = vadd.f32 %v2238_v3, %v1991_v58 }
  0xfe   :  { %v1506_v8 = vadd.f32 %v2278_v5, %v1442_v7  ;;  %v2239_v9 = vpop.f32.mrb[4].mxu0 }
  0xff   :  { %v2279_v10 = vpop.f32.mrb[4].mxu1  ;;  %v2240_v11 = vpop.f32.mrb[5].mxu0 }
 0x100   :  { %v2241_v12 = vadd.f32 %v2240_v11, %v2239_v9  ;;  %v2280_v13 = vpop.f32.mrb[5].mxu1  ;;  %v2242_v14 = vpop.f32.mrb[6].mxu0 }
 0x101   :  { %v2281_v15 = vadd.f32 %v2280_v13, %v2279_v10  ;;  %v2282_v16 = vpop.f32.mrb[6].mxu1  ;;  %v2243_v17 = vpop.f32.mrb[7].mxu0 }
 0x102   :  { %v1447_v18 = vadd.f32 %v2241_v12, %v1991_v58  ;;  %v2244_v19 = vadd.f32 %v2243_v17, %v2242_v14  ;;  %v2283_v20 = vpop.f32.mrb[7].mxu1 }
 0x103   :  { %v2284_v21 = vadd.f32 %v2283_v20, %v2282_v16 }
 0x104   :  { %v1511_v22 = vadd.f32 %v2281_v15, %v1447_v18  ;;  %v1450_v23 = vadd.f32 %v2244_v19, %v1991_v58 }
 0x106   :  { %v1514_v24 = vadd.f32 %v2284_v21, %v1450_v23  ;;  %v2245_v25 = vpop.f32.mrb[8].mxu0 }
 0x107   :  { %v2285_v26 = vpop.f32.mrb[8].mxu1  ;;  %v2246_v27 = vpop.f32.mrb[9].mxu0 }
 0x108   :  { %v2286_v28 = vpop.f32.mrb[9].mxu1  ;;  %v2247_v29 = vadd.f32 %v2246_v27, %v2245_v25  ;;  %v2248_v31 = vpop.f32.mrb[10].mxu0 }
 0x109   :  { %v2287_v30 = vadd.f32 %v2286_v28, %v2285_v26  ;;  %v2288_v32 = vpop.f32.mrb[10].mxu1  ;;  %v2249_v33 = vpop.f32.mrb[11].mxu0 }
 0x10a   :  { %v2289_v34 = vpop.f32.mrb[11].mxu1  ;;  %v1455_v35 = vadd.f32 %v2247_v29, %v1991_v58  ;;  %v2250_v36 = vadd.f32 %v2249_v33, %v2248_v31 }
 0x10b   :  { %v2290_v37 = vadd.f32 %v2289_v34, %v2288_v32 }
 0x10c   :  { %v1519_v38 = vadd.f32 %v2287_v30, %v1455_v35  ;;  %v1458_v39 = vadd.f32 %v2250_v36, %v1991_v58 }
 0x10e   :  { %v1522_v40 = vadd.f32 %v2290_v37, %v1458_v39  ;;  %v2251_v41 = vpop.f32.mrb[12].mxu0 }
 0x10f   :  { %v2291_v42 = vpop.f32.mrb[12].mxu1  ;;  %v2252_v43 = vpop.f32.mrb[13].mxu0 }
 0x110   :  { %v2292_v44 = vpop.f32.mrb[13].mxu1  ;;  %v2253_v45 = vadd.f32 %v2252_v43, %v2251_v41  ;;  %v2254_v47 = vpop.f32.mrb[14].mxu0 }
 0x111   :  { %v2293_v46 = vadd.f32 %v2292_v44, %v2291_v42  ;;  %v2294_v48 = vpop.f32.mrb[14].mxu1  ;;  %v2255_v49 = vpop.f32.mrb[15].mxu0 }
 0x112   :  { %v2295_v50 = vpop.f32.mrb[15].mxu1  ;;  %v1463_v51 = vadd.f32 %v2253_v45, %v1991_v58 }
 0x114   :  { %v1527_v52 = vadd.f32 %v2293_v46, %v1463_v51 }
 0x116   :  { %v2313_v53 = vpop.f32.mrb[16].mxu0 }
 0x117   :  { %v2353_v54 = vpop.f32.mrb[16].mxu1  ;;  %v2314_v55 = vpop.f32.mrb[17].mxu0 }
 0x118   :  { %v2315_v56 = vadd.f32 %v2314_v55, %v2313_v53  ;;  %v2354_v57 = vpop.f32.mrb[17].mxu1  ;;  %v2316_v59 = vpop.f32.mrb[18].mxu0 }
 0x119   :  { %v2355_v60 = vadd.f32 %v2354_v57, %v2353_v54  ;;  %v2356_v61 = vpop.f32.mrb[18].mxu1  ;;  %v2317_v62 = vpop.f32.mrb[19].mxu0 }
 0x11a   :  { %v1567_v63 = vadd.f32 %v2315_v56, %v1503_v6  ;;  %v2318_v0 = vadd.f32 %v2317_v62, %v2316_v59  ;;  %v2357_v1 = vpop.f32.mrb[19].mxu1 }
 0x11b   :  { %v2358_v2 = vadd.f32 %v2357_v1, %v2356_v61 }
 0x11c   :  { %v1631_v3 = vadd.f32 %v2355_v60, %v1567_v63  ;;  %v1570_v4 = vadd.f32 %v2318_v0, %v1506_v8 }
 0x11e   :  { %v1634_v5 = vadd.f32 %v2358_v2, %v1570_v4  ;;  %v2319_v7 = vpop.f32.mrb[20].mxu0 }
 0x11f   :  { %v2359_v9 = vpop.f32.mrb[20].mxu1  ;;  %v2320_v58 = vpop.f32.mrb[21].mxu0 }
 0x120   :  { %v2321_v10 = vadd.f32 %v2320_v58, %v2319_v7  ;;  %v2360_v11 = vpop.f32.mrb[21].mxu1  ;;  %v2322_v12 = vpop.f32.mrb[22].mxu0 }
 0x121   :  { %v2361_v13 = vadd.f32 %v2360_v11, %v2359_v9  ;;  %v2362_v14 = vpop.f32.mrb[22].mxu1  ;;  %v2323_v15 = vpop.f32.mrb[23].mxu0 }
 0x122   :  { %v1575_v16 = vadd.f32 %v2321_v10, %v1511_v22  ;;  %v2324_v17 = vadd.f32 %v2323_v15, %v2322_v12  ;;  %v2363_v18 = vpop.f32.mrb[23].mxu1 }
 0x123   :  { %v2364_v19 = vadd.f32 %v2363_v18, %v2362_v14 }
 0x124   :  { %v1639_v6 = vadd.f32 %v2361_v13, %v1575_v16  ;;  %v1578_v20 = vadd.f32 %v2324_v17, %v1514_v24 }
 0x126   :  { %v1642_v21 = vadd.f32 %v2364_v19, %v1578_v20  ;;  %v2325_v23 = vpop.f32.mrb[24].mxu0 }
 0x127   :  { %v2365_v25 = vpop.f32.mrb[24].mxu1  ;;  %v2326_v8 = vpop.f32.mrb[25].mxu0 }
 0x128   :  { %v2327_v26 = vadd.f32 %v2326_v8, %v2325_v23  ;;  %v2366_v27 = vpop.f32.mrb[25].mxu1  ;;  %v2328_v28 = vpop.f32.mrb[26].mxu0 }
 0x129   :  { %v2367_v29 = vadd.f32 %v2366_v27, %v2365_v25  ;;  %v2368_v30 = vpop.f32.mrb[26].mxu1  ;;  %v2329_v31 = vpop.f32.mrb[27].mxu0 }
 0x12a   :  { %v1583_v32 = vadd.f32 %v2327_v26, %v1519_v38  ;;  %v2330_v33 = vadd.f32 %v2329_v31, %v2328_v28  ;;  %v2369_v34 = vpop.f32.mrb[27].mxu1 }
 0x12b   :  { %v2370_v35 = vadd.f32 %v2369_v34, %v2368_v30 }
 0x12c   :  { %v1647_v22 = vadd.f32 %v2367_v29, %v1583_v32  ;;  %v1586_v36 = vadd.f32 %v2330_v33, %v1522_v40 }
 0x12e   :  { %v1650_v37 = vadd.f32 %v2370_v35, %v1586_v36  ;;  %v2331_v39 = vpop.f32.mrb[28].mxu0 }
 0x12f   :  { %v2371_v41 = vpop.f32.mrb[28].mxu1  ;;  %v2332_v24 = vpop.f32.mrb[29].mxu0 }
 0x130   :  { %v2333_v42 = vadd.f32 %v2332_v24, %v2331_v39  ;;  %v2372_v43 = vpop.f32.mrb[29].mxu1  ;;  %v2334_v44 = vpop.f32.mrb[30].mxu0 }
 0x131   :  { %v2373_v45 = vadd.f32 %v2372_v43, %v2371_v41  ;;  %v2374_v46 = vpop.f32.mrb[30].mxu1  ;;  %v2335_v47 = vpop.f32.mrb[31].mxu0 }
 0x132   :  { %v1591_v48 = vadd.f32 %v2333_v42, %v1527_v52  ;;  %v2375_v49 = vpop.f32.mrb[31].mxu1 }
 0x134   :  { %v1655_v50 = vadd.f32 %v2373_v45, %v1591_v48 }
 0x136   :  { %v2393_v51 = vpop.f32.mrb[32].mxu0 }
 0x137   :  { %v2433_v38 = vpop.f32.mrb[32].mxu1  ;;  %v2394_v53 = vpop.f32.mrb[33].mxu0 }
 0x138   :  { %v2395_v54 = vadd.f32 %v2394_v53, %v2393_v51  ;;  %v2434_v55 = vpop.f32.mrb[33].mxu1  ;;  %v2396_v56 = vpop.f32.mrb[34].mxu0 }
 0x139   :  { %v2435_v40 = vadd.f32 %v2434_v55, %v2433_v38  ;;  %v2436_v57 = vpop.f32.mrb[34].mxu1  ;;  %v2397_v59 = vpop.f32.mrb[35].mxu0 }
 0x13a   :  { %v1695_v60 = vadd.f32 %v2395_v54, %v1631_v3  ;;  %v2398_v61 = vadd.f32 %v2397_v59, %v2396_v56  ;;  %v2437_v62 = vpop.f32.mrb[35].mxu1 }
 0x13b   :  { %v2438_v63 = vadd.f32 %v2437_v62, %v2436_v57 }
 0x13c   :  { %v1759_v0 = vadd.f32 %v2435_v40, %v1695_v60  ;;  %v1698_v1 = vadd.f32 %v2398_v61, %v1634_v5 }
 0x13e   :  { %v1762_v2 = vadd.f32 %v2438_v63, %v1698_v1  ;;  %v2399_v4 = vpop.f32.mrb[36].mxu0 }
 0x13f   :  { %v2439_v52 = vpop.f32.mrb[36].mxu1  ;;  %v2400_v7 = vpop.f32.mrb[37].mxu0 }
 0x140   :  { %v2440_v9 = vpop.f32.mrb[37].mxu1  ;;  %v2401_v58 = vadd.f32 %v2400_v7, %v2399_v4  ;;  %v2402_v11 = vpop.f32.mrb[38].mxu0 }
 0x141   :  { %v2441_v10 = vadd.f32 %v2440_v9, %v2439_v52  ;;  %v2442_v12 = vpop.f32.mrb[38].mxu1  ;;  %v2403_v13 = vpop.f32.mrb[39].mxu0 }
 0x142   :  { %v2443_v14 = vpop.f32.mrb[39].mxu1  ;;  %v1703_v15 = vadd.f32 %v2401_v58, %v1639_v6  ;;  %v2404_v16 = vadd.f32 %v2403_v13, %v2402_v11 }
 0x143   :  { %v2444_v17 = vadd.f32 %v2443_v14, %v2442_v12 }
 0x144   :  { %v3266_v3 = vadd.f32 %v2441_v10, %v1703_v15  ;;  %v1706_v18 = vadd.f32 %v2404_v16, %v1642_v21 }
 0x146   :  { %v3268_v19 = vadd.f32 %v2444_v17, %v1706_v18  ;;  %v2405_v5 = vpop.f32.mrb[40].mxu0 }
 0x147   :  { %v2445_v20 = vpop.f32.mrb[40].mxu1  ;;  %v2406_v23 = vpop.f32.mrb[41].mxu0 }
 0x148   :  { %v2407_v25 = vadd.f32 %v2406_v23, %v2405_v5  ;;  %v2446_v8 = vpop.f32.mrb[41].mxu1  ;;  %v2408_v26 = vpop.f32.mrb[42].mxu0 }
 0x149   :  { %v2447_v27 = vadd.f32 %v2446_v8, %v2445_v20  ;;  %v2448_v28 = vpop.f32.mrb[42].mxu1  ;;  %v2409_v29 = vpop.f32.mrb[43].mxu0 }
 0x14a   :  { %v1711_v30 = vadd.f32 %v2407_v25, %v1647_v22  ;;  %v2410_v31 = vadd.f32 %v2409_v29, %v2408_v26  ;;  %v2449_v32 = vpop.f32.mrb[43].mxu1 }
 0x14b   :  { %v2450_v6 = vadd.f32 %v2449_v32, %v2448_v28 }
 0x14c   :  { %v3270_v33 = vadd.f32 %v2447_v27, %v1711_v30  ;;  %v1714_v34 = vadd.f32 %v2410_v31, %v1650_v37 }
 0x14e   :  { %v3272_v35 = vadd.f32 %v2450_v6, %v1714_v34  ;;  %v2411_v21 = vpop.f32.mrb[44].mxu0 }
 0x14f   :  { %v2451_v36 = vpop.f32.mrb[44].mxu1  ;;  %v2412_v39 = vpop.f32.mrb[45].mxu0 }
 0x150   :  { %v2452_v41 = vpop.f32.mrb[45].mxu1  ;;  %v2413_v24 = vadd.f32 %v2412_v39, %v2411_v21  ;;  %v2414_v43 = vpop.f32.mrb[46].mxu0 }
 0x151   :  { %v2453_v42 = vadd.f32 %v2452_v41, %v2451_v36  ;;  %v2454_v44 = vpop.f32.mrb[46].mxu1  ;;  %v2415_v45 = vpop.f32.mrb[47].mxu0 }
 0x152   :  { %v2455_v46 = vpop.f32.mrb[47].mxu1  ;;  %v1719_v47 = vadd.f32 %v2413_v24, %v1655_v50  ;;  %v3279_v50 = vld [vmem:[%s3320_s3] ss:$0 sm:$0xff] }
 0x154   :  { %v3274_v22 = vadd.f32 %v2453_v42, %v1719_v47 }
 0x156   :  { %v2473_v48 = vpop.f32.mrb[48].mxu0 }
 0x157   :  { %v2513_v49 = vpop.f32.mrb[48].mxu1  ;;  %v2474_v51 = vpop.f32.mrb[49].mxu0 }
 0x158   :  { %v2475_v38 = vadd.f32 %v2474_v51, %v2473_v48  ;;  %v2514_v37 = vpop.f32.mrb[49].mxu1  ;;  %v2476_v53 = vpop.f32.mrb[50].mxu0 }
 0x159   :  { %v2515_v54 = vadd.f32 %v2514_v37, %v2513_v49  ;;  %v2516_v55 = vpop.f32.mrb[50].mxu1  ;;  %v2477_v56 = vpop.f32.mrb[51].mxu0 }
 0x15a   :  { %v1823_v40 = vadd.f32 %v2475_v38, %v1759_v0  ;;  %v2478_v57 = vadd.f32 %v2477_v56, %v2476_v53  ;;  %v2517_v59 = vpop.f32.mrb[51].mxu1 }
 0x15b   :  { %v2518_v60 = vadd.f32 %v2517_v59, %v2516_v55 }
 0x15c   :  { %v1887_v61 = vadd.f32 %v2515_v54, %v1823_v40  ;;  %v1826_v62 = vadd.f32 %v2478_v57, %v1762_v2  ;;  %v3285_v2 = vld [vmem:[%s3321_s4] ss:$0 sm:$0xff] }
 0x15e   :  { %v1916_v63 = vmax.f32 %v1887_v61, 0.0  ;;  %v1890_v1 = vadd.f32 %v2518_v60, %v1826_v62  ;;  %v2479_v4 = vpop.f32.mrb[52].mxu0 }
 0x15f   :  { %v2519_v52 = vpop.f32.mrb[52].mxu1  ;;  %v2480_v7 = vpop.f32.mrb[53].mxu0 }
 0x160   :  { %v1930_v9 = vmul.f32 %v3279_v50, %v1916_v63  ;;  %v1917_v58 = vmax.f32 %v1890_v1, 0.0  ;;  %v2481_v10 = vadd.f32 %v2480_v7, %v2479_v4  ;;  %v2520_v0 = vpop.f32.mrb[53].mxu1  ;;  %v2482_v11 = vpop.f32.mrb[54].mxu0 }
 0x161   :  { %v2521_v12 = vadd.f32 %v2520_v0, %v2519_v52  ;;  %v2522_v13 = vpop.f32.mrb[54].mxu1  ;;  %v2483_v14 = vpop.f32.mrb[55].mxu0 }
 0x162   :  { %v1931_v15 = vmul.f32 %v3279_v50, %v1917_v58  ;;  %v1831_v16 = vadd.f32 %v2481_v10, %v3266_v3  ;;  %v2484_v17 = vadd.f32 %v2483_v14, %v2482_v11  ;;  %v2523_v18 = vpop.f32.mrb[55].mxu1  ;;  %v1944_v20 = vadd.f32 %v3285_v2, %v1930_v9 }
 0x163   :  { %v2524_v5 = vadd.f32 %v2523_v18, %v2522_v13 }
 0x164   :  { %v1945_v23 = vadd.f32 %v3285_v2, %v1931_v15  ;;  %v1895_v25 = vadd.f32 %v2521_v12, %v1831_v16  ;;  %v1834_v8 = vadd.f32 %v2484_v17, %v3268_v19 }
 0x166   :  { %v2203_v26 = vpack.c.bf16 %v1945_v23, %v1944_v20  ;;  %v1918_v27 = vmax.f32 %v1895_v25, 0.0  ;;  %v1898_v28 = vadd.f32 %v2524_v5, %v1834_v8  ;;  %v2485_v29 = vpop.f32.mrb[56].mxu0 }
 0x167   :  { %v2525_v30 = vpop.f32.mrb[56].mxu1  ;;  %v2486_v31 = vpop.f32.mrb[57].mxu0 }
 0x168   :  { %2204 = vst [vmem:[%s3322_s5] sm:$0xff] %v2203_v26   ;;  %v1932_v3 = vmul.f32 %v3279_v50, %v1918_v27  ;;  %v1919_v32 = vmax.f32 %v1898_v28, 0.0  ;;  %v2487_v6 = vadd.f32 %v2486_v31, %v2485_v29  ;;  %v2526_v34 = vpop.f32.mrb[57].mxu1  ;;  %v2488_v21 = vpop.f32.mrb[58].mxu0 }
 0x169   :  { %v2527_v36 = vadd.f32 %v2526_v34, %v2525_v30  ;;  %v2528_v39 = vpop.f32.mrb[58].mxu1  ;;  %v2489_v41 = vpop.f32.mrb[59].mxu0 }
 0x16a   :  { %v1933_v19 = vmul.f32 %v3279_v50, %v1919_v32  ;;  %v1839_v24 = vadd.f32 %v2487_v6, %v3270_v33  ;;  %v2490_v42 = vadd.f32 %v2489_v41, %v2488_v21  ;;  %v2529_v43 = vpop.f32.mrb[59].mxu1  ;;  %v1946_v45 = vadd.f32 %v3285_v2, %v1932_v3 }
 0x16b   :  { %v2530_v44 = vadd.f32 %v2529_v43, %v2528_v39 }
 0x16c   :  { %v1947_v46 = vadd.f32 %v3285_v2, %v1933_v19  ;;  %v1903_v47 = vadd.f32 %v2527_v36, %v1839_v24  ;;  %v1842_v48 = vadd.f32 %v2490_v42, %v3272_v35 }
 0x16e   :  { %v2208_v49 = vpack.c.bf16 %v1947_v46, %v1946_v45  ;;  %v1920_v51 = vmax.f32 %v1903_v47, 0.0  ;;  %v1906_v38 = vadd.f32 %v2530_v44, %v1842_v48  ;;  %v2491_v37 = vpop.f32.mrb[60].mxu0 }
 0x16f   :  { %v2531_v53 = vpop.f32.mrb[60].mxu1  ;;  %v2492_v54 = vpop.f32.mrb[61].mxu0 }
 0x170   :  { %2215 = vst [vmem:[%s3322_s5 + $0x8] sm:$0xff] %v2208_v49   ;;  %v1934_v33 = vmul.f32 %v3279_v50, %v1920_v51  ;;  %v1921_v55 = vmax.f32 %v1906_v38, 0.0  ;;  %v2493_v56 = vadd.f32 %v2492_v54, %v2491_v37  ;;  %v2532_v40 = vpop.f32.mrb[61].mxu1  ;;  %v2494_v57 = vpop.f32.mrb[62].mxu0 }
 0x171   :  { %v2533_v59 = vadd.f32 %v2532_v40, %v2531_v53  ;;  %v2534_v60 = vpop.f32.mrb[62].mxu1  ;;  %v2495_v61 = vpop.f32.mrb[63].mxu0 }
 0x172   :  { %v1935_v35 = vmul.f32 %v3279_v50, %v1921_v55  ;;  %v1847_v62 = vadd.f32 %v2493_v56, %v3274_v22  ;;  %v2535_v63 = vpop.f32.mrb[63].mxu1  ;;  %v1948_v1 = vadd.f32 %v3285_v2, %v1934_v33 }
 0x174   :  { %v1949_v4 = vadd.f32 %v3285_v2, %v1935_v35  ;;  %v1911_v52 = vadd.f32 %v2533_v59, %v1847_v62 }
 0x176   :  { %v2213_v7 = vpack.c.bf16 %v1949_v4, %v1948_v1  ;;  %v1922_v9 = vmax.f32 %v1911_v52, 0.0 }
 0x178   :  { %2216 = vst [vmem:[%s3322_s5 + $0x10] sm:$0xff] %v2213_v7   ;;  %v1936_v58 = vmul.f32 %v3279_v50, %v1922_v9 }
 0x17a   :  { %v1950_v10 = vadd.f32 %v3285_v2, %v1936_v58 }
 0x17c   :  { %v2199_v0 = vpack.c.bf16 %v1950_v10, %v1950_v10 }
 0x17e   :  { %1986 = vst [vmem:[%s3322_s5 + $0x18] sm:$0x1] %v2199_v0 }

// kernel: forward.7
= control target key start
LH: loop header
LB: loop body
LE: loop exit
PB: predicated region body
PF: predicated region fallthrough
CT: control target
= control target key end

     0   :  { %v834_v36 = vlaneseq  ;;  %v9140_v37 = vmov 1966171168   ;;  %s12059_s0 = inlined_call_operand.vmem [shape: bf16[2,3200], index: 0, kind: input, shape index: {}]   ;;  %s12060_s1 = inlined_call_operand.vmem [shape: bf16[3200,512], index: 1, kind: input, shape index: {}]   ;;  %s12061_s2 = inlined_call_operand.vmem [shape: f32[1,512], index: 2, kind: input, shape index: {}]   ;;  %s12062_s3 = inlined_call_operand.vmem [shape: bf16[512,256], index: 3, kind: input, shape index: {}]   ;;  %s12063_s4 = inlined_call_operand.vmem [shape: f32[1,256], index: 4, kind: input, shape index: {}]   ;;  %s12064_s5 = inlined_call_operand.vmem [shape: bf16[256,128], index: 5, kind: input, shape index: {}]   ;;  %s12065_s6 = inlined_call_operand.vmem [shape: f32[1,128], index: 6, kind: input, shape index: {}]   ;;  %s12066_s7 = inlined_call_operand.hbm [shape: f32[2,128], index: 7, kind: output, shape index: {}]  }
   0x1   :  { %v7801_v0 = vld [vmem:[%s12060_s1 + $0x4] ss:$16 sps:$4 sm:$0xff]   ;;  %v7805_v2 = vld [vmem:[%s12060_s1] ss:$16 sps:$4 sm:$0xff]   ;;  %v860_v38 = vunpack.c.l.s4 %v9140_v37 }
   0x2   :  { %v7803_v1 = vld [vmem:[%s12060_s1 + $0x204] ss:$16 sps:$4 sm:$0xff]   ;;  %5044 = vmatprep.subr.bf16.mxu1 %v7801_v0  ;;  %v7806_v3 = vld [vmem:[%s12060_s1 + $0x200] ss:$16 sps:$4 sm:$0xff]   ;;  %v9300_v42 = vshrl.u32 %v834_v36, 7 }
   0x3   :  { %5085 = vmatprep.subr.bf16.mxu0 %v7803_v1  ;;  %v7807_v4 = vld [vmem:[%s12060_s1 + $0x24] ss:$16 sps:$4 sm:$0xff]   ;;  %5045 = vmatpush1.bf16.msra.mxu1 %v7805_v2  ;;  %v7811_v6 = vld [vmem:[%s12060_s1 + $0x20] ss:$16 sps:$4 sm:$0xff]   ;;  %v861_v43 = vunpack.c.0.s8 %v860_v38  ;;  %v7924_v36 = vld [vmem:[%s12060_s1 + $0x88] ss:$16 sps:$4 sm:$0xff]  }
   0x4   :  { %5086 = vmatpush1.bf16.msra.mxu0 %v7806_v3  ;;  %v7809_v5 = vld [vmem:[%s12060_s1 + $0x224] ss:$16 sps:$4 sm:$0xff]   ;;  %5046 = vmatprep.subr.bf16.mxu1 %v7807_v4  ;;  %v7812_v7 = vld [vmem:[%s12060_s1 + $0x220] ss:$16 sps:$4 sm:$0xff]   ;;  %v7932_v38 = vld [vmem:[%s12060_s1 + $0xac] ss:$16 sps:$4 sm:$0xff]  }
   0x5   :  { %5087 = vmatprep.subr.bf16.mxu0 %v7809_v5  ;;  %v7813_v8 = vld [vmem:[%s12060_s1 + $0x44] ss:$16 sps:$4 sm:$0xff]   ;;  %v7817_v10 = vld [vmem:[%s12060_s1 + $0x40] ss:$16 sps:$4 sm:$0xff]   ;;  %v9318_v49 = vsub.s32 %v861_v43, %v9300_v42  ;;  %v7938_v43 = vld [vmem:[%s12060_s1 + $0xcc] ss:$16 sps:$4 sm:$0xff]  }
   0x6   :  { %v7815_v9 = vld [vmem:[%s12060_s1 + $0x244] ss:$16 sps:$4 sm:$0xff]   ;;  %v7818_v11 = vld [vmem:[%s12060_s1 + $0x240] ss:$16 sps:$4 sm:$0xff]  }
   0x7   :  { %5047 = vmatpush1.bf16.msra.mxu1 %v7811_v6  ;;  %v7819_v12 = vld [vmem:[%s12060_s1 + $0x64] ss:$16 sps:$4 sm:$0xff]   ;;  %v7823_v14 = vld [vmem:[%s12060_s1 + $0x60] ss:$16 sps:$4 sm:$0xff]  }
   0x8   :  { %5088 = vmatpush1.bf16.msra.mxu0 %v7812_v7  ;;  %5048 = vmatprep.subr.bf16.mxu1 %v7813_v8  ;;  %v7821_v13 = vld [vmem:[%s12060_s1 + $0x264] ss:$16 sps:$4 sm:$0xff]   ;;  %v7824_v15 = vld [vmem:[%s12060_s1 + $0x260] ss:$16 sps:$4 sm:$0xff]  }
   0x9   :  { %5089 = vmatprep.subr.bf16.mxu0 %v7815_v9  ;;  %v7825_v16 = vld [vmem:[%s12060_s1 + $0x84] ss:$16 sps:$4 sm:$0xff]   ;;  %v7829_v18 = vld [vmem:[%s12060_s1 + $0x80] ss:$16 sps:$4 sm:$0xff]  }
   0xa   :  { %v7827_v17 = vld [vmem:[%s12060_s1 + $0x284] ss:$16 sps:$4 sm:$0xff]   ;;  %v7830_v19 = vld [vmem:[%s12060_s1 + $0x280] ss:$16 sps:$4 sm:$0xff]  }
   0xb   :  { %5049 = vmatpush1.bf16.msra.mxu1 %v7817_v10  ;;  %v7831_v20 = vld [vmem:[%s12060_s1 + $0xa4] ss:$16 sps:$4 sm:$0xff]   ;;  %v7835_v22 = vld [vmem:[%s12060_s1 + $0xa0] ss:$16 sps:$4 sm:$0xff]  }
   0xc   :  { %5090 = vmatpush1.bf16.msra.mxu0 %v7818_v11  ;;  %5050 = vmatprep.subr.bf16.mxu1 %v7819_v12  ;;  %v7833_v21 = vld [vmem:[%s12060_s1 + $0x2a4] ss:$16 sps:$4 sm:$0xff]   ;;  %v7836_v23 = vld [vmem:[%s12060_s1 + $0x2a0] ss:$16 sps:$4 sm:$0xff]  }
   0xd   :  { %5091 = vmatprep.subr.bf16.mxu0 %v7821_v13  ;;  %v7837_v24 = vld [vmem:[%s12060_s1 + $0xc4] ss:$16 sps:$4 sm:$0xff]   ;;  %v7841_v26 = vld [vmem:[%s12060_s1 + $0xc0] ss:$16 sps:$4 sm:$0xff]  }
   0xe   :  { %v7839_v25 = vld [vmem:[%s12060_s1 + $0x2c4] ss:$16 sps:$4 sm:$0xff]   ;;  %v7842_v27 = vld [vmem:[%s12060_s1 + $0x2c0] ss:$16 sps:$4 sm:$0xff]  }
   0xf   :  { %5051 = vmatpush1.bf16.msra.mxu1 %v7823_v14  ;;  %v7843_v28 = vld [vmem:[%s12060_s1 + $0xe4] ss:$16 sps:$4 sm:$0xff]   ;;  %v7847_v30 = vld [vmem:[%s12060_s1 + $0xe0] ss:$16 sps:$4 sm:$0xff]  }
  0x10   :  { %5092 = vmatpush1.bf16.msra.mxu0 %v7824_v15  ;;  %5052 = vmatprep.subr.bf16.mxu1 %v7825_v16  ;;  %v7845_v29 = vld [vmem:[%s12060_s1 + $0x2e4] ss:$16 sps:$4 sm:$0xff]   ;;  %v7848_v31 = vld [vmem:[%s12060_s1 + $0x2e0] ss:$16 sps:$4 sm:$0xff]   ;;  %v7902_v15 = vld [vmem:[%s12060_s1 + $0xc] ss:$16 sps:$4 sm:$0xff]  }
  0x11   :  { %5093 = vmatprep.subr.bf16.mxu0 %v7827_v17  ;;  %v7849_v32 = vld [vmem:[%s12060_s1 + $0x104] ss:$16 sps:$4 sm:$0xff]   ;;  %v7853_v34 = vld [vmem:[%s12060_s1 + $0x100] ss:$16 sps:$4 sm:$0xff]  }
  0x12   :  { %v7851_v33 = vld [vmem:[%s12060_s1 + $0x304] ss:$16 sps:$4 sm:$0xff]   ;;  %v7854_v35 = vld [vmem:[%s12060_s1 + $0x300] ss:$16 sps:$4 sm:$0xff]  }
  0x13   :  { %5053 = vmatpush1.bf16.msra.mxu1 %v7829_v18  ;;  %v7855_v39 = vld [vmem:[%s12060_s1 + $0x124] ss:$16 sps:$4 sm:$0xff]   ;;  %v7859_v41 = vld [vmem:[%s12060_s1 + $0x120] ss:$16 sps:$4 sm:$0xff]  }
  0x14   :  { %5094 = vmatpush1.bf16.msra.mxu0 %v7830_v19  ;;  %5054 = vmatprep.subr.bf16.mxu1 %v7831_v20  ;;  %v7857_v40 = vld [vmem:[%s12060_s1 + $0x324] ss:$16 sps:$4 sm:$0xff]   ;;  %v7860_v44 = vld [vmem:[%s12060_s1 + $0x320] ss:$16 sps:$4 sm:$0xff]   ;;  %v7900_v19 = vld [vmem:[%s12060_s1 + $0x8] ss:$16 sps:$4 sm:$0xff]  }
  0x15   :  { %5095 = vmatprep.subr.bf16.mxu0 %v7833_v21  ;;  %v7861_v45 = vld [vmem:[%s12060_s1 + $0x144] ss:$16 sps:$4 sm:$0xff]   ;;  %v7865_v47 = vld [vmem:[%s12060_s1 + $0x140] ss:$16 sps:$4 sm:$0xff]   ;;  %v7908_v21 = vld [vmem:[%s12060_s1 + $0x2c] ss:$16 sps:$4 sm:$0xff]  }
  0x16   :  { %v7863_v46 = vld [vmem:[%s12060_s1 + $0x344] ss:$16 sps:$4 sm:$0xff]   ;;  %v7866_v48 = vld [vmem:[%s12060_s1 + $0x340] ss:$16 sps:$4 sm:$0xff]  }
  0x17   :  { %5055 = vmatpush1.bf16.msra.mxu1 %v7835_v22  ;;  %v7867_v50 = vld [vmem:[%s12060_s1 + $0x164] ss:$16 sps:$4 sm:$0xff]   ;;  %v7871_v53 = vld [vmem:[%s12060_s1 + $0x160] ss:$16 sps:$4 sm:$0xff]  }
  0x18   :  { %5096 = vmatpush1.bf16.msra.mxu0 %v7836_v23  ;;  %5056 = vmatprep.subr.bf16.mxu1 %v7837_v24  ;;  %v7869_v51 = vld [vmem:[%s12060_s1 + $0x364] ss:$16 sps:$4 sm:$0xff]   ;;  %v7872_v55 = vld [vmem:[%s12060_s1 + $0x360] ss:$16 sps:$4 sm:$0xff]   ;;  %v7906_v24 = vld [vmem:[%s12060_s1 + $0x28] ss:$16 sps:$4 sm:$0xff]  }
  0x19   :  { %5097 = vmatprep.subr.bf16.mxu0 %v7839_v25  ;;  %v28_v52 = vld [vmem:[%s12059_s0] sm:$0xff] }
  0x1a   :  { %v865_v54 = vrot.slane %v28_v52, %v9318_v49  ;;  %v7873_v56 = vld [vmem:[%s12060_s1 + $0x184] ss:$16 sps:$4 sm:$0xff]   ;;  %v7877_v59 = vld [vmem:[%s12060_s1 + $0x180] ss:$16 sps:$4 sm:$0xff]   ;;  %v858_v5 = vcombine.high %v28_v52, %v28_v52  ;;  %v7950_v52 = vld [vmem:[%s12060_s1 + $0x10c] ss:$16 sps:$4 sm:$0xff]  }
  0x1b   :  { %5057 = vmatpush1.bf16.msra.mxu1 %v7841_v26  ;;  %v7875_v57 = vld [vmem:[%s12060_s1 + $0x384] ss:$16 sps:$4 sm:$0xff]   ;;  %v7878_v61 = vld [vmem:[%s12060_s1 + $0x380] ss:$16 sps:$4 sm:$0xff]   ;;  %v7914_v26 = vld [vmem:[%s12060_s1 + $0x4c] ss:$16 sps:$4 sm:$0xff]  }
  0x1c   :  { %5098 = vmatpush1.bf16.msra.mxu0 %v7842_v27  ;;  %5058 = vmatprep.subr.bf16.mxu1 %v7843_v28  ;;  %v873_v58 = vcombine.high %v865_v54, %v865_v54  ;;  %v7879_v62 = vld [vmem:[%s12060_s1 + $0x1a4] ss:$16 sps:$4 sm:$0xff]   ;;  %v7883_v1 = vld [vmem:[%s12060_s1 + $0x1a0] ss:$16 sps:$4 sm:$0xff]   ;;  %v9383_v10 = vrot.slane %v858_v5, %v9318_v49  ;;  %v9389_v12 = vrot.slane %v865_v54, %v9318_v49  ;;  %v7912_v28 = vld [vmem:[%s12060_s1 + $0x48] ss:$16 sps:$4 sm:$0xff]  }
  0x1d   :  { %5099 = vmatprep.subr.bf16.mxu0 %v7845_v29  ;;  %v7881_v63 = vld [vmem:[%s12060_s1 + $0x3a4] ss:$16 sps:$4 sm:$0xff]   ;;  %v7884_v2 = vld [vmem:[%s12060_s1 + $0x3a0] ss:$16 sps:$4 sm:$0xff]   ;;  %v7948_v54 = vld [vmem:[%s12060_s1 + $0x108] ss:$16 sps:$4 sm:$0xff]  }
  0x1e   :  { %v895_v60 = vrot.slane %v873_v58, %v9318_v49  ;;  %v7885_v3 = vld [vmem:[%s12060_s1 + $0x1c4] ss:$16 sps:$4 sm:$0xff]   ;;  %v7889_v6 = vld [vmem:[%s12060_s1 + $0x1c0] ss:$16 sps:$4 sm:$0xff]   ;;  %v874_v16 = vcombine.high %v9383_v10, %v9383_v10  ;;  %v9407_v18 = vcombine.high %v9389_v12, %v9389_v12  ;;  %v7954_v58 = vld [vmem:[%s12060_s1 + $0x128] ss:$16 sps:$4 sm:$0xff]  }
  0x1f   :  { %5059 = vmatpush1.bf16.msra.mxu1 %v7847_v30  ;;  %v7887_v4 = vld [vmem:[%s12060_s1 + $0x3c4] ss:$16 sps:$4 sm:$0xff]   ;;  %v7890_v7 = vld [vmem:[%s12060_s1 + $0x3c0] ss:$16 sps:$4 sm:$0xff]   ;;  %v7920_v30 = vld [vmem:[%s12060_s1 + $0x6c] ss:$16 sps:$4 sm:$0xff]  }
  0x20   :  { %5100 = vmatpush1.bf16.msra.mxu0 %v7848_v31  ;;  %5060 = vmatprep.subr.bf16.mxu1 %v7849_v32  ;;  %v9355_v0 = vcombine.high %v895_v60, %v895_v60  ;;  %v7891_v8 = vld [vmem:[%s12060_s1 + $0x1e4] ss:$16 sps:$4 sm:$0xff]   ;;  %v7895_v11 = vld [vmem:[%s12060_s1 + $0x1e0] ss:$16 sps:$4 sm:$0xff]   ;;  %v9419_v22 = vrot.slane %v874_v16, %v9318_v49  ;;  %v7918_v32 = vld [vmem:[%s12060_s1 + $0x68] ss:$16 sps:$4 sm:$0xff]  }
  0x21   :  { %5101 = vmatprep.subr.bf16.mxu0 %v7851_v33  ;;  %5076 = vmatprep.mubr.bf16.mxu1 %v895_v60  ;;  %v7893_v9 = vld [vmem:[%s12060_s1 + $0x3e4] ss:$16 sps:$4 sm:$0xff]   ;;  %v7896_v13 = vld [vmem:[%s12060_s1 + $0x3e0] ss:$16 sps:$4 sm:$0xff]   ;;  %v7974_v5 = vld [vmem:[%s12060_s1 + $0x18c] ss:$16 sps:$4 sm:$0xff]  }
  0x22   :  { %5117 = vmatprep.mubr.bf16.mxu0 %v9355_v0  ;;  %v7899_v14 = vld [vmem:[%s12060_s1 + $0x404] ss:$16 sps:$4 sm:$0xff]   ;;  %v7897_v17 = vld [vmem:[%s12060_s1 + $0x400] ss:$16 sps:$4 sm:$0xff]  }
  0x23   :  { %5061 = vmatpush1.bf16.msra.mxu1 %v7853_v34  ;;  %v7905_v20 = vld [vmem:[%s12060_s1 + $0x424] ss:$16 sps:$4 sm:$0xff]   ;;  %v7903_v23 = vld [vmem:[%s12060_s1 + $0x420] ss:$16 sps:$4 sm:$0xff]   ;;  %v7926_v34 = vld [vmem:[%s12060_s1 + $0x8c] ss:$16 sps:$4 sm:$0xff]  }
  0x24   :  { %5102 = vmatpush1.bf16.msra.mxu0 %v7854_v35  ;;  %5062 = vmatprep.subr.bf16.mxu1 %v7855_v39  ;;  %v7911_v25 = vld [vmem:[%s12060_s1 + $0x444] ss:$16 sps:$4 sm:$0xff]   ;;  %v7909_v27 = vld [vmem:[%s12060_s1 + $0x440] ss:$16 sps:$4 sm:$0xff]  }
  0x25   :  { %5103 = vmatprep.subr.bf16.mxu0 %v7857_v40  ;;  %v7917_v29 = vld [vmem:[%s12060_s1 + $0x464] ss:$16 sps:$4 sm:$0xff]   ;;  %v7915_v31 = vld [vmem:[%s12060_s1 + $0x460] ss:$16 sps:$4 sm:$0xff]   ;;  %v7930_v40 = vld [vmem:[%s12060_s1 + $0xa8] ss:$16 sps:$4 sm:$0xff]  }
  0x26   :  { %v7923_v33 = vld [vmem:[%s12060_s1 + $0x484] ss:$16 sps:$4 sm:$0xff]   ;;  %v7921_v35 = vld [vmem:[%s12060_s1 + $0x480] ss:$16 sps:$4 sm:$0xff]  }
  0x27   :  { %5063 = vmatpush1.bf16.msra.mxu1 %v7859_v41  ;;  %v7929_v37 = vld [vmem:[%s12060_s1 + $0x4a4] ss:$16 sps:$4 sm:$0xff]   ;;  %v7927_v39 = vld [vmem:[%s12060_s1 + $0x4a0] ss:$16 sps:$4 sm:$0xff]  }
  0x28   :  { %5104 = vmatpush1.bf16.msra.mxu0 %v7860_v44  ;;  %5064 = vmatprep.subr.bf16.mxu1 %v7861_v45  ;;  %v7935_v41 = vld [vmem:[%s12060_s1 + $0x4c4] ss:$16 sps:$4 sm:$0xff]   ;;  %v7933_v44 = vld [vmem:[%s12060_s1 + $0x4c0] ss:$16 sps:$4 sm:$0xff]   ;;  %v7936_v45 = vld [vmem:[%s12060_s1 + $0xc8] ss:$16 sps:$4 sm:$0xff]  }
  0x29   :  { %5105 = vmatprep.subr.bf16.mxu0 %v7863_v46  ;;  %v7941_v46 = vld [vmem:[%s12060_s1 + $0x4e4] ss:$16 sps:$4 sm:$0xff]   ;;  %v7981_v16 = vld [vmem:[%s12060_s1 + $0x5c0] ss:$16 sps:$4 sm:$0xff]  }
  0x2b   :  { %5065 = vmatpush1.bf16.msra.mxu1 %v7865_v47  ;;  %v7944_v47 = vld [vmem:[%s12060_s1 + $0xec] ss:$16 sps:$4 sm:$0xff]  }
  0x2c   :  { %5106 = vmatpush1.bf16.msra.mxu0 %v7866_v48  ;;  %5066 = vmatprep.subr.bf16.mxu1 %v7867_v50  ;;  %v7939_v48 = vld [vmem:[%s12060_s1 + $0x4e0] ss:$16 sps:$4 sm:$0xff]   ;;  %v7942_v50 = vld [vmem:[%s12060_s1 + $0xe8] ss:$16 sps:$4 sm:$0xff]  }
  0x2d   :  { %5107 = vmatprep.subr.bf16.mxu0 %v7869_v51  ;;  %v7947_v51 = vld [vmem:[%s12060_s1 + $0x504] ss:$16 sps:$4 sm:$0xff]  }
  0x2f   :  { %5067 = vmatpush1.bf16.msra.mxu1 %v7871_v53  ;;  %v7945_v53 = vld [vmem:[%s12060_s1 + $0x500] ss:$16 sps:$4 sm:$0xff]  }
  0x30   :  { %5108 = vmatpush1.bf16.msra.mxu0 %v7872_v55  ;;  %5068 = vmatprep.subr.bf16.mxu1 %v7873_v56  ;;  %v7953_v55 = vld [vmem:[%s12060_s1 + $0x524] ss:$16 sps:$4 sm:$0xff]   ;;  %v7956_v56 = vld [vmem:[%s12060_s1 + $0x12c] ss:$16 sps:$4 sm:$0xff]  }
  0x31   :  { %5109 = vmatprep.subr.bf16.mxu0 %v7875_v57  ;;  %v7951_v57 = vld [vmem:[%s12060_s1 + $0x520] ss:$16 sps:$4 sm:$0xff]  }
  0x33   :  { %5069 = vmatpush1.bf16.msra.mxu1 %v7877_v59  ;;  %v7959_v59 = vld [vmem:[%s12060_s1 + $0x544] ss:$16 sps:$4 sm:$0xff]  }
  0x34   :  { %5110 = vmatpush1.bf16.msra.mxu0 %v7878_v61  ;;  %5070 = vmatprep.subr.bf16.mxu1 %v7879_v62  ;;  %v7957_v61 = vld [vmem:[%s12060_s1 + $0x540] ss:$16 sps:$4 sm:$0xff]   ;;  %v7960_v62 = vld [vmem:[%s12060_s1 + $0x148] ss:$16 sps:$4 sm:$0xff]  }
  0x35   :  { %5111 = vmatprep.subr.bf16.mxu0 %v7881_v63  ;;  %v7965_v63 = vld [vmem:[%s12060_s1 + $0x564] ss:$16 sps:$4 sm:$0xff]  }
  0x37   :  { %5071 = vmatpush1.bf16.msra.mxu1 %v7883_v1  ;;  %v7968_v1 = vld [vmem:[%s12060_s1 + $0x16c] ss:$16 sps:$4 sm:$0xff]  }
  0x38   :  { %5112 = vmatpush1.bf16.msra.mxu0 %v7884_v2  ;;  %5072 = vmatprep.subr.bf16.mxu1 %v7885_v3  ;;  %v7963_v2 = vld [vmem:[%s12060_s1 + $0x560] ss:$16 sps:$4 sm:$0xff]   ;;  %v7966_v3 = vld [vmem:[%s12060_s1 + $0x168] ss:$16 sps:$4 sm:$0xff]  }
  0x39   :  { %5113 = vmatprep.subr.bf16.mxu0 %v7887_v4  ;;  %v7971_v4 = vld [vmem:[%s12060_s1 + $0x584] ss:$16 sps:$4 sm:$0xff]  }
  0x3b   :  { %5073 = vmatpush1.bf16.msra.mxu1 %v7889_v6  ;;  %v7969_v6 = vld [vmem:[%s12060_s1 + $0x580] ss:$16 sps:$4 sm:$0xff]  }
  0x3c   :  { %5114 = vmatpush1.bf16.msra.mxu0 %v7890_v7  ;;  %5074 = vmatprep.subr.bf16.mxu1 %v7891_v8  ;;  %v7972_v7 = vld [vmem:[%s12060_s1 + $0x188] ss:$16 sps:$4 sm:$0xff]   ;;  %v7977_v8 = vld [vmem:[%s12060_s1 + $0x5a4] ss:$16 sps:$4 sm:$0xff]  }
  0x3d   :  { %5115 = vmatprep.subr.bf16.mxu0 %v7893_v9  ;;  %v7980_v9 = vld [vmem:[%s12060_s1 + $0x1ac] ss:$16 sps:$4 sm:$0xff]  }
  0x3f   :  { %5075 = vmatpush1.bf16.msra.mxu1 %v7895_v11  ;;  %v7975_v11 = vld [vmem:[%s12060_s1 + $0x5a0] ss:$16 sps:$4 sm:$0xff]  }
  0x40   :  { %5116 = vmatpush1.bf16.msra.mxu0 %v7896_v13  ;;  %5577 = vmatprep.subr.bf16.mxu1 %v7902_v15  ;;  %v7978_v13 = vld [vmem:[%s12060_s1 + $0x1a8] ss:$16 sps:$4 sm:$0xff]   ;;  %v7986_v15 = vld [vmem:[%s12060_s1 + $0x1cc] ss:$16 sps:$4 sm:$0xff]  }
  0x41   :  { %5126 = vmatprep.subr.bf16.mxu0 %v7899_v14  ;;  %v7983_v14 = vld [vmem:[%s12060_s1 + $0x5c4] ss:$16 sps:$4 sm:$0xff]  }
  0x42   :  { %5077 = vmatmul.mubr.bf16.vlgmr.msra.gmra.mrb[0].mxu1 %v9389_v12 }
  0x43   :  { %5118 = vmatmul.mubr.bf16.vlgmr.msra.gmra.mrb[0].mxu0 %v9407_v18  ;;  %5578 = vmatpush1.bf16.msra.mxu1 %v7900_v19  ;;  %v7989_v19 = vld [vmem:[%s12060_s1 + $0x5e4] ss:$16 sps:$4 sm:$0xff]  }
  0x44   :  { %5127 = vmatpush1.bf16.msra.mxu0 %v7897_v17  ;;  %5579 = vmatprep.subr.bf16.mxu1 %v7908_v21  ;;  %v7984_v17 = vld [vmem:[%s12060_s1 + $0x1c8] ss:$16 sps:$4 sm:$0xff]   ;;  %v7987_v21 = vld [vmem:[%s12060_s1 + $0x5e0] ss:$16 sps:$4 sm:$0xff]  }
  0x45   :  { %5128 = vmatprep.subr.bf16.mxu0 %v7905_v20  ;;  %5158 = vmatprep.mubr.bf16.mxu0 %v9419_v22  ;;  %v7992_v20 = vld [vmem:[%s12060_s1 + $0x1ec] ss:$16 sps:$4 sm:$0xff]  }
  0x46   :  { %5609 = vmatprep.mubr.bf16.mxu1 %v895_v60  ;;  %v7962_v60 = vld [vmem:[%s12060_s1 + $0x14c] ss:$16 sps:$4 sm:$0xff]  }
  0x47   :  { %5580 = vmatpush1.bf16.msra.mxu1 %v7906_v24  ;;  %v7996_v24 = vld [vmem:[%s12060_s1 + $0x604] ss:$16 sps:$4 sm:$0xff]  }
  0x48   :  { %5129 = vmatpush1.bf16.msra.mxu0 %v7903_v23  ;;  %5581 = vmatprep.subr.bf16.mxu1 %v7914_v26  ;;  %v7990_v23 = vld [vmem:[%s12060_s1 + $0x1e8] ss:$16 sps:$4 sm:$0xff]   ;;  %v7994_v26 = vld [vmem:[%s12060_s1 + $0x600] ss:$16 sps:$4 sm:$0xff]  }
  0x49   :  { %5130 = vmatprep.subr.bf16.mxu0 %v7911_v25  ;;  %v7999_v25 = vld [vmem:[%s12060_s1 + $0x20c] ss:$16 sps:$4 sm:$0xff]  }
  0x4b   :  { %5582 = vmatpush1.bf16.msra.mxu1 %v7912_v28  ;;  %v7997_v28 = vld [vmem:[%s12060_s1 + $0x208] ss:$16 sps:$4 sm:$0xff]  }
  0x4c   :  { %5131 = vmatpush1.bf16.msra.mxu0 %v7909_v27  ;;  %5583 = vmatprep.subr.bf16.mxu1 %v7920_v30  ;;  %v9609_v27 = vrot.slane %v9383_v10, %v9318_v49  ;;  %v8005_v30 = vld [vmem:[%s12060_s1 + $0x22c] ss:$16 sps:$4 sm:$0xff]   ;;  %v9622_v10 = vcombine.high %v9419_v22, %v9419_v22 }
  0x4d   :  { %5132 = vmatprep.subr.bf16.mxu0 %v7917_v29  ;;  %v8002_v29 = vld [vmem:[%s12060_s1 + $0x624] ss:$16 sps:$4 sm:$0xff]  }
  0x4f   :  { %5584 = vmatpush1.bf16.msra.mxu1 %v7918_v32  ;;  %v8003_v32 = vld [vmem:[%s12060_s1 + $0x228] ss:$16 sps:$4 sm:$0xff]  }
  0x50   :  { %5133 = vmatpush1.bf16.msra.mxu0 %v7915_v31  ;;  %5585 = vmatprep.subr.bf16.mxu1 %v7926_v34  ;;  %v8000_v31 = vld [vmem:[%s12060_s1 + $0x620] ss:$16 sps:$4 sm:$0xff]  }
  0x51   :  { %5134 = vmatprep.subr.bf16.mxu0 %v7923_v33  ;;  %v8008_v33 = vld [vmem:[%s12060_s1 + $0x644] ss:$16 sps:$4 sm:$0xff]   ;;  %v8006_v34 = vld [vmem:[%s12060_s1 + $0x640] ss:$16 sps:$4 sm:$0xff]  }
  0x53   :  { %5586 = vmatpush1.bf16.msra.mxu1 %v7924_v36  ;;  %v8014_v36 = vld [vmem:[%s12060_s1 + $0x664] ss:$16 sps:$4 sm:$0xff]  }
  0x54   :  { %5135 = vmatpush1.bf16.msra.mxu0 %v7921_v35  ;;  %5587 = vmatprep.subr.bf16.mxu1 %v7932_v38  ;;  %v8009_v35 = vld [vmem:[%s12060_s1 + $0x248] ss:$16 sps:$4 sm:$0xff]  }
  0x55   :  { %5136 = vmatprep.subr.bf16.mxu0 %v7929_v37  ;;  %v8012_v37 = vld [vmem:[%s12060_s1 + $0x660] ss:$16 sps:$4 sm:$0xff]   ;;  %v8015_v38 = vld [vmem:[%s12060_s1 + $0x268] ss:$16 sps:$4 sm:$0xff]  }
  0x57   :  { %5588 = vmatpush1.bf16.msra.mxu1 %v7930_v40  ;;  %v8023_v40 = vld [vmem:[%s12060_s1 + $0x28c] ss:$16 sps:$4 sm:$0xff]  }
  0x58   :  { %5137 = vmatpush1.bf16.msra.mxu0 %v7927_v39  ;;  %5589 = vmatprep.subr.bf16.mxu1 %v7938_v43  ;;  %v8020_v39 = vld [vmem:[%s12060_s1 + $0x684] ss:$16 sps:$4 sm:$0xff]   ;;  %v8021_v43 = vld [vmem:[%s12060_s1 + $0x288] ss:$16 sps:$4 sm:$0xff]  }
  0x59   :  { %5138 = vmatprep.subr.bf16.mxu0 %v7935_v41  ;;  %v8018_v41 = vld [vmem:[%s12060_s1 + $0x680] ss:$16 sps:$4 sm:$0xff]  }
  0x5b   :  { %5590 = vmatpush1.bf16.msra.mxu1 %v7936_v45  ;;  %v8029_v45 = vld [vmem:[%s12060_s1 + $0x2ac] ss:$16 sps:$4 sm:$0xff]  }
  0x5c   :  { %5139 = vmatpush1.bf16.msra.mxu0 %v7933_v44  ;;  %5591 = vmatprep.subr.bf16.mxu1 %v7944_v47  ;;  %v8026_v44 = vld [vmem:[%s12060_s1 + $0x6a4] ss:$16 sps:$4 sm:$0xff]   ;;  %v8027_v47 = vld [vmem:[%s12060_s1 + $0x2a8] ss:$16 sps:$4 sm:$0xff]  }
  0x5d   :  { %5140 = vmatprep.subr.bf16.mxu0 %v7941_v46  ;;  %v8024_v46 = vld [vmem:[%s12060_s1 + $0x6a0] ss:$16 sps:$4 sm:$0xff]  }
  0x5f   :  { %5592 = vmatpush1.bf16.msra.mxu1 %v7942_v50  ;;  %v8035_v50 = vld [vmem:[%s12060_s1 + $0x2cc] ss:$16 sps:$4 sm:$0xff]  }
  0x60   :  { %5141 = vmatpush1.bf16.msra.mxu0 %v7939_v48  ;;  %5593 = vmatprep.subr.bf16.mxu1 %v7950_v52  ;;  %v8032_v48 = vld [vmem:[%s12060_s1 + $0x6c4] ss:$16 sps:$4 sm:$0xff]   ;;  %v8033_v52 = vld [vmem:[%s12060_s1 + $0x2c8] ss:$16 sps:$4 sm:$0xff]  }
  0x61   :  { %5142 = vmatprep.subr.bf16.mxu0 %v7947_v51  ;;  %v8030_v51 = vld [vmem:[%s12060_s1 + $0x6c0] ss:$16 sps:$4 sm:$0xff]  }
  0x63   :  { %5594 = vmatpush1.bf16.msra.mxu1 %v7948_v54  ;;  %v8041_v54 = vld [vmem:[%s12060_s1 + $0x2ec] ss:$16 sps:$4 sm:$0xff]  }
  0x64   :  { %5143 = vmatpush1.bf16.msra.mxu0 %v7945_v53  ;;  %5595 = vmatprep.subr.bf16.mxu1 %v7956_v56  ;;  %v8038_v53 = vld [vmem:[%s12060_s1 + $0x6e4] ss:$16 sps:$4 sm:$0xff]   ;;  %v8039_v56 = vld [vmem:[%s12060_s1 + $0x2e8] ss:$16 sps:$4 sm:$0xff]  }
  0x65   :  { %5144 = vmatprep.subr.bf16.mxu0 %v7953_v55  ;;  %v8036_v55 = vld [vmem:[%s12060_s1 + $0x6e0] ss:$16 sps:$4 sm:$0xff]  }
  0x67   :  { %5596 = vmatpush1.bf16.msra.mxu1 %v7954_v58  ;;  %v8047_v58 = vld [vmem:[%s12060_s1 + $0x30c] ss:$16 sps:$4 sm:$0xff]  }
  0x68   :  { %5145 = vmatpush1.bf16.msra.mxu0 %v7951_v57  ;;  %5597 = vmatprep.subr.bf16.mxu1 %v7962_v60  ;;  %v8044_v57 = vld [vmem:[%s12060_s1 + $0x704] ss:$16 sps:$4 sm:$0xff]   ;;  %v8045_v60 = vld [vmem:[%s12060_s1 + $0x308] ss:$16 sps:$4 sm:$0xff]  }
  0x69   :  { %5146 = vmatprep.subr.bf16.mxu0 %v7959_v59  ;;  %v8042_v59 = vld [vmem:[%s12060_s1 + $0x700] ss:$16 sps:$4 sm:$0xff]  }
  0x6b   :  { %5598 = vmatpush1.bf16.msra.mxu1 %v7960_v62  ;;  %v8053_v62 = vld [vmem:[%s12060_s1 + $0x32c] ss:$16 sps:$4 sm:$0xff]  }
  0x6c   :  { %5147 = vmatpush1.bf16.msra.mxu0 %v7957_v61  ;;  %5599 = vmatprep.subr.bf16.mxu1 %v7968_v1  ;;  %v8050_v61 = vld [vmem:[%s12060_s1 + $0x724] ss:$16 sps:$4 sm:$0xff]   ;;  %v8051_v1 = vld [vmem:[%s12060_s1 + $0x328] ss:$16 sps:$4 sm:$0xff]  }
  0x6d   :  { %5148 = vmatprep.subr.bf16.mxu0 %v7965_v63  ;;  %v8048_v63 = vld [vmem:[%s12060_s1 + $0x720] ss:$16 sps:$4 sm:$0xff]  }
  0x6f   :  { %5600 = vmatpush1.bf16.msra.mxu1 %v7966_v3  ;;  %v8059_v3 = vld [vmem:[%s12060_s1 + $0x34c] ss:$16 sps:$4 sm:$0xff]  }
  0x70   :  { %5149 = vmatpush1.bf16.msra.mxu0 %v7963_v2  ;;  %5601 = vmatprep.subr.bf16.mxu1 %v7974_v5  ;;  %v8056_v2 = vld [vmem:[%s12060_s1 + $0x744] ss:$16 sps:$4 sm:$0xff]   ;;  %v8057_v5 = vld [vmem:[%s12060_s1 + $0x348] ss:$16 sps:$4 sm:$0xff]  }
  0x71   :  { %5150 = vmatprep.subr.bf16.mxu0 %v7971_v4  ;;  %v8054_v4 = vld [vmem:[%s12060_s1 + $0x740] ss:$16 sps:$4 sm:$0xff]  }
  0x73   :  { %5602 = vmatpush1.bf16.msra.mxu1 %v7972_v7  ;;  %v8065_v7 = vld [vmem:[%s12060_s1 + $0x36c] ss:$16 sps:$4 sm:$0xff]  }
  0x74   :  { %5151 = vmatpush1.bf16.msra.mxu0 %v7969_v6  ;;  %5603 = vmatprep.subr.bf16.mxu1 %v7980_v9  ;;  %v8062_v6 = vld [vmem:[%s12060_s1 + $0x764] ss:$16 sps:$4 sm:$0xff]   ;;  %v8063_v9 = vld [vmem:[%s12060_s1 + $0x368] ss:$16 sps:$4 sm:$0xff]  }
  0x75   :  { %5152 = vmatprep.subr.bf16.mxu0 %v7977_v8  ;;  %v8060_v8 = vld [vmem:[%s12060_s1 + $0x760] ss:$16 sps:$4 sm:$0xff]  }
  0x77   :  { %5604 = vmatpush1.bf16.msra.mxu1 %v7978_v13  ;;  %v8071_v13 = vld [vmem:[%s12060_s1 + $0x38c] ss:$16 sps:$4 sm:$0xff]  }
  0x78   :  { %5153 = vmatpush1.bf16.msra.mxu0 %v7975_v11  ;;  %5605 = vmatprep.subr.bf16.mxu1 %v7986_v15  ;;  %v8068_v11 = vld [vmem:[%s12060_s1 + $0x784] ss:$16 sps:$4 sm:$0xff]   ;;  %v8069_v15 = vld [vmem:[%s12060_s1 + $0x388] ss:$16 sps:$4 sm:$0xff]  }
  0x79   :  { %5154 = vmatprep.subr.bf16.mxu0 %v7983_v14  ;;  %v8066_v14 = vld [vmem:[%s12060_s1 + $0x780] ss:$16 sps:$4 sm:$0xff]  }
  0x7b   :  { %5606 = vmatpush1.bf16.msra.mxu1 %v7984_v17  ;;  %v8077_v17 = vld [vmem:[%s12060_s1 + $0x3ac] ss:$16 sps:$4 sm:$0xff]  }
  0x7c   :  { %5155 = vmatpush1.bf16.msra.mxu0 %v7981_v16  ;;  %5607 = vmatprep.subr.bf16.mxu1 %v7992_v20  ;;  %v8074_v16 = vld [vmem:[%s12060_s1 + $0x7a4] ss:$16 sps:$4 sm:$0xff]   ;;  %v8075_v20 = vld [vmem:[%s12060_s1 + $0x3a8] ss:$16 sps:$4 sm:$0xff]  }
  0x7d   :  { %5156 = vmatprep.subr.bf16.mxu0 %v7989_v19  ;;  %v8072_v19 = vld [vmem:[%s12060_s1 + $0x7a0] ss:$16 sps:$4 sm:$0xff]  }
  0x7f   :  { %5608 = vmatpush1.bf16.msra.mxu1 %v7990_v23  ;;  %v8083_v23 = vld [vmem:[%s12060_s1 + $0x3cc] ss:$16 sps:$4 sm:$0xff]  }
  0x80   :  { %5157 = vmatpush1.bf16.msra.mxu0 %v7987_v21  ;;  %5618 = vmatprep.subr.bf16.mxu1 %v7999_v25  ;;  %v8080_v21 = vld [vmem:[%s12060_s1 + $0x7c4] ss:$16 sps:$4 sm:$0xff]   ;;  %v8078_v25 = vld [vmem:[%s12060_s1 + $0x7c0] ss:$16 sps:$4 sm:$0xff]  }
  0x81   :  { %5167 = vmatprep.subr.bf16.mxu0 %v7996_v24  ;;  %v9787_v24 = vld [vmem:[%s12059_s0 + $0x8] sm:$0xff] }
  0x82   :  { %5610 = vmatmul.mubr.bf16.vlgmr.msra.gmra.mrb[4].mxu1 %v9389_v12  ;;  %v8011_v12 = vld [vmem:[%s12060_s1 + $0x24c] ss:$16 sps:$4 sm:$0xff]  }
  0x83   :  { %5159 = vmatmul.mubr.bf16.vlgmr.msra.gmra.mrb[0].mxu0 %v9609_v27  ;;  %5619 = vmatpush1.bf16.msra.mxu1 %v7997_v28  ;;  %v8086_v28 = vld [vmem:[%s12060_s1 + $0x7e4] ss:$16 sps:$4 sm:$0xff]  }
  0x84   :  { %5168 = vmatpush1.bf16.msra.mxu0 %v7994_v26  ;;  %5620 = vmatprep.subr.bf16.mxu1 %v8005_v30  ;;  %v8081_v26 = vld [vmem:[%s12060_s1 + $0x3c8] ss:$16 sps:$4 sm:$0xff]   ;;  %v9803_v30 = vrot.slane %v9787_v24, %v9318_v49 }
  0x85   :  { %5169 = vmatprep.subr.bf16.mxu0 %v8002_v29  ;;  %5199 = vmatprep.mubr.bf16.mxu0 %v9622_v10  ;;  %v8089_v29 = vld [vmem:[%s12060_s1 + $0x3ec] ss:$16 sps:$4 sm:$0xff]  }
  0x86   :  { %5650 = vmatprep.mubr.bf16.mxu1 %v9355_v0  ;;  %v8017_v0 = vld [vmem:[%s12060_s1 + $0x26c] ss:$16 sps:$4 sm:$0xff]  }
  0x87   :  { %5621 = vmatpush1.bf16.msra.mxu1 %v8003_v32  ;;  %v8087_v32 = vld [vmem:[%s12060_s1 + $0x3e8] ss:$16 sps:$4 sm:$0xff]  }
  0x88   :  { %5170 = vmatpush1.bf16.msra.mxu0 %v8000_v31  ;;  %5622 = vmatprep.subr.bf16.mxu1 %v8011_v12  ;;  %v8084_v31 = vld [vmem:[%s12060_s1 + $0x7e0] ss:$16 sps:$4 sm:$0xff]   ;;  %v8095_v12 = vld [vmem:[%s12060_s1 + $0x40c] ss:$16 sps:$4 sm:$0xff]  }
  0x89   :  { %5171 = vmatprep.subr.bf16.mxu0 %v8008_v33  ;;  %v8092_v33 = vld [vmem:[%s12060_s1 + $0x804] ss:$16 sps:$4 sm:$0xff]  }
  0x8b   :  { %5623 = vmatpush1.bf16.msra.mxu1 %v8009_v35  ;;  %v8090_v35 = vld [vmem:[%s12060_s1 + $0x800] ss:$16 sps:$4 sm:$0xff]  }
  0x8c   :  { %5172 = vmatpush1.bf16.msra.mxu0 %v8006_v34  ;;  %5624 = vmatprep.subr.bf16.mxu1 %v8017_v0  ;;  %v922_v34 = vcombine.high %v9803_v30, %v9803_v30  ;;  %v8093_v0 = vld [vmem:[%s12060_s1 + $0x408] ss:$16 sps:$4 sm:$0xff]  }
  0x8d   :  { %5173 = vmatprep.subr.bf16.mxu0 %v8014_v36  ;;  %v9824_v36 = vcombine.high %v9609_v27, %v9609_v27 }
  0x8f   :  { %5625 = vmatpush1.bf16.msra.mxu1 %v8015_v38  ;;  %v8101_v38 = vld [vmem:[%s12060_s1 + $0x42c] ss:$16 sps:$4 sm:$0xff]  }
  0x90   :  { %5174 = vmatpush1.bf16.msra.mxu0 %v8012_v37  ;;  %5626 = vmatprep.subr.bf16.mxu1 %v8023_v40  ;;  %v8098_v37 = vld [vmem:[%s12060_s1 + $0x824] ss:$16 sps:$4 sm:$0xff]   ;;  %v8096_v40 = vld [vmem:[%s12060_s1 + $0x820] ss:$16 sps:$4 sm:$0xff]  }
  0x91   :  { %5175 = vmatprep.subr.bf16.mxu0 %v8020_v39  ;;  %v9836_v39 = vrot.slane %v922_v34, %v9318_v49  ;;  %v8179_v34 = vld [vmem:[%s12060_s1 + $0x5cc] ss:$16 sps:$4 sm:$0xff]  }
  0x93   :  { %5627 = vmatpush1.bf16.msra.mxu1 %v8021_v43  ;;  %v8104_v43 = vld [vmem:[%s12060_s1 + $0x844] ss:$16 sps:$4 sm:$0xff]  }
  0x94   :  { %5176 = vmatpush1.bf16.msra.mxu0 %v8018_v41  ;;  %5628 = vmatprep.subr.bf16.mxu1 %v8029_v45  ;;  %v8099_v41 = vld [vmem:[%s12060_s1 + $0x428] ss:$16 sps:$4 sm:$0xff]  }
  0x95   :  { %5177 = vmatprep.subr.bf16.mxu0 %v8026_v44  ;;  %v8102_v44 = vld [vmem:[%s12060_s1 + $0x840] ss:$16 sps:$4 sm:$0xff]   ;;  %v8105_v45 = vld [vmem:[%s12060_s1 + $0x448] ss:$16 sps:$4 sm:$0xff]  }
  0x97   :  { %5629 = vmatpush1.bf16.msra.mxu1 %v8027_v47  ;;  %v8108_v47 = vld [vmem:[%s12060_s1 + $0x860] ss:$16 sps:$4 sm:$0xff]  }
  0x98   :  { %5178 = vmatpush1.bf16.msra.mxu0 %v8024_v46  ;;  %5630 = vmatprep.subr.bf16.mxu1 %v8035_v50  ;;  %v8110_v46 = vld [vmem:[%s12060_s1 + $0x864] ss:$16 sps:$4 sm:$0xff]  }
  0x99   :  { %5179 = vmatprep.subr.bf16.mxu0 %v8032_v48  ;;  %v8111_v48 = vld [vmem:[%s12060_s1 + $0x468] ss:$16 sps:$4 sm:$0xff]   ;;  %v8116_v50 = vld [vmem:[%s12060_s1 + $0x884] ss:$16 sps:$4 sm:$0xff]  }
  0x9b   :  { %5631 = vmatpush1.bf16.msra.mxu1 %v8033_v52  ;;  %v8114_v52 = vld [vmem:[%s12060_s1 + $0x880] ss:$16 sps:$4 sm:$0xff]  }
  0x9c   :  { %5180 = vmatpush1.bf16.msra.mxu0 %v8030_v51  ;;  %5632 = vmatprep.subr.bf16.mxu1 %v8041_v54  ;;  %v8119_v51 = vld [vmem:[%s12060_s1 + $0x48c] ss:$16 sps:$4 sm:$0xff]   ;;  %v8122_v54 = vld [vmem:[%s12060_s1 + $0x8a4] ss:$16 sps:$4 sm:$0xff]  }
  0x9d   :  { %5181 = vmatprep.subr.bf16.mxu0 %v8038_v53  ;;  %v8117_v53 = vld [vmem:[%s12060_s1 + $0x488] ss:$16 sps:$4 sm:$0xff]  }
  0x9f   :  { %5633 = vmatpush1.bf16.msra.mxu1 %v8039_v56  ;;  %v8120_v56 = vld [vmem:[%s12060_s1 + $0x8a0] ss:$16 sps:$4 sm:$0xff]  }
  0xa0   :  { %5182 = vmatpush1.bf16.msra.mxu0 %v8036_v55  ;;  %5634 = vmatprep.subr.bf16.mxu1 %v8047_v58  ;;  %v8125_v55 = vld [vmem:[%s12060_s1 + $0x4ac] ss:$16 sps:$4 sm:$0xff]   ;;  %v8128_v58 = vld [vmem:[%s12060_s1 + $0x8c4] ss:$16 sps:$4 sm:$0xff]  }
  0xa1   :  { %5183 = vmatprep.subr.bf16.mxu0 %v8044_v57  ;;  %v8123_v57 = vld [vmem:[%s12060_s1 + $0x4a8] ss:$16 sps:$4 sm:$0xff]  }
  0xa3   :  { %5635 = vmatpush1.bf16.msra.mxu1 %v8045_v60  ;;  %v8126_v60 = vld [vmem:[%s12060_s1 + $0x8c0] ss:$16 sps:$4 sm:$0xff]  }
  0xa4   :  { %5184 = vmatpush1.bf16.msra.mxu0 %v8042_v59  ;;  %5636 = vmatprep.subr.bf16.mxu1 %v8053_v62  ;;  %v8131_v59 = vld [vmem:[%s12060_s1 + $0x4cc] ss:$16 sps:$4 sm:$0xff]   ;;  %v8134_v62 = vld [vmem:[%s12060_s1 + $0x8e4] ss:$16 sps:$4 sm:$0xff]  }
  0xa5   :  { %5185 = vmatprep.subr.bf16.mxu0 %v8050_v61  ;;  %v8129_v61 = vld [vmem:[%s12060_s1 + $0x4c8] ss:$16 sps:$4 sm:$0xff]  }
  0xa7   :  { %5637 = vmatpush1.bf16.msra.mxu1 %v8051_v1  ;;  %v8132_v1 = vld [vmem:[%s12060_s1 + $0x8e0] ss:$16 sps:$4 sm:$0xff]  }
  0xa8   :  { %5186 = vmatpush1.bf16.msra.mxu0 %v8048_v63  ;;  %5638 = vmatprep.subr.bf16.mxu1 %v8059_v3  ;;  %v8137_v63 = vld [vmem:[%s12060_s1 + $0x4ec] ss:$16 sps:$4 sm:$0xff]   ;;  %v8140_v3 = vld [vmem:[%s12060_s1 + $0x904] ss:$16 sps:$4 sm:$0xff]  }
  0xa9   :  { %5187 = vmatprep.subr.bf16.mxu0 %v8056_v2  ;;  %v8135_v2 = vld [vmem:[%s12060_s1 + $0x4e8] ss:$16 sps:$4 sm:$0xff]  }
  0xab   :  { %5639 = vmatpush1.bf16.msra.mxu1 %v8057_v5  ;;  %v8138_v5 = vld [vmem:[%s12060_s1 + $0x900] ss:$16 sps:$4 sm:$0xff]  }
  0xac   :  { %5188 = vmatpush1.bf16.msra.mxu0 %v8054_v4  ;;  %5640 = vmatprep.subr.bf16.mxu1 %v8065_v7  ;;  %v8143_v4 = vld [vmem:[%s12060_s1 + $0x50c] ss:$16 sps:$4 sm:$0xff]   ;;  %v8146_v7 = vld [vmem:[%s12060_s1 + $0x924] ss:$16 sps:$4 sm:$0xff]  }
  0xad   :  { %5189 = vmatprep.subr.bf16.mxu0 %v8062_v6  ;;  %v8141_v6 = vld [vmem:[%s12060_s1 + $0x508] ss:$16 sps:$4 sm:$0xff]  }
  0xaf   :  { %5641 = vmatpush1.bf16.msra.mxu1 %v8063_v9  ;;  %v8144_v9 = vld [vmem:[%s12060_s1 + $0x920] ss:$16 sps:$4 sm:$0xff]  }
  0xb0   :  { %5190 = vmatpush1.bf16.msra.mxu0 %v8060_v8  ;;  %5642 = vmatprep.subr.bf16.mxu1 %v8071_v13  ;;  %v8149_v8 = vld [vmem:[%s12060_s1 + $0x52c] ss:$16 sps:$4 sm:$0xff]   ;;  %v8152_v13 = vld [vmem:[%s12060_s1 + $0x944] ss:$16 sps:$4 sm:$0xff]  }
  0xb1   :  { %5191 = vmatprep.subr.bf16.mxu0 %v8068_v11  ;;  %v8147_v11 = vld [vmem:[%s12060_s1 + $0x528] ss:$16 sps:$4 sm:$0xff]  }
  0xb3   :  { %5643 = vmatpush1.bf16.msra.mxu1 %v8069_v15  ;;  %v8150_v15 = vld [vmem:[%s12060_s1 + $0x940] ss:$16 sps:$4 sm:$0xff]  }
  0xb4   :  { %5192 = vmatpush1.bf16.msra.mxu0 %v8066_v14  ;;  %5644 = vmatprep.subr.bf16.mxu1 %v8077_v17  ;;  %v8155_v14 = vld [vmem:[%s12060_s1 + $0x54c] ss:$16 sps:$4 sm:$0xff]   ;;  %v8158_v17 = vld [vmem:[%s12060_s1 + $0x964] ss:$16 sps:$4 sm:$0xff]  }
  0xb5   :  { %5193 = vmatprep.subr.bf16.mxu0 %v8074_v16  ;;  %v8153_v16 = vld [vmem:[%s12060_s1 + $0x548] ss:$16 sps:$4 sm:$0xff]  }
  0xb7   :  { %5645 = vmatpush1.bf16.msra.mxu1 %v8075_v20  ;;  %v8156_v20 = vld [vmem:[%s12060_s1 + $0x960] ss:$16 sps:$4 sm:$0xff]  }
  0xb8   :  { %5194 = vmatpush1.bf16.msra.mxu0 %v8072_v19  ;;  %5646 = vmatprep.subr.bf16.mxu1 %v8083_v23  ;;  %v8161_v19 = vld [vmem:[%s12060_s1 + $0x56c] ss:$16 sps:$4 sm:$0xff]   ;;  %v8164_v23 = vld [vmem:[%s12060_s1 + $0x984] ss:$16 sps:$4 sm:$0xff]  }
  0xb9   :  { %5195 = vmatprep.subr.bf16.mxu0 %v8080_v21  ;;  %v8159_v21 = vld [vmem:[%s12060_s1 + $0x568] ss:$16 sps:$4 sm:$0xff]  }
  0xbb   :  { %5647 = vmatpush1.bf16.msra.mxu1 %v8081_v26  ;;  %v8162_v26 = vld [vmem:[%s12060_s1 + $0x980] ss:$16 sps:$4 sm:$0xff]  }
  0xbc   :  { %5196 = vmatpush1.bf16.msra.mxu0 %v8078_v25  ;;  %5648 = vmatprep.subr.bf16.mxu1 %v8089_v29  ;;  %v8167_v25 = vld [vmem:[%s12060_s1 + $0x58c] ss:$16 sps:$4 sm:$0xff]   ;;  %v8170_v29 = vld [vmem:[%s12060_s1 + $0x9a4] ss:$16 sps:$4 sm:$0xff]  }
  0xbd   :  { %5197 = vmatprep.subr.bf16.mxu0 %v8086_v28  ;;  %v8165_v28 = vld [vmem:[%s12060_s1 + $0x588] ss:$16 sps:$4 sm:$0xff]  }
  0xbf   :  { %5649 = vmatpush1.bf16.msra.mxu1 %v8087_v32  ;;  %v8168_v32 = vld [vmem:[%s12060_s1 + $0x9a0] ss:$16 sps:$4 sm:$0xff]  }
  0xc0   :  { %5198 = vmatpush1.bf16.msra.mxu0 %v8084_v31  ;;  %5659 = vmatprep.subr.bf16.mxu1 %v8095_v12  ;;  %v8173_v31 = vld [vmem:[%s12060_s1 + $0x5ac] ss:$16 sps:$4 sm:$0xff]   ;;  %v8176_v12 = vld [vmem:[%s12060_s1 + $0x9c4] ss:$16 sps:$4 sm:$0xff]  }
  0xc1   :  { %5208 = vmatprep.subr.bf16.mxu0 %v8092_v33  ;;  %v8171_v33 = vld [vmem:[%s12060_s1 + $0x5a8] ss:$16 sps:$4 sm:$0xff]  }
  0xc2   :  { %5651 = vmatmul.mubr.bf16.vlgmr.msra.gmra.mrb[4].mxu1 %v9407_v18  ;;  %v8107_v18 = vld [vmem:[%s12060_s1 + $0x44c] ss:$16 sps:$4 sm:$0xff]  }
  0xc3   :  { %5200 = vmatmul.mubr.bf16.vlgmr.msra.gmra.mrb[0].mxu0 %v9824_v36  ;;  %5660 = vmatpush1.bf16.msra.mxu1 %v8093_v0  ;;  %v8177_v0 = vld [vmem:[%s12060_s1 + $0x5c8] ss:$16 sps:$4 sm:$0xff]  }
  0xc4   :  { %5209 = vmatpush1.bf16.msra.mxu0 %v8090_v35  ;;  %5661 = vmatprep.subr.bf16.mxu1 %v8101_v38  ;;  %v8174_v35 = vld [vmem:[%s12060_s1 + $0x9c0] ss:$16 sps:$4 sm:$0xff]   ;;  %v8185_v38 = vld [vmem:[%s12060_s1 + $0x5ec] ss:$16 sps:$4 sm:$0xff]  }
  0xc5   :  { %5210 = vmatprep.subr.bf16.mxu0 %v8098_v37  ;;  %5240 = vmatprep.mubr.bf16.mxu0 %v9836_v39  ;;  %v8182_v37 = vld [vmem:[%s12060_s1 + $0x9e4] ss:$16 sps:$4 sm:$0xff]  }
  0xc6   :  { %5691 = vmatprep.mubr.bf16.mxu1 %v9419_v22  ;;  %v8113_v22 = vld [vmem:[%s12060_s1 + $0x46c] ss:$16 sps:$4 sm:$0xff]  }
  0xc7   :  { %5662 = vmatpush1.bf16.msra.mxu1 %v8099_v41  ;;  %v8183_v41 = vld [vmem:[%s12060_s1 + $0x5e8] ss:$16 sps:$4 sm:$0xff]  }
  0xc8   :  { %5211 = vmatpush1.bf16.msra.mxu0 %v8096_v40  ;;  %5663 = vmatprep.subr.bf16.mxu1 %v8107_v18  ;;  %v8180_v40 = vld [vmem:[%s12060_s1 + $0x9e0] ss:$16 sps:$4 sm:$0xff]   ;;  %v8191_v18 = vld [vmem:[%s12060_s1 + $0x60c] ss:$16 sps:$4 sm:$0xff]  }
  0xc9   :  { %5212 = vmatprep.subr.bf16.mxu0 %v8104_v43  ;;  %v8188_v43 = vld [vmem:[%s12060_s1 + $0xa04] ss:$16 sps:$4 sm:$0xff]  }
  0xcb   :  { %5664 = vmatpush1.bf16.msra.mxu1 %v8105_v45  ;;  %v10027_v45 = vrot.slane %v9803_v30, %v9318_v49  ;;  %v10040_v30 = vcombine.high %v9836_v39, %v9836_v39 }
  0xcc   :  { %5213 = vmatpush1.bf16.msra.mxu0 %v8102_v44  ;;  %5665 = vmatprep.subr.bf16.mxu1 %v8113_v22  ;;  %v8186_v44 = vld [vmem:[%s12060_s1 + $0xa00] ss:$16 sps:$4 sm:$0xff]   ;;  %v8194_v22 = vld [vmem:[%s12060_s1 + $0xa24] ss:$16 sps:$4 sm:$0xff]  }
  0xcd   :  { %5214 = vmatprep.subr.bf16.mxu0 %v8110_v46  ;;  %v8189_v46 = vld [vmem:[%s12060_s1 + $0x608] ss:$16 sps:$4 sm:$0xff]  }
  0xcf   :  { %5666 = vmatpush1.bf16.msra.mxu1 %v8111_v48  ;;  %v8192_v48 = vld [vmem:[%s12060_s1 + $0xa20] ss:$16 sps:$4 sm:$0xff]  }
  0xd0   :  { %5215 = vmatpush1.bf16.msra.mxu0 %v8108_v47  ;;  %5667 = vmatprep.subr.bf16.mxu1 %v8119_v51  ;;  %v8197_v47 = vld [vmem:[%s12060_s1 + $0x62c] ss:$16 sps:$4 sm:$0xff]   ;;  %v8200_v51 = vld [vmem:[%s12060_s1 + $0xa44] ss:$16 sps:$4 sm:$0xff]  }
  0xd1   :  { %5216 = vmatprep.subr.bf16.mxu0 %v8116_v50  ;;  %v8195_v50 = vld [vmem:[%s12060_s1 + $0x628] ss:$16 sps:$4 sm:$0xff]  }
  0xd3   :  { %5668 = vmatpush1.bf16.msra.mxu1 %v8117_v53  ;;  %v8201_v53 = vld [vmem:[%s12060_s1 + $0x648] ss:$16 sps:$4 sm:$0xff]  }
  0xd4   :  { %5217 = vmatpush1.bf16.msra.mxu0 %v8114_v52  ;;  %5669 = vmatprep.subr.bf16.mxu1 %v8125_v55  ;;  %v8198_v52 = vld [vmem:[%s12060_s1 + $0xa40] ss:$16 sps:$4 sm:$0xff]  }
  0xd5   :  { %5218 = vmatprep.subr.bf16.mxu0 %v8122_v54  ;;  %v8206_v54 = vld [vmem:[%s12060_s1 + $0xa64] ss:$16 sps:$4 sm:$0xff]   ;;  %v8204_v55 = vld [vmem:[%s12060_s1 + $0xa60] ss:$16 sps:$4 sm:$0xff]  }
  0xd7   :  { %5670 = vmatpush1.bf16.msra.mxu1 %v8123_v57  ;;  %v8212_v57 = vld [vmem:[%s12060_s1 + $0xa84] ss:$16 sps:$4 sm:$0xff]  }
  0xd8   :  { %5219 = vmatpush1.bf16.msra.mxu0 %v8120_v56  ;;  %5671 = vmatprep.subr.bf16.mxu1 %v8131_v59  ;;  %v8207_v56 = vld [vmem:[%s12060_s1 + $0x668] ss:$16 sps:$4 sm:$0xff]   ;;  %v8210_v59 = vld [vmem:[%s12060_s1 + $0xa80] ss:$16 sps:$4 sm:$0xff]  }
  0xd9   :  { %5220 = vmatprep.subr.bf16.mxu0 %v8128_v58  ;;  %v8215_v58 = vld [vmem:[%s12060_s1 + $0x68c] ss:$16 sps:$4 sm:$0xff]  }
  0xdb   :  { %5672 = vmatpush1.bf16.msra.mxu1 %v8129_v61  ;;  %v8218_v61 = vld [vmem:[%s12060_s1 + $0xaa4] ss:$16 sps:$4 sm:$0xff]  }
  0xdc   :  { %5221 = vmatpush1.bf16.msra.mxu0 %v8126_v60  ;;  %5673 = vmatprep.subr.bf16.mxu1 %v8137_v63  ;;  %v8213_v60 = vld [vmem:[%s12060_s1 + $0x688] ss:$16 sps:$4 sm:$0xff]   ;;  %v8216_v63 = vld [vmem:[%s12060_s1 + $0xaa0] ss:$16 sps:$4 sm:$0xff]  }
  0xdd   :  { %5222 = vmatprep.subr.bf16.mxu0 %v8134_v62  ;;  %v8221_v62 = vld [vmem:[%s12060_s1 + $0x6ac] ss:$16 sps:$4 sm:$0xff]  }
  0xdf   :  { %5674 = vmatpush1.bf16.msra.mxu1 %v8135_v2  ;;  %v8224_v2 = vld [vmem:[%s12060_s1 + $0xac4] ss:$16 sps:$4 sm:$0xff]  }
  0xe0   :  { %5223 = vmatpush1.bf16.msra.mxu0 %v8132_v1  ;;  %5675 = vmatprep.subr.bf16.mxu1 %v8143_v4  ;;  %v8219_v1 = vld [vmem:[%s12060_s1 + $0x6a8] ss:$16 sps:$4 sm:$0xff]  }
  0xe1   :  { %5224 = vmatprep.subr.bf16.mxu0 %v8140_v3  ;;  %v8227_v3 = vld [vmem:[%s12060_s1 + $0x6cc] ss:$16 sps:$4 sm:$0xff]  }
  0xe3   :  { %5676 = vmatpush1.bf16.msra.mxu1 %v8141_v6 }
  0xe4   :  { %5225 = vmatpush1.bf16.msra.mxu0 %v8138_v5  ;;  %5677 = vmatprep.subr.bf16.mxu1 %v8149_v8  ;;  %v8225_v8 = vld [vmem:[%s12060_s1 + $0x6c8] ss:$16 sps:$4 sm:$0xff]  }
  0xe5   :  { %5226 = vmatprep.subr.bf16.mxu0 %v8146_v7  ;;  %v8222_v7 = vld [vmem:[%s12060_s1 + $0xac0] ss:$16 sps:$4 sm:$0xff]  }
  0xe7   :  { %5678 = vmatpush1.bf16.msra.mxu1 %v8147_v11  ;;  %v8230_v11 = vld [vmem:[%s12060_s1 + $0xae4] ss:$16 sps:$4 sm:$0xff]  }
  0xe8   :  { %5227 = vmatpush1.bf16.msra.mxu0 %v8144_v9  ;;  %5679 = vmatprep.subr.bf16.mxu1 %v8155_v14  ;;  %v8228_v14 = vld [vmem:[%s12060_s1 + $0xae0] ss:$16 sps:$4 sm:$0xff]  }
  0xe9   :  { %5228 = vmatprep.subr.bf16.mxu0 %v8152_v13  ;;  %v8233_v13 = vld [vmem:[%s12060_s1 + $0x6ec] ss:$16 sps:$4 sm:$0xff]  }
  0xeb   :  { %5680 = vmatpush1.bf16.msra.mxu1 %v8153_v16  ;;  %v8236_v16 = vld [vmem:[%s12060_s1 + $0xb04] ss:$16 sps:$4 sm:$0xff]  }
  0xec   :  { %5229 = vmatpush1.bf16.msra.mxu0 %v8150_v15  ;;  %5681 = vmatprep.subr.bf16.mxu1 %v8161_v19  ;;  %v8231_v15 = vld [vmem:[%s12060_s1 + $0x6e8] ss:$16 sps:$4 sm:$0xff]   ;;  %v8234_v19 = vld [vmem:[%s12060_s1 + $0xb00] ss:$16 sps:$4 sm:$0xff]  }
  0xed   :  { %5230 = vmatprep.subr.bf16.mxu0 %v8158_v17  ;;  %v8239_v17 = vld [vmem:[%s12060_s1 + $0x70c] ss:$16 sps:$4 sm:$0xff]  }
  0xef   :  { %5682 = vmatpush1.bf16.msra.mxu1 %v8159_v21  ;;  %v8242_v21 = vld [vmem:[%s12060_s1 + $0xb24] ss:$16 sps:$4 sm:$0xff]  }
  0xf0   :  { %5231 = vmatpush1.bf16.msra.mxu0 %v8156_v20  ;;  %5683 = vmatprep.subr.bf16.mxu1 %v8167_v25  ;;  %v8237_v20 = vld [vmem:[%s12060_s1 + $0x708] ss:$16 sps:$4 sm:$0xff]   ;;  %v8240_v25 = vld [vmem:[%s12060_s1 + $0xb20] ss:$16 sps:$4 sm:$0xff]  }
  0xf1   :  { %5232 = vmatprep.subr.bf16.mxu0 %v8164_v23  ;;  %v8245_v23 = vld [vmem:[%s12060_s1 + $0x72c] ss:$16 sps:$4 sm:$0xff]  }
  0xf3   :  { %5684 = vmatpush1.bf16.msra.mxu1 %v8165_v28  ;;  %v8248_v28 = vld [vmem:[%s12060_s1 + $0xb44] ss:$16 sps:$4 sm:$0xff]  }
  0xf4   :  { %5233 = vmatpush1.bf16.msra.mxu0 %v8162_v26  ;;  %5685 = vmatprep.subr.bf16.mxu1 %v8173_v31  ;;  %v8243_v26 = vld [vmem:[%s12060_s1 + $0x728] ss:$16 sps:$4 sm:$0xff]   ;;  %v8246_v31 = vld [vmem:[%s12060_s1 + $0xb40] ss:$16 sps:$4 sm:$0xff]  }
  0xf5   :  { %5234 = vmatprep.subr.bf16.mxu0 %v8170_v29  ;;  %v8251_v29 = vld [vmem:[%s12060_s1 + $0x74c] ss:$16 sps:$4 sm:$0xff]  }
  0xf7   :  { %5686 = vmatpush1.bf16.msra.mxu1 %v8171_v33  ;;  %v8254_v33 = vld [vmem:[%s12060_s1 + $0xb64] ss:$16 sps:$4 sm:$0xff]  }
  0xf8   :  { %5235 = vmatpush1.bf16.msra.mxu0 %v8168_v32  ;;  %5687 = vmatprep.subr.bf16.mxu1 %v8179_v34  ;;  %v8249_v32 = vld [vmem:[%s12060_s1 + $0x748] ss:$16 sps:$4 sm:$0xff]   ;;  %v8252_v34 = vld [vmem:[%s12060_s1 + $0xb60] ss:$16 sps:$4 sm:$0xff]  }
  0xf9   :  { %5236 = vmatprep.subr.bf16.mxu0 %v8176_v12  ;;  %v8257_v12 = vld [vmem:[%s12060_s1 + $0x76c] ss:$16 sps:$4 sm:$0xff]  }
  0xfb   :  { %5688 = vmatpush1.bf16.msra.mxu1 %v8177_v0  ;;  %v8260_v0 = vld [vmem:[%s12060_s1 + $0xb84] ss:$16 sps:$4 sm:$0xff]  }
  0xfc   :  { %5237 = vmatpush1.bf16.msra.mxu0 %v8174_v35  ;;  %5689 = vmatprep.subr.bf16.mxu1 %v8185_v38  ;;  %v8255_v35 = vld [vmem:[%s12060_s1 + $0x768] ss:$16 sps:$4 sm:$0xff]   ;;  %v8258_v38 = vld [vmem:[%s12060_s1 + $0xb80] ss:$16 sps:$4 sm:$0xff]  }
  0xfd   :  { %5238 = vmatprep.subr.bf16.mxu0 %v8182_v37  ;;  %v8263_v37 = vld [vmem:[%s12060_s1 + $0x78c] ss:$16 sps:$4 sm:$0xff]  }
  0xff   :  { %5690 = vmatpush1.bf16.msra.mxu1 %v8183_v41  ;;  %v8266_v41 = vld [vmem:[%s12060_s1 + $0xba4] ss:$16 sps:$4 sm:$0xff]  }
 0x100   :  { %5239 = vmatpush1.bf16.msra.mxu0 %v8180_v40  ;;  %5700 = vmatprep.subr.bf16.mxu1 %v8191_v18  ;;  %v8261_v40 = vld [vmem:[%s12060_s1 + $0x788] ss:$16 sps:$4 sm:$0xff]   ;;  %v8264_v18 = vld [vmem:[%s12060_s1 + $0xba0] ss:$16 sps:$4 sm:$0xff]  }
 0x101   :  { %5249 = vmatprep.subr.bf16.mxu0 %v8188_v43  ;;  %v8269_v43 = vld [vmem:[%s12060_s1 + $0x7ac] ss:$16 sps:$4 sm:$0xff]  }
 0x102   :  { %5692 = vmatmul.mubr.bf16.vlgmr.msra.gmra.mrb[4].mxu1 %v9609_v27  ;;  %v8203_v27 = vld [vmem:[%s12060_s1 + $0x64c] ss:$16 sps:$4 sm:$0xff]  }
 0x103   :  { %5241 = vmatmul.mubr.bf16.vlgmr.msra.gmra.mrb[0].mxu0 %v10027_v45  ;;  %5701 = vmatpush1.bf16.msra.mxu1 %v8189_v46  ;;  %v8272_v46 = vld [vmem:[%s12060_s1 + $0xbc4] ss:$16 sps:$4 sm:$0xff]  }
 0x104   :  { %5250 = vmatpush1.bf16.msra.mxu0 %v8186_v44  ;;  %5702 = vmatprep.subr.bf16.mxu1 %v8197_v47  ;;  %v8267_v44 = vld [vmem:[%s12060_s1 + $0x7a8] ss:$16 sps:$4 sm:$0xff]   ;;  %v907_v47 = vcombine.high %v9787_v24, %v9787_v24  ;;  %v8281_v24 = vld [vmem:[%s12060_s1 + $0x7ec] ss:$16 sps:$4 sm:$0xff]  }
 0x105   :  { %5251 = vmatprep.subr.bf16.mxu0 %v8194_v22  ;;  %5281 = vmatprep.mubr.bf16.mxu0 %v10040_v30  ;;  %v8275_v22 = vld [vmem:[%s12060_s1 + $0x7cc] ss:$16 sps:$4 sm:$0xff]  }
 0x106   :  { %5732 = vmatprep.mubr.bf16.mxu1 %v9622_v10  ;;  %v8209_v10 = vld [vmem:[%s12060_s1 + $0x66c] ss:$16 sps:$4 sm:$0xff]  }
 0x107   :  { %5703 = vmatpush1.bf16.msra.mxu1 %v8195_v50  ;;  %v8273_v50 = vld [vmem:[%s12060_s1 + $0x7c8] ss:$16 sps:$4 sm:$0xff]  }
 0x108   :  { %5252 = vmatpush1.bf16.msra.mxu0 %v8192_v48  ;;  %5704 = vmatprep.subr.bf16.mxu1 %v8203_v27  ;;  %v8270_v48 = vld [vmem:[%s12060_s1 + $0xbc0] ss:$16 sps:$4 sm:$0xff]   ;;  %v10221_v27 = vrot.slane %v907_v47, %v9318_v49  ;;  %v8351_v47 = vld [vmem:[%s12060_s1 + $0x968] ss:$16 sps:$4 sm:$0xff]  }
 0x109   :  { %5253 = vmatprep.subr.bf16.mxu0 %v8200_v51  ;;  %v8278_v51 = vld [vmem:[%s12060_s1 + $0xbe4] ss:$16 sps:$4 sm:$0xff]  }
 0x10b   :  { %5705 = vmatpush1.bf16.msra.mxu1 %v8201_v53  ;;  %v8279_v53 = vld [vmem:[%s12060_s1 + $0x7e8] ss:$16 sps:$4 sm:$0xff]  }
 0x10c   :  { %5254 = vmatpush1.bf16.msra.mxu0 %v8198_v52  ;;  %5706 = vmatprep.subr.bf16.mxu1 %v8209_v10  ;;  %v8276_v52 = vld [vmem:[%s12060_s1 + $0xbe0] ss:$16 sps:$4 sm:$0xff]   ;;  %v8287_v10 = vld [vmem:[%s12060_s1 + $0x80c] ss:$16 sps:$4 sm:$0xff]  }
 0x10d   :  { %5255 = vmatprep.subr.bf16.mxu0 %v8206_v54  ;;  %v8284_v54 = vld [vmem:[%s12060_s1 + $0xc04] ss:$16 sps:$4 sm:$0xff]  }
 0x10f   :  { %5707 = vmatpush1.bf16.msra.mxu1 %v8207_v56  ;;  %v10239_v56 = vcombine.high %v10027_v45, %v10027_v45 }
 0x110   :  { %5256 = vmatpush1.bf16.msra.mxu0 %v8204_v55  ;;  %5708 = vmatprep.subr.bf16.mxu1 %v8215_v58  ;;  %v923_v55 = vcombine.high %v10221_v27, %v10221_v27  ;;  %v8285_v58 = vld [vmem:[%s12060_s1 + $0x808] ss:$16 sps:$4 sm:$0xff]  }
 0x111   :  { %5257 = vmatprep.subr.bf16.mxu0 %v8212_v57  ;;  %v8282_v57 = vld [vmem:[%s12060_s1 + $0xc00] ss:$16 sps:$4 sm:$0xff]  }
 0x113   :  { %5709 = vmatpush1.bf16.msra.mxu1 %v8213_v60  ;;  %v8293_v60 = vld [vmem:[%s12060_s1 + $0x82c] ss:$16 sps:$4 sm:$0xff]  }
 0x114   :  { %5258 = vmatpush1.bf16.msra.mxu0 %v8210_v59  ;;  %5710 = vmatprep.subr.bf16.mxu1 %v8221_v62  ;;  %v8290_v59 = vld [vmem:[%s12060_s1 + $0xc24] ss:$16 sps:$4 sm:$0xff]   ;;  %v8288_v62 = vld [vmem:[%s12060_s1 + $0xc20] ss:$16 sps:$4 sm:$0xff]  }
 0x115   :  { %5259 = vmatprep.subr.bf16.mxu0 %v8218_v61  ;;  %v10106_v4 = vpop.f32.mrb[0].mxu1  ;;  %v10254_v61 = vrot.slane %v923_v55, %v9318_v49  ;;  %v8368_v55 = vld [vmem:[%s12060_s1 + $0xdc4] ss:$16 sps:$4 sm:$0xff]  }
 0x116   :  { %v10108_v5 = vpop.f32.mrb[1].mxu1 }
 0x117   :  { %v5082_v6 = vpop.f32.mrb[2].mxu1  ;;  %5711 = vmatpush1.bf16.msra.mxu1 %v8219_v1  ;;  %v8296_v1 = vld [vmem:[%s12060_s1 + $0xc44] ss:$16 sps:$4 sm:$0xff]  }
 0x118   :  { %5260 = vmatpush1.bf16.msra.mxu0 %v8216_v63  ;;  %v5083_v9 = vpop.f32.mrb[3].mxu1  ;;  %5712 = vmatprep.subr.bf16.mxu1 %v8227_v3  ;;  %v8291_v63 = vld [vmem:[%s12060_s1 + $0x828] ss:$16 sps:$4 sm:$0xff]   ;;  %v8302_v6 = vld [vmem:[%s12060_s1 + $0xc64] ss:$16 sps:$4 sm:$0xff]  }
 0x119   :  { %5261 = vmatprep.subr.bf16.mxu0 %v8224_v2  ;;  %v8294_v2 = vld [vmem:[%s12060_s1 + $0xc40] ss:$16 sps:$4 sm:$0xff]   ;;  %v8297_v3 = vld [vmem:[%s12060_s1 + $0x848] ss:$16 sps:$4 sm:$0xff]   ;;  %v8308_v9 = vld [vmem:[%s12060_s1 + $0xc84] ss:$16 sps:$4 sm:$0xff]  }
 0x11b   :  { %5713 = vmatpush1.bf16.msra.mxu1 %v8225_v8  ;;  %v8303_v8 = vld [vmem:[%s12060_s1 + $0x868] ss:$16 sps:$4 sm:$0xff]  }
 0x11c   :  { %5262 = vmatpush1.bf16.msra.mxu0 %v8222_v7  ;;  %5714 = vmatprep.subr.bf16.mxu1 %v8233_v13  ;;  %v8300_v7 = vld [vmem:[%s12060_s1 + $0xc60] ss:$16 sps:$4 sm:$0xff]  }
 0x11d   :  { %5263 = vmatprep.subr.bf16.mxu0 %v8230_v11  ;;  %v8311_v11 = vld [vmem:[%s12060_s1 + $0x88c] ss:$16 sps:$4 sm:$0xff]   ;;  %v8306_v13 = vld [vmem:[%s12060_s1 + $0xc80] ss:$16 sps:$4 sm:$0xff]  }
 0x11f   :  { %5715 = vmatpush1.bf16.msra.mxu1 %v8231_v15  ;;  %v8314_v15 = vld [vmem:[%s12060_s1 + $0xca4] ss:$16 sps:$4 sm:$0xff]  }
 0x120   :  { %5264 = vmatpush1.bf16.msra.mxu0 %v8228_v14  ;;  %5716 = vmatprep.subr.bf16.mxu1 %v8239_v17  ;;  %v8309_v14 = vld [vmem:[%s12060_s1 + $0x888] ss:$16 sps:$4 sm:$0xff]   ;;  %v8312_v17 = vld [vmem:[%s12060_s1 + $0xca0] ss:$16 sps:$4 sm:$0xff]  }
 0x121   :  { %5265 = vmatprep.subr.bf16.mxu0 %v8236_v16  ;;  %v8317_v16 = vld [vmem:[%s12060_s1 + $0x8ac] ss:$16 sps:$4 sm:$0xff]  }
 0x123   :  { %5717 = vmatpush1.bf16.msra.mxu1 %v8237_v20  ;;  %v8320_v20 = vld [vmem:[%s12060_s1 + $0xcc4] ss:$16 sps:$4 sm:$0xff]  }
 0x124   :  { %5266 = vmatpush1.bf16.msra.mxu0 %v8234_v19  ;;  %5718 = vmatprep.subr.bf16.mxu1 %v8245_v23  ;;  %v8315_v19 = vld [vmem:[%s12060_s1 + $0x8a8] ss:$16 sps:$4 sm:$0xff]   ;;  %v8318_v23 = vld [vmem:[%s12060_s1 + $0xcc0] ss:$16 sps:$4 sm:$0xff]  }
 0x125   :  { %5267 = vmatprep.subr.bf16.mxu0 %v8242_v21  ;;  %v8323_v21 = vld [vmem:[%s12060_s1 + $0x8cc] ss:$16 sps:$4 sm:$0xff]  }
 0x127   :  { %5719 = vmatpush1.bf16.msra.mxu1 %v8243_v26  ;;  %v8326_v26 = vld [vmem:[%s12060_s1 + $0xce4] ss:$16 sps:$4 sm:$0xff]  }
 0x128   :  { %5268 = vmatpush1.bf16.msra.mxu0 %v8240_v25  ;;  %5720 = vmatprep.subr.bf16.mxu1 %v8251_v29  ;;  %v8321_v25 = vld [vmem:[%s12060_s1 + $0x8c8] ss:$16 sps:$4 sm:$0xff]   ;;  %v8324_v29 = vld [vmem:[%s12060_s1 + $0xce0] ss:$16 sps:$4 sm:$0xff]  }
 0x129   :  { %5269 = vmatprep.subr.bf16.mxu0 %v8248_v28  ;;  %v8329_v28 = vld [vmem:[%s12060_s1 + $0x8ec] ss:$16 sps:$4 sm:$0xff]  }
 0x12b   :  { %5721 = vmatpush1.bf16.msra.mxu1 %v8249_v32  ;;  %v8332_v32 = vld [vmem:[%s12060_s1 + $0xd04] ss:$16 sps:$4 sm:$0xff]  }
 0x12c   :  { %5270 = vmatpush1.bf16.msra.mxu0 %v8246_v31  ;;  %5722 = vmatprep.subr.bf16.mxu1 %v8257_v12  ;;  %v8327_v31 = vld [vmem:[%s12060_s1 + $0x8e8] ss:$16 sps:$4 sm:$0xff]   ;;  %v8330_v12 = vld [vmem:[%s12060_s1 + $0xd00] ss:$16 sps:$4 sm:$0xff]  }
 0x12d   :  { %5271 = vmatprep.subr.bf16.mxu0 %v8254_v33  ;;  %v8335_v33 = vld [vmem:[%s12060_s1 + $0x90c] ss:$16 sps:$4 sm:$0xff]  }
 0x12f   :  { %5723 = vmatpush1.bf16.msra.mxu1 %v8255_v35  ;;  %v8338_v35 = vld [vmem:[%s12060_s1 + $0xd24] ss:$16 sps:$4 sm:$0xff]  }
 0x130   :  { %5272 = vmatpush1.bf16.msra.mxu0 %v8252_v34  ;;  %5724 = vmatprep.subr.bf16.mxu1 %v8263_v37  ;;  %v8333_v34 = vld [vmem:[%s12060_s1 + $0x908] ss:$16 sps:$4 sm:$0xff]   ;;  %v8336_v37 = vld [vmem:[%s12060_s1 + $0xd20] ss:$16 sps:$4 sm:$0xff]  }
 0x131   :  { %5273 = vmatprep.subr.bf16.mxu0 %v8260_v0  ;;  %v8341_v0 = vld [vmem:[%s12060_s1 + $0x92c] ss:$16 sps:$4 sm:$0xff]  }
 0x133   :  { %5725 = vmatpush1.bf16.msra.mxu1 %v8261_v40  ;;  %v8344_v40 = vld [vmem:[%s12060_s1 + $0xd44] ss:$16 sps:$4 sm:$0xff]  }
 0x134   :  { %5274 = vmatpush1.bf16.msra.mxu0 %v8258_v38  ;;  %5726 = vmatprep.subr.bf16.mxu1 %v8269_v43  ;;  %v8339_v38 = vld [vmem:[%s12060_s1 + $0x928] ss:$16 sps:$4 sm:$0xff]   ;;  %v8342_v43 = vld [vmem:[%s12060_s1 + $0xd40] ss:$16 sps:$4 sm:$0xff]  }
 0x135   :  { %5275 = vmatprep.subr.bf16.mxu0 %v8266_v41  ;;  %v8347_v41 = vld [vmem:[%s12060_s1 + $0x94c] ss:$16 sps:$4 sm:$0xff]  }
 0x137   :  { %5727 = vmatpush1.bf16.msra.mxu1 %v8267_v44  ;;  %v8350_v44 = vld [vmem:[%s12060_s1 + $0xd64] ss:$16 sps:$4 sm:$0xff]  }
 0x138   :  { %5276 = vmatpush1.bf16.msra.mxu0 %v8264_v18  ;;  %5728 = vmatprep.subr.bf16.mxu1 %v8275_v22  ;;  %v8345_v18 = vld [vmem:[%s12060_s1 + $0x948] ss:$16 sps:$4 sm:$0xff]   ;;  %v8348_v22 = vld [vmem:[%s12060_s1 + $0xd60] ss:$16 sps:$4 sm:$0xff]  }
 0x139   :  { %5277 = vmatprep.subr.bf16.mxu0 %v8272_v46  ;;  %v8353_v46 = vld [vmem:[%s12060_s1 + $0x96c] ss:$16 sps:$4 sm:$0xff]  }
 0x13b   :  { %5729 = vmatpush1.bf16.msra.mxu1 %v8273_v50  ;;  %v8359_v50 = vld [vmem:[%s12060_s1 + $0x98c] ss:$16 sps:$4 sm:$0xff]  }
 0x13c   :  { %5278 = vmatpush1.bf16.msra.mxu0 %v8270_v48  ;;  %5730 = vmatprep.subr.bf16.mxu1 %v8281_v24  ;;  %v8356_v48 = vld [vmem:[%s12060_s1 + $0xd84] ss:$16 sps:$4 sm:$0xff]   ;;  %v8357_v24 = vld [vmem:[%s12060_s1 + $0x988] ss:$16 sps:$4 sm:$0xff]  }
 0x13d   :  { %5279 = vmatprep.subr.bf16.mxu0 %v8278_v51  ;;  %v8354_v51 = vld [vmem:[%s12060_s1 + $0xd80] ss:$16 sps:$4 sm:$0xff]  }
 0x13f   :  { %5731 = vmatpush1.bf16.msra.mxu1 %v8279_v53  ;;  %v8365_v53 = vld [vmem:[%s12060_s1 + $0x9ac] ss:$16 sps:$4 sm:$0xff]  }
 0x140   :  { %5280 = vmatpush1.bf16.msra.mxu0 %v8276_v52  ;;  %5741 = vmatprep.subr.bf16.mxu1 %v8287_v10  ;;  %v8362_v52 = vld [vmem:[%s12060_s1 + $0xda4] ss:$16 sps:$4 sm:$0xff]   ;;  %v8363_v10 = vld [vmem:[%s12060_s1 + $0x9a8] ss:$16 sps:$4 sm:$0xff]  }
 0x141   :  { %5290 = vmatprep.subr.bf16.mxu0 %v8284_v54  ;;  %v8360_v54 = vld [vmem:[%s12060_s1 + $0xda0] ss:$16 sps:$4 sm:$0xff]  }
 0x142   :  { %5733 = vmatmul.mubr.bf16.vlgmr.msra.gmra.mrb[4].mxu1 %v9824_v36  ;;  %v8299_v36 = vld [vmem:[%s12060_s1 + $0x84c] ss:$16 sps:$4 sm:$0xff]  }
 0x143   :  { %5282 = vmatmul.mubr.bf16.vlgmr.msra.gmra.mrb[0].mxu0 %v10239_v56  ;;  %5742 = vmatpush1.bf16.msra.mxu1 %v8285_v58  ;;  %v8366_v58 = vld [vmem:[%s12060_s1 + $0xdc0] ss:$16 sps:$4 sm:$0xff]  }
 0x144   :  { %5291 = vmatpush1.bf16.msra.mxu0 %v8282_v57  ;;  %5743 = vmatprep.subr.bf16.mxu1 %v8293_v60  ;;  %v8371_v57 = vld [vmem:[%s12060_s1 + $0x9cc] ss:$16 sps:$4 sm:$0xff]   ;;  %v8374_v60 = vld [vmem:[%s12060_s1 + $0xde4] ss:$16 sps:$4 sm:$0xff]  }
 0x145   :  { %5292 = vmatprep.subr.bf16.mxu0 %v8290_v59  ;;  %5322 = vmatprep.mubr.bf16.mxu0 %v10254_v61  ;;  %v8369_v59 = vld [vmem:[%s12060_s1 + $0x9c8] ss:$16 sps:$4 sm:$0xff]  }
 0x146   :  { %5773 = vmatprep.mubr.bf16.mxu1 %v9836_v39  ;;  %v8305_v39 = vld [vmem:[%s12060_s1 + $0x86c] ss:$16 sps:$4 sm:$0xff]  }
 0x147   :  { %5744 = vmatpush1.bf16.msra.mxu1 %v8291_v63  ;;  %v8372_v63 = vld [vmem:[%s12060_s1 + $0xde0] ss:$16 sps:$4 sm:$0xff]  }
 0x148   :  { %5293 = vmatpush1.bf16.msra.mxu0 %v8288_v62  ;;  %5745 = vmatprep.subr.bf16.mxu1 %v8299_v36  ;;  %v8377_v62 = vld [vmem:[%s12060_s1 + $0x9ec] ss:$16 sps:$4 sm:$0xff]   ;;  %v8381_v36 = vld [vmem:[%s12060_s1 + $0xe04] ss:$16 sps:$4 sm:$0xff]  }
 0x149   :  { %5294 = vmatprep.subr.bf16.mxu0 %v8296_v1  ;;  %v8375_v1 = vld [vmem:[%s12060_s1 + $0x9e8] ss:$16 sps:$4 sm:$0xff]  }
 0x14b   :  { %5746 = vmatpush1.bf16.msra.mxu1 %v8297_v3  ;;  %v10442_v3 = vrot.slane %v10221_v27, %v9318_v49  ;;  %v8390_v27 = vld [vmem:[%s12060_s1 + $0xa2c] ss:$16 sps:$4 sm:$0xff]  }
 0x14c   :  { %5295 = vmatpush1.bf16.msra.mxu0 %v8294_v2  ;;  %5747 = vmatprep.subr.bf16.mxu1 %v8305_v39  ;;  %v8384_v2 = vld [vmem:[%s12060_s1 + $0xa0c] ss:$16 sps:$4 sm:$0xff]   ;;  %v8382_v39 = vld [vmem:[%s12060_s1 + $0xa08] ss:$16 sps:$4 sm:$0xff]  }
 0x14d   :  { %5296 = vmatprep.subr.bf16.mxu0 %v8302_v6  ;;  %v8379_v6 = vld [vmem:[%s12060_s1 + $0xe00] ss:$16 sps:$4 sm:$0xff]  }
 0x14f   :  { %5748 = vmatpush1.bf16.msra.mxu1 %v8303_v8  ;;  %v10458_v8 = vcombine.high %v10254_v61, %v10254_v61 }
 0x150   :  { %5297 = vmatpush1.bf16.msra.mxu0 %v8300_v7  ;;  %5749 = vmatprep.subr.bf16.mxu1 %v8311_v11  ;;  %v8387_v7 = vld [vmem:[%s12060_s1 + $0xe24] ss:$16 sps:$4 sm:$0xff]   ;;  %v8388_v11 = vld [vmem:[%s12060_s1 + $0xa28] ss:$16 sps:$4 sm:$0xff]  }
 0x151   :  { %5298 = vmatprep.subr.bf16.mxu0 %v8308_v9  ;;  %v8385_v9 = vld [vmem:[%s12060_s1 + $0xe20] ss:$16 sps:$4 sm:$0xff]  }
 0x153   :  { %5750 = vmatpush1.bf16.msra.mxu1 %v8309_v14  ;;  %v8391_v14 = vld [vmem:[%s12060_s1 + $0xe40] ss:$16 sps:$4 sm:$0xff]  }
 0x154   :  { %5299 = vmatpush1.bf16.msra.mxu0 %v8306_v13  ;;  %5751 = vmatprep.subr.bf16.mxu1 %v8317_v16  ;;  %v8393_v13 = vld [vmem:[%s12060_s1 + $0xe44] ss:$16 sps:$4 sm:$0xff]  }
 0x155   :  { %5300 = vmatprep.subr.bf16.mxu0 %v8314_v15  ;;  %v8394_v15 = vld [vmem:[%s12060_s1 + $0xa48] ss:$16 sps:$4 sm:$0xff]   ;;  %v8399_v16 = vld [vmem:[%s12060_s1 + $0xe64] ss:$16 sps:$4 sm:$0xff]  }
 0x157   :  { %5752 = vmatpush1.bf16.msra.mxu1 %v8315_v19  ;;  %v8400_v19 = vld [vmem:[%s12060_s1 + $0xa68] ss:$16 sps:$4 sm:$0xff]  }
 0x158   :  { %5301 = vmatpush1.bf16.msra.mxu0 %v8312_v17  ;;  %5753 = vmatprep.subr.bf16.mxu1 %v8323_v21  ;;  %v8397_v17 = vld [vmem:[%s12060_s1 + $0xe60] ss:$16 sps:$4 sm:$0xff]   ;;  %v8408_v21 = vld [vmem:[%s12060_s1 + $0xa8c] ss:$16 sps:$4 sm:$0xff]  }
 0x159   :  { %5302 = vmatprep.subr.bf16.mxu0 %v8320_v20  ;;  %v8405_v20 = vld [vmem:[%s12060_s1 + $0xe84] ss:$16 sps:$4 sm:$0xff]  }
 0x15b   :  { %5754 = vmatpush1.bf16.msra.mxu1 %v8321_v25  ;;  %v8406_v25 = vld [vmem:[%s12060_s1 + $0xa88] ss:$16 sps:$4 sm:$0xff]  }
 0x15c   :  { %5303 = vmatpush1.bf16.msra.mxu0 %v8318_v23  ;;  %5755 = vmatprep.subr.bf16.mxu1 %v8329_v28  ;;  %v8403_v23 = vld [vmem:[%s12060_s1 + $0xe80] ss:$16 sps:$4 sm:$0xff]   ;;  %v8414_v28 = vld [vmem:[%s12060_s1 + $0xaac] ss:$16 sps:$4 sm:$0xff]  }
 0x15d   :  { %5304 = vmatprep.subr.bf16.mxu0 %v8326_v26  ;;  %v8411_v26 = vld [vmem:[%s12060_s1 + $0xea4] ss:$16 sps:$4 sm:$0xff]  }
 0x15f   :  { %5756 = vmatpush1.bf16.msra.mxu1 %v8327_v31  ;;  %v8412_v31 = vld [vmem:[%s12060_s1 + $0xaa8] ss:$16 sps:$4 sm:$0xff]  }
 0x160   :  { %5305 = vmatpush1.bf16.msra.mxu0 %v8324_v29  ;;  %5757 = vmatprep.subr.bf16.mxu1 %v8335_v33  ;;  %v8409_v29 = vld [vmem:[%s12060_s1 + $0xea0] ss:$16 sps:$4 sm:$0xff]   ;;  %v8420_v33 = vld [vmem:[%s12060_s1 + $0xacc] ss:$16 sps:$4 sm:$0xff]  }
 0x161   :  { %5306 = vmatprep.subr.bf16.mxu0 %v8332_v32  ;;  %v8417_v32 = vld [vmem:[%s12060_s1 + $0xec4] ss:$16 sps:$4 sm:$0xff]  }
 0x163   :  { %5758 = vmatpush1.bf16.msra.mxu1 %v8333_v34  ;;  %v8418_v34 = vld [vmem:[%s12060_s1 + $0xac8] ss:$16 sps:$4 sm:$0xff]  }
 0x164   :  { %5307 = vmatpush1.bf16.msra.mxu0 %v8330_v12  ;;  %5759 = vmatprep.subr.bf16.mxu1 %v8341_v0  ;;  %v8415_v12 = vld [vmem:[%s12060_s1 + $0xec0] ss:$16 sps:$4 sm:$0xff]   ;;  %v8426_v0 = vld [vmem:[%s12060_s1 + $0xaec] ss:$16 sps:$4 sm:$0xff]  }
 0x165   :  { %5308 = vmatprep.subr.bf16.mxu0 %v8338_v35  ;;  %v8423_v35 = vld [vmem:[%s12060_s1 + $0xee4] ss:$16 sps:$4 sm:$0xff]  }
 0x167   :  { %5760 = vmatpush1.bf16.msra.mxu1 %v8339_v38  ;;  %v8424_v38 = vld [vmem:[%s12060_s1 + $0xae8] ss:$16 sps:$4 sm:$0xff]  }
 0x168   :  { %5309 = vmatpush1.bf16.msra.mxu0 %v8336_v37  ;;  %5761 = vmatprep.subr.bf16.mxu1 %v8347_v41  ;;  %v8421_v37 = vld [vmem:[%s12060_s1 + $0xee0] ss:$16 sps:$4 sm:$0xff]   ;;  %v8432_v41 = vld [vmem:[%s12060_s1 + $0xb0c] ss:$16 sps:$4 sm:$0xff]  }
 0x169   :  { %5310 = vmatprep.subr.bf16.mxu0 %v8344_v40  ;;  %v8429_v40 = vld [vmem:[%s12060_s1 + $0xf04] ss:$16 sps:$4 sm:$0xff]  }
 0x16b   :  { %5762 = vmatpush1.bf16.msra.mxu1 %v8345_v18  ;;  %v8430_v18 = vld [vmem:[%s12060_s1 + $0xb08] ss:$16 sps:$4 sm:$0xff]  }
 0x16c   :  { %5311 = vmatpush1.bf16.msra.mxu0 %v8342_v43  ;;  %5763 = vmatprep.subr.bf16.mxu1 %v8353_v46  ;;  %v8427_v43 = vld [vmem:[%s12060_s1 + $0xf00] ss:$16 sps:$4 sm:$0xff]   ;;  %v8438_v46 = vld [vmem:[%s12060_s1 + $0xb2c] ss:$16 sps:$4 sm:$0xff]  }
 0x16d   :  { %5312 = vmatprep.subr.bf16.mxu0 %v8350_v44  ;;  %v8435_v44 = vld [vmem:[%s12060_s1 + $0xf24] ss:$16 sps:$4 sm:$0xff]  }
 0x16f   :  { %5764 = vmatpush1.bf16.msra.mxu1 %v8351_v47  ;;  %v8436_v47 = vld [vmem:[%s12060_s1 + $0xb28] ss:$16 sps:$4 sm:$0xff]  }
 0x170   :  { %5313 = vmatpush1.bf16.msra.mxu0 %v8348_v22  ;;  %5765 = vmatprep.subr.bf16.mxu1 %v8359_v50  ;;  %v8433_v22 = vld [vmem:[%s12060_s1 + $0xf20] ss:$16 sps:$4 sm:$0xff]   ;;  %v8444_v50 = vld [vmem:[%s12060_s1 + $0xb4c] ss:$16 sps:$4 sm:$0xff]  }
 0x171   :  { %5314 = vmatprep.subr.bf16.mxu0 %v8356_v48  ;;  %v8441_v48 = vld [vmem:[%s12060_s1 + $0xf44] ss:$16 sps:$4 sm:$0xff]  }
 0x173   :  { %5766 = vmatpush1.bf16.msra.mxu1 %v8357_v24  ;;  %v8442_v24 = vld [vmem:[%s12060_s1 + $0xb48] ss:$16 sps:$4 sm:$0xff]  }
 0x174   :  { %5315 = vmatpush1.bf16.msra.mxu0 %v8354_v51  ;;  %5767 = vmatprep.subr.bf16.mxu1 %v8365_v53  ;;  %v8439_v51 = vld [vmem:[%s12060_s1 + $0xf40] ss:$16 sps:$4 sm:$0xff]   ;;  %v8450_v53 = vld [vmem:[%s12060_s1 + $0xb6c] ss:$16 sps:$4 sm:$0xff]  }
 0x175   :  { %5316 = vmatprep.subr.bf16.mxu0 %v8362_v52  ;;  %v8447_v52 = vld [vmem:[%s12060_s1 + $0xf64] ss:$16 sps:$4 sm:$0xff]  }
 0x177   :  { %5768 = vmatpush1.bf16.msra.mxu1 %v8363_v10  ;;  %v8448_v10 = vld [vmem:[%s12060_s1 + $0xb68] ss:$16 sps:$4 sm:$0xff]  }
 0x178   :  { %5317 = vmatpush1.bf16.msra.mxu0 %v8360_v54  ;;  %5769 = vmatprep.subr.bf16.mxu1 %v8371_v57  ;;  %v8445_v54 = vld [vmem:[%s12060_s1 + $0xf60] ss:$16 sps:$4 sm:$0xff]   ;;  %v8456_v57 = vld [vmem:[%s12060_s1 + $0xb8c] ss:$16 sps:$4 sm:$0xff]  }
 0x179   :  { %5318 = vmatprep.subr.bf16.mxu0 %v8368_v55  ;;  %v8453_v55 = vld [vmem:[%s12060_s1 + $0xf84] ss:$16 sps:$4 sm:$0xff]  }
 0x17b   :  { %5770 = vmatpush1.bf16.msra.mxu1 %v8369_v59  ;;  %v8454_v59 = vld [vmem:[%s12060_s1 + $0xb88] ss:$16 sps:$4 sm:$0xff]  }
 0x17c   :  { %5319 = vmatpush1.bf16.msra.mxu0 %v8366_v58  ;;  %5771 = vmatprep.subr.bf16.mxu1 %v8377_v62  ;;  %v8451_v58 = vld [vmem:[%s12060_s1 + $0xf80] ss:$16 sps:$4 sm:$0xff]   ;;  %v8462_v62 = vld [vmem:[%s12060_s1 + $0xbac] ss:$16 sps:$4 sm:$0xff]  }
 0x17d   :  { %5320 = vmatprep.subr.bf16.mxu0 %v8374_v60  ;;  %v8459_v60 = vld [vmem:[%s12060_s1 + $0xfa4] ss:$16 sps:$4 sm:$0xff]  }
 0x17f   :  { %5772 = vmatpush1.bf16.msra.mxu1 %v8375_v1  ;;  %v8460_v1 = vld [vmem:[%s12060_s1 + $0xba8] ss:$16 sps:$4 sm:$0xff]  }
 0x180   :  { %5321 = vmatpush1.bf16.msra.mxu0 %v8372_v63  ;;  %5782 = vmatprep.subr.bf16.mxu1 %v8384_v2  ;;  %v8457_v63 = vld [vmem:[%s12060_s1 + $0xfa0] ss:$16 sps:$4 sm:$0xff]   ;;  %v8468_v2 = vld [vmem:[%s12060_s1 + $0xbcc] ss:$16 sps:$4 sm:$0xff]  }
 0x181   :  { %5331 = vmatprep.subr.bf16.mxu0 %v8381_v36  ;;  %v8465_v36 = vld [vmem:[%s12060_s1 + $0xfc4] ss:$16 sps:$4 sm:$0xff]  }
 0x182   :  { %5774 = vmatmul.mubr.bf16.vlgmr.msra.gmra.mrb[4].mxu1 %v10027_v45  ;;  %v8396_v45 = vld [vmem:[%s12060_s1 + $0xa4c] ss:$16 sps:$4 sm:$0xff]  }
 0x183   :  { %5323 = vmatmul.mubr.bf16.vlgmr.msra.gmra.mrb[0].mxu0 %v10442_v3  ;;  %5783 = vmatpush1.bf16.msra.mxu1 %v8382_v39  ;;  %v8463_v39 = vld [vmem:[%s12060_s1 + $0xfc0] ss:$16 sps:$4 sm:$0xff]  }
 0x184   :  { %5332 = vmatpush1.bf16.msra.mxu0 %v8379_v6  ;;  %5784 = vmatprep.subr.bf16.mxu1 %v8390_v27  ;;  %v10623_v6 = vld [vmem:[%s12059_s0 + $0x10] sm:$0xff] }
 0x185   :  { %5333 = vmatprep.subr.bf16.mxu0 %v8387_v7  ;;  %5363 = vmatprep.mubr.bf16.mxu0 %v10458_v8  ;;  %v8466_v7 = vld [vmem:[%s12060_s1 + $0xbc8] ss:$16 sps:$4 sm:$0xff]   ;;  %v8471_v27 = vld [vmem:[%s12060_s1 + $0xfe4] ss:$16 sps:$4 sm:$0xff]  }
 0x186   :  { %5814 = vmatprep.mubr.bf16.mxu1 %v10040_v30  ;;  %v8402_v30 = vld [vmem:[%s12060_s1 + $0xa6c] ss:$16 sps:$4 sm:$0xff]  }
 0x187   :  { %5785 = vmatpush1.bf16.msra.mxu1 %v8388_v11  ;;  %v10639_v11 = vrot.slane %v10623_v6, %v9318_v49 }
 0x188   :  { %5334 = vmatpush1.bf16.msra.mxu0 %v8385_v9  ;;  %5786 = vmatprep.subr.bf16.mxu1 %v8396_v45  ;;  %v8474_v9 = vld [vmem:[%s12060_s1 + $0xbec] ss:$16 sps:$4 sm:$0xff]   ;;  %v8472_v45 = vld [vmem:[%s12060_s1 + $0xbe8] ss:$16 sps:$4 sm:$0xff]  }
 0x189   :  { %5335 = vmatprep.subr.bf16.mxu0 %v8393_v13  ;;  %v8469_v13 = vld [vmem:[%s12060_s1 + $0xfe0] ss:$16 sps:$4 sm:$0xff]  }
 0x18b   :  { %5787 = vmatpush1.bf16.msra.mxu1 %v8394_v15  ;;  %v8480_v15 = vld [vmem:[%s12060_s1 + $0xc0c] ss:$16 sps:$4 sm:$0xff]  }
 0x18c   :  { %5336 = vmatpush1.bf16.msra.mxu0 %v8391_v14  ;;  %5788 = vmatprep.subr.bf16.mxu1 %v8402_v30  ;;  %v8477_v14 = vld [vmem:[%s12060_s1 + $0x1004] ss:$16 sps:$4 sm:$0xff]   ;;  %v10657_v30 = vcombine.high %v10442_v3, %v10442_v3 }
 0x18d   :  { %5337 = vmatprep.subr.bf16.mxu0 %v8399_v16  ;;  %v971_v16 = vcombine.high %v10639_v11, %v10639_v11 }
 0x18f   :  { %5789 = vmatpush1.bf16.msra.mxu1 %v8400_v19  ;;  %v8478_v19 = vld [vmem:[%s12060_s1 + $0xc08] ss:$16 sps:$4 sm:$0xff]  }
 0x190   :  { %5338 = vmatpush1.bf16.msra.mxu0 %v8397_v17  ;;  %5790 = vmatprep.subr.bf16.mxu1 %v8408_v21  ;;  %v8475_v17 = vld [vmem:[%s12060_s1 + $0x1000] ss:$16 sps:$4 sm:$0xff]   ;;  %v8486_v21 = vld [vmem:[%s12060_s1 + $0xc2c] ss:$16 sps:$4 sm:$0xff]  }
 0x191   :  { %5339 = vmatprep.subr.bf16.mxu0 %v8405_v20  ;;  %v8483_v20 = vld [vmem:[%s12060_s1 + $0x1024] ss:$16 sps:$4 sm:$0xff]  }
 0x193   :  { %5791 = vmatpush1.bf16.msra.mxu1 %v8406_v25  ;;  %v8481_v25 = vld [vmem:[%s12060_s1 + $0x1020] ss:$16 sps:$4 sm:$0xff]  }
 0x194   :  { %5340 = vmatpush1.bf16.msra.mxu0 %v8403_v23  ;;  %5792 = vmatprep.subr.bf16.mxu1 %v8414_v28  ;;  %v10672_v23 = vrot.slane %v971_v16, %v9318_v49  ;;  %v8489_v28 = vld [vmem:[%s12060_s1 + $0x1044] ss:$16 sps:$4 sm:$0xff]   ;;  %v8556_v16 = vld [vmem:[%s12060_s1 + $0xda8] ss:$16 sps:$4 sm:$0xff]  }
 0x195   :  { %5341 = vmatprep.subr.bf16.mxu0 %v8411_v26  ;;  %v8484_v26 = vld [vmem:[%s12060_s1 + $0xc28] ss:$16 sps:$4 sm:$0xff]  }
 0x197   :  { %5793 = vmatpush1.bf16.msra.mxu1 %v8412_v31  ;;  %v8490_v31 = vld [vmem:[%s12060_s1 + $0xc48] ss:$16 sps:$4 sm:$0xff]  }
 0x198   :  { %5342 = vmatpush1.bf16.msra.mxu0 %v8409_v29  ;;  %5794 = vmatprep.subr.bf16.mxu1 %v8420_v33  ;;  %v8487_v29 = vld [vmem:[%s12060_s1 + $0x1040] ss:$16 sps:$4 sm:$0xff]  }
 0x199   :  { %5343 = vmatprep.subr.bf16.mxu0 %v8417_v32  ;;  %v8495_v32 = vld [vmem:[%s12060_s1 + $0x1064] ss:$16 sps:$4 sm:$0xff]   ;;  %v8493_v33 = vld [vmem:[%s12060_s1 + $0x1060] ss:$16 sps:$4 sm:$0xff]  }
 0x19b   :  { %5795 = vmatpush1.bf16.msra.mxu1 %v8418_v34  ;;  %v8501_v34 = vld [vmem:[%s12060_s1 + $0x1084] ss:$16 sps:$4 sm:$0xff]  }
 0x19c   :  { %5344 = vmatpush1.bf16.msra.mxu0 %v8415_v12  ;;  %5796 = vmatprep.subr.bf16.mxu1 %v8426_v0  ;;  %v8496_v12 = vld [vmem:[%s12060_s1 + $0xc68] ss:$16 sps:$4 sm:$0xff]   ;;  %v8499_v0 = vld [vmem:[%s12060_s1 + $0x1080] ss:$16 sps:$4 sm:$0xff]  }
 0x19d   :  { %5345 = vmatprep.subr.bf16.mxu0 %v8423_v35  ;;  %v8504_v35 = vld [vmem:[%s12060_s1 + $0xc8c] ss:$16 sps:$4 sm:$0xff]  }
 0x19f   :  { %5797 = vmatpush1.bf16.msra.mxu1 %v8424_v38  ;;  %v8507_v38 = vld [vmem:[%s12060_s1 + $0x10a4] ss:$16 sps:$4 sm:$0xff]  }
 0x1a0   :  { %5346 = vmatpush1.bf16.msra.mxu0 %v8421_v37  ;;  %5798 = vmatprep.subr.bf16.mxu1 %v8432_v41  ;;  %v8502_v37 = vld [vmem:[%s12060_s1 + $0xc88] ss:$16 sps:$4 sm:$0xff]   ;;  %v8505_v41 = vld [vmem:[%s12060_s1 + $0x10a0] ss:$16 sps:$4 sm:$0xff]  }
 0x1a1   :  { %5347 = vmatprep.subr.bf16.mxu0 %v8429_v40  ;;  %v8510_v40 = vld [vmem:[%s12060_s1 + $0xcac] ss:$16 sps:$4 sm:$0xff]  }
 0x1a3   :  { %5799 = vmatpush1.bf16.msra.mxu1 %v8430_v18  ;;  %v8513_v18 = vld [vmem:[%s12060_s1 + $0x10c4] ss:$16 sps:$4 sm:$0xff]  }
 0x1a4   :  { %5348 = vmatpush1.bf16.msra.mxu0 %v8427_v43  ;;  %5800 = vmatprep.subr.bf16.mxu1 %v8438_v46  ;;  %v8508_v43 = vld [vmem:[%s12060_s1 + $0xca8] ss:$16 sps:$4 sm:$0xff]   ;;  %v8511_v46 = vld [vmem:[%s12060_s1 + $0x10c0] ss:$16 sps:$4 sm:$0xff]  }
 0x1a5   :  { %5349 = vmatprep.subr.bf16.mxu0 %v8435_v44  ;;  %v8516_v44 = vld [vmem:[%s12060_s1 + $0xccc] ss:$16 sps:$4 sm:$0xff]  }
 0x1a7   :  { %5801 = vmatpush1.bf16.msra.mxu1 %v8436_v47  ;;  %v8519_v47 = vld [vmem:[%s12060_s1 + $0x10e4] ss:$16 sps:$4 sm:$0xff]  }
 0x1a8   :  { %5350 = vmatpush1.bf16.msra.mxu0 %v8433_v22  ;;  %5802 = vmatprep.subr.bf16.mxu1 %v8444_v50  ;;  %v8514_v22 = vld [vmem:[%s12060_s1 + $0xcc8] ss:$16 sps:$4 sm:$0xff]   ;;  %v8517_v50 = vld [vmem:[%s12060_s1 + $0x10e0] ss:$16 sps:$4 sm:$0xff]  }
 0x1a9   :  { %5351 = vmatprep.subr.bf16.mxu0 %v8441_v48  ;;  %v8522_v48 = vld [vmem:[%s12060_s1 + $0xcec] ss:$16 sps:$4 sm:$0xff]  }
 0x1ab   :  { %5803 = vmatpush1.bf16.msra.mxu1 %v8442_v24  ;;  %v8525_v24 = vld [vmem:[%s12060_s1 + $0x1104] ss:$16 sps:$4 sm:$0xff]  }
 0x1ac   :  { %5352 = vmatpush1.bf16.msra.mxu0 %v8439_v51  ;;  %5804 = vmatprep.subr.bf16.mxu1 %v8450_v53  ;;  %v8520_v51 = vld [vmem:[%s12060_s1 + $0xce8] ss:$16 sps:$4 sm:$0xff]   ;;  %v8523_v53 = vld [vmem:[%s12060_s1 + $0x1100] ss:$16 sps:$4 sm:$0xff]  }
 0x1ad   :  { %5353 = vmatprep.subr.bf16.mxu0 %v8447_v52  ;;  %v8528_v52 = vld [vmem:[%s12060_s1 + $0xd0c] ss:$16 sps:$4 sm:$0xff]  }
 0x1af   :  { %5805 = vmatpush1.bf16.msra.mxu1 %v8448_v10  ;;  %v8531_v10 = vld [vmem:[%s12060_s1 + $0x1124] ss:$16 sps:$4 sm:$0xff]  }
 0x1b0   :  { %5354 = vmatpush1.bf16.msra.mxu0 %v8445_v54  ;;  %5806 = vmatprep.subr.bf16.mxu1 %v8456_v57  ;;  %v8526_v54 = vld [vmem:[%s12060_s1 + $0xd08] ss:$16 sps:$4 sm:$0xff]   ;;  %v8529_v57 = vld [vmem:[%s12060_s1 + $0x1120] ss:$16 sps:$4 sm:$0xff]  }
 0x1b1   :  { %5355 = vmatprep.subr.bf16.mxu0 %v8453_v55  ;;  %v8534_v55 = vld [vmem:[%s12060_s1 + $0xd2c] ss:$16 sps:$4 sm:$0xff]  }
 0x1b3   :  { %5807 = vmatpush1.bf16.msra.mxu1 %v8454_v59  ;;  %v8537_v59 = vld [vmem:[%s12060_s1 + $0x1144] ss:$16 sps:$4 sm:$0xff]  }
 0x1b4   :  { %5356 = vmatpush1.bf16.msra.mxu0 %v8451_v58  ;;  %5808 = vmatprep.subr.bf16.mxu1 %v8462_v62  ;;  %v8532_v58 = vld [vmem:[%s12060_s1 + $0xd28] ss:$16 sps:$4 sm:$0xff]   ;;  %v8535_v62 = vld [vmem:[%s12060_s1 + $0x1140] ss:$16 sps:$4 sm:$0xff]  }
 0x1b5   :  { %5357 = vmatprep.subr.bf16.mxu0 %v8459_v60  ;;  %v8540_v60 = vld [vmem:[%s12060_s1 + $0xd4c] ss:$16 sps:$4 sm:$0xff]  }
 0x1b7   :  { %5809 = vmatpush1.bf16.msra.mxu1 %v8460_v1  ;;  %v8543_v1 = vld [vmem:[%s12060_s1 + $0x1164] ss:$16 sps:$4 sm:$0xff]  }
 0x1b8   :  { %5358 = vmatpush1.bf16.msra.mxu0 %v8457_v63  ;;  %5810 = vmatprep.subr.bf16.mxu1 %v8468_v2  ;;  %v8538_v63 = vld [vmem:[%s12060_s1 + $0xd48] ss:$16 sps:$4 sm:$0xff]   ;;  %v8541_v2 = vld [vmem:[%s12060_s1 + $0x1160] ss:$16 sps:$4 sm:$0xff]  }
 0x1b9   :  { %5359 = vmatprep.subr.bf16.mxu0 %v8465_v36  ;;  %v8546_v36 = vld [vmem:[%s12060_s1 + $0xd6c] ss:$16 sps:$4 sm:$0xff]  }
 0x1bb   :  { %5811 = vmatpush1.bf16.msra.mxu1 %v8466_v7  ;;  %v8549_v7 = vld [vmem:[%s12060_s1 + $0x1184] ss:$16 sps:$4 sm:$0xff]  }
 0x1bc   :  { %5360 = vmatpush1.bf16.msra.mxu0 %v8463_v39  ;;  %5812 = vmatprep.subr.bf16.mxu1 %v8474_v9  ;;  %v8544_v39 = vld [vmem:[%s12060_s1 + $0xd68] ss:$16 sps:$4 sm:$0xff]   ;;  %v8547_v9 = vld [vmem:[%s12060_s1 + $0x1180] ss:$16 sps:$4 sm:$0xff]  }
 0x1bd   :  { %5361 = vmatprep.subr.bf16.mxu0 %v8471_v27  ;;  %v8552_v27 = vld [vmem:[%s12060_s1 + $0xd8c] ss:$16 sps:$4 sm:$0xff]  }
 0x1bf   :  { %5813 = vmatpush1.bf16.msra.mxu1 %v8472_v45  ;;  %v8555_v45 = vld [vmem:[%s12060_s1 + $0x11a4] ss:$16 sps:$4 sm:$0xff]  }
 0x1c0   :  { %5362 = vmatpush1.bf16.msra.mxu0 %v8469_v13  ;;  %5823 = vmatprep.subr.bf16.mxu1 %v8480_v15  ;;  %v8550_v13 = vld [vmem:[%s12060_s1 + $0xd88] ss:$16 sps:$4 sm:$0xff]   ;;  %v8553_v15 = vld [vmem:[%s12060_s1 + $0x11a0] ss:$16 sps:$4 sm:$0xff]  }
 0x1c1   :  { %5372 = vmatprep.subr.bf16.mxu0 %v8477_v14  ;;  %v8558_v14 = vld [vmem:[%s12060_s1 + $0xdac] ss:$16 sps:$4 sm:$0xff]  }
 0x1c2   :  { %5815 = vmatmul.mubr.bf16.vlgmr.msra.gmra.mrb[4].mxu1 %v10239_v56  ;;  %v8492_v56 = vld [vmem:[%s12060_s1 + $0xc4c] ss:$16 sps:$4 sm:$0xff]  }
 0x1c3   :  { %5364 = vmatmul.mubr.bf16.vlgmr.msra.gmra.mrb[0].mxu0 %v10657_v30  ;;  %5824 = vmatpush1.bf16.msra.mxu1 %v8478_v19  ;;  %v8564_v19 = vld [vmem:[%s12060_s1 + $0xdcc] ss:$16 sps:$4 sm:$0xff]  }
 0x1c4   :  { %5373 = vmatpush1.bf16.msra.mxu0 %v8475_v17  ;;  %5825 = vmatprep.subr.bf16.mxu1 %v8486_v21  ;;  %v8561_v17 = vld [vmem:[%s12060_s1 + $0x11c4] ss:$16 sps:$4 sm:$0xff]   ;;  %v8562_v21 = vld [vmem:[%s12060_s1 + $0xdc8] ss:$16 sps:$4 sm:$0xff]  }
 0x1c5   :  { %5374 = vmatprep.subr.bf16.mxu0 %v8483_v20  ;;  %5404 = vmatprep.mubr.bf16.mxu0 %v10672_v23  ;;  %v8559_v20 = vld [vmem:[%s12060_s1 + $0x11c0] ss:$16 sps:$4 sm:$0xff]  }
 0x1c6   :  { %5855 = vmatprep.mubr.bf16.mxu1 %v10254_v61  ;;  %v8498_v61 = vld [vmem:[%s12060_s1 + $0xc6c] ss:$16 sps:$4 sm:$0xff]  }
 0x1c7   :  { %5826 = vmatpush1.bf16.msra.mxu1 %v8484_v26  ;;  %v8570_v26 = vld [vmem:[%s12060_s1 + $0xdec] ss:$16 sps:$4 sm:$0xff]  }
 0x1c8   :  { %5375 = vmatpush1.bf16.msra.mxu0 %v8481_v25  ;;  %5827 = vmatprep.subr.bf16.mxu1 %v8492_v56  ;;  %v8567_v25 = vld [vmem:[%s12060_s1 + $0x11e4] ss:$16 sps:$4 sm:$0xff]   ;;  %v8568_v56 = vld [vmem:[%s12060_s1 + $0xde8] ss:$16 sps:$4 sm:$0xff]  }
 0x1c9   :  { %5376 = vmatprep.subr.bf16.mxu0 %v8489_v28  ;;  %v8565_v28 = vld [vmem:[%s12060_s1 + $0x11e0] ss:$16 sps:$4 sm:$0xff]  }
 0x1cb   :  { %5828 = vmatpush1.bf16.msra.mxu1 %v8490_v31  ;;  %v8576_v31 = vld [vmem:[%s12060_s1 + $0xe0c] ss:$16 sps:$4 sm:$0xff]  }
 0x1cc   :  { %5377 = vmatpush1.bf16.msra.mxu0 %v8487_v29  ;;  %5829 = vmatprep.subr.bf16.mxu1 %v8498_v61  ;;  %v8573_v29 = vld [vmem:[%s12060_s1 + $0x1204] ss:$16 sps:$4 sm:$0xff]   ;;  %v8571_v61 = vld [vmem:[%s12060_s1 + $0x1200] ss:$16 sps:$4 sm:$0xff]  }
 0x1cd   :  { %5378 = vmatprep.subr.bf16.mxu0 %v8495_v32  ;;  %v10860_v32 = vrot.slane %v10639_v11, %v9318_v49  ;;  %v8582_v11 = vld [vmem:[%s12060_s1 + $0xe2c] ss:$16 sps:$4 sm:$0xff]  }
 0x1cf   :  { %5830 = vmatpush1.bf16.msra.mxu1 %v8496_v12  ;;  %v8579_v12 = vld [vmem:[%s12060_s1 + $0x1224] ss:$16 sps:$4 sm:$0xff]  }
 0x1d0   :  { %5379 = vmatpush1.bf16.msra.mxu0 %v8493_v33  ;;  %5831 = vmatprep.subr.bf16.mxu1 %v8504_v35  ;;  %v8574_v33 = vld [vmem:[%s12060_s1 + $0xe08] ss:$16 sps:$4 sm:$0xff]  }
 0x1d1   :  { %5380 = vmatprep.subr.bf16.mxu0 %v8501_v34  ;;  %v10876_v34 = vcombine.high %v10672_v23, %v10672_v23 }
 0x1d3   :  { %5832 = vmatpush1.bf16.msra.mxu1 %v8502_v37 }
 0x1d4   :  { %5381 = vmatpush1.bf16.msra.mxu0 %v8499_v0  ;;  %5833 = vmatprep.subr.bf16.mxu1 %v8510_v40 }
 0x1d5   :  { %5382 = vmatprep.subr.bf16.mxu0 %v8507_v38 }
 0x1d7   :  { %5834 = vmatpush1.bf16.msra.mxu1 %v8508_v43 }
 0x1d8   :  { %5383 = vmatpush1.bf16.msra.mxu0 %v8505_v41  ;;  %5835 = vmatprep.subr.bf16.mxu1 %v8516_v44 }
 0x1d9   :  { %5384 = vmatprep.subr.bf16.mxu0 %v8513_v18 }
 0x1db   :  { %5836 = vmatpush1.bf16.msra.mxu1 %v8514_v22 }
 0x1dc   :  { %5385 = vmatpush1.bf16.msra.mxu0 %v8511_v46  ;;  %5837 = vmatprep.subr.bf16.mxu1 %v8522_v48 }
 0x1dd   :  { %5386 = vmatprep.subr.bf16.mxu0 %v8519_v47 }
 0x1df   :  { %5838 = vmatpush1.bf16.msra.mxu1 %v8520_v51 }
 0x1e0   :  { %5387 = vmatpush1.bf16.msra.mxu0 %v8517_v50  ;;  %5839 = vmatprep.subr.bf16.mxu1 %v8528_v52 }
 0x1e1   :  { %5388 = vmatprep.subr.bf16.mxu0 %v8525_v24 }
 0x1e3   :  { %5840 = vmatpush1.bf16.msra.mxu1 %v8526_v54 }
 0x1e4   :  { %5389 = vmatpush1.bf16.msra.mxu0 %v8523_v53  ;;  %5841 = vmatprep.subr.bf16.mxu1 %v8534_v55 }
 0x1e5   :  { %5390 = vmatprep.subr.bf16.mxu0 %v8531_v10 }
 0x1e7   :  { %5842 = vmatpush1.bf16.msra.mxu1 %v8532_v58 }
 0x1e8   :  { %5391 = vmatpush1.bf16.msra.mxu0 %v8529_v57  ;;  %5843 = vmatprep.subr.bf16.mxu1 %v8540_v60 }
 0x1e9   :  { %5392 = vmatprep.subr.bf16.mxu0 %v8537_v59 }
 0x1eb   :  { %5844 = vmatpush1.bf16.msra.mxu1 %v8538_v63 }
 0x1ec   :  { %5393 = vmatpush1.bf16.msra.mxu0 %v8535_v62  ;;  %5845 = vmatprep.subr.bf16.mxu1 %v8546_v36 }
 0x1ed   :  { %5394 = vmatprep.subr.bf16.mxu0 %v8543_v1 }
 0x1ef   :  { %5846 = vmatpush1.bf16.msra.mxu1 %v8544_v39 }
 0x1f0   :  { %5395 = vmatpush1.bf16.msra.mxu0 %v8541_v2  ;;  %5847 = vmatprep.subr.bf16.mxu1 %v8552_v27 }
 0x1f1   :  { %5396 = vmatprep.subr.bf16.mxu0 %v8549_v7 }
 0x1f3   :  { %5848 = vmatpush1.bf16.msra.mxu1 %v8550_v13 }
 0x1f4   :  { %5397 = vmatpush1.bf16.msra.mxu0 %v8547_v9  ;;  %5849 = vmatprep.subr.bf16.mxu1 %v8558_v14 }
 0x1f5   :  { %5398 = vmatprep.subr.bf16.mxu0 %v8555_v45 }
 0x1f7   :  { %5850 = vmatpush1.bf16.msra.mxu1 %v8556_v16 }
 0x1f8   :  { %5399 = vmatpush1.bf16.msra.mxu0 %v8553_v15  ;;  %5851 = vmatprep.subr.bf16.mxu1 %v8564_v19 }
 0x1f9   :  { %5400 = vmatprep.subr.bf16.mxu0 %v8561_v17 }
 0x1fb   :  { %5852 = vmatpush1.bf16.msra.mxu1 %v8562_v21 }
 0x1fc   :  { %5401 = vmatpush1.bf16.msra.mxu0 %v8559_v20  ;;  %5853 = vmatprep.subr.bf16.mxu1 %v8570_v26 }
 0x1fd   :  { %5402 = vmatprep.subr.bf16.mxu0 %v8567_v25 }
 0x1ff   :  { %5854 = vmatpush1.bf16.msra.mxu1 %v8568_v56 }
 0x200   :  { %5403 = vmatpush1.bf16.msra.mxu0 %v8565_v28  ;;  %5864 = vmatprep.subr.bf16.mxu1 %v8576_v31 }
 0x201   :  { %5413 = vmatprep.subr.bf16.mxu0 %v8573_v29 }
 0x202   :  { %12 = vsyncpa [#allocation3], 0  ;;  %5856 = vmatmul.mubr.bf16.vlgmr.msra.gmra.mrb[4].mxu1 %v10442_v3  ;;  %v8577_v35 = vld [vmem:[%s12060_s1 + $0x1220] ss:$16 sps:$4 sm:$0xff]   ;;  %v8580_v0 = vld [vmem:[%s12060_s1 + $0xe28] ss:$16 sps:$4 sm:$0xff]  }
 0x203   :  { %5405 = vmatmul.mubr.bf16.vlgmr.msra.gmra.mrb[0].mxu0 %v10860_v32  ;;  %5865 = vmatpush1.bf16.msra.mxu1 %v8574_v33  ;;  %v8585_v37 = vld [vmem:[%s12060_s1 + $0x1244] ss:$16 sps:$4 sm:$0xff]   ;;  %v8588_v3 = vld [vmem:[%s12060_s1 + $0xe4c] ss:$16 sps:$4 sm:$0xff]   ;;  %v8583_v38 = vld [vmem:[%s12060_s1 + $0x1240] ss:$16 sps:$4 sm:$0xff]   ;;  %v956_v33 = vcombine.high %v10623_v6, %v10623_v6 }
 0x204   :  { %5414 = vmatpush1.bf16.msra.mxu0 %v8571_v61  ;;  %5866 = vmatprep.subr.bf16.mxu1 %v8582_v11  ;;  %v8586_v40 = vld [vmem:[%s12060_s1 + $0xe48] ss:$16 sps:$4 sm:$0xff]   ;;  %v8591_v41 = vld [vmem:[%s12060_s1 + $0x1264] ss:$16 sps:$4 sm:$0xff]   ;;  %v8589_v43 = vld [vmem:[%s12060_s1 + $0x1260] ss:$16 sps:$4 sm:$0xff]  }
 0x205   :  { %5415 = vmatprep.subr.bf16.mxu0 %v8579_v12  ;;  %5445 = vmatprep.mubr.bf16.mxu0 %v10876_v34  ;;  %v8592_v18 = vld [vmem:[%s12060_s1 + $0xe68] ss:$16 sps:$4 sm:$0xff]   ;;  %v8597_v44 = vld [vmem:[%s12060_s1 + $0x1284] ss:$16 sps:$4 sm:$0xff]   ;;  %v8600_v46 = vld [vmem:[%s12060_s1 + $0xe8c] ss:$16 sps:$4 sm:$0xff]  }
 0x206   :  { %5896 = vmatprep.mubr.bf16.mxu1 %v10458_v8  ;;  %v8594_v8 = vld [vmem:[%s12060_s1 + $0xe6c] ss:$16 sps:$4 sm:$0xff]   ;;  %v8595_v22 = vld [vmem:[%s12060_s1 + $0x1280] ss:$16 sps:$4 sm:$0xff]   ;;  %v8598_v47 = vld [vmem:[%s12060_s1 + $0xe88] ss:$16 sps:$4 sm:$0xff]  }
 0x207   :  { %5867 = vmatpush1.bf16.msra.mxu1 %v8580_v0  ;;  %v8603_v48 = vld [vmem:[%s12060_s1 + $0x12a4] ss:$16 sps:$4 sm:$0xff]   ;;  %v8606_v50 = vld [vmem:[%s12060_s1 + $0xeac] ss:$16 sps:$4 sm:$0xff]   ;;  %v8601_v51 = vld [vmem:[%s12060_s1 + $0x12a0] ss:$16 sps:$4 sm:$0xff]   ;;  %v11053_v0 = vrot.slane %v956_v33, %v9318_v49 }
 0x208   :  { %5416 = vmatpush1.bf16.msra.mxu0 %v8577_v35  ;;  %5868 = vmatprep.subr.bf16.mxu1 %v8588_v3  ;;  %v8604_v24 = vld [vmem:[%s12060_s1 + $0xea8] ss:$16 sps:$4 sm:$0xff]   ;;  %v8609_v52 = vld [vmem:[%s12060_s1 + $0x12c4] ss:$16 sps:$4 sm:$0xff]   ;;  %v8612_v53 = vld [vmem:[%s12060_s1 + $0xecc] ss:$16 sps:$4 sm:$0xff]  }
 0x209   :  { %5417 = vmatprep.subr.bf16.mxu0 %v8585_v37  ;;  %v8607_v54 = vld [vmem:[%s12060_s1 + $0x12c0] ss:$16 sps:$4 sm:$0xff]   ;;  %v8610_v10 = vld [vmem:[%s12060_s1 + $0xec8] ss:$16 sps:$4 sm:$0xff]   ;;  %v8615_v55 = vld [vmem:[%s12060_s1 + $0x12e4] ss:$16 sps:$4 sm:$0xff]  }
 0x20a   :  { %v8618_v57 = vld [vmem:[%s12060_s1 + $0xeec] ss:$16 sps:$4 sm:$0xff]   ;;  %v8613_v58 = vld [vmem:[%s12060_s1 + $0x12e0] ss:$16 sps:$4 sm:$0xff]   ;;  %v8616_v59 = vld [vmem:[%s12060_s1 + $0xee8] ss:$16 sps:$4 sm:$0xff]  }
 0x20b   :  { %5869 = vmatpush1.bf16.msra.mxu1 %v8586_v40  ;;  %v8621_v60 = vld [vmem:[%s12060_s1 + $0x1304] ss:$16 sps:$4 sm:$0xff]   ;;  %v8624_v62 = vld [vmem:[%s12060_s1 + $0xf0c] ss:$16 sps:$4 sm:$0xff]   ;;  %v8619_v63 = vld [vmem:[%s12060_s1 + $0x1300] ss:$16 sps:$4 sm:$0xff]  }
 0x20c   :  { %5418 = vmatpush1.bf16.msra.mxu0 %v8583_v38  ;;  %5870 = vmatprep.subr.bf16.mxu1 %v8594_v8  ;;  %v8622_v1 = vld [vmem:[%s12060_s1 + $0xf08] ss:$16 sps:$4 sm:$0xff]   ;;  %v8627_v36 = vld [vmem:[%s12060_s1 + $0x1324] ss:$16 sps:$4 sm:$0xff]   ;;  %v8630_v2 = vld [vmem:[%s12060_s1 + $0xf2c] ss:$16 sps:$4 sm:$0xff]   ;;  %v11071_v8 = vcombine.high %v10860_v32, %v10860_v32 }
 0x20d   :  { %5419 = vmatprep.subr.bf16.mxu0 %v8591_v41  ;;  %v8625_v39 = vld [vmem:[%s12060_s1 + $0x1320] ss:$16 sps:$4 sm:$0xff]   ;;  %v8628_v7 = vld [vmem:[%s12060_s1 + $0xf28] ss:$16 sps:$4 sm:$0xff]   ;;  %v8633_v27 = vld [vmem:[%s12060_s1 + $0x1344] ss:$16 sps:$4 sm:$0xff]   ;;  %v972_v41 = vcombine.high %v11053_v0, %v11053_v0 }
 0x20e   :  { %v8636_v9 = vld [vmem:[%s12060_s1 + $0xf4c] ss:$16 sps:$4 sm:$0xff]   ;;  %v8631_v13 = vld [vmem:[%s12060_s1 + $0x1340] ss:$16 sps:$4 sm:$0xff]   ;;  %v8634_v45 = vld [vmem:[%s12060_s1 + $0xf48] ss:$16 sps:$4 sm:$0xff]  }
 0x20f   :  { %5871 = vmatpush1.bf16.msra.mxu1 %v8592_v18  ;;  %v8639_v14 = vld [vmem:[%s12060_s1 + $0x1364] ss:$16 sps:$4 sm:$0xff]   ;;  %v8642_v15 = vld [vmem:[%s12060_s1 + $0xf6c] ss:$16 sps:$4 sm:$0xff]   ;;  %v8637_v16 = vld [vmem:[%s12060_s1 + $0x1360] ss:$16 sps:$4 sm:$0xff]  }
 0x210   :  { %5420 = vmatpush1.bf16.msra.mxu0 %v8589_v43  ;;  %5872 = vmatprep.subr.bf16.mxu1 %v8600_v46  ;;  %v8640_v17 = vld [vmem:[%s12060_s1 + $0xf68] ss:$16 sps:$4 sm:$0xff]   ;;  %v8645_v19 = vld [vmem:[%s12060_s1 + $0x1384] ss:$16 sps:$4 sm:$0xff]   ;;  %v8648_v20 = vld [vmem:[%s12060_s1 + $0xf8c] ss:$16 sps:$4 sm:$0xff]  }
 0x211   :  { %5421 = vmatprep.subr.bf16.mxu0 %v8597_v44  ;;  %v8643_v21 = vld [vmem:[%s12060_s1 + $0x1380] ss:$16 sps:$4 sm:$0xff]   ;;  %v8646_v25 = vld [vmem:[%s12060_s1 + $0xf88] ss:$16 sps:$4 sm:$0xff]   ;;  %v8651_v26 = vld [vmem:[%s12060_s1 + $0x13a4] ss:$16 sps:$4 sm:$0xff]  }
 0x212   :  { %v8654_v28 = vld [vmem:[%s12060_s1 + $0xfac] ss:$16 sps:$4 sm:$0xff]   ;;  %v8649_v56 = vld [vmem:[%s12060_s1 + $0x13a0] ss:$16 sps:$4 sm:$0xff]   ;;  %v8652_v29 = vld [vmem:[%s12060_s1 + $0xfa8] ss:$16 sps:$4 sm:$0xff]  }
 0x213   :  { %5873 = vmatpush1.bf16.msra.mxu1 %v8598_v47  ;;  %v8657_v31 = vld [vmem:[%s12060_s1 + $0x13c4] ss:$16 sps:$4 sm:$0xff]   ;;  %v8660_v61 = vld [vmem:[%s12060_s1 + $0xfcc] ss:$16 sps:$4 sm:$0xff]   ;;  %v8655_v12 = vld [vmem:[%s12060_s1 + $0x13c0] ss:$16 sps:$4 sm:$0xff]  }
 0x214   :  { %5422 = vmatpush1.bf16.msra.mxu0 %v8595_v22  ;;  %5874 = vmatprep.subr.bf16.mxu1 %v8606_v50  ;;  %v8658_v11 = vld [vmem:[%s12060_s1 + $0xfc8] ss:$16 sps:$4 sm:$0xff]   ;;  %v8663_v35 = vld [vmem:[%s12060_s1 + $0x13e4] ss:$16 sps:$4 sm:$0xff]   ;;  %v8666_v6 = vld [vmem:[%s12060_s1 + $0xfec] ss:$16 sps:$4 sm:$0xff]   ;;  %v11086_v22 = vrot.slane %v972_v41, %v9318_v49 }
 0x215   :  { %5423 = vmatprep.subr.bf16.mxu0 %v8603_v48  ;;  %v8661_v37 = vld [vmem:[%s12060_s1 + $0x13e0] ss:$16 sps:$4 sm:$0xff]   ;;  %v8664_v3 = vld [vmem:[%s12060_s1 + $0xfe8] ss:$16 sps:$4 sm:$0xff]   ;;  %v8669_v38 = vld [vmem:[%s12060_s1 + $0x1404] ss:$16 sps:$4 sm:$0xff]  }
 0x216   :  { %v8672_v40 = vld [vmem:[%s12060_s1 + $0x100c] ss:$16 sps:$4 sm:$0xff]   ;;  %v8667_v43 = vld [vmem:[%s12060_s1 + $0x1400] ss:$16 sps:$4 sm:$0xff]   ;;  %v8670_v18 = vld [vmem:[%s12060_s1 + $0x1008] ss:$16 sps:$4 sm:$0xff]  }
 0x217   :  { %5875 = vmatpush1.bf16.msra.mxu1 %v8604_v24  ;;  %v8675_v44 = vld [vmem:[%s12060_s1 + $0x1424] ss:$16 sps:$4 sm:$0xff]   ;;  %v8678_v46 = vld [vmem:[%s12060_s1 + $0x102c] ss:$16 sps:$4 sm:$0xff]   ;;  %v8673_v47 = vld [vmem:[%s12060_s1 + $0x1420] ss:$16 sps:$4 sm:$0xff]  }
 0x218   :  { %5424 = vmatpush1.bf16.msra.mxu0 %v8601_v51  ;;  %5876 = vmatprep.subr.bf16.mxu1 %v8612_v53  ;;  %v8676_v48 = vld [vmem:[%s12060_s1 + $0x1028] ss:$16 sps:$4 sm:$0xff]   ;;  %v8681_v50 = vld [vmem:[%s12060_s1 + $0x1444] ss:$16 sps:$4 sm:$0xff]   ;;  %v8679_v51 = vld [vmem:[%s12060_s1 + $0x1440] ss:$16 sps:$4 sm:$0xff]  }
 0x219   :  { %5425 = vmatprep.subr.bf16.mxu0 %v8609_v52  ;;  %v8682_v24 = vld [vmem:[%s12060_s1 + $0x1048] ss:$16 sps:$4 sm:$0xff]   ;;  %v8687_v52 = vld [vmem:[%s12060_s1 + $0x1464] ss:$16 sps:$4 sm:$0xff]   ;;  %v8685_v53 = vld [vmem:[%s12060_s1 + $0x1460] ss:$16 sps:$4 sm:$0xff]  }
 0x21a   :  { %v8736_v33 = vld [vmem:[%s12060_s1 + $0x1168] ss:$16 sps:$4 sm:$0xff]   ;;  %v8753_v41 = vld [vmem:[%s12060_s1 + $0x15c4] ss:$16 sps:$4 sm:$0xff]   ;;  %s9142_s27 = smov [#allocation2]  }
 0x21b   :  { %5877 = vmatpush1.bf16.msra.mxu1 %v8610_v10  ;;  %v8693_v10 = vld [vmem:[%s12060_s1 + $0x1484] ss:$16 sps:$4 sm:$0xff]   ;;  %s6782_s28 = sshll.u32 %s9142_s27, 4  ;;  %s6783_s28 = int_to_ptr.vmem [resolvable:$true] %s6782_s28 }
 0x21c   :  { %5426 = vmatpush1.bf16.msra.mxu0 %v8607_v54  ;;  %5878 = vmatprep.subr.bf16.mxu1 %v8618_v57  ;;  %v8688_v54 = vld [vmem:[%s12060_s1 + $0x1068] ss:$16 sps:$4 sm:$0xff]   ;;  %v8691_v57 = vld [vmem:[%s12060_s1 + $0x1480] ss:$16 sps:$4 sm:$0xff]   ;;  %s9116_s29 = scalar_lea.vmem %s6783_s28, 32  ;;  %p9121_p1 = scmp.lt.s32.totalorder %s6783_s28, %s6783_s28 }
 0x21d   :  { %5427 = vmatprep.subr.bf16.mxu0 %v8615_v55  ;;  %v8696_v55 = vld [vmem:[%s12060_s1 + $0x108c] ss:$16 sps:$4 sm:$0xff]   ;;  %p9117_p0 = scmp.ne.s32.totalorder %s6783_s28, %s9116_s29  ;;  %p9122_p2 = scmp.lt.s32.totalorder %s9116_s29, %s9116_s29 }
 0x21f   :  { %5879 = vmatpush1.bf16.msra.mxu1 %v8616_v59  ;;  %v8699_v59 = vld [vmem:[%s12060_s1 + $0x14a4] ss:$16 sps:$4 sm:$0xff]   ;;  %p9123_p3 = por %p9122_p2, %p9121_p1 }
 0x220   :  { %5428 = vmatpush1.bf16.msra.mxu0 %v8613_v58  ;;  %5880 = vmatprep.subr.bf16.mxu1 %v8624_v62  ;;  %v8694_v58 = vld [vmem:[%s12060_s1 + $0x1088] ss:$16 sps:$4 sm:$0xff]   ;;  %v8697_v62 = vld [vmem:[%s12060_s1 + $0x14a0] ss:$16 sps:$4 sm:$0xff]  }
 0x221   :  { %5429 = vmatprep.subr.bf16.mxu0 %v8621_v60  ;;  %v8702_v60 = vld [vmem:[%s12060_s1 + $0x10ac] ss:$16 sps:$4 sm:$0xff]   ;;  %p9124_p4 = pnand %p9123_p3, %p9117_p0 }
 0x223   :  { %5881 = vmatpush1.bf16.msra.mxu1 %v8622_v1  ;;  %v8705_v1 = vld [vmem:[%s12060_s1 + $0x14c4] ss:$16 sps:$4 sm:$0xff]  }
 0x224   :  { %5430 = vmatpush1.bf16.msra.mxu0 %v8619_v63  ;;  %5882 = vmatprep.subr.bf16.mxu1 %v8630_v2  ;;  %v8700_v63 = vld [vmem:[%s12060_s1 + $0x10a8] ss:$16 sps:$4 sm:$0xff]   ;;  %v8703_v2 = vld [vmem:[%s12060_s1 + $0x14c0] ss:$16 sps:$4 sm:$0xff]  }
 0x225   :  { %5431 = vmatprep.subr.bf16.mxu0 %v8627_v36  ;;  %v8708_v36 = vld [vmem:[%s12060_s1 + $0x10cc] ss:$16 sps:$4 sm:$0xff]  }
 0x227   :  { %5883 = vmatpush1.bf16.msra.mxu1 %v8628_v7  ;;  %v8711_v7 = vld [vmem:[%s12060_s1 + $0x14e4] ss:$16 sps:$4 sm:$0xff]  }
 0x228   :  { %5432 = vmatpush1.bf16.msra.mxu0 %v8625_v39  ;;  %5884 = vmatprep.subr.bf16.mxu1 %v8636_v9  ;;  %v8706_v39 = vld [vmem:[%s12060_s1 + $0x10c8] ss:$16 sps:$4 sm:$0xff]   ;;  %v8709_v9 = vld [vmem:[%s12060_s1 + $0x14e0] ss:$16 sps:$4 sm:$0xff]  }
 0x229   :  { %5433 = vmatprep.subr.bf16.mxu0 %v8633_v27  ;;  %v8714_v27 = vld [vmem:[%s12060_s1 + $0x10ec] ss:$16 sps:$4 sm:$0xff]  }
 0x22b   :  { %5885 = vmatpush1.bf16.msra.mxu1 %v8634_v45  ;;  %v8717_v45 = vld [vmem:[%s12060_s1 + $0x1504] ss:$16 sps:$4 sm:$0xff]  }
 0x22c   :  { %5434 = vmatpush1.bf16.msra.mxu0 %v8631_v13  ;;  %5886 = vmatprep.subr.bf16.mxu1 %v8642_v15  ;;  %v8712_v13 = vld [vmem:[%s12060_s1 + $0x10e8] ss:$16 sps:$4 sm:$0xff]   ;;  %v8715_v15 = vld [vmem:[%s12060_s1 + $0x1500] ss:$16 sps:$4 sm:$0xff]  }
 0x22d   :  { %5435 = vmatprep.subr.bf16.mxu0 %v8639_v14  ;;  %v8720_v14 = vld [vmem:[%s12060_s1 + $0x110c] ss:$16 sps:$4 sm:$0xff]  }
 0x22f   :  { %5887 = vmatpush1.bf16.msra.mxu1 %v8640_v17  ;;  %v8723_v17 = vld [vmem:[%s12060_s1 + $0x1524] ss:$16 sps:$4 sm:$0xff]  }
 0x230   :  { %5436 = vmatpush1.bf16.msra.mxu0 %v8637_v16  ;;  %5888 = vmatprep.subr.bf16.mxu1 %v8648_v20  ;;  %v8718_v16 = vld [vmem:[%s12060_s1 + $0x1108] ss:$16 sps:$4 sm:$0xff]   ;;  %v8721_v20 = vld [vmem:[%s12060_s1 + $0x1520] ss:$16 sps:$4 sm:$0xff]  }
 0x231   :  { %5437 = vmatprep.subr.bf16.mxu0 %v8645_v19  ;;  %v8726_v19 = vld [vmem:[%s12060_s1 + $0x112c] ss:$16 sps:$4 sm:$0xff]  }
 0x233   :  { %5889 = vmatpush1.bf16.msra.mxu1 %v8646_v25  ;;  %v8729_v25 = vld [vmem:[%s12060_s1 + $0x1544] ss:$16 sps:$4 sm:$0xff]  }
 0x234   :  { %5438 = vmatpush1.bf16.msra.mxu0 %v8643_v21  ;;  %5890 = vmatprep.subr.bf16.mxu1 %v8654_v28  ;;  %v8724_v21 = vld [vmem:[%s12060_s1 + $0x1128] ss:$16 sps:$4 sm:$0xff]   ;;  %v8727_v28 = vld [vmem:[%s12060_s1 + $0x1540] ss:$16 sps:$4 sm:$0xff]  }
 0x235   :  { %5439 = vmatprep.subr.bf16.mxu0 %v8651_v26  ;;  %v8732_v26 = vld [vmem:[%s12060_s1 + $0x114c] ss:$16 sps:$4 sm:$0xff]  }
 0x237   :  { %5891 = vmatpush1.bf16.msra.mxu1 %v8652_v29  ;;  %v8735_v29 = vld [vmem:[%s12060_s1 + $0x1564] ss:$16 sps:$4 sm:$0xff]  }
 0x238   :  { %5440 = vmatpush1.bf16.msra.mxu0 %v8649_v56  ;;  %5892 = vmatprep.subr.bf16.mxu1 %v8660_v61  ;;  %v8730_v56 = vld [vmem:[%s12060_s1 + $0x1148] ss:$16 sps:$4 sm:$0xff]   ;;  %v8733_v61 = vld [vmem:[%s12060_s1 + $0x1560] ss:$16 sps:$4 sm:$0xff]  }
 0x239   :  { %5441 = vmatprep.subr.bf16.mxu0 %v8657_v31  ;;  %v8738_v31 = vld [vmem:[%s12060_s1 + $0x116c] ss:$16 sps:$4 sm:$0xff]  }
 0x23b   :  { %5893 = vmatpush1.bf16.msra.mxu1 %v8658_v11  ;;  %v8744_v11 = vld [vmem:[%s12060_s1 + $0x118c] ss:$16 sps:$4 sm:$0xff]  }
 0x23c   :  { %5442 = vmatpush1.bf16.msra.mxu0 %v8655_v12  ;;  %5894 = vmatprep.subr.bf16.mxu1 %v8666_v6  ;;  %v8741_v12 = vld [vmem:[%s12060_s1 + $0x1584] ss:$16 sps:$4 sm:$0xff]   ;;  %v8742_v6 = vld [vmem:[%s12060_s1 + $0x1188] ss:$16 sps:$4 sm:$0xff]  }
 0x23d   :  { %5443 = vmatprep.subr.bf16.mxu0 %v8663_v35  ;;  %v8739_v35 = vld [vmem:[%s12060_s1 + $0x1580] ss:$16 sps:$4 sm:$0xff]  }
 0x23f   :  { %5895 = vmatpush1.bf16.msra.mxu1 %v8664_v3  ;;  %v8750_v3 = vld [vmem:[%s12060_s1 + $0x11ac] ss:$16 sps:$4 sm:$0xff]  }
 0x240   :  { %5444 = vmatpush1.bf16.msra.mxu0 %v8661_v37  ;;  %5905 = vmatprep.subr.bf16.mxu1 %v8672_v40  ;;  %v8747_v37 = vld [vmem:[%s12060_s1 + $0x15a4] ss:$16 sps:$4 sm:$0xff]   ;;  %v8748_v40 = vld [vmem:[%s12060_s1 + $0x11a8] ss:$16 sps:$4 sm:$0xff]  }
 0x241   :  { %5454 = vmatprep.subr.bf16.mxu0 %v8669_v38  ;;  %v8745_v38 = vld [vmem:[%s12060_s1 + $0x15a0] ss:$16 sps:$4 sm:$0xff]  }
 0x242   :  { %5897 = vmatmul.mubr.bf16.vlgmr.msra.gmra.mrb[4].mxu1 %v10657_v30  ;;  %v8684_v30 = vld [vmem:[%s12060_s1 + $0x104c] ss:$16 sps:$4 sm:$0xff]  }
 0x243   :  { %5446 = vmatmul.mubr.bf16.vlgmr.msra.gmra.mrb[0].mxu0 %v11071_v8  ;;  %5906 = vmatpush1.bf16.msra.mxu1 %v8670_v18  ;;  %v8751_v18 = vld [vmem:[%s12060_s1 + $0x15c0] ss:$16 sps:$4 sm:$0xff]  }
 0x244   :  { %5455 = vmatpush1.bf16.msra.mxu0 %v8667_v43  ;;  %5907 = vmatprep.subr.bf16.mxu1 %v8678_v46  ;;  %v8756_v43 = vld [vmem:[%s12060_s1 + $0x11cc] ss:$16 sps:$4 sm:$0xff]   ;;  %v8759_v46 = vld [vmem:[%s12060_s1 + $0x15e4] ss:$16 sps:$4 sm:$0xff]  }
 0x245   :  { %5456 = vmatprep.subr.bf16.mxu0 %v8675_v44  ;;  %5486 = vmatprep.mubr.bf16.mxu0 %v11086_v22  ;;  %v8754_v44 = vld [vmem:[%s12060_s1 + $0x11c8] ss:$16 sps:$4 sm:$0xff]  }
 0x246   :  { %5937 = vmatprep.mubr.bf16.mxu1 %v10672_v23  ;;  %v8690_v23 = vld [vmem:[%s12060_s1 + $0x106c] ss:$16 sps:$4 sm:$0xff]  }
 0x247   :  { %5908 = vmatpush1.bf16.msra.mxu1 %v8676_v48  ;;  %v8757_v48 = vld [vmem:[%s12060_s1 + $0x15e0] ss:$16 sps:$4 sm:$0xff]  }
 0x248   :  { %5457 = vmatpush1.bf16.msra.mxu0 %v8673_v47  ;;  %5909 = vmatprep.subr.bf16.mxu1 %v8684_v30  ;;  %v8762_v47 = vld [vmem:[%s12060_s1 + $0x11ec] ss:$16 sps:$4 sm:$0xff]   ;;  %v8766_v30 = vld [vmem:[%s12060_s1 + $0x1604] ss:$16 sps:$4 sm:$0xff]  }
 0x249   :  { %5458 = vmatprep.subr.bf16.mxu0 %v8681_v50  ;;  %v8760_v50 = vld [vmem:[%s12060_s1 + $0x11e8] ss:$16 sps:$4 sm:$0xff]  }
 0x24b   :  { %5910 = vmatpush1.bf16.msra.mxu1 %v8682_v24  ;;  %v11274_v24 = vrot.slane %v11053_v0, %v9318_v49  ;;  %v8775_v0 = vld [vmem:[%s12060_s1 + $0x122c] ss:$16 sps:$4 sm:$0xff]  }
 0x24c   :  { %5459 = vmatpush1.bf16.msra.mxu0 %v8679_v51  ;;  %5911 = vmatprep.subr.bf16.mxu1 %v8690_v23  ;;  %v8769_v51 = vld [vmem:[%s12060_s1 + $0x120c] ss:$16 sps:$4 sm:$0xff]   ;;  %v8767_v23 = vld [vmem:[%s12060_s1 + $0x1208] ss:$16 sps:$4 sm:$0xff]  }
 0x24d   :  { %5460 = vmatprep.subr.bf16.mxu0 %v8687_v52  ;;  %v8764_v52 = vld [vmem:[%s12060_s1 + $0x1600] ss:$16 sps:$4 sm:$0xff]  }
 0x24f   :  { %5912 = vmatpush1.bf16.msra.mxu1 %v8688_v54  ;;  %v11290_v54 = vcombine.high %v11086_v22, %v11086_v22 }
 0x250   :  { %5461 = vmatpush1.bf16.msra.mxu0 %v8685_v53  ;;  %5913 = vmatprep.subr.bf16.mxu1 %v8696_v55  ;;  %v8772_v53 = vld [vmem:[%s12060_s1 + $0x1624] ss:$16 sps:$4 sm:$0xff]   ;;  %v8773_v55 = vld [vmem:[%s12060_s1 + $0x1228] ss:$16 sps:$4 sm:$0xff]  }
 0x251   :  { %5462 = vmatprep.subr.bf16.mxu0 %v8693_v10  ;;  %v8770_v10 = vld [vmem:[%s12060_s1 + $0x1620] ss:$16 sps:$4 sm:$0xff]  }
 0x253   :  { %5914 = vmatpush1.bf16.msra.mxu1 %v8694_v58  ;;  %v8776_v58 = vld [vmem:[%s12060_s1 + $0x1640] ss:$16 sps:$4 sm:$0xff]  }
 0x254   :  { %5463 = vmatpush1.bf16.msra.mxu0 %v8691_v57  ;;  %5915 = vmatprep.subr.bf16.mxu1 %v8702_v60  ;;  %v8778_v57 = vld [vmem:[%s12060_s1 + $0x1644] ss:$16 sps:$4 sm:$0xff]  }
 0x255   :  { %5464 = vmatprep.subr.bf16.mxu0 %v8699_v59  ;;  %v8779_v59 = vld [vmem:[%s12060_s1 + $0x1248] ss:$16 sps:$4 sm:$0xff]   ;;  %v8784_v60 = vld [vmem:[%s12060_s1 + $0x1664] ss:$16 sps:$4 sm:$0xff]  }
 0x257   :  { %5916 = vmatpush1.bf16.msra.mxu1 %v8700_v63  ;;  %v8785_v63 = vld [vmem:[%s12060_s1 + $0x1268] ss:$16 sps:$4 sm:$0xff]  }
 0x258   :  { %5465 = vmatpush1.bf16.msra.mxu0 %v8697_v62  ;;  %5917 = vmatprep.subr.bf16.mxu1 %v8708_v36  ;;  %v8782_v62 = vld [vmem:[%s12060_s1 + $0x1660] ss:$16 sps:$4 sm:$0xff]   ;;  %v8793_v36 = vld [vmem:[%s12060_s1 + $0x128c] ss:$16 sps:$4 sm:$0xff]  }
 0x259   :  { %5466 = vmatprep.subr.bf16.mxu0 %v8705_v1  ;;  %v8790_v1 = vld [vmem:[%s12060_s1 + $0x1684] ss:$16 sps:$4 sm:$0xff]  }
 0x25b   :  { %5918 = vmatpush1.bf16.msra.mxu1 %v8706_v39  ;;  %v8791_v39 = vld [vmem:[%s12060_s1 + $0x1288] ss:$16 sps:$4 sm:$0xff]  }
 0x25c   :  { %5467 = vmatpush1.bf16.msra.mxu0 %v8703_v2  ;;  %5919 = vmatprep.subr.bf16.mxu1 %v8714_v27  ;;  %v8788_v2 = vld [vmem:[%s12060_s1 + $0x1680] ss:$16 sps:$4 sm:$0xff]   ;;  %v8799_v27 = vld [vmem:[%s12060_s1 + $0x12ac] ss:$16 sps:$4 sm:$0xff]  }
 0x25d   :  { %5468 = vmatprep.subr.bf16.mxu0 %v8711_v7  ;;  %v8796_v7 = vld [vmem:[%s12060_s1 + $0x16a4] ss:$16 sps:$4 sm:$0xff]  }
 0x25f   :  { %5920 = vmatpush1.bf16.msra.mxu1 %v8712_v13  ;;  %v8797_v13 = vld [vmem:[%s12060_s1 + $0x12a8] ss:$16 sps:$4 sm:$0xff]  }
 0x260   :  { %5469 = vmatpush1.bf16.msra.mxu0 %v8709_v9  ;;  %5921 = vmatprep.subr.bf16.mxu1 %v8720_v14  ;;  %v8794_v9 = vld [vmem:[%s12060_s1 + $0x16a0] ss:$16 sps:$4 sm:$0xff]   ;;  %v8805_v14 = vld [vmem:[%s12060_s1 + $0x12cc] ss:$16 sps:$4 sm:$0xff]  }
 0x261   :  { %5470 = vmatprep.subr.bf16.mxu0 %v8717_v45  ;;  %v8802_v45 = vld [vmem:[%s12060_s1 + $0x16c4] ss:$16 sps:$4 sm:$0xff]  }
 0x263   :  { %5922 = vmatpush1.bf16.msra.mxu1 %v8718_v16  ;;  %v8803_v16 = vld [vmem:[%s12060_s1 + $0x12c8] ss:$16 sps:$4 sm:$0xff]  }
 0x264   :  { %5471 = vmatpush1.bf16.msra.mxu0 %v8715_v15  ;;  %5923 = vmatprep.subr.bf16.mxu1 %v8726_v19  ;;  %v8800_v15 = vld [vmem:[%s12060_s1 + $0x16c0] ss:$16 sps:$4 sm:$0xff]   ;;  %v8811_v19 = vld [vmem:[%s12060_s1 + $0x12ec] ss:$16 sps:$4 sm:$0xff]  }
 0x265   :  { %5472 = vmatprep.subr.bf16.mxu0 %v8723_v17  ;;  %v8808_v17 = vld [vmem:[%s12060_s1 + $0x16e4] ss:$16 sps:$4 sm:$0xff]  }
 0x267   :  { %5924 = vmatpush1.bf16.msra.mxu1 %v8724_v21  ;;  %v8809_v21 = vld [vmem:[%s12060_s1 + $0x12e8] ss:$16 sps:$4 sm:$0xff]  }
 0x268   :  { %5473 = vmatpush1.bf16.msra.mxu0 %v8721_v20  ;;  %5925 = vmatprep.subr.bf16.mxu1 %v8732_v26  ;;  %v8806_v20 = vld [vmem:[%s12060_s1 + $0x16e0] ss:$16 sps:$4 sm:$0xff]   ;;  %v8817_v26 = vld [vmem:[%s12060_s1 + $0x130c] ss:$16 sps:$4 sm:$0xff]  }
 0x269   :  { %5474 = vmatprep.subr.bf16.mxu0 %v8729_v25  ;;  %v8814_v25 = vld [vmem:[%s12060_s1 + $0x1704] ss:$16 sps:$4 sm:$0xff]  }
 0x26b   :  { %5926 = vmatpush1.bf16.msra.mxu1 %v8730_v56  ;;  %v8815_v56 = vld [vmem:[%s12060_s1 + $0x1308] ss:$16 sps:$4 sm:$0xff]  }
 0x26c   :  { %5475 = vmatpush1.bf16.msra.mxu0 %v8727_v28  ;;  %5927 = vmatprep.subr.bf16.mxu1 %v8738_v31  ;;  %v8812_v28 = vld [vmem:[%s12060_s1 + $0x1700] ss:$16 sps:$4 sm:$0xff]   ;;  %v8823_v31 = vld [vmem:[%s12060_s1 + $0x132c] ss:$16 sps:$4 sm:$0xff]  }
 0x26d   :  { %5476 = vmatprep.subr.bf16.mxu0 %v8735_v29  ;;  %v8820_v29 = vld [vmem:[%s12060_s1 + $0x1724] ss:$16 sps:$4 sm:$0xff]  }
 0x26f   :  { %5928 = vmatpush1.bf16.msra.mxu1 %v8736_v33  ;;  %v8821_v33 = vld [vmem:[%s12060_s1 + $0x1328] ss:$16 sps:$4 sm:$0xff]  }
 0x270   :  { %5477 = vmatpush1.bf16.msra.mxu0 %v8733_v61  ;;  %5929 = vmatprep.subr.bf16.mxu1 %v8744_v11  ;;  %v8818_v61 = vld [vmem:[%s12060_s1 + $0x1720] ss:$16 sps:$4 sm:$0xff]   ;;  %v8829_v11 = vld [vmem:[%s12060_s1 + $0x134c] ss:$16 sps:$4 sm:$0xff]  }
 0x271   :  { %5478 = vmatprep.subr.bf16.mxu0 %v8741_v12  ;;  %v8826_v12 = vld [vmem:[%s12060_s1 + $0x1744] ss:$16 sps:$4 sm:$0xff]  }
 0x273   :  { %5930 = vmatpush1.bf16.msra.mxu1 %v8742_v6  ;;  %v8827_v6 = vld [vmem:[%s12060_s1 + $0x1348] ss:$16 sps:$4 sm:$0xff]  }
 0x274   :  { %5479 = vmatpush1.bf16.msra.mxu0 %v8739_v35  ;;  %5931 = vmatprep.subr.bf16.mxu1 %v8750_v3  ;;  %v8824_v35 = vld [vmem:[%s12060_s1 + $0x1740] ss:$16 sps:$4 sm:$0xff]   ;;  %v8835_v3 = vld [vmem:[%s12060_s1 + $0x136c] ss:$16 sps:$4 sm:$0xff]  }
 0x275   :  { %5480 = vmatprep.subr.bf16.mxu0 %v8747_v37  ;;  %v8832_v37 = vld [vmem:[%s12060_s1 + $0x1764] ss:$16 sps:$4 sm:$0xff]  }
 0x277   :  { %5932 = vmatpush1.bf16.msra.mxu1 %v8748_v40  ;;  %v8833_v40 = vld [vmem:[%s12060_s1 + $0x1368] ss:$16 sps:$4 sm:$0xff]  }
 0x278   :  { %5481 = vmatpush1.bf16.msra.mxu0 %v8745_v38  ;;  %5933 = vmatprep.subr.bf16.mxu1 %v8756_v43  ;;  %v8830_v38 = vld [vmem:[%s12060_s1 + $0x1760] ss:$16 sps:$4 sm:$0xff]   ;;  %v8841_v43 = vld [vmem:[%s12060_s1 + $0x138c] ss:$16 sps:$4 sm:$0xff]  }
 0x279   :  { %5482 = vmatprep.subr.bf16.mxu0 %v8753_v41  ;;  %v8838_v41 = vld [vmem:[%s12060_s1 + $0x1784] ss:$16 sps:$4 sm:$0xff]  }
 0x27b   :  { %5934 = vmatpush1.bf16.msra.mxu1 %v8754_v44  ;;  %v8839_v44 = vld [vmem:[%s12060_s1 + $0x1388] ss:$16 sps:$4 sm:$0xff]  }
 0x27c   :  { %5483 = vmatpush1.bf16.msra.mxu0 %v8751_v18  ;;  %5935 = vmatprep.subr.bf16.mxu1 %v8762_v47  ;;  %v8836_v18 = vld [vmem:[%s12060_s1 + $0x1780] ss:$16 sps:$4 sm:$0xff]   ;;  %v8847_v47 = vld [vmem:[%s12060_s1 + $0x13ac] ss:$16 sps:$4 sm:$0xff]  }
 0x27d   :  { %5484 = vmatprep.subr.bf16.mxu0 %v8759_v46  ;;  %v8844_v46 = vld [vmem:[%s12060_s1 + $0x17a4] ss:$16 sps:$4 sm:$0xff]  }
 0x27f   :  { %5936 = vmatpush1.bf16.msra.mxu1 %v8760_v50  ;;  %v8845_v50 = vld [vmem:[%s12060_s1 + $0x13a8] ss:$16 sps:$4 sm:$0xff]  }
 0x280   :  { %5485 = vmatpush1.bf16.msra.mxu0 %v8757_v48  ;;  %5946 = vmatprep.subr.bf16.mxu1 %v8769_v51  ;;  %v8842_v48 = vld [vmem:[%s12060_s1 + $0x17a0] ss:$16 sps:$4 sm:$0xff]   ;;  %v8853_v51 = vld [vmem:[%s12060_s1 + $0x13cc] ss:$16 sps:$4 sm:$0xff]  }
 0x281   :  { %5495 = vmatprep.subr.bf16.mxu0 %v8766_v30  ;;  %v8850_v30 = vld [vmem:[%s12060_s1 + $0x17c4] ss:$16 sps:$4 sm:$0xff]  }
 0x282   :  { %5938 = vmatmul.mubr.bf16.vlgmr.msra.gmra.mrb[4].mxu1 %v10860_v32  ;;  %v8781_v32 = vld [vmem:[%s12060_s1 + $0x124c] ss:$16 sps:$4 sm:$0xff]  }
 0x283   :  { %5487 = vmatmul.mubr.bf16.vlgmr.msra.gmra.mrb[0].mxu0 %v11274_v24  ;;  %5947 = vmatpush1.bf16.msra.mxu1 %v8767_v23  ;;  %v8851_v23 = vld [vmem:[%s12060_s1 + $0x13c8] ss:$16 sps:$4 sm:$0xff]  }
 0x284   :  { %5496 = vmatpush1.bf16.msra.mxu0 %v8764_v52  ;;  %5948 = vmatprep.subr.bf16.mxu1 %v8775_v0  ;;  %v8848_v52 = vld [vmem:[%s12060_s1 + $0x17c0] ss:$16 sps:$4 sm:$0xff]   ;;  %v8859_v0 = vld [vmem:[%s12060_s1 + $0x13ec] ss:$16 sps:$4 sm:$0xff]  }
 0x285   :  { %5497 = vmatprep.subr.bf16.mxu0 %v8772_v53  ;;  %5527 = vmatprep.mubr.bf16.mxu0 %v11290_v54  ;;  %v8856_v53 = vld [vmem:[%s12060_s1 + $0x17e4] ss:$16 sps:$4 sm:$0xff]  }
 0x286   :  { %5978 = vmatprep.mubr.bf16.mxu1 %v10876_v34  ;;  %v8787_v34 = vld [vmem:[%s12060_s1 + $0x126c] ss:$16 sps:$4 sm:$0xff]  }
 0x287   :  { %5949 = vmatpush1.bf16.msra.mxu1 %v8773_v55  ;;  %v8857_v55 = vld [vmem:[%s12060_s1 + $0x13e8] ss:$16 sps:$4 sm:$0xff]  }
 0x288   :  { %5498 = vmatpush1.bf16.msra.mxu0 %v8770_v10  ;;  %5950 = vmatprep.subr.bf16.mxu1 %v8781_v32  ;;  %v8854_v10 = vld [vmem:[%s12060_s1 + $0x17e0] ss:$16 sps:$4 sm:$0xff]   ;;  %v8865_v32 = vld [vmem:[%s12060_s1 + $0x140c] ss:$16 sps:$4 sm:$0xff]  }
 0x289   :  { %5499 = vmatprep.subr.bf16.mxu0 %v8778_v57  ;;  %v8862_v57 = vld [vmem:[%s12060_s1 + $0x1804] ss:$16 sps:$4 sm:$0xff]  }
 0x28b   :  { %5951 = vmatpush1.bf16.msra.mxu1 %v8779_v59  ;;  %v8860_v59 = vld [vmem:[%s12060_s1 + $0x1800] ss:$16 sps:$4 sm:$0xff]  }
 0x28c   :  { %5500 = vmatpush1.bf16.msra.mxu0 %v8776_v58  ;;  %5952 = vmatprep.subr.bf16.mxu1 %v8787_v34  ;;  %v11478_v58 = vcombine.high %v11274_v24, %v11274_v24  ;;  %v8868_v34 = vld [vmem:[%s12060_s1 + $0x1824] ss:$16 sps:$4 sm:$0xff]  }
 0x28d   :  { %5501 = vmatprep.subr.bf16.mxu0 %v8784_v60  ;;  %v8863_v60 = vld [vmem:[%s12060_s1 + $0x1408] ss:$16 sps:$4 sm:$0xff]  }
 0x28f   :  { %5953 = vmatpush1.bf16.msra.mxu1 %v8785_v63  ;;  %v8866_v63 = vld [vmem:[%s12060_s1 + $0x1820] ss:$16 sps:$4 sm:$0xff]  }
 0x290   :  { %5502 = vmatpush1.bf16.msra.mxu0 %v8782_v62  ;;  %5954 = vmatprep.subr.bf16.mxu1 %v8793_v36  ;;  %v8871_v62 = vld [vmem:[%s12060_s1 + $0x142c] ss:$16 sps:$4 sm:$0xff]   ;;  %v8874_v36 = vld [vmem:[%s12060_s1 + $0x1844] ss:$16 sps:$4 sm:$0xff]  }
 0x291   :  { %5503 = vmatprep.subr.bf16.mxu0 %v8790_v1  ;;  %v8869_v1 = vld [vmem:[%s12060_s1 + $0x1428] ss:$16 sps:$4 sm:$0xff]  }
 0x293   :  { %5955 = vmatpush1.bf16.msra.mxu1 %v8791_v39  ;;  %v8872_v39 = vld [vmem:[%s12060_s1 + $0x1840] ss:$16 sps:$4 sm:$0xff]  }
 0x294   :  { %5504 = vmatpush1.bf16.msra.mxu0 %v8788_v2  ;;  %5956 = vmatprep.subr.bf16.mxu1 %v8799_v27  ;;  %v9141_v2 = vmov 0   ;;  %v8880_v27 = vld [vmem:[%s12060_s1 + $0x1864] ss:$16 sps:$4 sm:$0xff]  }
 0x295   :  { %5505 = vmatprep.subr.bf16.mxu0 %v8796_v7  ;;  %v8875_v7 = vld [vmem:[%s12060_s1 + $0x1448] ss:$16 sps:$4 sm:$0xff]  }
 0x297   :  { %5957 = vmatpush1.bf16.msra.mxu1 %v8797_v13  ;;  %v8881_v13 = vld [vmem:[%s12060_s1 + $0x1468] ss:$16 sps:$4 sm:$0xff]  }
 0x298   :  { %5506 = vmatpush1.bf16.msra.mxu0 %v8794_v9  ;;  %5958 = vmatprep.subr.bf16.mxu1 %v8805_v14  ;;  %v8878_v9 = vld [vmem:[%s12060_s1 + $0x1860] ss:$16 sps:$4 sm:$0xff]   ;;  %v8889_v14 = vld [vmem:[%s12060_s1 + $0x148c] ss:$16 sps:$4 sm:$0xff]  }
 0x299   :  { %5507 = vmatprep.subr.bf16.mxu0 %v8802_v45  ;;  %v8886_v45 = vld [vmem:[%s12060_s1 + $0x1884] ss:$16 sps:$4 sm:$0xff]  }
 0x29b   :  { %5959 = vmatpush1.bf16.msra.mxu1 %v8803_v16  ;;  %v8887_v16 = vld [vmem:[%s12060_s1 + $0x1488] ss:$16 sps:$4 sm:$0xff]  }
 0x29c   :  { %5508 = vmatpush1.bf16.msra.mxu0 %v8800_v15  ;;  %5960 = vmatprep.subr.bf16.mxu1 %v8811_v19  ;;  %v8884_v15 = vld [vmem:[%s12060_s1 + $0x1880] ss:$16 sps:$4 sm:$0xff]   ;;  %v8895_v19 = vld [vmem:[%s12060_s1 + $0x14ac] ss:$16 sps:$4 sm:$0xff]  }
 0x29d   :  { %5509 = vmatprep.subr.bf16.mxu0 %v8808_v17  ;;  %v8892_v17 = vld [vmem:[%s12060_s1 + $0x18a4] ss:$16 sps:$4 sm:$0xff]  }
 0x29f   :  { %5961 = vmatpush1.bf16.msra.mxu1 %v8809_v21  ;;  %v8893_v21 = vld [vmem:[%s12060_s1 + $0x14a8] ss:$16 sps:$4 sm:$0xff]  }
 0x2a0   :  { %5510 = vmatpush1.bf16.msra.mxu0 %v8806_v20  ;;  %5962 = vmatprep.subr.bf16.mxu1 %v8817_v26  ;;  %v8890_v20 = vld [vmem:[%s12060_s1 + $0x18a0] ss:$16 sps:$4 sm:$0xff]   ;;  %v8901_v26 = vld [vmem:[%s12060_s1 + $0x14cc] ss:$16 sps:$4 sm:$0xff]  }
 0x2a1   :  { %5511 = vmatprep.subr.bf16.mxu0 %v8814_v25  ;;  %v8898_v25 = vld [vmem:[%s12060_s1 + $0x18c4] ss:$16 sps:$4 sm:$0xff]  }
 0x2a3   :  { %5963 = vmatpush1.bf16.msra.mxu1 %v8815_v56  ;;  %v8899_v56 = vld [vmem:[%s12060_s1 + $0x14c8] ss:$16 sps:$4 sm:$0xff]  }
 0x2a4   :  { %5512 = vmatpush1.bf16.msra.mxu0 %v8812_v28  ;;  %5964 = vmatprep.subr.bf16.mxu1 %v8823_v31  ;;  %v8896_v28 = vld [vmem:[%s12060_s1 + $0x18c0] ss:$16 sps:$4 sm:$0xff]   ;;  %v8907_v31 = vld [vmem:[%s12060_s1 + $0x14ec] ss:$16 sps:$4 sm:$0xff]  }
 0x2a5   :  { %5513 = vmatprep.subr.bf16.mxu0 %v8820_v29  ;;  %v8904_v29 = vld [vmem:[%s12060_s1 + $0x18e4] ss:$16 sps:$4 sm:$0xff]  }
 0x2a7   :  { %5965 = vmatpush1.bf16.msra.mxu1 %v8821_v33  ;;  %v8905_v33 = vld [vmem:[%s12060_s1 + $0x14e8] ss:$16 sps:$4 sm:$0xff]  }
 0x2a8   :  { %5514 = vmatpush1.bf16.msra.mxu0 %v8818_v61  ;;  %5966 = vmatprep.subr.bf16.mxu1 %v8829_v11  ;;  %v8902_v61 = vld [vmem:[%s12060_s1 + $0x18e0] ss:$16 sps:$4 sm:$0xff]   ;;  %v8910_v11 = vld [vmem:[%s12060_s1 + $0x150c] ss:$16 sps:$4 sm:$0xff]  }
 0x2a9   :  { %5515 = vmatprep.subr.bf16.mxu0 %v8826_v12  ;;  %v6790_v12 = vld.sshfl [vmem:[%s12059_s0 + $0x18] sm:$0x1 pattern:$0x75316420] }
 0x2ab   :  { %5967 = vmatpush1.bf16.msra.mxu1 %v8827_v6  ;;  %v8908_v6 = vld [vmem:[%s12060_s1 + $0x1508] ss:$16 sps:$4 sm:$0xff]  }
 0x2ac   :  { %5516 = vmatpush1.bf16.msra.mxu0 %v8824_v35  ;;  %5968 = vmatprep.subr.bf16.mxu1 %v8835_v3  ;;  %v11581_v35 = vrot.slane %v6790_v12, %v9318_v49  ;;  %v9004_v3 = vld [vmem:[%s12062_s3] ss:$8 sps:$4 sm:$0xff]   ;;  %v9006_v49 = vld [vmem:[%s12062_s3 + $0x4] ss:$8 sps:$4 sm:$0xff]  }
 0x2ad   :  { %5517 = vmatprep.subr.bf16.mxu0 %v8832_v37  ;;  %v8913_v37 = vld [vmem:[%s12060_s1 + $0x152c] ss:$16 sps:$4 sm:$0xff]   ;;  %v8950_v12 = vld [vmem:[%s12060_s1 + $0x16c8] ss:$16 sps:$4 sm:$0xff]  }
 0x2af   :  { %5969 = vmatpush1.bf16.msra.mxu1 %v8833_v40  ;;  %v9009_v40 = vld [vmem:[%s12062_s3 + $0x14] ss:$8 sps:$4 sm:$0xff]  }
 0x2b0   :  { %5518 = vmatpush1.bf16.msra.mxu0 %v8830_v38  ;;  %5970 = vmatprep.subr.bf16.mxu1 %v8841_v43  ;;  %v8911_v38 = vld [vmem:[%s12060_s1 + $0x1528] ss:$16 sps:$4 sm:$0xff]  }
 0x2b1   :  { %5519 = vmatprep.subr.bf16.mxu0 %v8838_v41  ;;  %v8916_v41 = vld [vmem:[%s12060_s1 + $0x154c] ss:$16 sps:$4 sm:$0xff]   ;;  %v9007_v43 = vld [vmem:[%s12062_s3 + $0x10] ss:$8 sps:$4 sm:$0xff]  }
 0x2b3   :  { %5971 = vmatpush1.bf16.msra.mxu1 %v8839_v44  ;;  %v8914_v44 = vld [vmem:[%s12060_s1 + $0x1548] ss:$16 sps:$4 sm:$0xff]  }
 0x2b4   :  { %5520 = vmatpush1.bf16.msra.mxu0 %v8836_v18  ;;  %5972 = vmatprep.subr.bf16.mxu1 %v8847_v47  ;;  %v9012_v18 = vld [vmem:[%s12062_s3 + $0x24] ss:$8 sps:$4 sm:$0xff]   ;;  %v9010_v47 = vld [vmem:[%s12062_s3 + $0x20] ss:$8 sps:$4 sm:$0xff]  }
 0x2b5   :  { %5521 = vmatprep.subr.bf16.mxu0 %v8844_v46  ;;  %v8919_v46 = vld [vmem:[%s12060_s1 + $0x156c] ss:$16 sps:$4 sm:$0xff]  }
 0x2b7   :  { %5973 = vmatpush1.bf16.msra.mxu1 %v8845_v50  ;;  %v8917_v50 = vld [vmem:[%s12060_s1 + $0x1568] ss:$16 sps:$4 sm:$0xff]  }
 0x2b8   :  { %5522 = vmatpush1.bf16.msra.mxu0 %v8842_v48  ;;  %5974 = vmatprep.subr.bf16.mxu1 %v8853_v51  ;;  %v9015_v48 = vld [vmem:[%s12062_s3 + $0x34] ss:$8 sps:$4 sm:$0xff]   ;;  %v9013_v51 = vld [vmem:[%s12062_s3 + $0x30] ss:$8 sps:$4 sm:$0xff]  }
 0x2b9   :  { %5523 = vmatprep.subr.bf16.mxu0 %v8850_v30  ;;  %v8922_v30 = vld [vmem:[%s12060_s1 + $0x158c] ss:$16 sps:$4 sm:$0xff]  }
 0x2bb   :  { %5975 = vmatpush1.bf16.msra.mxu1 %v8851_v23  ;;  %v8920_v23 = vld [vmem:[%s12060_s1 + $0x1588] ss:$16 sps:$4 sm:$0xff]  }
 0x2bc   :  { %5524 = vmatpush1.bf16.msra.mxu0 %v8848_v52  ;;  %5976 = vmatprep.subr.bf16.mxu1 %v8859_v0  ;;  %v9018_v52 = vld [vmem:[%s12062_s3 + $0x44] ss:$8 sps:$4 sm:$0xff]   ;;  %v9016_v0 = vld [vmem:[%s12062_s3 + $0x40] ss:$8 sps:$4 sm:$0xff]  }
 0x2bd   :  { %5525 = vmatprep.subr.bf16.mxu0 %v8856_v53  ;;  %v8925_v53 = vld [vmem:[%s12060_s1 + $0x15ac] ss:$16 sps:$4 sm:$0xff]  }
 0x2bf   :  { %5977 = vmatpush1.bf16.msra.mxu1 %v8857_v55  ;;  %v8923_v55 = vld [vmem:[%s12060_s1 + $0x15a8] ss:$16 sps:$4 sm:$0xff]  }
 0x2c0   :  { %5526 = vmatpush1.bf16.msra.mxu0 %v8854_v10  ;;  %5987 = vmatprep.subr.bf16.mxu1 %v8865_v32  ;;  %v9021_v10 = vld [vmem:[%s12062_s3 + $0x54] ss:$8 sps:$4 sm:$0xff]   ;;  %v9019_v32 = vld [vmem:[%s12062_s3 + $0x50] ss:$8 sps:$4 sm:$0xff]  }
 0x2c1   :  { %5536 = vmatprep.subr.bf16.mxu0 %v8862_v57  ;;  %v8928_v57 = vld [vmem:[%s12060_s1 + $0x15cc] ss:$16 sps:$4 sm:$0xff]  }
 0x2c2   :  { %5979 = vmatmul.mubr.bf16.vlgmr.msra.gmra.mrb[4].mxu1 %v11071_v8  ;;  %v8877_v8 = vld [vmem:[%s12060_s1 + $0x144c] ss:$16 sps:$4 sm:$0xff]  }
 0x2c3   :  { %5528 = vmatmul.mubr.bf16.vlgmr.msra.gmra.mrb[0].mxu0 %v11478_v58  ;;  %5988 = vmatpush1.bf16.msra.mxu1 %v8863_v60  ;;  %v8926_v60 = vld [vmem:[%s12060_s1 + $0x15c8] ss:$16 sps:$4 sm:$0xff]  }
 0x2c4   :  { %5537 = vmatpush1.bf16.msra.mxu0 %v8860_v59  ;;  %5989 = vmatprep.subr.bf16.mxu1 %v8871_v62  ;;  %v9024_v59 = vld [vmem:[%s12062_s3 + $0x64] ss:$8 sps:$4 sm:$0xff]   ;;  %v9022_v62 = vld [vmem:[%s12062_s3 + $0x60] ss:$8 sps:$4 sm:$0xff]  }
 0x2c5   :  { %5538 = vmatprep.subr.bf16.mxu0 %v8868_v34  ;;  %5568 = vmatprep.mubr.bf16.mxu0 %v9141_v2  ;;  %v8931_v34 = vld [vmem:[%s12060_s1 + $0x15ec] ss:$16 sps:$4 sm:$0xff]  }
 0x2c6   :  { %6019 = vmatprep.mubr.bf16.mxu1 %v11086_v22  ;;  %v8883_v22 = vld [vmem:[%s12060_s1 + $0x146c] ss:$16 sps:$4 sm:$0xff]  }
 0x2c7   :  { %5990 = vmatpush1.bf16.msra.mxu1 %v8869_v1  ;;  %v8929_v1 = vld [vmem:[%s12060_s1 + $0x15e8] ss:$16 sps:$4 sm:$0xff]  }
 0x2c8   :  { %5539 = vmatpush1.bf16.msra.mxu0 %v8866_v63  ;;  %5991 = vmatprep.subr.bf16.mxu1 %v8877_v8  ;;  %v9027_v63 = vld [vmem:[%s12062_s3 + $0x74] ss:$8 sps:$4 sm:$0xff]   ;;  %v9025_v8 = vld [vmem:[%s12062_s3 + $0x70] ss:$8 sps:$4 sm:$0xff]  }
 0x2c9   :  { %5540 = vmatprep.subr.bf16.mxu0 %v8874_v36  ;;  %v8934_v36 = vld [vmem:[%s12060_s1 + $0x160c] ss:$16 sps:$4 sm:$0xff]  }
 0x2cb   :  { %5992 = vmatpush1.bf16.msra.mxu1 %v8875_v7  ;;  %v8932_v7 = vld [vmem:[%s12060_s1 + $0x1608] ss:$16 sps:$4 sm:$0xff]  }
 0x2cc   :  { %5541 = vmatpush1.bf16.msra.mxu0 %v8872_v39  ;;  %5993 = vmatprep.subr.bf16.mxu1 %v8883_v22  ;;  %v9030_v39 = vld [vmem:[%s12062_s3 + $0x84] ss:$8 sps:$4 sm:$0xff]   ;;  %v9028_v22 = vld [vmem:[%s12062_s3 + $0x80] ss:$8 sps:$4 sm:$0xff]  }
 0x2cd   :  { %5542 = vmatprep.subr.bf16.mxu0 %v8880_v27  ;;  %v8937_v27 = vld [vmem:[%s12060_s1 + $0x162c] ss:$16 sps:$4 sm:$0xff]  }
 0x2cf   :  { %5994 = vmatpush1.bf16.msra.mxu1 %v8881_v13  ;;  %v8935_v13 = vld [vmem:[%s12060_s1 + $0x1628] ss:$16 sps:$4 sm:$0xff]  }
 0x2d0   :  { %5543 = vmatpush1.bf16.msra.mxu0 %v8878_v9  ;;  %5995 = vmatprep.subr.bf16.mxu1 %v8889_v14  ;;  %v9033_v9 = vld [vmem:[%s12062_s3 + $0x94] ss:$8 sps:$4 sm:$0xff]   ;;  %v9036_v14 = vld [vmem:[%s12062_s3 + $0xa4] ss:$8 sps:$4 sm:$0xff]  }
 0x2d1   :  { %5544 = vmatprep.subr.bf16.mxu0 %v8886_v45  ;;  %v8940_v45 = vld [vmem:[%s12060_s1 + $0x164c] ss:$16 sps:$4 sm:$0xff]  }
 0x2d3   :  { %5996 = vmatpush1.bf16.msra.mxu1 %v8887_v16  ;;  %v9034_v16 = vld [vmem:[%s12062_s3 + $0xa0] ss:$8 sps:$4 sm:$0xff]  }
 0x2d4   :  { %5545 = vmatpush1.bf16.msra.mxu0 %v8884_v15  ;;  %5997 = vmatprep.subr.bf16.mxu1 %v8895_v19  ;;  %v8943_v15 = vld [vmem:[%s12060_s1 + $0x166c] ss:$16 sps:$4 sm:$0xff]   ;;  %v8941_v19 = vld [vmem:[%s12060_s1 + $0x1668] ss:$16 sps:$4 sm:$0xff]  }
 0x2d5   :  { %5546 = vmatprep.subr.bf16.mxu0 %v8892_v17  ;;  %v9039_v17 = vld [vmem:[%s12062_s3 + $0xb4] ss:$8 sps:$4 sm:$0xff]  }
 0x2d7   :  { %5998 = vmatpush1.bf16.msra.mxu1 %v8893_v21  ;;  %v9037_v21 = vld [vmem:[%s12062_s3 + $0xb0] ss:$8 sps:$4 sm:$0xff]  }
 0x2d8   :  { %5547 = vmatpush1.bf16.msra.mxu0 %v8890_v20  ;;  %5999 = vmatprep.subr.bf16.mxu1 %v8901_v26  ;;  %v8946_v20 = vld [vmem:[%s12060_s1 + $0x168c] ss:$16 sps:$4 sm:$0xff]   ;;  %v8944_v26 = vld [vmem:[%s12060_s1 + $0x1688] ss:$16 sps:$4 sm:$0xff]  }
 0x2d9   :  { %5548 = vmatprep.subr.bf16.mxu0 %v8898_v25  ;;  %v9042_v25 = vld [vmem:[%s12062_s3 + $0xc4] ss:$8 sps:$4 sm:$0xff]  }
 0x2db   :  { %6000 = vmatpush1.bf16.msra.mxu1 %v8899_v56  ;;  %v9040_v56 = vld [vmem:[%s12062_s3 + $0xc0] ss:$8 sps:$4 sm:$0xff]  }
 0x2dc   :  { %5549 = vmatpush1.bf16.msra.mxu0 %v8896_v28  ;;  %6001 = vmatprep.subr.bf16.mxu1 %v8907_v31  ;;  %v8949_v28 = vld [vmem:[%s12060_s1 + $0x16ac] ss:$16 sps:$4 sm:$0xff]   ;;  %v8947_v31 = vld [vmem:[%s12060_s1 + $0x16a8] ss:$16 sps:$4 sm:$0xff]  }
 0x2dd   :  { %5550 = vmatprep.subr.bf16.mxu0 %v8904_v29  ;;  %v9045_v29 = vld [vmem:[%s12062_s3 + $0xd4] ss:$8 sps:$4 sm:$0xff]  }
 0x2df   :  { %6002 = vmatpush1.bf16.msra.mxu1 %v8905_v33  ;;  %v9043_v33 = vld [vmem:[%s12062_s3 + $0xd0] ss:$8 sps:$4 sm:$0xff]  }
 0x2e0   :  { %5551 = vmatpush1.bf16.msra.mxu0 %v8902_v61  ;;  %6003 = vmatprep.subr.bf16.mxu1 %v8910_v11  ;;  %v8952_v61 = vld [vmem:[%s12060_s1 + $0x16cc] ss:$16 sps:$4 sm:$0xff]  }
 0x2e1   :  { %6514 = vmatprep.subr.bf16.mxu0 %v9006_v49  ;;  %v8955_v11 = vld [vmem:[%s12060_s1 + $0x16ec] ss:$16 sps:$4 sm:$0xff]  }
 0x2e2   :  { %v8961_v49 = vld [vmem:[%s12060_s1 + $0x172c] ss:$16 sps:$4 sm:$0xff]  }
 0x2e3   :  { %5569 = vmatmul.mubr.bf16.vlgmr.msra.gmra.mrb[0].mxu0 %v11581_v35  ;;  %6004 = vmatpush1.bf16.msra.mxu1 %v8908_v6  ;;  %v8953_v6 = vld [vmem:[%s12060_s1 + $0x16e8] ss:$16 sps:$4 sm:$0xff]  }
 0x2e4   :  { %6005 = vmatprep.subr.bf16.mxu1 %v8913_v37  ;;  %6515 = vmatpush1.bf16.msra.mxu0 %v9004_v3  ;;  %v8958_v37 = vld [vmem:[%s12060_s1 + $0x170c] ss:$16 sps:$4 sm:$0xff]   ;;  %v8956_v3 = vld [vmem:[%s12060_s1 + $0x1708] ss:$16 sps:$4 sm:$0xff]  }
 0x2e5   :  { %6516 = vmatprep.subr.bf16.mxu0 %v9009_v40  ;;  %v8964_v40 = vld [vmem:[%s12060_s1 + $0x174c] ss:$16 sps:$4 sm:$0xff]  }
 0x2e7   :  { %6006 = vmatpush1.bf16.msra.mxu1 %v8911_v38  ;;  %v8959_v38 = vld [vmem:[%s12060_s1 + $0x1728] ss:$16 sps:$4 sm:$0xff]  }
 0x2e8   :  { %6007 = vmatprep.subr.bf16.mxu1 %v8916_v41  ;;  %6517 = vmatpush1.bf16.msra.mxu0 %v9007_v43  ;;  %v8962_v41 = vld [vmem:[%s12060_s1 + $0x1748] ss:$16 sps:$4 sm:$0xff]   ;;  %v8967_v43 = vld [vmem:[%s12060_s1 + $0x176c] ss:$16 sps:$4 sm:$0xff]  }
 0x2e9   :  { %6518 = vmatprep.subr.bf16.mxu0 %v9012_v18  ;;  %v8965_v18 = vld [vmem:[%s12060_s1 + $0x1768] ss:$16 sps:$4 sm:$0xff]  }
 0x2eb   :  { %6008 = vmatpush1.bf16.msra.mxu1 %v8914_v44  ;;  %v8970_v44 = vld [vmem:[%s12060_s1 + $0x178c] ss:$16 sps:$4 sm:$0xff]  }
 0x2ec   :  { %6009 = vmatprep.subr.bf16.mxu1 %v8919_v46  ;;  %6519 = vmatpush1.bf16.msra.mxu0 %v9010_v47  ;;  %v8968_v46 = vld [vmem:[%s12060_s1 + $0x1788] ss:$16 sps:$4 sm:$0xff]   ;;  %v8973_v47 = vld [vmem:[%s12060_s1 + $0x17ac] ss:$16 sps:$4 sm:$0xff]  }
 0x2ed   :  { %6520 = vmatprep.subr.bf16.mxu0 %v9015_v48  ;;  %v8971_v48 = vld [vmem:[%s12060_s1 + $0x17a8] ss:$16 sps:$4 sm:$0xff]  }
 0x2ef   :  { %6010 = vmatpush1.bf16.msra.mxu1 %v8917_v50  ;;  %v8976_v50 = vld [vmem:[%s12060_s1 + $0x17cc] ss:$16 sps:$4 sm:$0xff]  }
 0x2f0   :  { %6011 = vmatprep.subr.bf16.mxu1 %v8922_v30  ;;  %6521 = vmatpush1.bf16.msra.mxu0 %v9013_v51  ;;  %v9048_v30 = vld [vmem:[%s12062_s3 + $0xe4] ss:$8 sps:$4 sm:$0xff]   ;;  %v9046_v51 = vld [vmem:[%s12062_s3 + $0xe0] ss:$8 sps:$4 sm:$0xff]  }
 0x2f1   :  { %6522 = vmatprep.subr.bf16.mxu0 %v9018_v52  ;;  %v8974_v52 = vld [vmem:[%s12060_s1 + $0x17c8] ss:$16 sps:$4 sm:$0xff]  }
 0x2f3   :  { %6012 = vmatpush1.bf16.msra.mxu1 %v8920_v23  ;;  %v8979_v23 = vld [vmem:[%s12060_s1 + $0x17ec] ss:$16 sps:$4 sm:$0xff]  }
 0x2f4   :  { %6013 = vmatprep.subr.bf16.mxu1 %v8925_v53  ;;  %6523 = vmatpush1.bf16.msra.mxu0 %v9016_v0  ;;  %v9051_v53 = vld [vmem:[%s12062_s3 + $0xf4] ss:$8 sps:$4 sm:$0xff]   ;;  %v9049_v0 = vld [vmem:[%s12062_s3 + $0xf0] ss:$8 sps:$4 sm:$0xff]  }
 0x2f5   :  { %6524 = vmatprep.subr.bf16.mxu0 %v9021_v10  ;;  %v8977_v10 = vld [vmem:[%s12060_s1 + $0x17e8] ss:$16 sps:$4 sm:$0xff]  }
 0x2f7   :  { %6014 = vmatpush1.bf16.msra.mxu1 %v8923_v55  ;;  %v8982_v55 = vld [vmem:[%s12060_s1 + $0x180c] ss:$16 sps:$4 sm:$0xff]  }
 0x2f8   :  { %6015 = vmatprep.subr.bf16.mxu1 %v8928_v57  ;;  %6525 = vmatpush1.bf16.msra.mxu0 %v9019_v32  ;;  %v9054_v57 = vld [vmem:[%s12062_s3 + $0x104] ss:$8 sps:$4 sm:$0xff]   ;;  %v8980_v32 = vld [vmem:[%s12060_s1 + $0x1808] ss:$16 sps:$4 sm:$0xff]  }
 0x2f9   :  { %6526 = vmatprep.subr.bf16.mxu0 %v9024_v59  ;;  %v8985_v59 = vld [vmem:[%s12060_s1 + $0x182c] ss:$16 sps:$4 sm:$0xff]  }
 0x2fb   :  { %6016 = vmatpush1.bf16.msra.mxu1 %v8926_v60  ;;  %v8983_v60 = vld [vmem:[%s12060_s1 + $0x1828] ss:$16 sps:$4 sm:$0xff]  }
 0x2fc   :  { %6017 = vmatprep.subr.bf16.mxu1 %v8931_v34  ;;  %6527 = vmatpush1.bf16.msra.mxu0 %v9022_v62  ;;  %v8988_v34 = vld [vmem:[%s12060_s1 + $0x184c] ss:$16 sps:$4 sm:$0xff]   ;;  %v8986_v62 = vld [vmem:[%s12060_s1 + $0x1848] ss:$16 sps:$4 sm:$0xff]  }
 0x2fd   :  { %6528 = vmatprep.subr.bf16.mxu0 %v9027_v63  ;;  %v8994_v63 = vld [vmem:[%s12060_s1 + $0x188c] ss:$16 sps:$4 sm:$0xff]  }
 0x2ff   :  { %6018 = vmatpush1.bf16.msra.mxu1 %v8929_v1  ;;  %v8992_v1 = vld [vmem:[%s12060_s1 + $0x1888] ss:$16 sps:$4 sm:$0xff]  }
 0x300   :  { %6028 = vmatprep.subr.bf16.mxu1 %v8934_v36  ;;  %6529 = vmatpush1.bf16.msra.mxu0 %v9025_v8  ;;  %v8997_v36 = vld [vmem:[%s12060_s1 + $0x18ac] ss:$16 sps:$4 sm:$0xff]   ;;  %v8995_v8 = vld [vmem:[%s12060_s1 + $0x18a8] ss:$16 sps:$4 sm:$0xff]  }
 0x301   :  { %6530 = vmatprep.subr.bf16.mxu0 %v9030_v39  ;;  %v9000_v39 = vld [vmem:[%s12060_s1 + $0x18cc] ss:$16 sps:$4 sm:$0xff]  }
 0x302   :  { %6020 = vmatmul.mubr.bf16.vlgmr.msra.gmra.mrb[4].mxu1 %v11274_v24  ;;  %v9031_v24 = vld [vmem:[%s12062_s3 + $0x90] ss:$8 sps:$4 sm:$0xff]  }
 0x303   :  { %6029 = vmatpush1.bf16.msra.mxu1 %v8932_v7  ;;  %6060 = vmatprep.mubr.bf16.mxu1 %v11290_v54  ;;  %v8938_v54 = vld [vmem:[%s12060_s1 + $0x1648] ss:$16 sps:$4 sm:$0xff]  }
 0x304   :  { %6030 = vmatprep.subr.bf16.mxu1 %v8937_v27  ;;  %6531 = vmatpush1.bf16.msra.mxu0 %v9028_v22  ;;  %v8998_v7 = vld [vmem:[%s12060_s1 + $0x18c8] ss:$16 sps:$4 sm:$0xff]   ;;  %v9003_v27 = vld [vmem:[%s12060_s1 + $0x18ec] ss:$16 sps:$4 sm:$0xff]  }
 0x305   :  { %6532 = vmatprep.subr.bf16.mxu0 %v9033_v9  ;;  %v9001_v22 = vld [vmem:[%s12060_s1 + $0x18e8] ss:$16 sps:$4 sm:$0xff]   ;;  %v836_v9 = vsub.s32 0, %v9300_v42 }
 0x307   :  { %6031 = vmatpush1.bf16.msra.mxu1 %v8935_v13  ;;  %v11881_v13 = vld [vmem:[%s12061_s2] sm:$0xf] }
 0x308   :  { %6032 = vmatprep.subr.bf16.mxu1 %v8940_v45  ;;  %6533 = vmatpush1.bf16.msra.mxu0 %v9031_v24  ;;  %v840_v45 = vsub.s32 1, %v9300_v42  ;;  %v837_v24 = vrot.slane %v11881_v13, %v836_v9 }
 0x309   :  { %6534 = vmatprep.subr.bf16.mxu0 %v9036_v14 }
 0x30a   :  { %v841_v14 = vrot.slane %v11881_v13, %v840_v45 }
 0x30b   :  { %6033 = vmatpush1.bf16.msra.mxu1 %v8938_v54  ;;  %v5079_v54 = vadd.f32 %v10106_v4, %v837_v24  ;;  %v9057_v4 = vld [vmem:[%s12062_s3 + $0x114] ss:$8 sps:$4 sm:$0xff]  }
 0x30c   :  { %6034 = vmatprep.subr.bf16.mxu1 %v8943_v15  ;;  %6535 = vmatpush1.bf16.msra.mxu0 %v9034_v16 }
 0x30d   :  { %6536 = vmatprep.subr.bf16.mxu0 %v9039_v17 }
 0x30f   :  { %6035 = vmatpush1.bf16.msra.mxu1 %v8941_v19 }
 0x310   :  { %6036 = vmatprep.subr.bf16.mxu1 %v8946_v20  ;;  %6537 = vmatpush1.bf16.msra.mxu0 %v9037_v21 }
 0x311   :  { %6538 = vmatprep.subr.bf16.mxu0 %v9042_v25 }
 0x313   :  { %6037 = vmatpush1.bf16.msra.mxu1 %v8944_v26 }
 0x314   :  { %6038 = vmatprep.subr.bf16.mxu1 %v8949_v28  ;;  %6539 = vmatpush1.bf16.msra.mxu0 %v9040_v56  ;;  %v9052_v56 = vld [vmem:[%s12062_s3 + $0x100] ss:$8 sps:$4 sm:$0xff]  }
 0x315   :  { %6540 = vmatprep.subr.bf16.mxu0 %v9045_v29 }
 0x317   :  { %6039 = vmatpush1.bf16.msra.mxu1 %v8947_v31  ;;  %v9101_v31 = vld [vmem:[%s12064_s5] sm:$0xff]  }
 0x318   :  { %6040 = vmatprep.subr.bf16.mxu1 %v8952_v61  ;;  %6541 = vmatpush1.bf16.msra.mxu0 %v9043_v33  ;;  %v9102_v61 = vld [vmem:[%s12064_s5 + $0x48] sm:$0xff]   ;;  %v9055_v33 = vld [vmem:[%s12062_s3 + $0x110] ss:$8 sps:$4 sm:$0xff]  }
 0x319   :  { %6542 = vmatprep.subr.bf16.mxu0 %v9048_v30  ;;  %v9072_v30 = vld [vmem:[%s12062_s3 + $0x164] ss:$8 sps:$4 sm:$0xff]  }
 0x31b   :  { %6041 = vmatpush1.bf16.msra.mxu1 %v8950_v12  ;;  %v9060_v12 = vld [vmem:[%s12062_s3 + $0x124] ss:$8 sps:$4 sm:$0xff]  }
 0x31c   :  { %6042 = vmatprep.subr.bf16.mxu1 %v8955_v11  ;;  %6543 = vmatpush1.bf16.msra.mxu0 %v9046_v51  ;;  %v9103_v11 = vld [vmem:[%s12064_s5 + $0x8] sm:$0xff]  }
 0x31d   :  { %6544 = vmatprep.subr.bf16.mxu0 %v9051_v53  ;;  %v9111_v51 = vld [vmem:[%s12064_s5 + $0x28] sm:$0xff]   ;;  %v9073_v53 = vld [vmem:[%s12062_s3 + $0x170] ss:$8 sps:$4 sm:$0xff]  }
 0x31f   :  { %6043 = vmatpush1.bf16.msra.mxu1 %v8953_v6  ;;  %v9104_v6 = vld [vmem:[%s12064_s5 + $0x50] sm:$0xff]  }
 0x320   :  { %6044 = vmatprep.subr.bf16.mxu1 %v8958_v37  ;;  %6545 = vmatpush1.bf16.msra.mxu0 %v9049_v0  ;;  %v9058_v37 = vld [vmem:[%s12062_s3 + $0x120] ss:$8 sps:$4 sm:$0xff]   ;;  %v9078_v0 = vld [vmem:[%s12062_s3 + $0x184] ss:$8 sps:$4 sm:$0xff]  }
 0x321   :  { %6555 = vmatprep.subr.bf16.mxu0 %v9054_v57  ;;  %v9079_v57 = vld [vmem:[%s12062_s3 + $0x190] ss:$8 sps:$4 sm:$0xff]  }
 0x323   :  { %6045 = vmatpush1.bf16.msra.mxu1 %v8956_v3  ;;  %v9063_v3 = vld [vmem:[%s12062_s3 + $0x134] ss:$8 sps:$4 sm:$0xff]  }
 0x324   :  { %6046 = vmatprep.subr.bf16.mxu1 %v8961_v49  ;;  %v9105_v49 = vld [vmem:[%s12064_s5 + $0x10] sm:$0xff]  }
 0x327   :  { %6047 = vmatpush1.bf16.msra.mxu1 %v8959_v38  ;;  %v9106_v38 = vld [vmem:[%s12064_s5 + $0x58] sm:$0xff]  }
 0x328   :  { %6048 = vmatprep.subr.bf16.mxu1 %v8964_v40  ;;  %v9061_v40 = vld [vmem:[%s12062_s3 + $0x130] ss:$8 sps:$4 sm:$0xff]  }
 0x32b   :  { %6049 = vmatpush1.bf16.msra.mxu1 %v8962_v41  ;;  %v9066_v41 = vld [vmem:[%s12062_s3 + $0x144] ss:$8 sps:$4 sm:$0xff]  }
 0x32c   :  { %6050 = vmatprep.subr.bf16.mxu1 %v8967_v43  ;;  %v9107_v43 = vld [vmem:[%s12064_s5 + $0x18] sm:$0xff]  }
 0x32f   :  { %6051 = vmatpush1.bf16.msra.mxu1 %v8965_v18  ;;  %v9108_v18 = vld [vmem:[%s12064_s5 + $0x60] sm:$0xff]  }
 0x330   :  { %6052 = vmatprep.subr.bf16.mxu1 %v8970_v44  ;;  %v9064_v44 = vld [vmem:[%s12062_s3 + $0x140] ss:$8 sps:$4 sm:$0xff]  }
 0x333   :  { %6053 = vmatpush1.bf16.msra.mxu1 %v8968_v46  ;;  %v9069_v46 = vld [vmem:[%s12062_s3 + $0x154] ss:$8 sps:$4 sm:$0xff]  }
 0x334   :  { %6054 = vmatprep.subr.bf16.mxu1 %v8973_v47  ;;  %v9109_v47 = vld [vmem:[%s12064_s5 + $0x20] sm:$0xff]  }
 0x337   :  { %6055 = vmatpush1.bf16.msra.mxu1 %v8971_v48  ;;  %v9110_v48 = vld [vmem:[%s12064_s5 + $0x68] sm:$0xff]  }
 0x338   :  { %6056 = vmatprep.subr.bf16.mxu1 %v8976_v50  ;;  %v9067_v50 = vld [vmem:[%s12062_s3 + $0x150] ss:$8 sps:$4 sm:$0xff]  }
 0x33b   :  { %6057 = vmatpush1.bf16.msra.mxu1 %v8974_v52  ;;  %v9070_v52 = vld [vmem:[%s12062_s3 + $0x160] ss:$8 sps:$4 sm:$0xff]  }
 0x33c   :  { %6058 = vmatprep.subr.bf16.mxu1 %v8979_v23  ;;  %v9075_v23 = vld [vmem:[%s12062_s3 + $0x174] ss:$8 sps:$4 sm:$0xff]  }
 0x33f   :  { %6059 = vmatpush1.bf16.msra.mxu1 %v8977_v10  ;;  %v9076_v10 = vld [vmem:[%s12062_s3 + $0x180] ss:$8 sps:$4 sm:$0xff]  }
 0x340   :  { %6069 = vmatprep.subr.bf16.mxu1 %v8982_v55  ;;  %v9081_v55 = vld [vmem:[%s12062_s3 + $0x194] ss:$8 sps:$4 sm:$0xff]  }
 0x342   :  { %6061 = vmatmul.mubr.bf16.vlgmr.msra.gmra.mrb[4].mxu1 %v11478_v58  ;;  %v8991_v58 = vld [vmem:[%s12060_s1 + $0x186c] ss:$16 sps:$4 sm:$0xff]  }
 0x343   :  { %6070 = vmatpush1.bf16.msra.mxu1 %v8980_v32  ;;  %6101 = vmatprep.mubr.bf16.mxu1 %v9141_v2  ;;  %v8989_v2 = vld [vmem:[%s12060_s1 + $0x1868] ss:$16 sps:$4 sm:$0xff]   ;;  %v9084_v32 = vld [vmem:[%s12062_s3 + $0x1a4] ss:$8 sps:$4 sm:$0xff]  }
 0x344   :  { %6071 = vmatprep.subr.bf16.mxu1 %v8985_v59  ;;  %v9082_v59 = vld [vmem:[%s12062_s3 + $0x1a0] ss:$8 sps:$4 sm:$0xff]  }
 0x347   :  { %6072 = vmatpush1.bf16.msra.mxu1 %v8983_v60  ;;  %v9087_v60 = vld [vmem:[%s12062_s3 + $0x1b4] ss:$8 sps:$4 sm:$0xff]  }
 0x348   :  { %6073 = vmatprep.subr.bf16.mxu1 %v8988_v34  ;;  %v9085_v34 = vld [vmem:[%s12062_s3 + $0x1b0] ss:$8 sps:$4 sm:$0xff]  }
 0x34b   :  { %6074 = vmatpush1.bf16.msra.mxu1 %v8986_v62  ;;  %v9090_v62 = vld [vmem:[%s12062_s3 + $0x1c4] ss:$8 sps:$4 sm:$0xff]  }
 0x34c   :  { %6075 = vmatprep.subr.bf16.mxu1 %v8991_v58  ;;  %v9088_v58 = vld [vmem:[%s12062_s3 + $0x1c0] ss:$8 sps:$4 sm:$0xff]  }
 0x34f   :  { %6076 = vmatpush1.bf16.msra.mxu1 %v8989_v2  ;;  %v9093_v2 = vld [vmem:[%s12062_s3 + $0x1d4] ss:$8 sps:$4 sm:$0xff]  }
 0x350   :  { %6077 = vmatprep.subr.bf16.mxu1 %v8994_v63  ;;  %v9091_v63 = vld [vmem:[%s12062_s3 + $0x1d0] ss:$8 sps:$4 sm:$0xff]  }
 0x353   :  { %6078 = vmatpush1.bf16.msra.mxu1 %v8992_v1  ;;  %v9096_v1 = vld [vmem:[%s12062_s3 + $0x1e4] ss:$8 sps:$4 sm:$0xff]  }
 0x354   :  { %6079 = vmatprep.subr.bf16.mxu1 %v8997_v36  ;;  %v9094_v36 = vld [vmem:[%s12062_s3 + $0x1e0] ss:$8 sps:$4 sm:$0xff]  }
 0x357   :  { %6080 = vmatpush1.bf16.msra.mxu1 %v8995_v8  ;;  %v9099_v8 = vld [vmem:[%s12062_s3 + $0x1f4] ss:$8 sps:$4 sm:$0xff]  }
 0x358   :  { %6081 = vmatprep.subr.bf16.mxu1 %v9000_v39  ;;  %v9097_v39 = vld [vmem:[%s12062_s3 + $0x1f0] ss:$8 sps:$4 sm:$0xff]  }
 0x35b   :  { %6082 = vmatpush1.bf16.msra.mxu1 %v8998_v7  ;;  %v844_v7 = vsub.s32 2, %v9300_v42 }
 0x35c   :  { %6083 = vmatprep.subr.bf16.mxu1 %v9003_v27  ;;  %v848_v27 = vsub.s32 3, %v9300_v42 }
 0x35e   :  { %v849_v24 = vrot.slane %v11881_v13, %v848_v27 }
 0x35f   :  { %6084 = vmatpush1.bf16.msra.mxu1 %v9001_v22  ;;  %v845_v22 = vrot.slane %v11881_v13, %v844_v7  ;;  %v9113_v13 = vld [vmem:[%s12064_s5 + $0x30] sm:$0xff]  }
 0x362   :  { %6102 = vmatmul.mubr.bf16.vlgmr.msra.gmra.mrb[4].mxu1 %v11581_v35  ;;  %v5081_v35 = vadd.f32 %v10108_v5, %v841_v14  ;;  %v9100_v5 = vld [vmem:[%s12064_s5 + $0x40] sm:$0xff]  }
 0x363   :  { %7672 = vmatprep.subr.bf16.mxu1 %v9100_v5 }
 0x364   :  { %7673 = vmatpush3.bf16.msra.mxu1 %v9101_v31 }
 0x365   :  { %7674 = vmatprep.subr.bf16.mxu1 %v9102_v61 }
 0x368   :  { %7675 = vmatpush3.bf16.msra.mxu1 %v9103_v11 }
 0x369   :  { %7676 = vmatprep.subr.bf16.mxu1 %v9104_v6 }
 0x36c   :  { %7677 = vmatpush3.bf16.msra.mxu1 %v9105_v49 }
 0x36d   :  { %7678 = vmatprep.subr.bf16.mxu1 %v9106_v38 }
 0x370   :  { %7679 = vmatpush3.bf16.msra.mxu1 %v9107_v43 }
 0x371   :  { %7680 = vmatprep.subr.bf16.mxu1 %v9108_v18 }
 0x374   :  { %7681 = vmatpush3.bf16.msra.mxu1 %v9109_v47 }
 0x375   :  { %7682 = vmatprep.subr.bf16.mxu1 %v9110_v48 }
 0x378   :  { %7683 = vmatpush3.bf16.msra.mxu1 %v9111_v51 }
 0x3b6   :  { %v5570_v15 = vpop.f32.mrb[0].mxu0 }
 0x3b7   :  { %v7695_v16 = vadd.f32 %v5570_v15, %v5079_v54  ;;  %v5572_v17 = vpop.f32.mrb[1].mxu0 }
 0x3b8   :  { %v7697_v19 = vadd.f32 %v5572_v17, %v5081_v35  ;;  %v5574_v20 = vpop.f32.mrb[2].mxu0 }
 0x3b9   :  { %v6110_v21 = vmax.f32 %v7695_v16, 0.0  ;;  %v5575_v25 = vpop.f32.mrb[3].mxu0 }
 0x3ba   :  { %v6111_v26 = vmax.f32 %v7697_v19, 0.0 }
 0x3bb   :  { %v6114_v29 = vpack.c.bf16 %v6110_v21, %v6110_v21 }
 0x3bc   :  { %v6115_v28 = vpack.c.bf16 %v6111_v26, %v6111_v26  ;;  %v9112_v26 = vld [vmem:[%s12064_s5 + $0x70] sm:$0xff]  }
 0x3bd   :  { %7684 = vmatprep.subr.bf16.mxu1 %v9112_v26 }
 0x3be   :  { %6546 = vmatprep.mubr.bf16.mxu0 %v6115_v28  ;;  %7685 = vmatpush3.bf16.msra.mxu1 %v9113_v13  ;;  %v9114_v28 = vld [vmem:[%s12064_s5 + $0x78] sm:$0xff]  }
 0x3bf   :  { %6547 = vmatmul.mubr.bf16.vlgmr.msra.gmra.mrb[4].mxu0 %v6114_v29  ;;  %7686 = vmatprep.subr.bf16.mxu1 %v9114_v28  ;;  %v6182_v29 = vld [vmem:[%s12063_s4] sm:$0x3] }
 0x3c0   :  { %6556 = vmatpush1.bf16.msra.mxu0 %v9052_v56  ;;  %v9115_v56 = vld [vmem:[%s12064_s5 + $0x38] sm:$0xff]   ;;  %v6191_v5 = vrot.slane %v6182_v29, %v840_v45 }
 0x3c1   :  { %6557 = vmatprep.subr.bf16.mxu0 %v9057_v4  ;;  %v6187_v4 = vrot.slane %v6182_v29, %v836_v9  ;;  %v7655_v9 = vld [vmem:[%s12065_s6] ss:$0 sm:$0xff] }
 0x3c2   :  { %7687 = vmatpush3.bf16.msra.mxu1 %v9115_v56 }
 0x3c4   :  { %6558 = vmatpush1.bf16.msra.mxu0 %v9055_v33 }
 0x3c5   :  { %6559 = vmatprep.subr.bf16.mxu0 %v9060_v12 }
 0x3c8   :  { %6560 = vmatpush1.bf16.msra.mxu0 %v9058_v37 }
 0x3c9   :  { %6561 = vmatprep.subr.bf16.mxu0 %v9063_v3 }
 0x3cc   :  { %6562 = vmatpush1.bf16.msra.mxu0 %v9061_v40 }
 0x3cd   :  { %6563 = vmatprep.subr.bf16.mxu0 %v9066_v41 }
 0x3d0   :  { %6564 = vmatpush1.bf16.msra.mxu0 %v9064_v44 }
 0x3d1   :  { %6565 = vmatprep.subr.bf16.mxu0 %v9069_v46 }
 0x3d4   :  { %6566 = vmatpush1.bf16.msra.mxu0 %v9067_v50 }
 0x3d5   :  { %6567 = vmatprep.subr.bf16.mxu0 %v9072_v30 }
 0x3d8   :  { %6568 = vmatpush1.bf16.msra.mxu0 %v9070_v52 }
 0x3d9   :  { %6569 = vmatprep.subr.bf16.mxu0 %v9075_v23 }
 0x3dc   :  { %6570 = vmatpush1.bf16.msra.mxu0 %v9073_v53 }
 0x3dd   :  { %6571 = vmatprep.subr.bf16.mxu0 %v9078_v0 }
 0x3e0   :  { %6572 = vmatpush1.bf16.msra.mxu0 %v9076_v10 }
 0x3e1   :  { %6573 = vmatprep.subr.bf16.mxu0 %v9081_v55 }
 0x3e4   :  { %6574 = vmatpush1.bf16.msra.mxu0 %v9079_v57 }
 0x3e5   :  { %6575 = vmatprep.subr.bf16.mxu0 %v9084_v32 }
 0x3e8   :  { %6576 = vmatpush1.bf16.msra.mxu0 %v9082_v59 }
 0x3e9   :  { %6577 = vmatprep.subr.bf16.mxu0 %v9087_v60 }
 0x3ec   :  { %6578 = vmatpush1.bf16.msra.mxu0 %v9085_v34 }
 0x3ed   :  { %6579 = vmatprep.subr.bf16.mxu0 %v9090_v62 }
 0x3f0   :  { %6580 = vmatpush1.bf16.msra.mxu0 %v9088_v58 }
 0x3f1   :  { %6581 = vmatprep.subr.bf16.mxu0 %v9093_v2 }
 0x3f4   :  { %6582 = vmatpush1.bf16.msra.mxu0 %v9091_v63 }
 0x3f5   :  { %6583 = vmatprep.subr.bf16.mxu0 %v9096_v1 }
 0x3f8   :  { %6584 = vmatpush1.bf16.msra.mxu0 %v9094_v36 }
 0x3f9   :  { %6585 = vmatprep.subr.bf16.mxu0 %v9099_v8 }
 0x3fc   :  { %6586 = vmatpush1.bf16.msra.mxu0 %v9097_v39 }
 0x435   :  { %v6103_v14 = vpop.f32.mrb[4].mxu1 }
 0x436   :  { %v7698_v54 = vadd.f32 %v6103_v14, %v845_v22  ;;  %v6105_v35 = vpop.f32.mrb[5].mxu1 }
 0x437   :  { %v7699_v15 = vadd.f32 %v6105_v35, %v849_v24  ;;  %v6107_v16 = vpop.f32.mrb[6].mxu1 }
 0x438   :  { %v6112_v17 = vmax.f32 %v7698_v54, 0.0  ;;  %v6108_v19 = vpop.f32.mrb[7].mxu1 }
 0x439   :  { %v6113_v20 = vmax.f32 %v7699_v15, 0.0 }
 0x43a   :  { %v6116_v25 = vpack.c.bf16 %v6112_v17, %v6112_v17 }
 0x43b   :  { %v6117_v21 = vpack.c.bf16 %v6113_v20, %v6113_v20 }
 0x43d   :  { %6587 = vmatprep.mubr.bf16.mxu0 %v6117_v21 }
 0x43e   :  { %6588 = vmatmul.mubr.bf16.vlgmr.msra.gmra.mrb[4].mxu0 %v6116_v25 }
 0x511   :  { %v6589_v31 = vpop.f32.mrb[4].mxu0 }
 0x512   :  { %v7700_v61 = vadd.f32 %v6589_v31, %v6187_v4  ;;  %v6591_v33 = vpop.f32.mrb[5].mxu0 }
 0x513   :  { %v7701_v12 = vadd.f32 %v6591_v33, %v6191_v5  ;;  %v6593_v11 = vpop.f32.mrb[6].mxu0 }
 0x514   :  { %v6596_v6 = vmax.f32 %v7700_v61, 0.0  ;;  %v6594_v37 = vpop.f32.mrb[7].mxu0 }
 0x515   :  { %v6597_v3 = vmax.f32 %v7701_v12, 0.0 }
 0x516   :  { %v6598_v38 = vpack.c.bf16 %v6596_v6, %v6596_v6 }
 0x517   :  { %v6599_v49 = vpack.c.bf16 %v6597_v3, %v6597_v3 }
 0x519   :  { %6767 = vmatprep.mubr.bf16.mxu1 %v6599_v49 }
 0x51a   :  { %6768 = vmatmul.mubr.bf16.vlgmr.msra.gmra.mrb[8].mxu1 %v6598_v38 }
 0x5ed   :  { %v7688_v40 = vpop.f32.mrb[8].mxu1 }
 0x5ee   :  { %v7689_v41 = vpop.f32.mrb[9].mxu1 }
 0x5ef   :  { %v7690_v42 = vadd.f32 %v7689_v41, %v7688_v40  ;;  %v7691_v45 = vpop.f32.mrb[10].mxu1 }
 0x5f0   :  { %v7692_v43 = vpop.f32.mrb[11].mxu1 }
 0x5f1   :  { %v6770_v18 = vadd.f32 %v7690_v42, %v7655_v9 }
 0x5f3   :  { %6775 = vst [vmem:[#allocation2] sm:$0x3] %v6770_v18 }
 0x5f4   :  { %9127 = shalt.err (!%p9124_p4)
}
 0x5f5   :  { %s9128_s9 = scalar_lea.hbm %s12066_s7, 32 }
 0x5f6   :  { %p9129_p5 = scmp.ne.s32.totalorder %s12066_s7, %s9128_s9  ;;  %p9132_p6 = scmp.lt.u32.totalorder %s9128_s9, %s12066_s7 }
 0x5f8   :  { %p9134_p7 = pnand %p9132_p6, %p9129_p5 }
 0x5fa   :  { %9137 = shalt.err (!%p9134_p7)
}
 0x5fb   :  { %6785 = dma.vmem_to_hbm [thread:$0]  %s6783_s28, 32, %s12066_s7, [#allocation3]  }
 0x5fc   :  { %9138 = dma.done.wait [#allocation3], 32  }
 0x5fd   :  { %9139 = vsyncadd [#allocation3], 4294967264 }
 0x5fe   :  { %6789 = vsyncpa [#allocation3], 1 }

</bundles_post_ra>
